<compile_context>
chip_gen: v6e
topology: v6e:2x2x1
jax: 0.10.0
libtpu: 0.0.40
codegen_flags: <defaults>
</compile_context>

<pallas_src>
import functools
import math

import jax
import jax.numpy as jnp
from jax import lax
from jax.experimental import pallas as pl
from jax.experimental.pallas import tpu as pltpu


# --------------------------- in-kernel helpers ---------------------------
def _edge_pad_hw(x, p):
    """Replicate-pad the first two (H, W) axes of a (H, W, C) value by p."""
    top = jnp.broadcast_to(x[0:1], (p,) + x.shape[1:])
    bot = jnp.broadcast_to(x[-1:], (p,) + x.shape[1:])
    x = jnp.concatenate([top, x, bot], axis=0)
    left = jnp.broadcast_to(x[:, 0:1, :], (x.shape[0], p, x.shape[2]))
    right = jnp.broadcast_to(x[:, -1:, :], (x.shape[0], p, x.shape[2]))
    return jnp.concatenate([left, x, right], axis=1)


def _width_cols(xp, kw, wo):
    """(Hp, Wp, C) -> (Hp, wo, kw*C); last index = j*C + c (shared across kh)."""
    return jnp.concatenate([xp[:, j:j + wo, :] for j in range(kw)], axis=-1)


def _im2col(xp, kh, kw, ho, wo):
    """(Hp, Wp, C) -> (ho, wo, kh*kw*C); K index = (i*kw + j)*C + c.

    Width-direction (sublane-shift) concat is hoisted out of the height loop:
    kh + kw slice/concat ops instead of kh * kw.  Height slices are on the
    un-tiled major axis and are nearly free.
    """
    xcols = _width_cols(xp, kw, wo)
    return jnp.concatenate([xcols[i:i + ho] for i in range(kh)], axis=-1)


# ------------------------------ fused kernel -----------------------------
def _srcnn_kernel(x_ref, w1_ref, b1_ref, w2_ref, b2_ref, w3_ref, b3_ref,
                  o_ref, *, H, W, NB):
    f32 = jnp.float32
    bf16 = jnp.bfloat16
    ho1, wo1 = H - 4, W - 4

    w1 = w1_ref[...]            # (243, 64) bf16
    w2 = w2_ref[...]            # (64, 32)  bf16
    w3 = w3_ref[...]            # (800, 3)  bf16
    b1 = b1_ref[...]            # (1, 64)   f32
    b2 = b2_ref[...]            # (1, 32)   f32
    b3 = b3_ref[...]            # (1, 3)    f32

    for n in range(NB):                                   # static batch-tile loop
        x = x_ref[n]                                       # (H, W, 3) bf16

        # conv1: replicate pad 2, 9x9 valid, ReLU.  One fat K=243 matmul.
        xp = _edge_pad_hw(x, 2)                            # (H+4, W+4, 3)
        p1 = _im2col(xp, 9, 9, ho1, wo1)                   # (H-4, W-4, 243)
        a1 = jnp.maximum(
            lax.dot_general(p1, w1, (((2,), (0,)), ((), ())),
                            preferred_element_type=f32) + b1,
            0.0).astype(bf16)                              # (H-4, W-4, 64)

        # conv2 (1x1) + ReLU fused as an epilogue matmul.  Its replicate pad
        # commutes with a pointwise conv and is folded into conv3's pad below.
        a2 = jnp.maximum(
            lax.dot_general(a1, w2, (((2,), (0,)), ((), ())),
                            preferred_element_type=f32) + b2,
            0.0).astype(bf16)                              # (H-4, W-4, 32)

        # conv3: pad2(conv2) + pad2(conv3) == replicate pad 4, then 5x5 valid.
        # Accumulated over the 5 kh taps (K=160 each) to cap live VMEM.
        a2p = _edge_pad_hw(a2, 4)                          # (H+4, W+4, 32)
        xcols3 = _width_cols(a2p, 5, W)                    # (H+4, W, 160)
        y = lax.dot_general(xcols3[0:H], w3[0:160],
                            (((2,), (0,)), ((), ())),
                            preferred_element_type=f32)    # (H, W, 3) f32
        for i in range(1, 5):
            y = y + lax.dot_general(xcols3[i:i + H], w3[i * 160:(i + 1) * 160],
                                    (((2,), (0,)), ((), ())),
                                    preferred_element_type=f32)
        o_ref[n] = (y + b3).astype(o_ref.dtype)


# -------------------------------- wrapper --------------------------------
def _prep_weights(params):
    bf16 = jnp.bfloat16
    # PyTorch (Cout, Cin, KH, KW) -> (KH*KW*Cin, Cout), matching im2col order.
    w1 = jnp.transpose(params["w1"], (2, 3, 1, 0)).reshape(9 * 9 * 3, 64).astype(bf16)
    w2 = jnp.transpose(params["w2"], (2, 3, 1, 0)).reshape(64, 32).astype(bf16)
    w3 = jnp.transpose(params["w3"], (2, 3, 1, 0)).reshape(5 * 5 * 32, 3).astype(bf16)
    b1 = params["b1"].reshape(1, 64).astype(jnp.float32)
    b2 = params["b2"].reshape(1, 32).astype(jnp.float32)
    b3 = params["b3"].reshape(1, 3).astype(jnp.float32)
    return w1, b1, w2, b2, w3, b3


def _largest_divisor_leq(n, cap):
    for d in range(min(n, cap), 0, -1):
        if n % d == 0:
            return d
    return 1


def _vmem_budget():
    """Per-generation VMEM limits (v7x: 64 MiB physical; v5e/v6e: 128 MiB)."""
    cap = 128 * 1024 * 1024
    try:
        info = pltpu.get_tpu_info()
        cap = int(getattr(info, "vmem_capacity_bytes", cap))
    except Exception:  # info query unavailable -> conservative default
        pass
    vmem_limit = min((cap * 5) // 8, 64 * 1024 * 1024)   # ~40 MiB on v7x, 64 MiB else
    scratch = min(8 * 1024 * 1024, cap // 16)            # 4 MiB on v7x, 8 MiB else
    return int(vmem_limit), int(scratch)


def srcnn_forward(x_nchw, params, *, max_batch_block=8):
    N, C, H, W = x_nchw.shape
    assert C == 3 and H >= 5 and W >= 5
    nb = _largest_divisor_leq(N, max_batch_block)

    # NCHW -> NHWC + bf16 cast (one fused XLA op).
    x = jnp.transpose(x_nchw, (0, 2, 3, 1)).astype(jnp.bfloat16)
    w1, b1, w2, b2, w3, b3 = _prep_weights(params)
    vmem_limit, scratch = _vmem_budget()

    kernel = functools.partial(_srcnn_kernel, H=H, W=W, NB=nb)
    out = pl.pallas_call(
        kernel,
        out_shape=jax.ShapeDtypeStruct((N, H, W, 3), jnp.float32),
        grid_spec=pltpu.PrefetchScalarGridSpec(
            num_scalar_prefetch=0,
            grid=(N // nb,),
            in_specs=[
                pl.BlockSpec((nb, H, W, 3), lambda g: (g, 0, 0, 0)),
                pl.BlockSpec((9 * 9 * 3, 64), lambda g: (0, 0)),
                pl.BlockSpec((1, 64), lambda g: (0, 0)),
                pl.BlockSpec((64, 32), lambda g: (0, 0)),
                pl.BlockSpec((1, 32), lambda g: (0, 0)),
                pl.BlockSpec((5 * 5 * 32, 3), lambda g: (0, 0)),
                pl.BlockSpec((1, 3), lambda g: (0, 0)),
            ],
            out_specs=pl.BlockSpec((nb, H, W, 3), lambda g: (g, 0, 0, 0)),
        ),
        compiler_params=pltpu.CompilerParams(
            dimension_semantics=("parallel",),
            vmem_limit_bytes=vmem_limit,
            internal_scratch_in_bytes=scratch,
        ),
    )(x, w1, b1, w2, b2, w3, b3)
    return jnp.transpose(out, (0, 3, 1, 2))        # NHWC -> NCHW


# ------------------------------ param init -------------------------------
def init_srcnn_params(key):
    """Deterministic weights; std matches SRCNN._initialize_weights, bias=0."""
    specs = [("1", 3, 64, 9), ("2", 64, 32, 1), ("3", 32, 3, 5)]
    params = {}
    for name, cin, cout, k in specs:
        key, sub = jax.random.split(key)
        std = math.sqrt(2.0 / (k * k * cout))
        params["w" + name] = (
            std * jax.random.normal(sub, (cout, cin, k, k), jnp.float32))
        params["b" + name] = jnp.zeros((cout,), jnp.float32)
    return params


# ----------------- pure-JAX reference (same bf16 quantization) -----------------
def _conv_ref(x_f32, w_oihw, b, pad, relu):
    xb = x_f32.astype(jnp.bfloat16)
    xp = jnp.pad(xb, ((0, 0), (pad, pad), (pad, pad), (0, 0)), mode="edge")
    w = jnp.transpose(w_oihw, (2, 3, 1, 0)).astype(jnp.bfloat16)
    out = lax.conv_general_dilated(
        xp, w, window_strides=(1, 1), padding="VALID",
        dimension_numbers=("NHWC", "HWIO", "NHWC"),
        preferred_element_type=jnp.float32)
    out = out + b[None, None, None, :].astype(jnp.float32)
    return jnp.maximum(out, 0.0) if relu else out


def srcnn_ref(x_nchw, params):
    x = jnp.transpose(x_nchw, (0, 2, 3, 1)).astype(jnp.float32)
    x = _conv_ref(x, params["w1"], params["b1"], 2, True)
    x = _conv_ref(x, params["w2"], params["b2"], 2, True)
    x = _conv_ref(x, params["w3"], params["b3"], 2, False)
    return jnp.transpose(x, (0, 3, 1, 2))


if __name__ == "__main__":
    key = jax.random.PRNGKey(0)
    key, kx = jax.random.split(key)
    x = jax.random.normal(kx, (2, 3, 16, 16), jnp.float32)   # NCHW, like PyTorch
    params = init_srcnn_params(key)

    fwd = jax.jit(srcnn_forward)
    out = jax.block_until_ready(fwd(x, params))
    assert out.shape == (2, 3, 16, 16), out.shape
    assert out.dtype == jnp.float32, out.dtype

    ref = jax.block_until_ready(jax.jit(srcnn_ref)(x, params))
    max_err = float(jnp.max(jnp.abs(out - ref)))
    assert jnp.allclose(out, ref, rtol=5e-3, atol=5e-3), max_err

    print("KERNEL_OK")
</pallas_src>

<mosaic_0001>
module attributes {stable_mosaic.version = 11 : i64} {
  func.func @_srcnn_kernel(%arg0: i32, %arg1: memref<2x16x16x3xbf16, #tpu.memory_space<vmem>>, %arg2: memref<243x64xbf16, #tpu.memory_space<vmem>>, %arg3: memref<1x64xf32, #tpu.memory_space<vmem>>, %arg4: memref<64x32xbf16, #tpu.memory_space<vmem>>, %arg5: memref<1x32xf32, #tpu.memory_space<vmem>>, %arg6: memref<800x3xbf16, #tpu.memory_space<vmem>>, %arg7: memref<1x3xf32, #tpu.memory_space<vmem>>, %arg8: memref<2x16x16x3xf32, #tpu.memory_space<vmem>>) attributes {dimension_semantics = [#tpu.dimension_semantics<parallel>], iteration_bounds = array<i64: 1>, scalar_prefetch = 0 : i64, scratch_operands = 0 : i64, tpu.core_type = #tpu.core_type<tc>, window_params = [{transform_indices = @transform_0, window_bounds = array<i64: 2, 16, 16, 3>}, {pipeline_mode = #tpu.pipeline_mode<synchronous>, transform_indices = @transform_1, window_bounds = array<i64: 243, 64>}, {pipeline_mode = #tpu.pipeline_mode<synchronous>, transform_indices = @transform_2, window_bounds = array<i64: 1, 64>}, {pipeline_mode = #tpu.pipeline_mode<synchronous>, transform_indices = @transform_3, window_bounds = array<i64: 64, 32>}, {pipeline_mode = #tpu.pipeline_mode<synchronous>, transform_indices = @transform_4, window_bounds = array<i64: 1, 32>}, {pipeline_mode = #tpu.pipeline_mode<synchronous>, transform_indices = @transform_5, window_bounds = array<i64: 800, 3>}, {pipeline_mode = #tpu.pipeline_mode<synchronous>, transform_indices = @transform_6, window_bounds = array<i64: 1, 3>}, {transform_indices = @transform_7, window_bounds = array<i64: 2, 16, 16, 3>}]} {
    %c0 = arith.constant 0 : index
    %c0_0 = arith.constant 0 : index
    %0 = vector.load %arg2[%c0, %c0_0] : memref<243x64xbf16, #tpu.memory_space<vmem>>, vector<243x64xbf16>
    %c0_1 = arith.constant 0 : index
    %c0_2 = arith.constant 0 : index
    %1 = vector.load %arg4[%c0_1, %c0_2] : memref<64x32xbf16, #tpu.memory_space<vmem>>, vector<64x32xbf16>
    %c0_3 = arith.constant 0 : index
    %c0_4 = arith.constant 0 : index
    %2 = vector.load %arg6[%c0_3, %c0_4] : memref<800x3xbf16, #tpu.memory_space<vmem>>, vector<800x3xbf16>
    %c0_5 = arith.constant 0 : index
    %c0_6 = arith.constant 0 : index
    %3 = vector.load %arg3[%c0_5, %c0_6] : memref<1x64xf32, #tpu.memory_space<vmem>>, vector<1x64xf32>
    %c0_7 = arith.constant 0 : index
    %c0_8 = arith.constant 0 : index
    %4 = vector.load %arg5[%c0_7, %c0_8] : memref<1x32xf32, #tpu.memory_space<vmem>>, vector<1x32xf32>
    %c0_9 = arith.constant 0 : index
    %c0_10 = arith.constant 0 : index
    %5 = vector.load %arg7[%c0_9, %c0_10] : memref<1x3xf32, #tpu.memory_space<vmem>>, vector<1x3xf32>
    %c0_11 = arith.constant 0 : index
    %c0_12 = arith.constant 0 : index
    %c0_13 = arith.constant 0 : index
    %c0_14 = arith.constant 0 : index
    %6 = vector.load %arg1[%c0_11, %c0_12, %c0_13, %c0_14] : memref<2x16x16x3xbf16, #tpu.memory_space<vmem>>, vector<1x16x16x3xbf16>
    %7 = vector.shape_cast %6 : vector<1x16x16x3xbf16> to vector<16x16x3xbf16>
    %8 = vector.extract_strided_slice %7 {offsets = [0, 0, 0], sizes = [1, 16, 3], strides = [1, 1, 1]} : vector<16x16x3xbf16> to vector<1x16x3xbf16>
    %9 = vector.shape_cast %8 : vector<1x16x3xbf16> to vector<1x16x3xbf16>
    %10 = vector.broadcast %9 : vector<1x16x3xbf16> to vector<2x16x3xbf16>
    %11 = vector.extract_strided_slice %7 {offsets = [15, 0, 0], sizes = [1, 16, 3], strides = [1, 1, 1]} : vector<16x16x3xbf16> to vector<1x16x3xbf16>
    %12 = vector.shape_cast %11 : vector<1x16x3xbf16> to vector<1x16x3xbf16>
    %13 = vector.broadcast %12 : vector<1x16x3xbf16> to vector<2x16x3xbf16>
    %14 = tpu.concatenate %10, %7, %13 in 0 : vector<2x16x3xbf16>, vector<16x16x3xbf16>, vector<2x16x3xbf16> -> vector<20x16x3xbf16>
    %15 = vector.extract_strided_slice %14 {offsets = [0, 0, 0], sizes = [20, 1, 3], strides = [1, 1, 1]} : vector<20x16x3xbf16> to vector<20x1x3xbf16>
    %16 = vector.shape_cast %15 : vector<20x1x3xbf16> to vector<20x1x3xbf16>
    %17 = vector.broadcast %16 : vector<20x1x3xbf16> to vector<20x2x3xbf16>
    %18 = vector.extract_strided_slice %14 {offsets = [0, 15, 0], sizes = [20, 1, 3], strides = [1, 1, 1]} : vector<20x16x3xbf16> to vector<20x1x3xbf16>
    %19 = vector.shape_cast %18 : vector<20x1x3xbf16> to vector<20x1x3xbf16>
    %20 = vector.broadcast %19 : vector<20x1x3xbf16> to vector<20x2x3xbf16>
    %21 = tpu.concatenate %17, %14, %20 in 1 : vector<20x2x3xbf16>, vector<20x16x3xbf16>, vector<20x2x3xbf16> -> vector<20x20x3xbf16>
    %22 = vector.extract_strided_slice %21 {offsets = [0, 0, 0], sizes = [20, 12, 3], strides = [1, 1, 1]} : vector<20x20x3xbf16> to vector<20x12x3xbf16>
    %23 = vector.extract_strided_slice %21 {offsets = [0, 1, 0], sizes = [20, 12, 3], strides = [1, 1, 1]} : vector<20x20x3xbf16> to vector<20x12x3xbf16>
    %24 = vector.extract_strided_slice %21 {offsets = [0, 2, 0], sizes = [20, 12, 3], strides = [1, 1, 1]} : vector<20x20x3xbf16> to vector<20x12x3xbf16>
    %25 = vector.extract_strided_slice %21 {offsets = [0, 3, 0], sizes = [20, 12, 3], strides = [1, 1, 1]} : vector<20x20x3xbf16> to vector<20x12x3xbf16>
    %26 = vector.extract_strided_slice %21 {offsets = [0, 4, 0], sizes = [20, 12, 3], strides = [1, 1, 1]} : vector<20x20x3xbf16> to vector<20x12x3xbf16>
    %27 = vector.extract_strided_slice %21 {offsets = [0, 5, 0], sizes = [20, 12, 3], strides = [1, 1, 1]} : vector<20x20x3xbf16> to vector<20x12x3xbf16>
    %28 = vector.extract_strided_slice %21 {offsets = [0, 6, 0], sizes = [20, 12, 3], strides = [1, 1, 1]} : vector<20x20x3xbf16> to vector<20x12x3xbf16>
    %29 = vector.extract_strided_slice %21 {offsets = [0, 7, 0], sizes = [20, 12, 3], strides = [1, 1, 1]} : vector<20x20x3xbf16> to vector<20x12x3xbf16>
    %30 = vector.extract_strided_slice %21 {offsets = [0, 8, 0], sizes = [20, 12, 3], strides = [1, 1, 1]} : vector<20x20x3xbf16> to vector<20x12x3xbf16>
    %31 = tpu.concatenate %22, %23, %24, %25, %26, %27, %28, %29, %30 in 2 : vector<20x12x3xbf16>, vector<20x12x3xbf16>, vector<20x12x3xbf16>, vector<20x12x3xbf16>, vector<20x12x3xbf16>, vector<20x12x3xbf16>, vector<20x12x3xbf16>, vector<20x12x3xbf16>, vector<20x12x3xbf16> -> vector<20x12x27xbf16>
    %32 = vector.extract_strided_slice %31 {offsets = [0, 0, 0], sizes = [12, 12, 27], strides = [1, 1, 1]} : vector<20x12x27xbf16> to vector<12x12x27xbf16>
    %33 = vector.extract_strided_slice %31 {offsets = [1, 0, 0], sizes = [12, 12, 27], strides = [1, 1, 1]} : vector<20x12x27xbf16> to vector<12x12x27xbf16>
    %34 = vector.extract_strided_slice %31 {offsets = [2, 0, 0], sizes = [12, 12, 27], strides = [1, 1, 1]} : vector<20x12x27xbf16> to vector<12x12x27xbf16>
    %35 = vector.extract_strided_slice %31 {offsets = [3, 0, 0], sizes = [12, 12, 27], strides = [1, 1, 1]} : vector<20x12x27xbf16> to vector<12x12x27xbf16>
    %36 = vector.extract_strided_slice %31 {offsets = [4, 0, 0], sizes = [12, 12, 27], strides = [1, 1, 1]} : vector<20x12x27xbf16> to vector<12x12x27xbf16>
    %37 = vector.extract_strided_slice %31 {offsets = [5, 0, 0], sizes = [12, 12, 27], strides = [1, 1, 1]} : vector<20x12x27xbf16> to vector<12x12x27xbf16>
    %38 = vector.extract_strided_slice %31 {offsets = [6, 0, 0], sizes = [12, 12, 27], strides = [1, 1, 1]} : vector<20x12x27xbf16> to vector<12x12x27xbf16>
    %39 = vector.extract_strided_slice %31 {offsets = [7, 0, 0], sizes = [12, 12, 27], strides = [1, 1, 1]} : vector<20x12x27xbf16> to vector<12x12x27xbf16>
    %40 = vector.extract_strided_slice %31 {offsets = [8, 0, 0], sizes = [12, 12, 27], strides = [1, 1, 1]} : vector<20x12x27xbf16> to vector<12x12x27xbf16>
    %41 = tpu.concatenate %32, %33, %34, %35, %36, %37, %38, %39, %40 in 2 : vector<12x12x27xbf16>, vector<12x12x27xbf16>, vector<12x12x27xbf16>, vector<12x12x27xbf16>, vector<12x12x27xbf16>, vector<12x12x27xbf16>, vector<12x12x27xbf16>, vector<12x12x27xbf16>, vector<12x12x27xbf16> -> vector<12x12x243xbf16>
    %cst = arith.constant dense<0.000000e+00> : vector<12x12x64xf32>
    %42 = tpu.matmul %41, %0, %cst {dimension_numbers = #tpu.dot_dimension_numbers<[2], [0], [0, 1], [1], [0, 0, 0, 1, 1, 1], [], []>} : vector<12x12x243xbf16>, vector<243x64xbf16>, vector<12x12x64xf32> -> vector<12x12x64xf32>
    %43 = vector.shape_cast %3 : vector<1x64xf32> to vector<1x1x64xf32>
    %44 = vector.broadcast %43 : vector<1x1x64xf32> to vector<12x12x64xf32>
    %45 = arith.addf %42, %44 : vector<12x12x64xf32>
    %cst_15 = arith.constant 0.000000e+00 : f32
    %46 = vector.broadcast %cst_15 : f32 to vector<12x12x64xf32>
    %47 = arith.maximumf %45, %46 : vector<12x12x64xf32>
    %48 = arith.truncf %47 : vector<12x12x64xf32> to vector<12x12x64xbf16>
    %cst_16 = arith.constant dense<0.000000e+00> : vector<12x12x32xf32>
    %49 = tpu.matmul %48, %1, %cst_16 {dimension_numbers = #tpu.dot_dimension_numbers<[2], [0], [0, 1], [1], [0, 0, 0, 1, 1, 1], [], []>} : vector<12x12x64xbf16>, vector<64x32xbf16>, vector<12x12x32xf32> -> vector<12x12x32xf32>
    %50 = vector.shape_cast %4 : vector<1x32xf32> to vector<1x1x32xf32>
    %51 = vector.broadcast %50 : vector<1x1x32xf32> to vector<12x12x32xf32>
    %52 = arith.addf %49, %51 : vector<12x12x32xf32>
    %cst_17 = arith.constant 0.000000e+00 : f32
    %53 = vector.broadcast %cst_17 : f32 to vector<12x12x32xf32>
    %54 = arith.maximumf %52, %53 : vector<12x12x32xf32>
    %55 = arith.truncf %54 : vector<12x12x32xf32> to vector<12x12x32xbf16>
    %56 = vector.extract_strided_slice %55 {offsets = [0, 0, 0], sizes = [1, 12, 32], strides = [1, 1, 1]} : vector<12x12x32xbf16> to vector<1x12x32xbf16>
    %57 = vector.shape_cast %56 : vector<1x12x32xbf16> to vector<1x12x32xbf16>
    %58 = vector.broadcast %57 : vector<1x12x32xbf16> to vector<4x12x32xbf16>
    %59 = vector.extract_strided_slice %55 {offsets = [11, 0, 0], sizes = [1, 12, 32], strides = [1, 1, 1]} : vector<12x12x32xbf16> to vector<1x12x32xbf16>
    %60 = vector.shape_cast %59 : vector<1x12x32xbf16> to vector<1x12x32xbf16>
    %61 = vector.broadcast %60 : vector<1x12x32xbf16> to vector<4x12x32xbf16>
    %62 = tpu.concatenate %58, %55, %61 in 0 : vector<4x12x32xbf16>, vector<12x12x32xbf16>, vector<4x12x32xbf16> -> vector<20x12x32xbf16>
    %63 = vector.extract_strided_slice %62 {offsets = [0, 0, 0], sizes = [20, 1, 32], strides = [1, 1, 1]} : vector<20x12x32xbf16> to vector<20x1x32xbf16>
    %64 = vector.shape_cast %63 : vector<20x1x32xbf16> to vector<20x1x32xbf16>
    %65 = vector.broadcast %64 : vector<20x1x32xbf16> to vector<20x4x32xbf16>
    %66 = vector.extract_strided_slice %62 {offsets = [0, 11, 0], sizes = [20, 1, 32], strides = [1, 1, 1]} : vector<20x12x32xbf16> to vector<20x1x32xbf16>
    %67 = vector.shape_cast %66 : vector<20x1x32xbf16> to vector<20x1x32xbf16>
    %68 = vector.broadcast %67 : vector<20x1x32xbf16> to vector<20x4x32xbf16>
    %69 = tpu.concatenate %65, %62, %68 in 1 : vector<20x4x32xbf16>, vector<20x12x32xbf16>, vector<20x4x32xbf16> -> vector<20x20x32xbf16>
    %70 = vector.extract_strided_slice %69 {offsets = [0, 0, 0], sizes = [20, 16, 32], strides = [1, 1, 1]} : vector<20x20x32xbf16> to vector<20x16x32xbf16>
    %71 = vector.extract_strided_slice %69 {offsets = [0, 1, 0], sizes = [20, 16, 32], strides = [1, 1, 1]} : vector<20x20x32xbf16> to vector<20x16x32xbf16>
    %72 = vector.extract_strided_slice %69 {offsets = [0, 2, 0], sizes = [20, 16, 32], strides = [1, 1, 1]} : vector<20x20x32xbf16> to vector<20x16x32xbf16>
    %73 = vector.extract_strided_slice %69 {offsets = [0, 3, 0], sizes = [20, 16, 32], strides = [1, 1, 1]} : vector<20x20x32xbf16> to vector<20x16x32xbf16>
    %74 = vector.extract_strided_slice %69 {offsets = [0, 4, 0], sizes = [20, 16, 32], strides = [1, 1, 1]} : vector<20x20x32xbf16> to vector<20x16x32xbf16>
    %75 = tpu.concatenate %70, %71, %72, %73, %74 in 2 : vector<20x16x32xbf16>, vector<20x16x32xbf16>, vector<20x16x32xbf16>, vector<20x16x32xbf16>, vector<20x16x32xbf16> -> vector<20x16x160xbf16>
    %76 = vector.extract_strided_slice %75 {offsets = [0, 0, 0], sizes = [16, 16, 160], strides = [1, 1, 1]} : vector<20x16x160xbf16> to vector<16x16x160xbf16>
    %77 = vector.extract_strided_slice %2 {offsets = [0, 0], sizes = [160, 3], strides = [1, 1]} : vector<800x3xbf16> to vector<160x3xbf16>
    %cst_18 = arith.constant dense<0.000000e+00> : vector<16x16x3xf32>
    %78 = tpu.matmul %76, %77, %cst_18 {dimension_numbers = #tpu.dot_dimension_numbers<[2], [0], [0, 1], [1], [0, 0, 0, 1, 1, 1], [], []>} : vector<16x16x160xbf16>, vector<160x3xbf16>, vector<16x16x3xf32> -> vector<16x16x3xf32>
    %79 = vector.extract_strided_slice %75 {offsets = [1, 0, 0], sizes = [16, 16, 160], strides = [1, 1, 1]} : vector<20x16x160xbf16> to vector<16x16x160xbf16>
    %80 = vector.extract_strided_slice %2 {offsets = [160, 0], sizes = [160, 3], strides = [1, 1]} : vector<800x3xbf16> to vector<160x3xbf16>
    %cst_19 = arith.constant dense<0.000000e+00> : vector<16x16x3xf32>
    %81 = tpu.matmul %79, %80, %cst_19 {dimension_numbers = #tpu.dot_dimension_numbers<[2], [0], [0, 1], [1], [0, 0, 0, 1, 1, 1], [], []>} : vector<16x16x160xbf16>, vector<160x3xbf16>, vector<16x16x3xf32> -> vector<16x16x3xf32>
    %82 = arith.addf %78, %81 : vector<16x16x3xf32>
    %83 = vector.extract_strided_slice %75 {offsets = [2, 0, 0], sizes = [16, 16, 160], strides = [1, 1, 1]} : vector<20x16x160xbf16> to vector<16x16x160xbf16>
    %84 = vector.extract_strided_slice %2 {offsets = [320, 0], sizes = [160, 3], strides = [1, 1]} : vector<800x3xbf16> to vector<160x3xbf16>
    %cst_20 = arith.constant dense<0.000000e+00> : vector<16x16x3xf32>
    %85 = tpu.matmul %83, %84, %cst_20 {dimension_numbers = #tpu.dot_dimension_numbers<[2], [0], [0, 1], [1], [0, 0, 0, 1, 1, 1], [], []>} : vector<16x16x160xbf16>, vector<160x3xbf16>, vector<16x16x3xf32> -> vector<16x16x3xf32>
    %86 = arith.addf %82, %85 : vector<16x16x3xf32>
    %87 = vector.extract_strided_slice %75 {offsets = [3, 0, 0], sizes = [16, 16, 160], strides = [1, 1, 1]} : vector<20x16x160xbf16> to vector<16x16x160xbf16>
    %88 = vector.extract_strided_slice %2 {offsets = [480, 0], sizes = [160, 3], strides = [1, 1]} : vector<800x3xbf16> to vector<160x3xbf16>
    %cst_21 = arith.constant dense<0.000000e+00> : vector<16x16x3xf32>
    %89 = tpu.matmul %87, %88, %cst_21 {dimension_numbers = #tpu.dot_dimension_numbers<[2], [0], [0, 1], [1], [0, 0, 0, 1, 1, 1], [], []>} : vector<16x16x160xbf16>, vector<160x3xbf16>, vector<16x16x3xf32> -> vector<16x16x3xf32>
    %90 = arith.addf %86, %89 : vector<16x16x3xf32>
    %91 = vector.extract_strided_slice %75 {offsets = [4, 0, 0], sizes = [16, 16, 160], strides = [1, 1, 1]} : vector<20x16x160xbf16> to vector<16x16x160xbf16>
    %92 = vector.extract_strided_slice %2 {offsets = [640, 0], sizes = [160, 3], strides = [1, 1]} : vector<800x3xbf16> to vector<160x3xbf16>
    %cst_22 = arith.constant dense<0.000000e+00> : vector<16x16x3xf32>
    %93 = tpu.matmul %91, %92, %cst_22 {dimension_numbers = #tpu.dot_dimension_numbers<[2], [0], [0, 1], [1], [0, 0, 0, 1, 1, 1], [], []>} : vector<16x16x160xbf16>, vector<160x3xbf16>, vector<16x16x3xf32> -> vector<16x16x3xf32>
    %94 = arith.addf %90, %93 : vector<16x16x3xf32>
    %95 = vector.shape_cast %5 : vector<1x3xf32> to vector<1x1x3xf32>
    %96 = vector.broadcast %95 : vector<1x1x3xf32> to vector<16x16x3xf32>
    %97 = arith.addf %94, %96 : vector<16x16x3xf32>
    %c0_23 = arith.constant 0 : index
    %c0_24 = arith.constant 0 : index
    %c0_25 = arith.constant 0 : index
    %c0_26 = arith.constant 0 : index
    %98 = vector.load %arg8[%c0_23, %c0_24, %c0_25, %c0_26] : memref<2x16x16x3xf32, #tpu.memory_space<vmem>>, vector<1x16x16x3xf32>
    %99 = vector.shape_cast %98 : vector<1x16x16x3xf32> to vector<16x16x3xf32>
    %100 = vector.shape_cast %97 : vector<16x16x3xf32> to vector<1x16x16x3xf32>
    tpu.vector_store %arg8[%c0_23, %c0_24, %c0_25, %c0_26], %100 {strides = array<i32>} : memref<2x16x16x3xf32, #tpu.memory_space<vmem>>, vector<1x16x16x3xf32>,
    %c1 = arith.constant 1 : index
    %c0_27 = arith.constant 0 : index
    %c0_28 = arith.constant 0 : index
    %c0_29 = arith.constant 0 : index
    %101 = vector.load %arg1[%c1, %c0_27, %c0_28, %c0_29] : memref<2x16x16x3xbf16, #tpu.memory_space<vmem>>, vector<1x16x16x3xbf16>
    %102 = vector.shape_cast %101 : vector<1x16x16x3xbf16> to vector<16x16x3xbf16>
    %103 = vector.extract_strided_slice %102 {offsets = [0, 0, 0], sizes = [1, 16, 3], strides = [1, 1, 1]} : vector<16x16x3xbf16> to vector<1x16x3xbf16>
    %104 = vector.shape_cast %103 : vector<1x16x3xbf16> to vector<1x16x3xbf16>
    %105 = vector.broadcast %104 : vector<1x16x3xbf16> to vector<2x16x3xbf16>
    %106 = vector.extract_strided_slice %102 {offsets = [15, 0, 0], sizes = [1, 16, 3], strides = [1, 1, 1]} : vector<16x16x3xbf16> to vector<1x16x3xbf16>
    %107 = vector.shape_cast %106 : vector<1x16x3xbf16> to vector<1x16x3xbf16>
    %108 = vector.broadcast %107 : vector<1x16x3xbf16> to vector<2x16x3xbf16>
    %109 = tpu.concatenate %105, %102, %108 in 0 : vector<2x16x3xbf16>, vector<16x16x3xbf16>, vector<2x16x3xbf16> -> vector<20x16x3xbf16>
    %110 = vector.extract_strided_slice %109 {offsets = [0, 0, 0], sizes = [20, 1, 3], strides = [1, 1, 1]} : vector<20x16x3xbf16> to vector<20x1x3xbf16>
    %111 = vector.shape_cast %110 : vector<20x1x3xbf16> to vector<20x1x3xbf16>
    %112 = vector.broadcast %111 : vector<20x1x3xbf16> to vector<20x2x3xbf16>
    %113 = vector.extract_strided_slice %109 {offsets = [0, 15, 0], sizes = [20, 1, 3], strides = [1, 1, 1]} : vector<20x16x3xbf16> to vector<20x1x3xbf16>
    %114 = vector.shape_cast %113 : vector<20x1x3xbf16> to vector<20x1x3xbf16>
    %115 = vector.broadcast %114 : vector<20x1x3xbf16> to vector<20x2x3xbf16>
    %116 = tpu.concatenate %112, %109, %115 in 1 : vector<20x2x3xbf16>, vector<20x16x3xbf16>, vector<20x2x3xbf16> -> vector<20x20x3xbf16>
    %117 = vector.extract_strided_slice %116 {offsets = [0, 0, 0], sizes = [20, 12, 3], strides = [1, 1, 1]} : vector<20x20x3xbf16> to vector<20x12x3xbf16>
    %118 = vector.extract_strided_slice %116 {offsets = [0, 1, 0], sizes = [20, 12, 3], strides = [1, 1, 1]} : vector<20x20x3xbf16> to vector<20x12x3xbf16>
    %119 = vector.extract_strided_slice %116 {offsets = [0, 2, 0], sizes = [20, 12, 3], strides = [1, 1, 1]} : vector<20x20x3xbf16> to vector<20x12x3xbf16>
    %120 = vector.extract_strided_slice %116 {offsets = [0, 3, 0], sizes = [20, 12, 3], strides = [1, 1, 1]} : vector<20x20x3xbf16> to vector<20x12x3xbf16>
    %121 = vector.extract_strided_slice %116 {offsets = [0, 4, 0], sizes = [20, 12, 3], strides = [1, 1, 1]} : vector<20x20x3xbf16> to vector<20x12x3xbf16>
    %122 = vector.extract_strided_slice %116 {offsets = [0, 5, 0], sizes = [20, 12, 3], strides = [1, 1, 1]} : vector<20x20x3xbf16> to vector<20x12x3xbf16>
    %123 = vector.extract_strided_slice %116 {offsets = [0, 6, 0], sizes = [20, 12, 3], strides = [1, 1, 1]} : vector<20x20x3xbf16> to vector<20x12x3xbf16>
    %124 = vector.extract_strided_slice %116 {offsets = [0, 7, 0], sizes = [20, 12, 3], strides = [1, 1, 1]} : vector<20x20x3xbf16> to vector<20x12x3xbf16>
    %125 = vector.extract_strided_slice %116 {offsets = [0, 8, 0], sizes = [20, 12, 3], strides = [1, 1, 1]} : vector<20x20x3xbf16> to vector<20x12x3xbf16>
    %126 = tpu.concatenate %117, %118, %119, %120, %121, %122, %123, %124, %125 in 2 : vector<20x12x3xbf16>, vector<20x12x3xbf16>, vector<20x12x3xbf16>, vector<20x12x3xbf16>, vector<20x12x3xbf16>, vector<20x12x3xbf16>, vector<20x12x3xbf16>, vector<20x12x3xbf16>, vector<20x12x3xbf16> -> vector<20x12x27xbf16>
    %127 = vector.extract_strided_slice %126 {offsets = [0, 0, 0], sizes = [12, 12, 27], strides = [1, 1, 1]} : vector<20x12x27xbf16> to vector<12x12x27xbf16>
    %128 = vector.extract_strided_slice %126 {offsets = [1, 0, 0], sizes = [12, 12, 27], strides = [1, 1, 1]} : vector<20x12x27xbf16> to vector<12x12x27xbf16>
    %129 = vector.extract_strided_slice %126 {offsets = [2, 0, 0], sizes = [12, 12, 27], strides = [1, 1, 1]} : vector<20x12x27xbf16> to vector<12x12x27xbf16>
    %130 = vector.extract_strided_slice %126 {offsets = [3, 0, 0], sizes = [12, 12, 27], strides = [1, 1, 1]} : vector<20x12x27xbf16> to vector<12x12x27xbf16>
    %131 = vector.extract_strided_slice %126 {offsets = [4, 0, 0], sizes = [12, 12, 27], strides = [1, 1, 1]} : vector<20x12x27xbf16> to vector<12x12x27xbf16>
    %132 = vector.extract_strided_slice %126 {offsets = [5, 0, 0], sizes = [12, 12, 27], strides = [1, 1, 1]} : vector<20x12x27xbf16> to vector<12x12x27xbf16>
    %133 = vector.extract_strided_slice %126 {offsets = [6, 0, 0], sizes = [12, 12, 27], strides = [1, 1, 1]} : vector<20x12x27xbf16> to vector<12x12x27xbf16>
    %134 = vector.extract_strided_slice %126 {offsets = [7, 0, 0], sizes = [12, 12, 27], strides = [1, 1, 1]} : vector<20x12x27xbf16> to vector<12x12x27xbf16>
    %135 = vector.extract_strided_slice %126 {offsets = [8, 0, 0], sizes = [12, 12, 27], strides = [1, 1, 1]} : vector<20x12x27xbf16> to vector<12x12x27xbf16>
    %136 = tpu.concatenate %127, %128, %129, %130, %131, %132, %133, %134, %135 in 2 : vector<12x12x27xbf16>, vector<12x12x27xbf16>, vector<12x12x27xbf16>, vector<12x12x27xbf16>, vector<12x12x27xbf16>, vector<12x12x27xbf16>, vector<12x12x27xbf16>, vector<12x12x27xbf16>, vector<12x12x27xbf16> -> vector<12x12x243xbf16>
    %cst_30 = arith.constant dense<0.000000e+00> : vector<12x12x64xf32>
    %137 = tpu.matmul %136, %0, %cst_30 {dimension_numbers = #tpu.dot_dimension_numbers<[2], [0], [0, 1], [1], [0, 0, 0, 1, 1, 1], [], []>} : vector<12x12x243xbf16>, vector<243x64xbf16>, vector<12x12x64xf32> -> vector<12x12x64xf32>
    %138 = vector.shape_cast %3 : vector<1x64xf32> to vector<1x1x64xf32>
    %139 = vector.broadcast %138 : vector<1x1x64xf32> to vector<12x12x64xf32>
    %140 = arith.addf %137, %139 : vector<12x12x64xf32>
    %cst_31 = arith.constant 0.000000e+00 : f32
    %141 = vector.broadcast %cst_31 : f32 to vector<12x12x64xf32>
    %142 = arith.maximumf %140, %141 : vector<12x12x64xf32>
    %143 = arith.truncf %142 : vector<12x12x64xf32> to vector<12x12x64xbf16>
    %cst_32 = arith.constant dense<0.000000e+00> : vector<12x12x32xf32>
    %144 = tpu.matmul %143, %1, %cst_32 {dimension_numbers = #tpu.dot_dimension_numbers<[2], [0], [0, 1], [1], [0, 0, 0, 1, 1, 1], [], []>} : vector<12x12x64xbf16>, vector<64x32xbf16>, vector<12x12x32xf32> -> vector<12x12x32xf32>
    %145 = vector.shape_cast %4 : vector<1x32xf32> to vector<1x1x32xf32>
    %146 = vector.broadcast %145 : vector<1x1x32xf32> to vector<12x12x32xf32>
    %147 = arith.addf %144, %146 : vector<12x12x32xf32>
    %cst_33 = arith.constant 0.000000e+00 : f32
    %148 = vector.broadcast %cst_33 : f32 to vector<12x12x32xf32>
    %149 = arith.maximumf %147, %148 : vector<12x12x32xf32>
    %150 = arith.truncf %149 : vector<12x12x32xf32> to vector<12x12x32xbf16>
    %151 = vector.extract_strided_slice %150 {offsets = [0, 0, 0], sizes = [1, 12, 32], strides = [1, 1, 1]} : vector<12x12x32xbf16> to vector<1x12x32xbf16>
    %152 = vector.shape_cast %151 : vector<1x12x32xbf16> to vector<1x12x32xbf16>
    %153 = vector.broadcast %152 : vector<1x12x32xbf16> to vector<4x12x32xbf16>
    %154 = vector.extract_strided_slice %150 {offsets = [11, 0, 0], sizes = [1, 12, 32], strides = [1, 1, 1]} : vector<12x12x32xbf16> to vector<1x12x32xbf16>
    %155 = vector.shape_cast %154 : vector<1x12x32xbf16> to vector<1x12x32xbf16>
    %156 = vector.broadcast %155 : vector<1x12x32xbf16> to vector<4x12x32xbf16>
    %157 = tpu.concatenate %153, %150, %156 in 0 : vector<4x12x32xbf16>, vector<12x12x32xbf16>, vector<4x12x32xbf16> -> vector<20x12x32xbf16>
    %158 = vector.extract_strided_slice %157 {offsets = [0, 0, 0], sizes = [20, 1, 32], strides = [1, 1, 1]} : vector<20x12x32xbf16> to vector<20x1x32xbf16>
    %159 = vector.shape_cast %158 : vector<20x1x32xbf16> to vector<20x1x32xbf16>
    %160 = vector.broadcast %159 : vector<20x1x32xbf16> to vector<20x4x32xbf16>
    %161 = vector.extract_strided_slice %157 {offsets = [0, 11, 0], sizes = [20, 1, 32], strides = [1, 1, 1]} : vector<20x12x32xbf16> to vector<20x1x32xbf16>
    %162 = vector.shape_cast %161 : vector<20x1x32xbf16> to vector<20x1x32xbf16>
    %163 = vector.broadcast %162 : vector<20x1x32xbf16> to vector<20x4x32xbf16>
    %164 = tpu.concatenate %160, %157, %163 in 1 : vector<20x4x32xbf16>, vector<20x12x32xbf16>, vector<20x4x32xbf16> -> vector<20x20x32xbf16>
    %165 = vector.extract_strided_slice %164 {offsets = [0, 0, 0], sizes = [20, 16, 32], strides = [1, 1, 1]} : vector<20x20x32xbf16> to vector<20x16x32xbf16>
    %166 = vector.extract_strided_slice %164 {offsets = [0, 1, 0], sizes = [20, 16, 32], strides = [1, 1, 1]} : vector<20x20x32xbf16> to vector<20x16x32xbf16>
    %167 = vector.extract_strided_slice %164 {offsets = [0, 2, 0], sizes = [20, 16, 32], strides = [1, 1, 1]} : vector<20x20x32xbf16> to vector<20x16x32xbf16>
    %168 = vector.extract_strided_slice %164 {offsets = [0, 3, 0], sizes = [20, 16, 32], strides = [1, 1, 1]} : vector<20x20x32xbf16> to vector<20x16x32xbf16>
    %169 = vector.extract_strided_slice %164 {offsets = [0, 4, 0], sizes = [20, 16, 32], strides = [1, 1, 1]} : vector<20x20x32xbf16> to vector<20x16x32xbf16>
    %170 = tpu.concatenate %165, %166, %167, %168, %169 in 2 : vector<20x16x32xbf16>, vector<20x16x32xbf16>, vector<20x16x32xbf16>, vector<20x16x32xbf16>, vector<20x16x32xbf16> -> vector<20x16x160xbf16>
    %171 = vector.extract_strided_slice %170 {offsets = [0, 0, 0], sizes = [16, 16, 160], strides = [1, 1, 1]} : vector<20x16x160xbf16> to vector<16x16x160xbf16>
    %172 = vector.extract_strided_slice %2 {offsets = [0, 0], sizes = [160, 3], strides = [1, 1]} : vector<800x3xbf16> to vector<160x3xbf16>
    %cst_34 = arith.constant dense<0.000000e+00> : vector<16x16x3xf32>
    %173 = tpu.matmul %171, %172, %cst_34 {dimension_numbers = #tpu.dot_dimension_numbers<[2], [0], [0, 1], [1], [0, 0, 0, 1, 1, 1], [], []>} : vector<16x16x160xbf16>, vector<160x3xbf16>, vector<16x16x3xf32> -> vector<16x16x3xf32>
    %174 = vector.extract_strided_slice %170 {offsets = [1, 0, 0], sizes = [16, 16, 160], strides = [1, 1, 1]} : vector<20x16x160xbf16> to vector<16x16x160xbf16>
    %175 = vector.extract_strided_slice %2 {offsets = [160, 0], sizes = [160, 3], strides = [1, 1]} : vector<800x3xbf16> to vector<160x3xbf16>
    %cst_35 = arith.constant dense<0.000000e+00> : vector<16x16x3xf32>
    %176 = tpu.matmul %174, %175, %cst_35 {dimension_numbers = #tpu.dot_dimension_numbers<[2], [0], [0, 1], [1], [0, 0, 0, 1, 1, 1], [], []>} : vector<16x16x160xbf16>, vector<160x3xbf16>, vector<16x16x3xf32> -> vector<16x16x3xf32>
    %177 = arith.addf %173, %176 : vector<16x16x3xf32>
    %178 = vector.extract_strided_slice %170 {offsets = [2, 0, 0], sizes = [16, 16, 160], strides = [1, 1, 1]} : vector<20x16x160xbf16> to vector<16x16x160xbf16>
    %179 = vector.extract_strided_slice %2 {offsets = [320, 0], sizes = [160, 3], strides = [1, 1]} : vector<800x3xbf16> to vector<160x3xbf16>
    %cst_36 = arith.constant dense<0.000000e+00> : vector<16x16x3xf32>
    %180 = tpu.matmul %178, %179, %cst_36 {dimension_numbers = #tpu.dot_dimension_numbers<[2], [0], [0, 1], [1], [0, 0, 0, 1, 1, 1], [], []>} : vector<16x16x160xbf16>, vector<160x3xbf16>, vector<16x16x3xf32> -> vector<16x16x3xf32>
    %181 = arith.addf %177, %180 : vector<16x16x3xf32>
    %182 = vector.extract_strided_slice %170 {offsets = [3, 0, 0], sizes = [16, 16, 160], strides = [1, 1, 1]} : vector<20x16x160xbf16> to vector<16x16x160xbf16>
    %183 = vector.extract_strided_slice %2 {offsets = [480, 0], sizes = [160, 3], strides = [1, 1]} : vector<800x3xbf16> to vector<160x3xbf16>
    %cst_37 = arith.constant dense<0.000000e+00> : vector<16x16x3xf32>
    %184 = tpu.matmul %182, %183, %cst_37 {dimension_numbers = #tpu.dot_dimension_numbers<[2], [0], [0, 1], [1], [0, 0, 0, 1, 1, 1], [], []>} : vector<16x16x160xbf16>, vector<160x3xbf16>, vector<16x16x3xf32> -> vector<16x16x3xf32>
    %185 = arith.addf %181, %184 : vector<16x16x3xf32>
    %186 = vector.extract_strided_slice %170 {offsets = [4, 0, 0], sizes = [16, 16, 160], strides = [1, 1, 1]} : vector<20x16x160xbf16> to vector<16x16x160xbf16>
    %187 = vector.extract_strided_slice %2 {offsets = [640, 0], sizes = [160, 3], strides = [1, 1]} : vector<800x3xbf16> to vector<160x3xbf16>
    %cst_38 = arith.constant dense<0.000000e+00> : vector<16x16x3xf32>
    %188 = tpu.matmul %186, %187, %cst_38 {dimension_numbers = #tpu.dot_dimension_numbers<[2], [0], [0, 1], [1], [0, 0, 0, 1, 1, 1], [], []>} : vector<16x16x160xbf16>, vector<160x3xbf16>, vector<16x16x3xf32> -> vector<16x16x3xf32>
    %189 = arith.addf %185, %188 : vector<16x16x3xf32>
    %190 = vector.shape_cast %5 : vector<1x3xf32> to vector<1x1x3xf32>
    %191 = vector.broadcast %190 : vector<1x1x3xf32> to vector<16x16x3xf32>
    %192 = arith.addf %189, %191 : vector<16x16x3xf32>
    %c1_39 = arith.constant 1 : index
    %c0_40 = arith.constant 0 : index
    %c0_41 = arith.constant 0 : index
    %c0_42 = arith.constant 0 : index
    %193 = vector.load %arg8[%c1_39, %c0_40, %c0_41, %c0_42] : memref<2x16x16x3xf32, #tpu.memory_space<vmem>>, vector<1x16x16x3xf32>
    %194 = vector.shape_cast %193 : vector<1x16x16x3xf32> to vector<16x16x3xf32>
    %195 = vector.shape_cast %192 : vector<16x16x3xf32> to vector<1x16x16x3xf32>
    tpu.vector_store %arg8[%c1_39, %c0_40, %c0_41, %c0_42], %195 {strides = array<i32>} : memref<2x16x16x3xf32, #tpu.memory_space<vmem>>, vector<1x16x16x3xf32>,
    return
  }
  func.func @transform_0(%arg0: i32) -> (i32, i32, i32, i32) {
    %c0_i32 = arith.constant 0 : i32
    %c0_i32_0 = arith.constant 0 : i32
    %c0_i32_1 = arith.constant 0 : i32
    %c0_i32_2 = arith.constant 0 : i32
    return %arg0, %c0_i32, %c0_i32_0, %c0_i32_1 : i32, i32, i32, i32
  }
  func.func @transform_1(%arg0: i32) -> (i32, i32) {
    %c0_i32 = arith.constant 0 : i32
    %c0_i32_0 = arith.constant 0 : i32
    %c0_i32_1 = arith.constant 0 : i32
    return %c0_i32, %c0_i32_0 : i32, i32
  }
  func.func @transform_2(%arg0: i32) -> (i32, i32) {
    %c0_i32 = arith.constant 0 : i32
    %c0_i32_0 = arith.constant 0 : i32
    %c0_i32_1 = arith.constant 0 : i32
    return %c0_i32, %c0_i32_0 : i32, i32
  }
  func.func @transform_3(%arg0: i32) -> (i32, i32) {
    %c0_i32 = arith.constant 0 : i32
    %c0_i32_0 = arith.constant 0 : i32
    %c0_i32_1 = arith.constant 0 : i32
    return %c0_i32, %c0_i32_0 : i32, i32
  }
  func.func @transform_4(%arg0: i32) -> (i32, i32) {
    %c0_i32 = arith.constant 0 : i32
    %c0_i32_0 = arith.constant 0 : i32
    %c0_i32_1 = arith.constant 0 : i32
    return %c0_i32, %c0_i32_0 : i32, i32
  }
  func.func @transform_5(%arg0: i32) -> (i32, i32) {
    %c0_i32 = arith.constant 0 : i32
    %c0_i32_0 = arith.constant 0 : i32
    %c0_i32_1 = arith.constant 0 : i32
    return %c0_i32, %c0_i32_0 : i32, i32
  }
  func.func @transform_6(%arg0: i32) -> (i32, i32) {
    %c0_i32 = arith.constant 0 : i32
    %c0_i32_0 = arith.constant 0 : i32
    %c0_i32_1 = arith.constant 0 : i32
    return %c0_i32, %c0_i32_0 : i32, i32
  }
  func.func @transform_7(%arg0: i32) -> (i32, i32, i32, i32) {
    %c0_i32 = arith.constant 0 : i32
    %c0_i32_0 = arith.constant 0 : i32
    %c0_i32_1 = arith.constant 0 : i32
    %c0_i32_2 = arith.constant 0 : i32
    return %arg0, %c0_i32, %c0_i32_0, %c0_i32_1 : i32, i32, i32, i32
  }
}

</mosaic_0001>

<bundles_post_ra>
// kernel: srcnn_forward.1
= control target key start
LH: loop header
LB: loop body
LE: loop exit
PB: predicated region body
PF: predicated region fallthrough
CT: control target
= control target key end

     0   :  { %v204_v0 = vlaneseq  ;;  %vm17807_vm0 = vcmask 1040384   ;;  %s11413_s23 = smov 6   ;;  %s11414_s30 = smov 3   ;;  %vm17811_vm1 = vsmask.f32 5376  ;;  %vm17814_vm2 = vcmask 1044480   ;;  %s17797_s0 = inlined_call_operand.vmem [shape: bf16[2,16,16,3], index: 0, kind: input, shape index: {}]   ;;  %s17798_s1 = inlined_call_operand.vmem [shape: bf16[243,64], index: 1, kind: input, shape index: {}]   ;;  %s17799_s3 = inlined_call_operand.vmem [shape: bf16[64,32], index: 3, kind: input, shape index: {}]   ;;  %s17800_s2 = inlined_call_operand.vmem [shape: f32[1,64], index: 2, kind: input, shape index: {}]   ;;  %s17801_s5 = inlined_call_operand.vmem [shape: bf16[800,3], index: 5, kind: input, shape index: {}]   ;;  %s17802_s4 = inlined_call_operand.vmem [shape: f32[1,32], index: 4, kind: input, shape index: {}]   ;;  %s17803_s6 = inlined_call_operand.vmem [shape: f32[1,3], index: 6, kind: input, shape index: {}]   ;;  %s17804_s7 = inlined_call_operand.vmem [shape: f32[2,16,16,3], index: 7, kind: output, shape index: {}]  }
   0x1   :  { %v173_v1 = vld [vmem:[%s17797_s0 + $0x10] sm:$0xf]  ;;  %v11483_v2 = vld [vmem:[%s17797_s0 + $0x14] sm:$0xf]  ;;  %v169_v3 = vld [vmem:[%s17797_s0] sm:$0xf] }
   0x2   :  { %v11488_v4 = vshrl.u32 %v204_v0, 7  ;;  %v216_v5 = vpack.i.b16 %v173_v1, %v173_v1  ;;  %v10555_v6 = vcombine.low %v173_v1, %v11483_v2  ;;  %v11494_v7 = vld [vmem:[%s17797_s0 + $0x4] sm:$0xf]  ;;  %v202_v8 = vpack.i.b16 %v169_v3, %v169_v3  ;;  %v175_v9 = vld [vmem:[%s17797_s0 + $0x18] sm:$0xf]  ;;  %s11415_s8 = smov 9  }
   0x3   :  { %v10553_v10 = vcombine.low %v169_v3, %v11494_v7  ;;  %v11503_v11 = vld [vmem:[%s17797_s0 + $0x1c] sm:$0xf]  ;;  %v223_v12 = vpack.i.b16 %v175_v9, %v175_v9  ;;  %v177_v13 = vld [vmem:[%s17797_s0 + $0x20] sm:$0xf]  ;;  %v11511_v14 = vld [vmem:[%s17797_s0 + $0x24] sm:$0xf] }
   0x4   :  { %17933 = vst [vmem:[#allocation2_spill] sm:$0xff] %v11488_v4  ;;  %v11514_v15 = vsub.s32 0, %v11488_v4  ;;  %v11516_v16 = vrot.slane %v10555_v6, 7  ;;  %v10556_v17 = vcombine.low %v175_v9, %v11503_v11  ;;  %v230_v18 = vpack.i.b16 %v177_v13, %v177_v13  ;;  %v171_v19 = vld [vmem:[%s17797_s0 + $0x8] sm:$0xf]  ;;  %s11416_s13 = smov 12  }
   0x5   :  { %v11525_v20 = vld [vmem:[%s17797_s0 + $0xc] sm:$0xf]  ;;  %v11527_v21 = vrot.slane %v10553_v10, 7  ;;  %v10557_v22 = vcombine.low %v177_v13, %v11511_v14  ;;  %v209_v23 = vpack.i.b16 %v171_v19, %v171_v19  ;;  %v179_v24 = vld [vmem:[%s17797_s0 + $0x28] sm:$0xf]  ;;  %s11417_s14 = smov 15  }
   0x6   :  { %17934 = vst [vmem:[#allocation3_spill] sm:$0xff] %v11514_v15  ;;  %v221_v25 = vrot.slane %v216_v5, %v11514_v15  ;;  %v207_v26 = vrot.slane %v202_v8, %v11514_v15  ;;  %v228_v27 = vrot.slane %v223_v12, %v11514_v15  ;;  %v11536_v28 = vrot.slane %v10556_v17, 7  ;;  %v11592_v51 = vld [vmem:[%s17797_s0 + $0x2c] sm:$0xf]  ;;  %v181_v55 = vld [vmem:[%s17797_s0 + $0x30] sm:$0xf] }
   0x7   :  { %v235_v29 = vrot.slane %v230_v18, %v11514_v15  ;;  %v11539_v30 = vrot.slane %v10557_v22, 7  ;;  %v214_v31 = vrot.slane %v209_v23, %v11514_v15  ;;  %v10554_v32 = vcombine.low %v171_v19, %v11525_v20  ;;  %v11614_v60 = vld [vmem:[%s17797_s0 + $0x34] sm:$0xf]  ;;  %s11418_s15 = smov 18   ;;  %s11419_s16 = smov 21  }
   0x8   :  { %v11545_v33 = vsel %vm17807_vm0, %v221_v25, %v11516_v16  ;;  %v11549_v34 = vsel %vm17807_vm0, %v207_v26, %v11527_v21  ;;  %v11553_v35 = vsel %vm17807_vm0, %v228_v27, %v11536_v28  ;;  %v237_v36 = vpack.i.b16 %v179_v24, %v179_v24  ;;  %s11420_s17 = smov 24   ;;  %s11421_s27 = smov 108  }
   0x9   :  { %v764_v37 = vrot.slane %v11545_v33, 1  ;;  %v762_v38 = vrot.slane %v11549_v34, 1  ;;  %v11558_v39 = vshrl.u32 %v11553_v35, 16  ;;  %v11561_v40 = vshll.u32 %v11553_v35, 16  ;;  %s11422_s28 = smov 27   ;;  %s11424_s12 = smov 54  }
   0xa   :  { %v765_v41 = vrot.slane %v11553_v35, 1  ;;  %v11566_v42 = vsel %vm17807_vm0, %v235_v29, %v11539_v30  ;;  %v11569_v43 = vshrl.u32 %v11549_v34, 16  ;;  %v11572_v44 = vshll.u32 %v11549_v34, 16  ;;  %s11425_s18 = smov 7   ;;  %s11426_s9 = smov 34  }
   0xb   :  { %782 = vrot.lane.b32.xlu1 %v764_v37, %s11413_s23  ;;  %778 = vrot.lane.b32.xlu0 %v762_v38, %s11413_s23  ;;  %v640_v45 = vrot.slane %v11561_v40, 1  ;;  %v11578_v46 = vshrl.u32 %v11566_v42, 16  ;;  %v11581_v47 = vshll.u32 %v11566_v42, 16  ;;  %v11583_v48 = vrot.slane %v10554_v32, 7  ;;  %s11427_s26 = smov 61   ;;  %s11428_s29 = smov 81  }
   0xc   :  { %v622_v49 = vrot.slane %v11572_v44, 1  ;;  %v11587_v50 = vshll.u32 %v11545_v33, 16  ;;  %v11607_v57 = vshrl.u32 %v11545_v33, 16  ;;  %v242_v59 = vrot.slane %v237_v36, %v11514_v15  ;;  %s17817_s21 = smov 88   ;;  %s11435_s25 = smov 32  }
   0xd   :  { %v641_v52 = vor.u32 %v640_v45, %v11558_v39  ;;  %v646_v53 = vrot.slane %v11581_v47, 1  ;;  %v11598_v54 = vsel %vm17807_vm0, %v214_v31, %v11583_v48  ;;  %v10558_v0 = vcombine.low %v179_v24, %v11592_v51  ;;  %s11436_s10 = smov 96   ;;  %s18238_s19 = smov 88  }
   0xe   :  { %v11604_v56 = vshll.u32 %v11598_v54, 16  ;;  %v634_v58 = vrot.slane %v11587_v50, 1  ;;  %v623_v62 = vor.u32 %v622_v49, %v11569_v43  ;;  %v11621_v63 = vshrl.u32 %v11598_v54, 16 }
   0xf   :  { %720 = vrot.lane.b32.xlu1 %v641_v52, %s11414_s30  ;;  %784 = vrot.lane.b32.xlu0 %v765_v41, %s11413_s23  ;;  %v647_v61 = vor.u32 %v646_v53, %v11578_v46  ;;  %v11625_v3 = vrot.slane %v10558_v0, 7  ;;  %v244_v5 = vpack.i.b16 %v181_v55, %v181_v55  ;;  %v10559_v6 = vcombine.low %v181_v55, %v11614_v60 }
  0x10   :  { %v628_v1 = vrot.slane %v11604_v56, 1  ;;  %v635_v8 = vor.u32 %v634_v58, %v11607_v57  ;;  %v816_v19 = vrot.slane %v11607_v57, 1  ;;  %v817_v24 = vrot.slane %v11587_v50, 2 }
  0x11   :  { %v11634_v10 = vsel %vm17807_vm0, %v242_v59, %v11625_v3  ;;  %v249_v12 = vrot.slane %v244_v5, %v11514_v15  ;;  %v11637_v13 = vrot.slane %v10559_v6, 7  ;;  %v810_v25 = vrot.slane %v11569_v43, 1 }
  0x12   :  { %v629_v9 = vor.u32 %v628_v1, %v11621_v63  ;;  %v11640_v17 = vshrl.u32 %v11634_v10, 16  ;;  %v11643_v18 = vshll.u32 %v11634_v10, 16  ;;  %v811_v26 = vrot.slane %v11572_v44, 2 }
  0x13   :  { %722 = vrot.lane.b32.xlu1 %v647_v61, %s11414_s30  ;;  %714 = vrot.lane.b32.xlu0 %v623_v62, %s11414_s30  ;;  %v11648_v22 = vsel %vm17807_vm0, %v249_v12, %v11637_v13  ;;  %v766_v27 = vrot.slane %v11566_v42, 1  ;;  %v818_v32 = vor.u32 %v817_v24, %v816_v19  ;;  %v819_v41 = vrot.slane %v11558_v39, 1 }
  0x14   :  { %v652_v23 = vrot.slane %v11643_v18, 1  ;;  %v11658_v29 = vshll.u32 %v11648_v22, 16  ;;  %v812_v36 = vor.u32 %v811_v26, %v810_v25  ;;  %v11664_v37 = vshrl.u32 %v11648_v22, 16 }
  0x15   :  { %v820_v45 = vrot.slane %v11561_v40, 2  ;;  %v330_v53 = vshrl.u32 %v11483_v2, 16  ;;  %v314_v55 = vshrl.u32 %v11494_v7, 16  ;;  %v767_v58 = vrot.slane %v11634_v10, 1  ;;  %v183_v2 = vld [vmem:[%s17797_s0 + $0x38] sm:$0xf] }
  0x16   :  { %v653_v31 = vor.u32 %v652_v23, %v11640_v17  ;;  %v658_v38 = vrot.slane %v11658_v29, 1  ;;  %v763_v59 = vrot.slane %v11598_v54, 1  ;;  %v822_v61 = vrot.slane %v11578_v46, 1  ;;  %v11689_v7 = vld [vmem:[%s17797_s0 + $0x3c] sm:$0xf] }
  0x17   :  { %716 = vrot.lane.b32.xlu1 %v629_v9, %s11414_s30  ;;  %718 = vrot.lane.b32.xlu0 %v635_v8, %s11414_s30  ;;  %v821_v52 = vor.u32 %v820_v45, %v819_v41  ;;  %v823_v62 = vrot.slane %v11581_v47, 2  ;;  %v11681_v0 = vsub.s32 3, %v11488_v4  ;;  %v331_v1 = vpack.i.b16 %v330_v53, %v330_v53 }
  0x18   :  { %v659_v49 = vor.u32 %v658_v38, %v11664_v37  ;;  %v315_v5 = vpack.i.b16 %v314_v55, %v314_v55  ;;  %v338_v6 = vshrl.u32 %v11503_v11, 16  ;;  %v890_v8 = vrot.slane %v11549_v34, 2 }
  0x19   :  { %v824_v9 = vor.u32 %v823_v62, %v822_v61  ;;  %v336_v12 = vrot.slane %v331_v1, %v11681_v0  ;;  %v251_v19 = vpack.i.b16 %v183_v2, %v183_v2  ;;  %v10560_v23 = vcombine.low %v183_v2, %v11689_v7 }
  0x1a   :  { %v320_v24 = vrot.slane %v315_v5, %v11681_v0  ;;  %v339_v25 = vpack.i.b16 %v338_v6, %v338_v6  ;;  %v893_v26 = vrot.slane %v11553_v35, 2  ;;  %v813_v11 = vrot.slane %v11621_v63, 1 }
  0x1b   :  { %786 = vrot.lane.b32.xlu1 %v766_v27, %s11413_s23  ;;  %724 = vrot.lane.b32.xlu0 %v653_v31, %s11414_s30  ;;  %v892_v27 = vrot.slane %v11545_v33, 2  ;;  %v814_v31 = vrot.slane %v11604_v56, 2  ;;  %v11708_v38 = vsel %vm17807_vm0, %v11516_v16, %v336_v12  ;;  %v953_v41 = vrot.slane %v11607_v57, 2 }
  0x1c   :  { %v256_v45 = vrot.slane %v251_v19, %v11514_v15  ;;  %v11717_v53 = vsel %vm17807_vm0, %v11527_v21, %v320_v24  ;;  %v344_v55 = vrot.slane %v339_v25, %v11681_v0  ;;  %v940_v16 = vrot.slane %v11572_v44, 3 }
  0x1d   :  { %v1199_v61 = vrot.slane %v11607_v57, 3  ;;  %v1200_v62 = vrot.slane %v11587_v50, 4  ;;  %v815_v1 = vor.u32 %v814_v31, %v813_v11  ;;  %v768_v21 = vrot.slane %v11648_v22, 1 }
  0x1e   :  { %v894_v5 = vrot.slane %v11566_v42, 2  ;;  %v956_v2 = vshll.u32 %v11708_v38, 16  ;;  %v1182_v12 = vrot.slane %v11572_v44, 4  ;;  %v960_v25 = vrot.slane %v11558_v39, 2 }
  0x1f   :  { %862 = vrot.lane.b32.xlu1 %v818_v32, %s11415_s8  ;;  %858 = vrot.lane.b32.xlu0 %v812_v36, %s11415_s8  ;;  %v825_v32 = vrot.slane %v11640_v17, 1  ;;  %v826_v36 = vrot.slane %v11643_v18, 2  ;;  %v11735_v57 = vor.u32 %v1200_v62, %v1199_v61  ;;  %v1208_v31 = vrot.slane %v11558_v39, 3 }
  0x20   :  { %v362_v39 = vshrl.u32 %v11614_v60, 16  ;;  %v1217_v61 = vrot.slane %v11578_v46, 3  ;;  %v828_v62 = vrot.slane %v11664_v37, 1  ;;  %v829_v60 = vrot.slane %v11658_v29, 2 }
  0x21   :  { %v827_v19 = vor.u32 %v826_v36, %v825_v32  ;;  %v1209_v32 = vrot.slane %v11561_v40, 4  ;;  %vm17813_vm3 = vsmask.f32 4352  ;;  %vm17812_vm4 = vcmask 1043456  }
  0x22   :  { %vm1438_vm5 = vcmask 23552   ;;  %vm1504_vm6 = vcmask 72704   ;;  %vm1471_vm7 = vcmask 48128   ;;  %vm1537_vm8 = vcmask 97280  }
  0x23   :  { %726 = vrot.lane.b32.xlu1 %v659_v49, %s11414_s30  ;;  %864 = vrot.lane.b32.xlu0 %v821_v52, %s11415_s8  ;;  %v11712_v49 = vrot.slane %v10560_v23, 7  ;;  %v954_v52 = vrot.slane %v11587_v50, 3  ;;  %v1181_v50 = vrot.slane %v11569_v43, 3  ;;  %vm17810_vm9 = vcmask 121856  }
  0x24   :  { %vm17809_vm10 = vcmask 146432   ;;  %vm17808_vm11 = vcmask 171008   ;;  %vm17806_vm12 = vcmask 195584   ;;  %vm17805_vm13 = vcmask 1041408  }
  0x25   :  { %v11733_v6 = vsel %vm17807_vm0, %v256_v45, %v11712_v49  ;;  %v955_v23 = vor.u32 %v954_v52, %v953_v41  ;;  %v11763_v45 = vor.u32 %v1209_v32, %v1208_v31  ;;  %v830_v32 = vor.u32 %v829_v60, %v828_v62 }
  0x26   :  { %v11761_v41 = vshrl.u32 %v11733_v6, 16  ;;  %v1226_v60 = vrot.slane %v11640_v17, 3  ;;  %vm1902_vm14 = vcmask 220160   ;;  %vm17853_vm15 = vcmask 441344  }
  0x27   :  { %788 = vrot.lane.b32.xlu1 %v767_v58, %s11413_s23  ;;  %780 = vrot.lane.b32.xlu0 %v763_v59, %s11413_s23  ;;  %v346_v58 = vshrl.u32 %v11511_v14, 16  ;;  %v939_v59 = vrot.slane %v11569_v43, 2  ;;  %v942_v14 = vshll.u32 %v11717_v53, 16  ;;  %v958_v43 = vrot.slane %v956_v2, 3 }
  0x29   :  { %v941_v24 = vor.u32 %v940_v16, %v939_v59  ;;  %v944_v44 = vrot.slane %v942_v14, 3  ;;  %v959_v52 = vsel %vm17811_vm1, %v955_v23, %v958_v43  ;;  %v322_v16 = vshrl.u32 %v11525_v20, 16 }
  0x2a   :  { %v354_v43 = vshrl.u32 %v11592_v51, 16 }
  0x2b   :  { %906 = vrot.lane.b32.xlu1 %v890_v8, %s11416_s13  ;;  %866 = vrot.lane.b32.xlu0 %v824_v9, %s11415_s8  ;;  %v11740_v8 = vsel %vm17807_vm0, %v11536_v28, %v344_v55  ;;  %v347_v9 = vpack.i.b16 %v346_v58, %v346_v58  ;;  %v961_v28 = vrot.slane %v11561_v40, 3  ;;  %v945_v40 = vsel %vm17811_vm1, %v941_v24, %v944_v44 }
  0x2c   :  { %v963_v11 = vshll.u32 %v11740_v8, 16 }
  0x2d   :  { %v352_v36 = vrot.slane %v347_v9, %v11681_v0  ;;  %v962_v58 = vor.u32 %v961_v28, %v960_v25  ;;  %v981_v9 = vrot.slane %v11664_v37, 2  ;;  %v323_v25 = vpack.i.b16 %v322_v16, %v322_v16 }
  0x2e   :  { %v965_v59 = vrot.slane %v963_v11, 3  ;;  %v1107_v16 = vrot.slane %v11708_v38, 3 }
  0x2f   :  { %912 = vrot.lane.b32.xlu1 %v893_v26, %s11416_s13  ;;  %910 = vrot.lane.b32.xlu0 %v892_v27, %s11416_s13  ;;  %v11749_v26 = vshll.u32 %v11733_v6, 16  ;;  %v11752_v27 = vor.u32 %v1182_v12, %v1181_v50  ;;  %v967_v50 = vrot.slane %v11578_v46, 2  ;;  %v982_v12 = vrot.slane %v11658_v29, 3 }
  0x30   :  { %v966_v24 = vsel %vm17811_vm1, %v962_v58, %v965_v59  ;;  %v1191_v58 = vrot.slane %v11604_v56, 4  ;;  %v1106_v59 = vrot.slane %v11545_v33, 3 }
  0x31   :  { %v664_v55 = vrot.slane %v11749_v26, 1  ;;  %v983_v44 = vor.u32 %v982_v12, %v981_v9  ;;  %v1109_v12 = vrot.slane %v11553_v35, 3 }
  0x33   :  { %860 = vrot.lane.b32.xlu1 %v815_v1, %s11415_s8  ;;  %790 = vrot.lane.b32.xlu0 %v768_v21, %s11413_s23  ;;  %v11778_v1 = vsel %vm17807_vm0, %v11539_v30, %v352_v36  ;;  %v363_v21 = vpack.i.b16 %v362_v39, %v362_v39  ;;  %v665_v20 = vor.u32 %v664_v55, %v11761_v41  ;;  %v968_v30 = vrot.slane %v11581_v47, 3 }
  0x34   :  { %v970_v46 = vshll.u32 %v11778_v1, 16  ;;  %v328_v55 = vrot.slane %v323_v25, %v11681_v0  ;;  %v895_v39 = vrot.slane %v11634_v10, 2  ;;  %v1236_v25 = vrot.slane %v11658_v29, 4 }
  0x35   :  { %v969_v36 = vor.u32 %v968_v30, %v967_v50  ;;  %v1227_v50 = vrot.slane %v11643_v18, 4  ;;  %v1235_v30 = vrot.slane %v11664_v37, 3 }
  0x36   :  { %v972_v51 = vrot.slane %v970_v46, 3 }
  0x37   :  { %914 = vrot.lane.b32.xlu1 %v894_v5, %s11416_s13  ;;  %868 = vrot.lane.b32.xlu0 %v827_v19, %s11415_s8  ;;  %v1218_v5 = vrot.slane %v11581_v47, 4  ;;  %v368_v19 = vrot.slane %v363_v21, %v11681_v0  ;;  %v891_v47 = vrot.slane %v11598_v54, 2  ;;  %v1100_v21 = vrot.slane %v11549_v34, 3 }
  0x38   :  { %v973_v9 = vsel %vm17811_vm1, %v969_v36, %v972_v51 }
  0x39   :  { %v11790_v23 = vor.u32 %v1218_v5, %v1217_v61  ;;  %v11797_v28 = vsel %vm17807_vm0, %v11637_v13, %v368_v19  ;;  %v1101_v5 = vrot.slane %v11717_v53, 3 }
  0x3a   :  { %v984_v31 = vshll.u32 %v11797_v28, 16 }
  0x3b   :  { %1055 = vrot.lane.b32.xlu1 %v959_v52, %s11417_s14  ;;  %1051 = vrot.lane.b32.xlu0 %v945_v40, %s11417_s14  ;;  %v1190_v52 = vrot.slane %v11621_v63, 3  ;;  %v355_v40 = vpack.i.b16 %v354_v43, %v354_v43  ;;  %v1238_v43 = vshrl.u32 %v11797_v28, 16  ;;  %v1102_v51 = vsel %vm17814_vm2, %v1100_v21, %v1101_v5 }
  0x3c   :  { %v986_v13 = vrot.slane %v984_v31, 3  ;;  %v1241_v36 = vrot.slane %v984_v31, 4  ;;  %v1244_v21 = vrot.slane %v11761_v41, 3  ;;  %v1245_v5 = vrot.slane %v11749_v26, 4 }
  0x3d   :  { %v11814_v62 = vor.u32 %v1191_v58, %v1190_v52  ;;  %v360_v19 = vrot.slane %v355_v40, %v11681_v0  ;;  %v1240_v37 = vrot.slane %v1238_v43, 3  ;;  %v1108_v52 = vsel %vm17814_vm2, %v1106_v59, %v1107_v16 }
  0x3e   :  { %v11812_v61 = vsel %vm17811_vm1, %v983_v44, %v986_v13  ;;  %v1110_v44 = vrot.slane %v11740_v8, 3  ;;  %v974_v58 = vrot.slane %v11640_v17, 2  ;;  %v1202_v40 = vshrl.u32 %v11708_v38, 16 }
  0x3f   :  { %728 = vrot.lane.b32.xlu1 %v665_v20, %s11414_s30  ;;  %1057 = vrot.lane.b32.xlu0 %v966_v24, %s11417_s14  ;;  %v11826_v20 = vsel %vm17807_vm0, %v11583_v48, %v328_v55  ;;  %v11830_v24 = vor.u32 %v1227_v50, %v1226_v60  ;;  %v1237_v48 = vor.u32 %v1236_v25, %v1235_v30  ;;  %v769_v55 = vrot.slane %v11733_v6, 1 }
  0x40   :  { %v949_v29 = vshll.u32 %v11826_v20, 16  ;;  %v1111_v31 = vsel %vm17814_vm2, %v1109_v12, %v1110_v44  ;;  %v1184_v59 = vshrl.u32 %v11717_v53, 16  ;;  %v896_v60 = vrot.slane %v11648_v22, 2 }
  0x41   :  { %v1113_v50 = vrot.slane %v11778_v1, 3  ;;  %v1204_v30 = vrot.slane %v1202_v40, 3  ;;  %v1187_v25 = vrot.slane %v942_v14, 4  ;;  %v1214_v14 = vrot.slane %v963_v11, 4 }
  0x42   :  { %v951_v16 = vrot.slane %v949_v29, 3 }
  0x43   :  { %908 = vrot.lane.b32.xlu1 %v891_v47, %s11416_s13  ;;  %870 = vrot.lane.b32.xlu0 %v830_v32, %s11415_s8  ;;  %v946_v47 = vrot.slane %v11621_v63, 2  ;;  %v947_v32 = vrot.slane %v11604_v56, 3  ;;  %v11845_v63 = vsel %vm17807_vm0, %v11625_v3, %v360_v19  ;;  %v1242_v56 = vor.u32 %v1241_v36, %v1240_v37 }
  0x44   :  { %v977_v17 = vshll.u32 %v11845_v63, 16  ;;  %v1205_v19 = vrot.slane %v956_v2, 4 }
  0x45   :  { %v948_v13 = vor.u32 %v947_v32, %v946_v47  ;;  %v11855_v3 = vsel %vm17813_vm3, %v1237_v48, %v1242_v56  ;;  %v1186_v47 = vrot.slane %v1184_v59, 3  ;;  %v1211_v32 = vshrl.u32 %v11740_v8, 16 }
  0x46   :  { %v979_v44 = vrot.slane %v977_v17, 3  ;;  %v1206_v48 = vor.u32 %v1205_v19, %v1204_v30  ;;  %v1104_v59 = vrot.slane %v11826_v20, 3  ;;  %v1365_v30 = vrot.slane %v11708_v38, 4 }
  0x47   :  { %1059 = vrot.lane.b32.xlu1 %v973_v9, %s11417_s14  ;;  %916 = vrot.lane.b32.xlu0 %v895_v39, %s11416_s13  ;;  %v975_v39 = vrot.slane %v11643_v18, 3  ;;  %v1112_v18 = vrot.slane %v11566_v42, 3  ;;  %v11865_v9 = vor.u32 %v1245_v5, %v1244_v21  ;;  %v952_v43 = vsel %vm17811_vm1, %v948_v13, %v951_v16 }
  0x48   :  { %v1188_v37 = vor.u32 %v1187_v25, %v1186_v47  ;;  %v1207_v56 = vsel %vm17813_vm3, %v11735_v57, %v1206_v48  ;;  %v1115_v16 = vrot.slane %v11634_v10, 3  ;;  %v1116_v21 = vrot.slane %v11845_v63, 3 }
  0x49   :  { %v976_v12 = vor.u32 %v975_v39, %v974_v58  ;;  %v1114_v36 = vsel %vm17814_vm2, %v1112_v18, %v1113_v50  ;;  %v1220_v58 = vshrl.u32 %v11778_v1, 16  ;;  %v1103_v39 = vrot.slane %v11598_v54, 3 }
  0x4a   :  { %v370_v18 = vshrl.u32 %v11689_v7, 16  ;;  %v1193_v50 = vshrl.u32 %v11826_v20, 16  ;;  %v1358_v19 = vrot.slane %v11549_v34, 4  ;;  %v1359_v7 = vrot.slane %v11717_v53, 4 }
  0x4b   :  { %1152 = vrot.lane.b32.xlu1 %v1108_v52, %s11418_s15  ;;  %1148 = vrot.lane.b32.xlu0 %v1102_v51, %s11418_s15  ;;  %v980_v2 = vsel %vm17811_vm1, %v976_v12, %v979_v44  ;;  %v1213_v52 = vrot.slane %v1211_v32, 3  ;;  %v831_v51 = vrot.slane %v11761_v41, 1  ;;  %v1222_v57 = vrot.slane %v1220_v58, 3 }
  0x4c   :  { %v1105_v5 = vsel %vm17814_vm2, %v1103_v39, %v1104_v59  ;;  %v371_v25 = vpack.i.b16 %v370_v18, %v370_v18  ;;  %v1229_v44 = vshrl.u32 %v11845_v63, 16  ;;  %v1360_v38 = vsel %vm17812_vm4, %v1358_v19, %v1359_v7 }
  0x4d   :  { %v1215_v13 = vor.u32 %v1214_v14, %v1213_v52  ;;  %v1367_v47 = vrot.slane %v11553_v35, 4  ;;  %v1368_v53 = vrot.slane %v11740_v8, 4  ;;  %v1118_v48 = vrot.slane %v11648_v22, 3 }
  0x4e   :  { %v376_v32 = vrot.slane %v371_v25, %v11681_v0  ;;  %v1232_v52 = vrot.slane %v977_v17, 4  ;;  %v988_v58 = vrot.slane %v11761_v41, 2  ;;  %v1121_v19 = vrot.slane %v11733_v6, 3 }
  0x4f   :  { %792 = vrot.lane.b32.xlu1 %v769_v55, %s11413_s23  ;;  %1154 = vrot.lane.b32.xlu0 %v1111_v31, %s11418_s15  ;;  %v832_v55 = vrot.slane %v11749_v26, 2  ;;  %v1189_v31 = vsel %vm17813_vm3, %v11752_v27, %v1188_v37  ;;  %v1216_v40 = vsel %vm17813_vm3, %v11763_v45, %v1215_v13  ;;  %v1223_v27 = vrot.slane %v970_v46, 4 }
  0x50   :  { %v1117_v45 = vsel %vm17814_vm2, %v1115_v16, %v1116_v21  ;;  %v1364_v46 = vrot.slane %v11545_v33, 4  ;;  %v1231_v37 = vrot.slane %v1229_v44, 3  ;;  %v1369_v8 = vsel %vm17812_vm4, %v1367_v47, %v1368_v53 }
  0x51   :  { %v833_v11 = vor.u32 %v832_v55, %v831_v51  ;;  %v11937_v14 = vsel %vm17807_vm0, %v11712_v49, %v376_v32  ;;  %v185_v51 = vld [vmem:[%s17797_s0 + $0x40] sm:$0xf]  ;;  %v186_v55 = vld [vmem:[%s17797_s0 + $0x44] sm:$0xf]  ;;  %v1374_v21 = vrot.slane %v11845_v63, 4 }
  0x52   :  { %v1233_v13 = vor.u32 %v1232_v52, %v1231_v37  ;;  %v991_v39 = vshll.u32 %v11937_v14, 16  ;;  %v10561_v59 = vcombine.low %v185_v51, %v186_v55  ;;  %v1122_v7 = vrot.slane %v11937_v14, 3 }
  0x53   :  { %1053 = vrot.lane.b32.xlu1 %v952_v43, %s11417_s14  ;;  %918 = vrot.lane.b32.xlu0 %v896_v60, %s11416_s13  ;;  %v1224_v60 = vor.u32 %v1223_v27, %v1222_v57  ;;  %v1196_v43 = vrot.slane %v949_v29, 4  ;;  %v1379_v37 = vrot.slane %v11733_v6, 4  ;;  %v1380_v52 = vrot.slane %v11937_v14, 4 }
  0x54   :  { %v993_v27 = vrot.slane %v991_v39, 3  ;;  %v529_v41 = vrot.slane %v10561_v59, 7  ;;  %v1123_v47 = vsel %vm17814_vm2, %v1121_v19, %v1122_v7 }
  0x55   :  { %v1225_v12 = vsel %vm17813_vm3, %v11790_v23, %v1224_v60  ;;  %v1366_v23 = vsel %vm17812_vm4, %v1364_v46, %v1365_v30  ;;  %v1362_v60 = vrot.slane %v11826_v20, 4  ;;  %v378_v46 = vshrl.u32 %v186_v55, 16 }
  0x56   :  { %v1377_v20 = vrot.slane %v11797_v28, 4 }
  0x57   :  { %1156 = vrot.lane.b32.xlu1 %v1114_v36, %s11418_s15  ;;  %1061 = vrot.lane.b32.xlu0 %v980_v2, %s11417_s14  ;;  %v897_v36 = vrot.slane %v11733_v6, 2  ;;  %v1119_v2 = vrot.slane %v11797_v28, 3  ;;  %v379_v44 = vpack.i.b16 %v378_v46, %v378_v46 }
  0x59   :  { %v1120_v17 = vsel %vm17814_vm2, %v1118_v48, %v1119_v2  ;;  %v384_v48 = vrot.slane %v379_v44, %v11681_v0  ;;  %v188_v2 = vld [vmem:[%s17797_s0 + $0x4c] sm:$0xf] }
  0x5b   :  { %1329 = vrot.lane.b32.xlu1 %v1207_v56, %s11419_s16  ;;  %1325 = vrot.lane.b32.xlu0 %v1189_v31, %s11419_s16  ;;  %v1370_v56 = vrot.slane %v11566_v42, 4  ;;  %v1371_v31 = vrot.slane %v11778_v1, 4 }
  0x5d   :  { %v1372_v1 = vsel %vm17812_vm4, %v1370_v56, %v1371_v31 }
  0x5f   :  { %872 = vrot.lane.b32.xlu1 %v833_v11, %s11415_s8  ;;  %1331 = vrot.lane.b32.xlu0 %v1216_v40, %s11419_s16  ;;  %v989_v11 = vrot.slane %v11749_v26, 3  ;;  %v258_v40 = vpack.i.b16 %v185_v51, %v185_v51  ;;  %v1373_v26 = vrot.slane %v11634_v10, 4 }
  0x61   :  { %v990_v57 = vor.u32 %v989_v11, %v988_v58  ;;  %v263_v16 = vrot.slane %v258_v40, %v11514_v15 }
  0x63   :  { %1150 = vrot.lane.b32.xlu1 %v1105_v5, %s11418_s15  ;;  %1063 = vrot.lane.b32.xlu0 %v11812_v61, %s11417_s14  ;;  %v1195_v61 = vrot.slane %v1193_v50, 3  ;;  %v1361_v5 = vrot.slane %v11598_v54, 4  ;;  %v994_v18 = vsel %vm17811_vm1, %v990_v57, %v993_v27  ;;  %v1375_v50 = vsel %vm17812_vm4, %v1373_v26, %v1374_v21 }
  0x65   :  { %v1197_v29 = vor.u32 %v1196_v43, %v1195_v61  ;;  %v1363_v63 = vsel %vm17812_vm4, %v1361_v5, %v1362_v60  ;;  %v1250_v61 = vrot.slane %v991_v39, 4 }
  0x67   :  { %1333 = vrot.lane.b32.xlu1 %v1225_v12, %s11419_s16  ;;  %1158 = vrot.lane.b32.xlu0 %v1117_v45, %s11418_s15  ;;  %v1198_v49 = vsel %vm17813_vm3, %v11814_v62, %v1197_v29  ;;  %v1234_v62 = vsel %vm17813_vm3, %v11830_v24, %v1233_v13  ;;  %v1247_v24 = vshrl.u32 %v11937_v14, 16  ;;  %v11970_v45 = vsel %vm17807_vm0, %v263_v16, %v529_v41  ;;  %v187_v29 = vld [vmem:[%s17797_s0 + $0x48] sm:$0xf] }
  0x68   :  { %v1376_v12 = vrot.slane %v11648_v22, 4  ;;  %v11980_v30 = vshll.u32 %v11970_v45, 16  ;;  %v666_v28 = vshrl.u32 %v11970_v45, 16  ;;  %v265_v55 = vpack.i.b16 %v187_v29, %v187_v29 }
  0x69   :  { %v1249_v25 = vrot.slane %v1247_v24, 3  ;;  %v10562_v56 = vcombine.low %v187_v29, %v188_v2  ;;  %v1381_v13 = vsel %vm17812_vm4, %v1379_v37, %v1380_v52  ;;  %v770_v14 = vrot.slane %v11970_v45, 1 }
  0x6a   :  { %v834_v58 = vrot.slane %v666_v28, 1  ;;  %v835_v11 = vrot.slane %v11980_v30, 2  ;;  %v996_v39 = vrot.slane %v11980_v30, 3  ;;  %v386_v16 = vshrl.u32 %v188_v2, 16 }
  0x6b   :  { %1410 = vrot.lane.b32.xlu1 %v1366_v23, %s11420_s17  ;;  %1406 = vrot.lane.b32.xlu0 %v1360_v38, %s11420_s17  ;;  %v670_v23 = vrot.slane %v11980_v30, 1  ;;  %v1378_v38 = vsel %vm17812_vm4, %v1376_v12, %v1377_v20  ;;  %v1251_v53 = vor.u32 %v1250_v61, %v1249_v25  ;;  %v1124_v26 = vrot.slane %v11970_v45, 3 }
  0x6c   :  { %v1253_v21 = vrot.slane %v666_v28, 3  ;;  %v836_v5 = vor.u32 %v835_v11, %v834_v58  ;;  %v1254_v24 = vrot.slane %v11980_v30, 4  ;;  %v387_v7 = vpack.i.b16 %v386_v16, %v386_v16 }
  0x6d   :  { %v1252_v51 = vsel %vm17813_vm3, %v11865_v9, %v1251_v53  ;;  %v995_v9 = vrot.slane %v666_v28, 2  ;;  %v1382_v61 = vrot.slane %v11970_v45, 4 }
  0x6e   :  { %v1255_v25 = vor.u32 %v1254_v24, %v1253_v21 }
  0x6f   :  { %920 = vrot.lane.b32.xlu1 %v897_v36, %s11416_s13  ;;  %1412 = vrot.lane.b32.xlu0 %v1369_v8, %s11420_s17  ;;  %v671_v8 = vor.u32 %v670_v23, %v666_v28  ;;  %v997_v60 = vor.u32 %v996_v39, %v995_v9 }
  0x73   :  { %1327 = vrot.lane.b32.xlu1 %v1198_v49, %s11419_s16  ;;  %1160 = vrot.lane.b32.xlu0 %v1120_v17, %s11418_s15  ;;  %v603_v17 = vsel %vm17807_vm0, %v529_v41, %v384_v48  ;;  %v898_v41 = vrot.slane %v11970_v45, 2  ;;  %v392_v48 = vrot.slane %v387_v7, %v11681_v0 }
  0x74   :  { %v998_v40 = vshll.u32 %v603_v17, 16  ;;  %v1256_v59 = vshrl.u32 %v603_v17, 16 }
  0x76   :  { %v1000_v46 = vrot.slane %v998_v40, 3 }
  0x77   :  { %1414 = vrot.lane.b32.xlu1 %v1372_v1, %s11420_s17  ;;  %1335 = vrot.lane.b32.xlu0 %v1234_v62, %s11419_s16  ;;  %v270_v1 = vrot.slane %v265_v55, %v11514_v15  ;;  %v530_v62 = vrot.slane %v10562_v56, 7 }
  0x78   :  { %v1001_v44 = vsel %vm17811_vm1, %v997_v60, %v1000_v46 }
  0x79   :  { %v12033_v12 = vsel %vm17807_vm0, %v270_v1, %v530_v62  ;;  %v605_v55 = vsel %vm17807_vm0, %v530_v62, %v392_v48 }
  0x7a   :  { %v674_v30 = vshll.u32 %v12033_v12, 16  ;;  %v672_v29 = vshrl.u32 %v12033_v12, 16  ;;  %v771_v56 = vrot.slane %v12033_v12, 1  ;;  %v1005_v9 = vshll.u32 %v605_v55, 16 }
  0x7b   :  { %1337 = vrot.lane.b32.xlu1 %v11855_v3, %s11419_s16  ;;  %1065 = vrot.lane.b32.xlu0 %v994_v18, %s11417_s14  ;;  %v1125_v18 = vrot.slane %v603_v17, 3  ;;  %v1265_v39 = vshrl.u32 %v605_v55, 16  ;;  %v899_v1 = vrot.slane %v12033_v12, 2  ;;  %v1127_v62 = vrot.slane %v12033_v12, 3 }
  0x7c   :  { %v676_v2 = vrot.slane %v674_v30, 1  ;;  %v1002_v58 = vrot.slane %v672_v29, 2  ;;  %v1003_v11 = vrot.slane %v674_v30, 3  ;;  %v1262_v21 = vrot.slane %v672_v29, 3 }
  0x7d   :  { %v11984_v43 = vpop.permute.xlu1 %782  ;;  %v11986_v3 = vpop.permute.xlu0 %778  ;;  %v1126_v28 = vsel %vm17814_vm2, %v1124_v26, %v1125_v18  ;;  %v1128_v26 = vrot.slane %v605_v55, 3  ;;  %v1263_v60 = vrot.slane %v674_v30, 4  ;;  %v1267_v18 = vrot.slane %v1265_v39, 3 }
  0x7e   :  { %v1268_v24 = vrot.slane %v1005_v9, 4  ;;  %v1385_v7 = vrot.slane %v12033_v12, 4 }
  0x7f   :  { %1416 = vrot.lane.b32.xlu1 %v1375_v50, %s11420_s17  ;;  %1408 = vrot.lane.b32.xlu0 %v1363_v63, %s11420_s17  ;;  %v1258_v50 = vrot.slane %v1256_v59, 3  ;;  %v1259_v63 = vrot.slane %v998_v40, 4 }
  0x81   :  { %v11994_v32 = vpop.permute.xlu1 %720  ;;  %v11996_v36 = vpop.permute.xlu0 %784  ;;  %v1260_v23 = vor.u32 %v1259_v63, %v1258_v50  ;;  %v1129_v63 = vsel %vm17814_vm2, %v1127_v62, %v1128_v26 }
  0x83   :  { %1418 = vrot.lane.b32.xlu1 %v1378_v38, %s11420_s17  ;;  %1162 = vrot.lane.b32.xlu0 %v1123_v47, %s11418_s15  ;;  %v1383_v38 = vrot.slane %v603_v17, 4  ;;  %v1261_v37 = vsel %vm17813_vm3, %v1255_v25, %v1260_v23  ;;  %v837_v17 = vrot.slane %v672_v29, 1 }
  0x85   :  { %v12011_v31 = vpop.permute.xlu1 %722  ;;  %v12013_v49 = vpop.permute.xlu0 %714  ;;  %v1384_v52 = vsel %vm17812_vm4, %v1382_v61, %v1383_v38  ;;  %v1264_v61 = vor.u32 %v1263_v60, %v1262_v21 }
  0x87   :  { %1339 = vrot.lane.b32.xlu1 %v1252_v51, %s11419_s16  ;;  %730 = vrot.lane.b32.xlu0 %v671_v8, %s11414_s30 }
  0x89   :  { %v12023_v57 = vpop.permute.xlu1 %716  ;;  %v12025_v27 = vpop.permute.xlu0 %718 }
  0x8b   :  { %1420 = vrot.lane.b32.xlu1 %v1381_v13, %s11420_s17  ;;  %794 = vrot.lane.b32.xlu0 %v770_v14, %s11413_s23  ;;  %v677_v13 = vor.u32 %v676_v2, %v672_v29  ;;  %v838_v14 = vrot.slane %v674_v30, 2 }
  0x8d   :  { %v12035_v20 = vpop.permute.xlu1 %786  ;;  %v12037_v19 = vpop.permute.xlu0 %724  ;;  %v839_v16 = vor.u32 %v838_v14, %v837_v17 }
  0x8f   :  { %874 = vrot.lane.b32.xlu0 %v836_v5, %s11415_s8  ;;  %922 = vrot.lane.b32.xlu1 %v898_v41, %s11416_s13  ;;  %v1004_v41 = vor.u32 %v1003_v11, %v1002_v58  ;;  %v1007_v5 = vrot.slane %v1005_v9, 3 }
  0x91   :  { %v12045_v47 = vpop.permute.xlu1 %862  ;;  %v12047_v53 = vpop.permute.xlu0 %858  ;;  %v1008_v25 = vsel %vm17811_vm1, %v1004_v41, %v1007_v5 }
  0x93   :  { %1067 = vrot.lane.b32.xlu0 %v1001_v44, %s11417_s14  ;;  %1164 = vrot.lane.b32.xlu1 %v1126_v28, %s11418_s15  ;;  %v1269_v44 = vor.u32 %v1268_v24, %v1267_v18  ;;  %v1386_v28 = vrot.slane %v605_v55, 4 }
  0x95   :  { %v12055_v8 = vpop.permute.xlu1 %726  ;;  %v12057_v51 = vpop.permute.xlu0 %864  ;;  %v1270_v38 = vsel %vm17813_vm3, %v1264_v61, %v1269_v44  ;;  %v1387_v48 = vsel %vm17812_vm4, %v1385_v7, %v1386_v28  ;;  %v1440_v7 = vsel %vm1438_vm5, %v11549_v34, %v12013_v49  ;;  %v1446_v34 = vsel %vm1438_vm5, %v11553_v35, %v11994_v32 }
  0x96   :  { %v1479_v35 = vsel %vm1471_vm7, %v1446_v34, %v11996_v36 }
  0x97   :  { %1341 = vrot.lane.b32.xlu0 %v1261_v37, %s11419_s16  ;;  %1422 = vrot.lane.b32.xlu1 %v1384_v52, %s11420_s17 }
  0x99   :  { %v12063_v40 = vpop.permute.xlu1 %788  ;;  %v12065_v59 = vpop.permute.xlu0 %780 }
  0x9b   :  { %732 = vrot.lane.b32.xlu0 %v677_v13, %s11414_s30  ;;  %796 = vrot.lane.b32.xlu1 %v771_v56, %s11413_s23 }
  0x9d   :  { %v907_v46 = vpop.permute.xlu1 %906  ;;  %v12071_v50 = vpop.permute.xlu0 %866 }
  0x9f   :  { %876 = vrot.lane.b32.xlu0 %v839_v16, %s11415_s8  ;;  %924 = vrot.lane.b32.xlu1 %v899_v1, %s11416_s13 }
  0xa1   :  { %v12078_v23 = vpop.permute.xlu1 %912  ;;  %v911_v30 = vpop.permute.xlu0 %910 }
  0xa3   :  { %1069 = vrot.lane.b32.xlu0 %v1008_v25, %s11417_s14  ;;  %1166 = vrot.lane.b32.xlu1 %v1129_v63, %s11418_s15  ;;  %v1444_v25 = vsel %vm1438_vm5, %v11545_v33, %v12025_v27 }
  0xa4   :  { %v1477_v28 = vsel %vm1471_vm7, %v1444_v25, %v11984_v43 }
  0xa5   :  { %v12084_v29 = vpop.permute.xlu1 %860  ;;  %v12086_v2 = vpop.permute.xlu0 %790  ;;  %v1510_v33 = vsel %vm1504_vm6, %v1477_v28, %v12045_v47 }
  0xa6   :  { %v1543_v25 = vsel %vm1537_vm8, %v1510_v33, %v911_v30 }
  0xa7   :  { %1343 = vrot.lane.b32.xlu0 %v1270_v38, %s11419_s16  ;;  %1424 = vrot.lane.b32.xlu1 %v1387_v48, %s11420_s17  ;;  %v1473_v38 = vsel %vm1471_vm7, %v1440_v7, %v11986_v3 }
  0xa8   :  { %v1506_v49 = vsel %vm1504_vm6, %v1473_v38, %v12047_v53  ;;  %v1512_v53 = vsel %vm1504_vm6, %v1479_v35, %v12057_v51  ;;  %v11254_v51 = vld [vmem:[%s17798_s1 + $0x78] ss:$0 sps:$4 sm:$0x33]  }
  0xa9   :  { %v12090_v37 = vpop.permute.xlu1 %914  ;;  %v12092_v52 = vpop.permute.xlu0 %868  ;;  %v1539_v43 = vsel %vm1537_vm8, %v1506_v49, %v907_v46 }
  0xad   :  { %v1056_v55 = vpop.permute.xlu1 %1055  ;;  %v1052_v56 = vpop.permute.xlu0 %1051 }
  0xae   :  { %v1576_v3 = vsel %vm17810_vm9, %v1543_v25, %v1056_v55  ;;  %v1572_v7 = vsel %vm17810_vm9, %v1539_v43, %v1052_v56  ;;  %v1545_v55 = vsel %vm1537_vm8, %v1512_v53, %v12078_v23  ;;  %v11256_v25 = vld [vmem:[%s17798_s1 + $0x38] sm:$0xff]  }
  0xb1   :  { %v12094_v17 = vpop.permute.xlu1 %728  ;;  %v1058_v13 = vpop.permute.xlu0 %1057 }
  0xb5   :  { %v12096_v14 = vpop.permute.xlu1 %908  ;;  %v12098_v58 = vpop.permute.xlu0 %870 }
  0xb9   :  { %v12100_v11 = vpop.permute.xlu1 %1059  ;;  %v12102_v9 = vpop.permute.xlu0 %916 }
  0xbd   :  { %v1153_v39 = vpop.permute.xlu1 %1152  ;;  %v1149_v1 = vpop.permute.xlu0 %1148 }
  0xbe   :  { %v1609_v32 = vsel %vm17809_vm10, %v1576_v3, %v1153_v39  ;;  %v1605_v47 = vsel %vm17809_vm10, %v1572_v7, %v1149_v1  ;;  %v1578_v39 = vsel %vm17810_vm9, %v1545_v55, %v1058_v13  ;;  %v11423_v1 = vmov 65535  }
  0xc1   :  { %v12104_v62 = vpop.permute.xlu1 %792  ;;  %v1155_v16 = vpop.permute.xlu0 %1154 }
  0xc2   :  { %v1611_v23 = vsel %vm17809_vm10, %v1578_v39, %v1155_v16  ;;  %v1448_v16 = vsel %vm1438_vm5, %v11566_v42, %v12011_v31  ;;  %v11257_v42 = vld [vmem:[%s17798_s1 + $0x70] sm:$0xff]  }
  0xc5   :  { %v12106_v41 = vpop.permute.xlu1 %1053  ;;  %v12108_v26 = vpop.permute.xlu0 %918 }
  0xc9   :  { %v12110_v21 = vpop.permute.xlu1 %1156  ;;  %v12112_v5 = vpop.permute.xlu0 %1061 }
  0xcd   :  { %v1330_v60 = vpop.permute.xlu1 %1329  ;;  %v1326_v18 = vpop.permute.xlu0 %1325 }
  0xce   :  { %v1642_v46 = vsel %vm17808_vm11, %v1609_v32, %v1330_v60  ;;  %v1638_v30 = vsel %vm17808_vm11, %v1605_v47, %v1326_v18  ;;  %v2630_v60 = vsel %vm17807_vm0, 4294967295, %v11423_v1 }
  0xcf   :  { %v2631_v33 = vsel %vm17805_vm13, %v2630_v60, 0  ;;  %vm2000_vm13 = vcmask 56320  }
  0xd0   :  { %v12176_v43 = vand.u32 %v11254_v51, %v2631_v33  ;;  %v11266_v33 = vld [vmem:[%s17798_s1 + $0x50] sm:$0xff]  }
  0xd1   :  { %v12114_v24 = vpop.permute.xlu1 %872  ;;  %v1332_v63 = vpop.permute.xlu0 %1331 }
  0xd2   :  { %v1644_v13 = vsel %vm17808_vm11, %v1611_v23, %v1332_v63  ;;  %17935 = vst [vmem:[#allocation4_spill] sm:$0xff] %v12176_v43  ;;  %v1481_v63 = vsel %vm1471_vm7, %v1448_v16, %v12035_v20  ;;  %10942 = vmatprep.subr.bf16.mxu0 %v12176_v43  ;;  %v11258_v20 = vld [vmem:[%s17798_s1 + $0x30] sm:$0xff]   ;;  %v1452_v16 = vsel %vm1438_vm5, %v11648_v22, %v12055_v8 }
  0xd3   :  { %v1514_v3 = vsel %vm1504_vm6, %v1481_v63, %v12071_v50  ;;  %10943 = vmatpush3.bf16.msra.mxu0 %v11256_v25  ;;  %v11267_v25 = vld [vmem:[%s17798_s1 + $0x10] sm:$0xff]   ;;  %v1454_v63 = vsel %vm1438_vm5, %v11733_v6, %v12094_v17 }
  0xd4   :  { %v1547_v31 = vsel %vm1537_vm8, %v1514_v3, %v12090_v37  ;;  %10944 = vmatprep.subr.bf16.mxu0 %v11257_v42  ;;  %v11259_v37 = vld [vmem:[%s17798_s1 + $0x68] sm:$0xff]   ;;  %v1485_v3 = vsel %vm1471_vm7, %v1452_v16, %v12086_v2 }
  0xd5   :  { %v12122_v61 = vpop.permute.xlu1 %1150  ;;  %v12124_v44 = vpop.permute.xlu0 %1063  ;;  %v1580_v32 = vsel %vm17810_vm9, %v1547_v31, %v12100_v11  ;;  %v11261_v11 = vld [vmem:[%s17798_s1 + $0x28] sm:$0xff]   ;;  %v1518_v22 = vsel %vm1504_vm6, %v1485_v3, %v12098_v58 }
  0xd6   :  { %v1613_v50 = vsel %vm17809_vm10, %v1580_v32, %v12110_v21  ;;  %v1442_v21 = vsel %vm1438_vm5, %v11598_v54, %v12023_v57  ;;  %v11268_v42 = vld [vmem:[%s17798_s1 + $0x48] sm:$0xff]   ;;  %v1551_v2 = vsel %vm1537_vm8, %v1518_v22, %v12108_v26 }
  0xd7   :  { %10945 = vmatpush3.bf16.msra.mxu0 %v11258_v20  ;;  %v11269_v58 = vld [vmem:[%s17798_s1 + $0x8] sm:$0xff]  }
  0xd8   :  { %10946 = vmatprep.subr.bf16.mxu0 %v11259_v37 }
  0xd9   :  { %v1334_v27 = vpop.permute.xlu1 %1333  ;;  %v12137_v48 = vpop.permute.xlu0 %1158 }
  0xda   :  { %v1646_v47 = vsel %vm17808_vm11, %v1613_v50, %v1334_v27  ;;  %v1450_v27 = vsel %vm1438_vm5, %v11634_v10, %v12037_v19  ;;  %v11262_v10 = vld [vmem:[%s17798_s1 + $0x60] sm:$0xff]  }
  0xdb   :  { %10947 = vmatpush3.bf16.msra.mxu0 %v11261_v11 }
  0xdc   :  { %10948 = vmatprep.subr.bf16.mxu0 %v11262_v10 }
  0xdd   :  { %v1411_v28 = vpop.permute.xlu1 %1410  ;;  %v1407_v38 = vpop.permute.xlu0 %1406 }
  0xde   :  { %v12154_v56 = vsel %vm17806_vm12, %v1642_v46, %v1411_v28  ;;  %v12157_v36 = vsel %vm17806_vm12, %v1638_v30, %v1407_v38  ;;  %v1483_v28 = vsel %vm1471_vm7, %v1450_v27, %v12063_v40  ;;  %v1475_v38 = vsel %vm1471_vm7, %v1442_v21, %v12065_v59  ;;  %v11263_v59 = vld [vmem:[%s17798_s1 + $0x20] sm:$0xff]  }
  0xdf   :  { %1786 = vrot.lane.b32.xlu1 %v12154_v56, %s11421_s27  ;;  %1713 = vrot.lane.b32.xlu0 %v12157_v36, %s11422_s28  ;;  %v1508_v55 = vsel %vm1504_vm6, %v1475_v38, %v12084_v29  ;;  %v1516_v54 = vsel %vm1504_vm6, %v1483_v28, %v12092_v52 }
  0xe0   :  { %v1541_v19 = vsel %vm1537_vm8, %v1508_v55, %v12096_v14  ;;  %v1549_v40 = vsel %vm1537_vm8, %v1516_v54, %v12102_v9  ;;  %10949 = vmatpush3.bf16.msra.mxu0 %v11263_v59  ;;  %v190_v59 = vld [vmem:[%s17797_s0 + $0x54] sm:$0xf] }
  0xe1   :  { %v12170_v18 = vpop.permute.xlu1 %920  ;;  %v1413_v34 = vpop.permute.xlu0 %1412  ;;  %v1574_v29 = vsel %vm17810_vm9, %v1541_v19, %v12106_v41  ;;  %v1582_v52 = vsel %vm17810_vm9, %v1549_v40, %v12112_v5  ;;  %v11264_v41 = vld [vmem:[%s17798_s1 + $0x58] sm:$0xff]   ;;  %v189_v40 = vld [vmem:[%s17797_s0 + $0x50] sm:$0xf]  ;;  %v394_v3 = vshrl.u32 %v190_v59, 16 }
  0xe2   :  { %v12174_v49 = vsel %vm17806_vm12, %v1644_v13, %v1413_v34  ;;  %v1607_v14 = vsel %vm17809_vm10, %v1574_v29, %v12122_v61  ;;  %v1615_v9 = vsel %vm17809_vm10, %v1582_v52, %v12137_v48  ;;  %v11265_v61 = vld [vmem:[%s17798_s1 + $0x18] sm:$0xff]   ;;  %10950 = vmatprep.subr.bf16.mxu0 %v11264_v41 }
  0xe3   :  { %1736 = vrot.lane.b32.xlu1 %v12157_v36, %s11424_s12  ;;  %1811 = vrot.lane.b32.xlu0 %v12174_v49, %s11425_s18 }
  0xe4   :  { %10951 = vmatpush3.bf16.msra.mxu0 %v11265_v61  ;;  %v191_v61 = vld [vmem:[%s17797_s0 + $0x58] sm:$0xf] }
  0xe5   :  { %v1328_v7 = vpop.permute.xlu1 %1327  ;;  %v12193_v35 = vpop.permute.xlu0 %1160  ;;  %10952 = vmatprep.subr.bf16.mxu0 %v11266_v33  ;;  %v279_v16 = vpack.i.b16 %v191_v61, %v191_v61 }
  0xe6   :  { %v1640_v51 = vsel %vm17808_vm11, %v1607_v14, %v1328_v7  ;;  %v1487_v7 = vsel %vm1471_vm7, %v1454_v63, %v12104_v62 }
  0xe7   :  { %v1520_v8 = vsel %vm1504_vm6, %v1487_v7, %v12114_v24  ;;  %v1584_v24 = vsel %vm17810_vm9, %v1551_v2, %v12124_v44  ;;  %v395_v2 = vpack.i.b16 %v394_v3, %v394_v3 }
  0xe8   :  { %10953 = vmatpush3.bf16.msra.mxu0 %v11267_v25  ;;  %v1553_v62 = vsel %vm1537_vm8, %v1520_v8, %v12170_v18  ;;  %v1617_v26 = vsel %vm17809_vm10, %v1584_v24, %v12193_v35  ;;  %v11271_v35 = vld [vmem:[%s17798_s1] sm:$0xff]  }
  0xe9   :  { %v1415_v53 = vpop.permute.xlu1 %1414  ;;  %v1336_v46 = vpop.permute.xlu0 %1335  ;;  %10954 = vmatprep.subr.bf16.mxu0 %v11268_v42 }
  0xea   :  { %v12212_v30 = vsel %vm17806_vm12, %v1646_v47, %v1415_v53  ;;  %v1648_v23 = vsel %vm17808_vm11, %v1615_v9, %v1336_v46  ;;  %v11270_v47 = vld [vmem:[%s17798_s1 + $0x40] sm:$0xff]  }
  0xeb   :  { %1836 = vrot.lane.b32.xlu0 %v12212_v30, %s11426_s9 }
  0xec   :  { %10955 = vmatpush3.bf16.msra.mxu0 %v11269_v58 }
  0xed   :  { %v1338_v57 = vpop.permute.xlu1 %1337  ;;  %v1066_v39 = vpop.permute.xlu0 %1065  ;;  %10956 = vmatprep.subr.bf16.mxu0 %v11270_v47 }
  0xee   :  { %v1586_v31 = vsel %vm17810_vm9, %v1553_v62, %v1066_v39  ;;  %v1650_v20 = vsel %vm17808_vm11, %v1617_v26, %v1338_v57 }
  0xef   :  { %1788 = vrot.lane.b32.xlu0 %v12174_v49, %s11421_s27 }
  0xf0   :  { %10957 = vmatpush3.bf16.msra.mxu0 %v11271_v35 }
  0xf1   :  { %v1417_v1 = vpop.permute.xlu1 %1416  ;;  %v1409_v60 = vpop.permute.xlu0 %1408 }
  0xf2   :  { %v12259_v5 = vsel %vm17806_vm12, %v1648_v23, %v1417_v1  ;;  %v12262_v13 = vsel %vm17806_vm12, %v1640_v51, %v1409_v60  ;;  %v272_v23 = vpack.i.b16 %v189_v40, %v189_v40  ;;  %v10563_v1 = vcombine.low %v189_v40, %v190_v59 }
  0xf3   :  { %1860 = vrot.lane.b32.xlu0 %v12259_v5, %s11427_s26  ;;  %1761 = vrot.lane.b32.xlu1 %v12262_v13, %s11428_s29 }
  0xf4   :  { %v531_v33 = vrot.slane %v10563_v1, 7  ;;  %v194_v1 = vld [vmem:[%s17797_s0 + $0x64] sm:$0xf] }
  0xf5   :  { %v1419_v48 = vpop.permute.xlu1 %1418  ;;  %v1163_v34 = vpop.permute.xlu0 %1162 }
  0xf6   :  { %v1619_v18 = vsel %vm17809_vm10, %v1586_v31, %v1163_v34  ;;  %v12321_v53 = vsel %vm17806_vm12, %v1650_v20, %v1419_v48  ;;  %v277_v34 = vrot.slane %v272_v23, %v11514_v15  ;;  %v193_v23 = vld [vmem:[%s17797_s0 + $0x60] sm:$0xf] }
  0xf7   :  { %1838 = vrot.lane.b32.xlu0 %v12259_v5, %s11426_s9  ;;  %1813 = vrot.lane.b32.xlu1 %v12212_v30, %s11425_s18  ;;  %v286_v3 = vpack.i.b16 %v193_v23, %v193_v23 }
  0xf9   :  { %v1340_v6 = vpop.permute.xlu1 %1339  ;;  %v731_v17 = vpop.permute.xlu0 %730 }
  0xfa   :  { %v1652_v32 = vsel %vm17808_vm11, %v1619_v18, %v1340_v6  ;;  %v1456_v37 = vsel %vm1438_vm5, %v11970_v45, %v731_v17  ;;  %v12388_v6 = vsel %vm17807_vm0, %v277_v34, %v531_v33  ;;  %v284_v17 = vrot.slane %v279_v16, %v11514_v15 }
  0xfb   :  { %1763 = vrot.lane.b32.xlu0 %v12154_v56, %s11428_s29  ;;  %1738 = vrot.lane.b32.xlu1 %v12262_v13, %s11424_s12  ;;  %v678_v24 = vshrl.u32 %v12388_v6, 16  ;;  %v680_v31 = vshll.u32 %v12388_v6, 16  ;;  %v900_v59 = vrot.slane %v12388_v6, 2 }
  0xfd   :  { %v1421_v50 = vpop.permute.xlu1 %1420  ;;  %v795_v44 = vpop.permute.xlu0 %794  ;;  %v840_v47 = vrot.slane %v678_v24, 1  ;;  %v841_v35 = vrot.slane %v680_v31, 2 }
  0xfe   :  { %v12324_v46 = vsel %vm17806_vm12, %v1652_v32, %v1421_v50  ;;  %v1489_v27 = vsel %vm1471_vm7, %v1456_v37, %v795_v44  ;;  %v400_v32 = vrot.slane %v395_v2, %v11681_v0  ;;  %v682_v44 = vrot.slane %v680_v31, 1 }
  0xff   :  { %1882 = vrot.lane.b32.xlu1 %v12321_v53, %s17817_s21  ;;  %1884 = vrot.lane.b32.xlu0 %v12324_v46, %s17817_s21  ;;  %v772_v37 = vrot.slane %v12388_v6, 1 }
 0x101   :  { %v875_v11 = vpop.permute.xlu0 %874  ;;  %v923_v21 = vpop.permute.xlu1 %922 }
 0x102   :  { %v1522_v28 = vsel %vm1504_vm6, %v1489_v27, %v875_v11 }
 0x103   :  { %1862 = vrot.lane.b32.xlu1 %v12321_v53, %s11427_s26  ;;  %1790 = vrot.lane.b32.xlu0 %v12212_v30, %s11421_s27  ;;  %v1555_v55 = vsel %vm1537_vm8, %v1522_v28, %v923_v21  ;;  %v12415_v21 = vsel %vm17807_vm0, %v531_v33, %v400_v32  ;;  %v683_v28 = vor.u32 %v682_v44, %v678_v24  ;;  %v1388_v44 = vrot.slane %v12388_v6, 4 }
 0x104   :  { %v1131_v16 = vrot.slane %v12415_v21, 3 }
 0x105   :  { %v1068_v45 = vpop.permute.xlu0 %1067  ;;  %v1165_v38 = vpop.permute.xlu1 %1164 }
 0x106   :  { %v1588_v54 = vsel %vm17810_vm9, %v1555_v55, %v1068_v45  ;;  %v842_v45 = vor.u32 %v841_v35, %v840_v47  ;;  %v1389_v47 = vrot.slane %v12415_v21, 4 }
 0x107   :  { %1715 = vrot.lane.b32.xlu1 %v12262_v13, %s11422_s28  ;;  %1740 = vrot.lane.b32.xlu0 %v12154_v56, %s11424_s12  ;;  %v1621_v10 = vsel %vm17809_vm10, %v1588_v54, %v1165_v38  ;;  %v1009_v54 = vrot.slane %v678_v24, 2 }
 0x109   :  { %v1342_v57 = vpop.permute.xlu0 %1341  ;;  %v1423_v39 = vpop.permute.xlu1 %1422 }
 0x10a   :  { %v1654_v19 = vsel %vm17808_vm11, %v1621_v10, %v1342_v57  ;;  %v1010_v57 = vrot.slane %v680_v31, 3 }
 0x10b   :  { %1815 = vrot.lane.b32.xlu1 %v12259_v5, %s11425_s18  ;;  %1765 = vrot.lane.b32.xlu0 %v12174_v49, %s11428_s29  ;;  %v12360_v14 = vsel %vm17806_vm12, %v1654_v19, %v1423_v39  ;;  %v1012_v39 = vshll.u32 %v12415_v21, 16  ;;  %v1274_v19 = vshrl.u32 %v12415_v21, 16 }
 0x10d   :  { %v733_v29 = vpop.permute.xlu0 %732  ;;  %v797_v52 = vpop.permute.xlu1 %796 }
 0x10e   :  { %v1458_v9 = vsel %vm1438_vm5, %v12033_v12, %v733_v29  ;;  %v192_v12 = vld [vmem:[%s17797_s0 + $0x5c] sm:$0xf]  ;;  %v1011_v29 = vor.u32 %v1010_v57, %v1009_v54 }
 0x10f   :  { %v1491_v51 = vsel %vm1471_vm7, %v1458_v9, %v797_v52  ;;  %1840 = vrot.lane.b32.xlu1 %v12321_v53, %s11426_s9  ;;  %1886 = vrot.lane.b32.xlu0 %v12360_v14, %s17817_s21  ;;  %v10564_v63 = vcombine.low %v191_v61, %v192_v12  ;;  %v402_v27 = vshrl.u32 %v192_v12, 16  ;;  %v1014_v52 = vrot.slane %v1012_v39, 3 }
 0x110   :  { %v1276_v61 = vrot.slane %v1274_v19, 3  ;;  %v1277_v12 = vrot.slane %v1012_v39, 4  ;;  %v1390_v39 = vsel %vm17812_vm4, %v1388_v44, %v1389_v47 }
 0x111   :  { %v877_v60 = vpop.permute.xlu0 %876  ;;  %v925_v41 = vpop.permute.xlu1 %924  ;;  %v532_v42 = vrot.slane %v10564_v63, 7  ;;  %v403_v10 = vpack.i.b16 %v402_v27, %v402_v27 }
 0x112   :  { %v1524_v48 = vsel %vm1504_vm6, %v1491_v51, %v877_v60  ;;  %v1271_v60 = vrot.slane %v678_v24, 3 }
 0x113   :  { %1864 = vrot.lane.b32.xlu1 %v12324_v46, %s11427_s26  ;;  %1792 = vrot.lane.b32.xlu0 %v12259_v5, %s11421_s27  ;;  %v1557_v25 = vsel %vm1537_vm8, %v1524_v48, %v925_v41  ;;  %v12400_v20 = vsel %vm17807_vm0, %v284_v17, %v532_v42  ;;  %v408_v9 = vrot.slane %v403_v10, %v11681_v0  ;;  %v1272_v41 = vrot.slane %v680_v31, 4 }
 0x114   :  { %v12412_v11 = vshll.u32 %v12400_v20, 16  ;;  %v12418_v38 = vshrl.u32 %v12400_v20, 16  ;;  %v773_v51 = vrot.slane %v12400_v20, 1  ;;  %v1015_v48 = vsel %vm17811_vm1, %v1011_v29, %v1014_v52 }
 0x115   :  { %v1070_v7 = vpop.permute.xlu0 %1069  ;;  %v1167_v22 = vpop.permute.xlu1 %1166  ;;  %v609_v63 = vsel %vm17807_vm0, %v532_v42, %v408_v9 }
 0x116   :  { %v1590_v8 = vsel %vm17810_vm9, %v1557_v25, %v1070_v7  ;;  %v688_v55 = vrot.slane %v12412_v11, 1  ;;  %v843_v34 = vrot.slane %v12418_v38, 1  ;;  %v844_v33 = vrot.slane %v12412_v11, 2 }
 0x117   :  { %1717 = vrot.lane.b32.xlu1 %v12154_v56, %s11422_s28  ;;  %1742 = vrot.lane.b32.xlu0 %v12174_v49, %s11424_s12  ;;  %v1623_v58 = vsel %vm17809_vm10, %v1590_v8, %v1167_v22  ;;  %v1130_v25 = vrot.slane %v12388_v6, 3  ;;  %v10565_v7 = vcombine.low %v193_v23, %v194_v1  ;;  %v1273_v22 = vor.u32 %v1272_v41, %v1271_v60  ;;  %v195_v41 = vld [vmem:[%s17797_s0 + $0x68] sm:$0xf] }
 0x118   :  { %v689_v40 = vor.u32 %v688_v55, %v12418_v38  ;;  %v1278_v8 = vor.u32 %v1277_v12, %v1276_v61  ;;  %v845_v17 = vor.u32 %v844_v33, %v843_v34  ;;  %v1016_v2 = vrot.slane %v12418_v38, 2  ;;  %v196_v61 = vld [vmem:[%s17797_s0 + $0x6c] sm:$0xf] }
 0x119   :  { %v1344_v62 = vpop.permute.xlu0 %1343  ;;  %v1425_v18 = vpop.permute.xlu1 %1424  ;;  %v1132_v24 = vsel %vm17814_vm2, %v1130_v25, %v1131_v16  ;;  %v1283_v31 = vshrl.u32 %v609_v63, 16  ;;  %v533_v42 = vrot.slane %v10565_v7, 7  ;;  %v1280_v27 = vrot.slane %v12418_v38, 3 }
 0x11a   :  { %v1656_v26 = vsel %vm17808_vm11, %v1623_v58, %v1344_v62  ;;  %v1017_v62 = vrot.slane %v12412_v11, 3  ;;  %v1019_v58 = vshll.u32 %v609_v63, 16  ;;  %v1279_v32 = vsel %vm17813_vm3, %v1273_v22, %v1278_v8 }
 0x11b   :  { %1817 = vrot.lane.b32.xlu1 %v12321_v53, %s11425_s18  ;;  %1767 = vrot.lane.b32.xlu0 %v12212_v30, %s11428_s29  ;;  %v12404_v50 = vsel %vm17806_vm12, %v1656_v26, %v1425_v18  ;;  %v291_v26 = vrot.slane %v286_v3, %v11514_v15  ;;  %v901_v18 = vrot.slane %v12400_v20, 2  ;;  %v1285_v55 = vrot.slane %v1283_v31, 3 }
 0x11c   :  { %v1018_v35 = vor.u32 %v1017_v62, %v1016_v2  ;;  %v1286_v54 = vrot.slane %v1019_v58, 4  ;;  %v1133_v38 = vrot.slane %v12400_v20, 3  ;;  %v1392_v60 = vrot.slane %v609_v63, 4 }
 0x11d   :  { %v12461_v57 = vsel %vm17807_vm0, %v291_v26, %v533_v42  ;;  %v293_v33 = vpack.i.b16 %v195_v41, %v195_v41  ;;  %v10566_v25 = vcombine.low %v195_v41, %v196_v61  ;;  %vm17852_vm12 = vcmask 277504  }
 0x11e   :  { %v692_v10 = vshll.u32 %v12461_v57, 16  ;;  %v690_v29 = vshrl.u32 %v12461_v57, 16  ;;  %v774_v16 = vrot.slane %v12461_v57, 1  ;;  %v1136_v22 = vrot.slane %v12461_v57, 3 }
 0x11f   :  { %1842 = vrot.lane.b32.xlu1 %v12324_v46, %s11426_s9  ;;  %1888 = vrot.lane.b32.xlu0 %v12404_v50, %s17817_s21  ;;  %v298_v31 = vrot.slane %v293_v33, %v11514_v15  ;;  %v534_v26 = vrot.slane %v10566_v25, 7  ;;  %vm17843_vm11 = vcmask 498688   ;;  %vm17840_vm10 = vcmask 883712  }
 0x120   :  { %v694_v52 = vrot.slane %v692_v10, 1  ;;  %v846_v3 = vrot.slane %v690_v29, 1  ;;  %v847_v7 = vrot.slane %v692_v10, 2  ;;  %v1024_v2 = vrot.slane %v692_v10, 3 }
 0x121   :  { %vm17816_vm9 = vcmask 719872  }
 0x122   :  { %v695_v12 = vor.u32 %v694_v52, %v690_v29 }
 0x123   :  { %1866 = vrot.lane.b32.xlu1 %v12360_v14, %s11427_s26  ;;  %798 = vrot.lane.b32.xlu0 %v772_v37, %s11413_s23  ;;  %v1021_v37 = vrot.slane %v1019_v58, 3  ;;  %v418_v58 = vshrl.u32 %v196_v61, 16 }
 0x125   :  { %v1022_v21 = vsel %vm17811_vm1, %v1018_v35, %v1021_v37  ;;  %v1289_v37 = vrot.slane %v690_v29, 3 }
 0x127   :  { %734 = vrot.lane.b32.xlu1 %v683_v28, %s11414_s30  ;;  %878 = vrot.lane.b32.xlu0 %v842_v45, %s11415_s8  ;;  %v410_v28 = vshrl.u32 %v194_v1, 16  ;;  %v1281_v45 = vrot.slane %v12412_v11, 4  ;;  %v1391_v1 = vrot.slane %v12400_v20, 4 }
 0x129   :  { %v411_v19 = vpack.i.b16 %v410_v28, %v410_v28  ;;  %v1282_v11 = vor.u32 %v1281_v45, %v1280_v27  ;;  %v1393_v34 = vsel %vm17812_vm4, %v1391_v1, %v1392_v60  ;;  %v419_v27 = vpack.i.b16 %v418_v58, %v418_v58 }
 0x12a   :  { %v1290_v28 = vrot.slane %v692_v10, 4  ;;  %v197_v10 = vld [vmem:[%s17797_s0 + $0x70] sm:$0xf] }
 0x12b   :  { %736 = vrot.lane.b32.xlu1 %v689_v40, %s11414_s30  ;;  %926 = vrot.lane.b32.xlu0 %v900_v59, %s11416_s13  ;;  %v1134_v40 = vrot.slane %v609_v63, 3  ;;  %v1287_v59 = vor.u32 %v1286_v54, %v1285_v55  ;;  %v416_v9 = vrot.slane %v411_v19, %v11681_v0  ;;  %v902_v63 = vrot.slane %v12461_v57, 2 }
 0x12c   :  { %v12497_v54 = vsel %vm17807_vm0, %v298_v31, %v534_v26  ;;  %v300_v1 = vpack.i.b16 %v197_v10, %v197_v10 }
 0x12d   :  { %v1288_v23 = vsel %vm17813_vm3, %v1282_v11, %v1287_v59  ;;  %v198_v59 = vld [vmem:[%s17797_s0 + $0x74] sm:$0xf]  ;;  %v696_v52 = vshrl.u32 %v12497_v54, 16 }
 0x12e   :  { %v10567_v60 = vcombine.low %v197_v10, %v198_v59  ;;  %v426_v31 = vshrl.u32 %v198_v59, 16 }
 0x12f   :  { %800 = vrot.lane.b32.xlu1 %v773_v51, %s11413_s23  ;;  %1071 = vrot.lane.b32.xlu0 %v1015_v48, %s11417_s14  ;;  %v1135_v51 = vsel %vm17814_vm2, %v1133_v38, %v1134_v40  ;;  %v611_v48 = vsel %vm17807_vm0, %v533_v42, %v416_v9  ;;  %v848_v42 = vor.u32 %v847_v7, %v846_v3  ;;  %v849_v41 = vrot.slane %v696_v52, 1 }
 0x130   :  { %v1137_v8 = vrot.slane %v611_v48, 3  ;;  %v1026_v62 = vshll.u32 %v611_v48, 16  ;;  %v1395_v44 = vrot.slane %v611_v48, 4  ;;  %v1291_v40 = vor.u32 %v1290_v28, %v1289_v37 }
 0x131   :  { %v1030_v25 = vrot.slane %v696_v52, 2  ;;  %v903_v7 = vrot.slane %v12497_v54, 2 }
 0x132   :  { %v1028_v35 = vrot.slane %v1026_v62, 3  ;;  %v1295_v55 = vrot.slane %v1026_v62, 4 }
 0x133   :  { %880 = vrot.lane.b32.xlu1 %v845_v17, %s11415_s8  ;;  %1168 = vrot.lane.b32.xlu0 %v1132_v24, %s11418_s15  ;;  %v1023_v17 = vrot.slane %v690_v29, 2  ;;  %v1292_v24 = vshrl.u32 %v611_v48, 16  ;;  %v775_v29 = vrot.slane %v12497_v54, 1  ;;  %v200_v48 = vld [vmem:[%s17797_s0 + $0x7c] sm:$0xf] }
 0x135   :  { %v1025_v47 = vor.u32 %v1024_v2, %v1023_v17  ;;  %v1294_v45 = vrot.slane %v1292_v24, 3  ;;  %v305_v17 = vrot.slane %v300_v1, %v11514_v15  ;;  %v535_v2 = vrot.slane %v10567_v60, 7 }
 0x137   :  { %928 = vrot.lane.b32.xlu1 %v901_v18, %s11416_s13  ;;  %1345 = vrot.lane.b32.xlu0 %v1279_v32, %s11419_s16  ;;  %v1138_v18 = vsel %vm17814_vm2, %v1136_v22, %v1137_v8  ;;  %v1394_v32 = vrot.slane %v12461_v57, 4  ;;  %v1029_v19 = vsel %vm17811_vm1, %v1025_v47, %v1028_v35  ;;  %v1296_v11 = vor.u32 %v1295_v55, %v1294_v45 }
 0x138   :  { %v1298_v47 = vrot.slane %v696_v52, 3  ;;  %v12535_v28 = vsel %vm17807_vm0, %v305_v17, %v535_v2 }
 0x139   :  { %v1396_v38 = vsel %vm17812_vm4, %v1394_v32, %v1395_v44  ;;  %v776_v1 = vrot.slane %v12535_v28, 1 }
 0x13b   :  { %1073 = vrot.lane.b32.xlu1 %v1022_v21, %s11417_s14  ;;  %1426 = vrot.lane.b32.xlu0 %v1390_v39, %s11420_s17  ;;  %v698_v21 = vshll.u32 %v12497_v54, 16  ;;  %v424_v39 = vrot.slane %v419_v27, %v11681_v0 }
 0x13d   :  { %v700_v9 = vrot.slane %v698_v21, 1  ;;  %v850_v61 = vrot.slane %v698_v21, 2  ;;  %v1299_v35 = vrot.slane %v698_v21, 4 }
 0x13f   :  { %1170 = vrot.lane.b32.xlu1 %v1135_v51, %s11418_s15  ;;  %1347 = vrot.lane.b32.xlu0 %v1288_v23, %s11419_s16  ;;  %v613_v51 = vsel %vm17807_vm0, %v534_v26, %v424_v39  ;;  %v1297_v23 = vsel %vm17813_vm3, %v1291_v40, %v1296_v11  ;;  %v701_v3 = vor.u32 %v700_v9, %v696_v52  ;;  %v12549_v11 = vshll.u32 %v12535_v28, 16 }
 0x140   :  { %v1140_v33 = vrot.slane %v613_v51, 3  ;;  %v1033_v22 = vshll.u32 %v613_v51, 16  ;;  %v1301_v8 = vshrl.u32 %v613_v51, 16  ;;  %v851_v24 = vor.u32 %v850_v61, %v849_v41 }
 0x141   :  { %v1398_v32 = vrot.slane %v613_v51, 4  ;;  %v1300_v59 = vor.u32 %v1299_v35, %v1298_v47  ;;  %v706_v60 = vrot.slane %v12549_v11, 1  ;;  %v853_v61 = vrot.slane %v12549_v11, 2 }
 0x142   :  { %v1035_v44 = vrot.slane %v1033_v22, 3  ;;  %v1303_v37 = vrot.slane %v1301_v8, 3  ;;  %v1304_v27 = vrot.slane %v1033_v22, 4  ;;  %v904_v47 = vrot.slane %v12535_v28, 2 }
 0x143   :  { %738 = vrot.lane.b32.xlu1 %v695_v12, %s11414_s30  ;;  %1428 = vrot.lane.b32.xlu0 %v1393_v34, %s11420_s17  ;;  %v199_v12 = vld [vmem:[%s17797_s0 + $0x78] sm:$0xf]  ;;  %v1139_v34 = vrot.slane %v12497_v54, 3 }
 0x144   :  { %v307_v62 = vpack.i.b16 %v199_v12, %v199_v12  ;;  %v10568_v58 = vcombine.low %v199_v12, %v200_v48 }
 0x145   :  { %v1141_v26 = vsel %vm17814_vm2, %v1139_v34, %v1140_v33 }
 0x146   :  { %v312_v45 = vrot.slane %v307_v62, %v11514_v15  ;;  %v536_v55 = vrot.slane %v10568_v58, 7 }
 0x147   :  { %802 = vrot.lane.b32.xlu1 %v774_v16, %s11413_s23  ;;  %930 = vrot.lane.b32.xlu0 %v902_v63, %s11416_s13  ;;  %v1031_v16 = vrot.slane %v698_v21, 3  ;;  %v12546_v21 = vshrl.u32 %v12535_v28, 16 }
 0x148   :  { %v12553_v52 = vsel %vm17807_vm0, %v312_v45, %v536_v55 }
 0x149   :  { %v852_v41 = vrot.slane %v12546_v21, 1  ;;  %v12565_v12 = vshll.u32 %v12553_v52, 16  ;;  %v707_v22 = vor.u32 %v706_v60, %v12546_v21  ;;  %v12579_v17 = vshrl.u32 %v12553_v52, 16 }
 0x14a   :  { %v1037_v58 = vrot.slane %v12546_v21, 2 }
 0x14b   :  { %882 = vrot.lane.b32.xlu1 %v848_v42, %s11415_s8  ;;  %1172 = vrot.lane.b32.xlu0 %v1138_v18, %s11418_s15  ;;  %v1032_v42 = vor.u32 %v1031_v16, %v1030_v25  ;;  %v1397_v18 = vrot.slane %v12497_v54, 4  ;;  %v854_v8 = vor.u32 %v853_v61, %v852_v41  ;;  %v712_v62 = vrot.slane %v12565_v12, 1 }
 0x14c   :  { %v777_v41 = vrot.slane %v12553_v52, 1  ;;  %v1044_v61 = vrot.slane %v12579_v17, 2 }
 0x14d   :  { %v1399_v40 = vsel %vm17812_vm4, %v1397_v18, %v1398_v32  ;;  %v1036_v10 = vsel %vm17811_vm1, %v1032_v42, %v1035_v44  ;;  %v713_v44 = vor.u32 %v712_v62, %v12579_v17 }
 0x14f   :  { %1075 = vrot.lane.b32.xlu1 %v1029_v19, %s11417_s14  ;;  %1430 = vrot.lane.b32.xlu0 %v1396_v38, %s11420_s17  ;;  %v427_v19 = vpack.i.b16 %v426_v31, %v426_v31 }
 0x151   :  { %v12524_v63 = vpop.permute.xlu0 %1713  ;;  %v12540_v38 = vpop.permute.xlu1 %1786  ;;  %v432_v51 = vrot.slane %v427_v19, %v11681_v0 }
 0x153   :  { %1349 = vrot.lane.b32.xlu1 %v1297_v23, %s11419_s16  ;;  %804 = vrot.lane.b32.xlu0 %v775_v29, %s11413_s23  ;;  %v1305_v29 = vor.u32 %v1304_v27, %v1303_v37  ;;  %v434_v23 = vshrl.u32 %v200_v48, 16  ;;  %v12571_v48 = vsel %vm17807_vm0, %v535_v2, %v432_v51  ;;  %v1038_v2 = vrot.slane %v12549_v11, 3 }
 0x154   :  { %v1310_v18 = vshrl.u32 %v12571_v48, 16  ;;  %v855_v27 = vrot.slane %v12579_v17, 1  ;;  %v1307_v51 = vrot.slane %v12546_v21, 3 }
 0x155   :  { %v12538_v39 = vpop.permute.xlu0 %1811  ;;  %v1306_v34 = vsel %vm17813_vm3, %v1300_v59, %v1305_v29  ;;  %v1737_v33 = vpop.permute.xlu1 %1736  ;;  %v435_v16 = vpack.i.b16 %v434_v23, %v434_v23  ;;  %v1039_v35 = vor.u32 %v1038_v2, %v1037_v58  ;;  %v1143_v59 = vrot.slane %v12571_v48, 3 }
 0x156   :  { %v1308_v23 = vrot.slane %v12549_v11, 4  ;;  %v1904_v11 = vsel %vm1902_vm14, %v12157_v36, %v12524_v63  ;;  %v2002_v2 = vsel %vm2000_vm13, %v12540_v38, %v12538_v39 }
 0x157   :  { %740 = vrot.lane.b32.xlu1 %v701_v3, %s11414_s30  ;;  %932 = vrot.lane.b32.xlu0 %v903_v7, %s11416_s13  ;;  %v11430_v3 = vmov 1983009808   ;;  %v440_v42 = vrot.slane %v435_v16, %v11681_v0 }
 0x158   :  { %v12573_v7 = vunpack.c.l.s4 %v11430_v3  ;;  %v1309_v62 = vor.u32 %v1308_v23, %v1307_v51 }
 0x159   :  { %v12597_v29 = vsel %vm17807_vm0, %v536_v55, %v440_v42  ;;  %vm17844_vm0 = vcmask 662528  }
 0x15a   :  { %v2130_v32 = vunpack.c.0.s8 %v12573_v7  ;;  %v1047_v21 = vshll.u32 %v12597_v29, 16  ;;  %v1319_v51 = vshrl.u32 %v12597_v29, 16 }
 0x15b   :  { %884 = vrot.lane.b32.xlu1 %v851_v24, %s11415_s8  ;;  %1174 = vrot.lane.b32.xlu0 %v1141_v26, %s11418_s15  ;;  %v1040_v24 = vshll.u32 %v12571_v48, 16 }
 0x15d   :  { %v12555_v9 = vpop.permute.xlu0 %1836  ;;  %v1042_v37 = vrot.slane %v1040_v24, 3  ;;  %v1313_v60 = vrot.slane %v1040_v24, 4 }
 0x15e   :  { %v2027_v42 = vsel %vm17852_vm12, %v2002_v2, %v12555_v9  ;;  %v1322_v2 = vrot.slane %v1047_v21, 4 }
 0x15f   :  { %1077 = vrot.lane.b32.xlu1 %v1036_v10, %s11417_s14  ;;  %1432 = vrot.lane.b32.xlu0 %v1399_v40, %s11420_s17  ;;  %v856_v40 = vrot.slane %v12565_v12, 2  ;;  %v1142_v10 = vrot.slane %v12535_v28, 3  ;;  %v1043_v55 = vsel %vm17811_vm1, %v1039_v35, %v1042_v37 }
 0x161   :  { %v12568_v25 = vpop.permute.xlu0 %1788  ;;  %v857_v7 = vor.u32 %v856_v40, %v855_v27 }
 0x163   :  { %1351 = vrot.lane.b32.xlu1 %v1306_v34, %s11419_s16  ;;  %806 = vrot.lane.b32.xlu0 %v776_v1, %s11413_s23  ;;  %v1312_v1 = vrot.slane %v1310_v18, 3  ;;  %v1045_v34 = vrot.slane %v12565_v12, 3  ;;  %v1400_v18 = vrot.slane %v12535_v28, 4 }
 0x165   :  { %v1762_v31 = vpop.permute.xlu1 %1761  ;;  %v1861_v26 = vpop.permute.xlu0 %1860  ;;  %v1314_v58 = vor.u32 %v1313_v60, %v1312_v1  ;;  %v1046_v63 = vor.u32 %v1045_v34, %v1044_v61  ;;  %v1146_v61 = vrot.slane %v12597_v29, 3 }
 0x166   :  { %v2052_v39 = vsel %vm17843_vm11, %v2027_v42, %v1861_v26 }
 0x167   :  { %742 = vrot.lane.b32.xlu1 %v707_v22, %s11414_s30  ;;  %886 = vrot.lane.b32.xlu0 %v854_v8, %s11415_s8  ;;  %v1927_v22 = vsel %vm17853_vm15, %v1904_v11, %v1737_v33  ;;  %v1144_v8 = vsel %vm17814_vm2, %v1142_v10, %v1143_v59  ;;  %v1049_v33 = vrot.slane %v1047_v21, 3  ;;  %v1315_v26 = vsel %vm17813_vm3, %v1309_v62, %v1314_v58 }
 0x168   :  { %v1952_v24 = vsel %vm17844_vm0, %v1927_v22, %v1762_v31  ;;  %v1316_v22 = vrot.slane %v12579_v17, 3  ;;  %v1317_v62 = vrot.slane %v12565_v12, 4  ;;  %v1321_v58 = vrot.slane %v1319_v51, 3 }
 0x169   :  { %v1814_v45 = vpop.permute.xlu1 %1813  ;;  %v1839_v19 = vpop.permute.xlu0 %1838  ;;  %v1977_v9 = vsel %vm17840_vm10, %v1952_v24, %v12540_v38  ;;  %v1050_v59 = vsel %vm17811_vm1, %v1046_v63, %v1049_v33  ;;  %vm17815_vm1 = vcmask 941056  }
 0x16a   :  { %v2004_v27 = vsel %vm2000_vm13, %v12568_v25, %v1814_v45  ;;  %v1323_v12 = vor.u32 %v1322_v2, %v1321_v58 }
 0x16b   :  { %744 = vrot.lane.b32.xlu1 %v713_v44, %s11414_s30  ;;  %934 = vrot.lane.b32.xlu0 %v904_v47, %s11416_s13  ;;  %v1401_v44 = vrot.slane %v12571_v48, 4  ;;  %v12624_v47 = vsub.s32 %v2130_v32, %v11488_v4  ;;  %v905_v48 = vrot.slane %v12553_v52, 2  ;;  %v2029_v38 = vsel %vm17852_vm12, %v2004_v27, %v1839_v19 }
 0x16d   :  { %v1739_v16 = vpop.permute.xlu1 %1738  ;;  %v1764_v3 = vpop.permute.xlu0 %1763  ;;  %17936 = vst [vmem:[#allocation5_spill] sm:$0xff] %v12624_v47  ;;  %v1402_v45 = vsel %vm17812_vm4, %v1400_v18, %v1401_v44  ;;  %v1318_v44 = vor.u32 %v1317_v62, %v1316_v22 }
 0x16e   :  { %v1929_v31 = vsel %vm17853_vm15, %v1904_v11, %v1739_v16  ;;  %v1403_v11 = vrot.slane %v12553_v52, 4  ;;  %v1404_v16 = vrot.slane %v12597_v29, 4 }
 0x16f   :  { %808 = vrot.lane.b32.xlu1 %v777_v41, %s11413_s23  ;;  %1079 = vrot.lane.b32.xlu0 %v1043_v55, %s11417_s14  ;;  %v1954_v32 = vsel %vm17844_vm0, %v1929_v31, %v1764_v3  ;;  %v1145_v41 = vrot.slane %v12553_v52, 3 }
 0x170   :  { %v1979_v3 = vsel %vm17840_vm10, %v1954_v32, %v12568_v25  ;;  %v1405_v17 = vsel %vm17812_vm4, %v1403_v11, %v1404_v16  ;;  %vm17937_vm4 = vcmask 121856  }
 0x171   :  { %v1883_v35 = vpop.permute.xlu1 %1882  ;;  %v1885_v37 = vpop.permute.xlu0 %1884  ;;  %v1147_v33 = vsel %vm17814_vm2, %v1145_v41, %v1146_v61  ;;  %vm17939_vm2 = vcmask 171008  }
 0x172   :  { %v2076_v40 = vsel %vm17816_vm9, %v2052_v39, %v1883_v35 }
 0x173   :  { %v2126_v10 = vcombine.low %v1977_v9, %v2076_v40  ;;  %888 = vrot.lane.b32.xlu1 %v857_v7, %s11415_s8  ;;  %1176 = vrot.lane.b32.xlu0 %v1144_v8, %s11418_s15  ;;  %v2127_v34 = vcombine.high %v1977_v9, %v2076_v40  ;;  %v1324_v9 = vsel %vm17813_vm3, %v1318_v44, %v1323_v12  ;;  %vm17938_vm3 = vcmask 146432  }
 0x175   :  { %v2134_v23 = vrot.slane %v2126_v10, %v12624_v47  ;;  %v1863_v1 = vpop.permute.xlu1 %1862  ;;  %v1791_v60 = vpop.permute.xlu0 %1790  ;;  %v2141_v29 = vrot.slane %v2127_v34, %v12624_v47 }
 0x176   :  { %v2054_v55 = vsel %vm17843_vm11, %v2029_v38, %v1863_v1 }
 0x177   :  { %v2142_v7 = vcombine.high %v2134_v23, %v2134_v23  ;;  %v2078_v19 = vsel %vm17816_vm9, %v2054_v55, %v1885_v37  ;;  %936 = vrot.lane.b32.xlu1 %v905_v48, %s11416_s13  ;;  %1353 = vrot.lane.b32.xlu0 %v1315_v26, %s11419_s16 }
 0x178   :  { %v2143_v8 = vcombine.low %v1979_v3, %v2078_v19  ;;  %v2144_v38 = vcombine.high %v1979_v3, %v2078_v19 }
 0x179   :  { %v1716_v24 = vpop.permute.xlu1 %1715  ;;  %v1741_v63 = vpop.permute.xlu0 %1740  ;;  %v2331_v42 = vcombine.low %v2134_v23, %v2142_v7 }
 0x17a   :  { %v2151_v25 = vrot.slane %v2143_v8, %v12624_v47  ;;  %v1906_v37 = vsel %vm1902_vm14, %v12157_v36, %v1716_v24  ;;  %v2158_v16 = vrot.slane %v2144_v38, %v12624_v47 }
 0x17b   :  { %1081 = vrot.lane.b32.xlu1 %v1050_v59, %s11417_s14  ;;  %1434 = vrot.lane.b32.xlu0 %v1402_v45, %s11420_s17  ;;  %v2339_v31 = vrot.slane %v2331_v42, %v12624_v47  ;;  %v1931_v26 = vsel %vm17853_vm15, %v1906_v37, %v1741_v63 }
 0x17c   :  { %v2332_v18 = vcombine.low %v2141_v29, %v2151_v25  ;;  %v2159_v61 = vcombine.high %v2151_v25, %v2151_v25 }
 0x17d   :  { %v1816_v39 = vpop.permute.xlu1 %1815  ;;  %v1766_v21 = vpop.permute.xlu0 %1765 }
 0x17e   :  { %v2346_v35 = vrot.slane %v2332_v18, %v12624_v47  ;;  %v2006_v32 = vsel %vm2000_vm13, %v1791_v60, %v1816_v39  ;;  %v1956_v59 = vsel %vm17844_vm0, %v1931_v26, %v1766_v21 }
 0x17f   :  { %1178 = vrot.lane.b32.xlu1 %v1147_v33, %s11418_s15  ;;  %1436 = vrot.lane.b32.xlu0 %v1405_v17, %s11420_s17  ;;  %v1981_v1 = vsel %vm17840_vm10, %v1956_v59, %v1791_v60  ;;  %v2349_v60 = vcombine.low %v2159_v61, %v2158_v16 }
 0x180   :  { %v2348_v27 = vcombine.high %v2339_v31, %v2346_v35  ;;  %v2347_v40 = vcombine.low %v2339_v31, %v2346_v35 }
 0x181   :  { %v1841_v10 = vpop.permute.xlu1 %1840  ;;  %v1887_v48 = vpop.permute.xlu0 %1886  ;;  %v2357_v58 = vrot.slane %v2349_v60, %v12624_v47 }
 0x182   :  { %10586 = vmatprep.mubr.msk.bf16.mxu0 %vm17815_vm1, %v2348_v27  ;;  %v2031_v36 = vsel %vm17852_vm12, %v2006_v32, %v1841_v10 }
 0x183   :  { %1355 = vrot.lane.b32.xlu1 %v1324_v9, %s11419_s16  ;;  %1794 = vrot.lane.b32.xlu0 %v12321_v53, %s11421_s27 }
 0x184   :  { %2668 = vmatmul.mubr.bf16.vlgmr.msra.gmra.mxu0 %v2347_v40 }
 0x185   :  { %v1865_v45 = vpop.permute.xlu1 %1864  ;;  %v1793_v51 = vpop.permute.xlu0 %1792 }
 0x186   :  { %v2056_v23 = vsel %vm17843_vm11, %v2031_v36, %v1865_v45 }
 0x187   :  { %v2080_v41 = vsel %vm17816_vm9, %v2056_v23, %v1887_v48  ;;  %1719 = vrot.lane.b32.xlu1 %v12174_v49, %s11422_s28  ;;  %1744 = vrot.lane.b32.xlu0 %v12212_v30, %s11424_s12 }
 0x188   :  { %v2160_v34 = vcombine.low %v1981_v1, %v2080_v41  ;;  %v2161_v12 = vcombine.high %v1981_v1, %v2080_v41 }
 0x189   :  { %v1718_v55 = vpop.permute.xlu1 %1717  ;;  %v1743_v11 = vpop.permute.xlu0 %1742 }
 0x18a   :  { %v2168_v3 = vrot.slane %v2160_v34, %v12624_v47  ;;  %v1908_v62 = vsel %vm1902_vm14, %v12262_v13, %v1718_v55  ;;  %v2175_v40 = vrot.slane %v2161_v12, %v12624_v47 }
 0x18b   :  { %1819 = vrot.lane.b32.xlu1 %v12324_v46, %s11425_s18  ;;  %1721 = vrot.lane.b32.xlu0 %v12212_v30, %s11422_s28  ;;  %v1933_v42 = vsel %vm17853_vm15, %v1908_v62, %v1743_v11 }
 0x18c   :  { %v2176_v7 = vcombine.high %v2168_v3, %v2168_v3 }
 0x18d   :  { %v1818_v19 = vpop.permute.xlu1 %1817  ;;  %v1768_v22 = vpop.permute.xlu0 %1767 }
 0x18e   :  { %v2350_v8 = vcombine.low %v2168_v3, %v2176_v7  ;;  %v2008_v33 = vsel %vm2000_vm13, %v1793_v51, %v1818_v19  ;;  %v1958_v13 = vsel %vm17844_vm0, %v1933_v42, %v1768_v22 }
 0x18f   :  { %1844 = vrot.lane.b32.xlu1 %v12360_v14, %s11426_s9  ;;  %1796 = vrot.lane.b32.xlu0 %v12324_v46, %s11421_s27  ;;  %v1983_v21 = vsel %vm17840_vm10, %v1958_v13, %v1793_v51 }
 0x190   :  { %v2364_v2 = vrot.slane %v2350_v8, %v12624_v47 }
 0x191   :  { %v1843_v24 = vpop.permute.xlu1 %1842  ;;  %v1889_v63 = vpop.permute.xlu0 %1888 }
 0x192   :  { %v2366_v29 = vcombine.high %v2357_v58, %v2364_v2  ;;  %v2365_v25 = vcombine.low %v2357_v58, %v2364_v2  ;;  %v2033_v17 = vsel %vm17852_vm12, %v2008_v33, %v1843_v24 }
 0x193   :  { %1769 = vrot.lane.b32.xlu1 %v12259_v5, %s11428_s29  ;;  %1868 = vrot.lane.b32.xlu0 %v12404_v50, %s11427_s26 }
 0x194   :  { %10587 = vmatprep.mubr.msk.bf16.mxu0 %vm17815_vm1, %v2366_v29 }
 0x195   :  { %v1867_v18 = vpop.permute.xlu1 %1866  ;;  %2676 = vmatmul.mubr.bf16.gmra.mxu0 %v2365_v25  ;;  %v799_v44 = vpop.permute.xlu0 %798 }
 0x196   :  { %v2058_v39 = vsel %vm17843_vm11, %v2033_v17, %v1867_v18 }
 0x197   :  { %v2082_v31 = vsel %vm17816_vm9, %v2058_v39, %v1889_v63  ;;  %1821 = vrot.lane.b32.xlu1 %v12360_v14, %s11425_s18  ;;  %1846 = vrot.lane.b32.xlu0 %v12404_v50, %s11426_s9  ;;  %vm17946_vm9 = vcmask 195584  }
 0x198   :  { %v2177_v35 = vcombine.low %v1983_v21, %v2082_v31  ;;  %v2178_v37 = vcombine.high %v1983_v21, %v2082_v31 }
 0x199   :  { %v735_v27 = vpop.permute.xlu1 %734  ;;  %v879_v9 = vpop.permute.xlu0 %878 }
 0x19a   :  { %v2185_v10 = vrot.slane %v2177_v35, %v12624_v47  ;;  %v2192_v48 = vrot.slane %v2178_v37, %v12624_v47  ;;  %v1460_v23 = vsel %vm1438_vm5, %v12388_v6, %v735_v27 }
 0x19b   :  { %1746 = vrot.lane.b32.xlu1 %v12259_v5, %s11424_s12  ;;  %1771 = vrot.lane.b32.xlu0 %v12321_v53, %s11428_s29  ;;  %v1493_v55 = vsel %vm1471_vm7, %v1460_v23, %v799_v44 }
 0x19c   :  { %v2193_v26 = vcombine.high %v2185_v10, %v2185_v10  ;;  %v2367_v32 = vcombine.low %v2175_v40, %v2185_v10  ;;  %v1526_v3 = vsel %vm1504_vm6, %v1493_v55, %v879_v9 }
 0x19d   :  { %v737_v59 = vpop.permute.xlu1 %736  ;;  %v927_v36 = vpop.permute.xlu0 %926 }
 0x19e   :  { %v2368_v45 = vcombine.low %v2193_v26, %v2192_v48  ;;  %v2375_v51 = vrot.slane %v2367_v32, %v12624_v47  ;;  %v1559_v19 = vsel %vm1537_vm8, %v1526_v3, %v927_v36  ;;  %v1462_v8 = vsel %vm1438_vm5, %v12400_v20, %v737_v59 }
 0x1a0   :  { %v2382_v38 = vrot.slane %v2368_v45, %v12624_v47 }
 0x1a1   :  { %v801_v1 = vpop.permute.xlu1 %800  ;;  %v1072_v41 = vpop.permute.xlu0 %1071 }
 0x1a2   :  { %v2384_v61 = vcombine.high %v2375_v51, %v2382_v38  ;;  %v2383_v34 = vcombine.low %v2375_v51, %v2382_v38  ;;  %v1592_v22 = vsel %vm17937_vm4, %v1559_v19, %v1072_v41  ;;  %v1495_v24 = vsel %vm1471_vm7, %v1462_v8, %v801_v1 }
 0x1a4   :  { %10588 = vmatprep.mubr.msk.bf16.mxu0 %vm17815_vm1, %v2384_v61  ;;  %vm17940_vm1 = vcmask 195584  }
 0x1a5   :  { %v881_v11 = vpop.permute.xlu1 %880  ;;  %2684 = vmatmul.mubr.bf16.gmra.mxu0 %v2383_v34  ;;  %v1169_v16 = vpop.permute.xlu0 %1168 }
 0x1a6   :  { %v1625_v6 = vsel %vm17938_vm3, %v1592_v22, %v1169_v16  ;;  %v1528_v29 = vsel %vm1504_vm6, %v1495_v24, %v881_v11  ;;  %vm17941_vm3 = vmmov %vm17937_vm4  ;;  %vm17942_vm4 = vcmask 146432  }
 0x1a9   :  { %v929_v60 = vpop.permute.xlu1 %928  ;;  %v1346_v7 = vpop.permute.xlu0 %1345 }
 0x1aa   :  { %v1658_v62 = vsel %vm17939_vm2, %v1625_v6, %v1346_v7  ;;  %v1561_v25 = vsel %vm1537_vm8, %v1528_v29, %v929_v60  ;;  %v11273_v29 = vld [vmem:[%s17799_s3 + $0x10] sm:$0xff]  }
 0x1ad   :  { %v1074_v58 = vpop.permute.xlu1 %1073  ;;  %v1427_v2 = vpop.permute.xlu0 %1426 }
 0x1ae   :  { %v12735_v63 = vsel %vm17940_vm1, %v1658_v62, %v1427_v2  ;;  %v1594_v42 = vsel %vm17941_vm3, %v1561_v25, %v1074_v58  ;;  %v11272_v62 = vld [vmem:[%s17799_s3 + $0x18] sm:$0xff]   ;;  %v17819_v58 = vmov 0.0  }
 0x1af   :  { %1890 = vrot.lane.b32.xlu1 %v12735_v63, %s17817_s21  ;;  %11108 = vmatprep.subr.bf16.mxu1 %v17819_v58 }
 0x1b0   :  { %11109 = vmatpush3.bf16.msra.mxu1 %v11272_v62 }
 0x1b1   :  { %v1171_v33 = vpop.permute.xlu1 %1170  ;;  %v1348_v20 = vpop.permute.xlu0 %1347  ;;  %11110 = vmatprep.subr.bf16.mxu1 %v17819_v58 }
 0x1b2   :  { %v1627_v13 = vsel %vm17942_vm4, %v1594_v42, %v1171_v33 }
 0x1b3   :  { %1870 = vrot.lane.b32.xlu1 %v12735_v63, %s11427_s26  ;;  %v1660_v17 = vsel %vm17939_vm2, %v1627_v13, %v1348_v20  ;;  %v11274_v20 = vld [vmem:[%s17799_s3 + $0x8] sm:$0xff]  }
 0x1b4   :  { %11111 = vmatpush3.bf16.msra.mxu1 %v11273_v29 }
 0x1b5   :  { %v739_v18 = vpop.permute.xlu1 %738  ;;  %v1429_v44 = vpop.permute.xlu0 %1428  ;;  %11112 = vmatprep.subr.bf16.mxu1 %v17819_v58 }
 0x1b6   :  { %v12747_v12 = vsel %vm17940_vm1, %v1660_v17, %v1429_v44  ;;  %v1464_v31 = vsel %vm1438_vm5, %v12461_v57, %v739_v18 }
 0x1b7   :  { %1723 = vrot.lane.b32.xlu1 %v12259_v5, %s11422_s28  ;;  %1892 = vrot.lane.b32.xlu0 %v12747_v12, %s17817_s21 }
 0x1b8   :  { %11113 = vmatpush3.bf16.msra.mxu1 %v11274_v20 }
 0x1b9   :  { %v803_v39 = vpop.permute.xlu1 %802  ;;  %v931_v21 = vpop.permute.xlu0 %930  ;;  %11114 = vmatprep.subr.bf16.mxu1 %v17819_v58 }
 0x1ba   :  { %v1497_v35 = vsel %vm1471_vm7, %v1464_v31, %v803_v39 }
 0x1bb   :  { %1823 = vrot.lane.b32.xlu1 %v12404_v50, %s11425_s18  ;;  %1798 = vrot.lane.b32.xlu0 %v12360_v14, %s11421_s27 }
 0x1bd   :  { %v883_v37 = vpop.permute.xlu1 %882  ;;  %v1173_v27 = vpop.permute.xlu0 %1172 }
 0x1be   :  { %v1530_v9 = vsel %vm1504_vm6, %v1497_v35, %v883_v37 }
 0x1bf   :  { %1848 = vrot.lane.b32.xlu1 %v12735_v63, %s11426_s9  ;;  %1748 = vrot.lane.b32.xlu0 %v12321_v53, %s11424_s12  ;;  %v1563_v10 = vsel %vm1537_vm8, %v1530_v9, %v931_v21 }
 0x1c1   :  { %v1076_v40 = vpop.permute.xlu1 %1075  ;;  %v1431_v48 = vpop.permute.xlu0 %1430 }
 0x1c2   :  { %v1596_v26 = vsel %vm17941_vm3, %v1563_v10, %v1076_v40 }
 0x1c3   :  { %1872 = vrot.lane.b32.xlu1 %v12747_v12, %s11427_s26  ;;  %1773 = vrot.lane.b32.xlu0 %v12324_v46, %s11428_s29  ;;  %v1629_v32 = vsel %vm17942_vm4, %v1596_v26, %v1173_v27 }
 0x1c5   :  { %v1350_v57 = vpop.permute.xlu1 %1349  ;;  %v805_v59 = vpop.permute.xlu0 %804 }
 0x1c6   :  { %v1662_v36 = vsel %vm17939_vm2, %v1629_v32, %v1350_v57 }
 0x1c7   :  { %v12774_v45 = vsel %vm17940_vm1, %v1662_v36, %v1431_v48  ;;  %1725 = vrot.lane.b32.xlu1 %v12321_v53, %s11422_s28 }
 0x1c8   :  { %1894 = vrot.lane.b32.xlu0 %v12774_v45, %s17817_s21 }
 0x1c9   :  { %v741_v51 = vpop.permute.xlu1 %740  ;;  %v933_v38 = vpop.permute.xlu0 %932 }
 0x1ca   :  { %v1466_v23 = vsel %vm1438_vm5, %v12497_v54, %v741_v51 }
 0x1cb   :  { %1825 = vrot.lane.b32.xlu1 %v12735_v63, %s11425_s18  ;;  %v1499_v41 = vsel %vm1471_vm7, %v1466_v23, %v805_v59 }
 0x1cc   :  { %1800 = vrot.lane.b32.xlu0 %v12404_v50, %s11421_s27 }
 0x1cd   :  { %v885_v1 = vpop.permute.xlu1 %884  ;;  %v1175_v61 = vpop.permute.xlu0 %1174 }
 0x1ce   :  { %v1532_v34 = vsel %vm1504_vm6, %v1499_v41, %v885_v1 }
 0x1cf   :  { %1850 = vrot.lane.b32.xlu1 %v12747_v12, %s11426_s9  ;;  %v1565_v54 = vsel %vm1537_vm8, %v1532_v34, %v933_v38 }
 0x1d0   :  { %1750 = vrot.lane.b32.xlu0 %v12324_v46, %s11424_s12 }
 0x1d1   :  { %v1078_v55 = vpop.permute.xlu1 %1077  ;;  %v1433_v11 = vpop.permute.xlu0 %1432 }
 0x1d2   :  { %v1598_v16 = vsel %vm17941_vm3, %v1565_v54, %v1078_v55  ;;  %vm17872_vm3 = vmmov 0  }
 0x1d3   :  { %1874 = vrot.lane.b32.xlu1 %v12774_v45, %s11427_s26  ;;  %v1631_v60 = vsel %vm17942_vm4, %v1598_v16, %v1175_v61  ;;  %11116 = vmatprep.mubr.msk.bf16.mxu1 %vm17872_vm3, %v17819_v58  ;;  %vm17943_vm4 = vcmask 121856  }
 0x1d4   :  { %1775 = vrot.lane.b32.xlu0 %v12360_v14, %s11428_s29 }
 0x1d5   :  { %v1352_v3 = vpop.permute.xlu1 %1351  ;;  %v807_v7 = vpop.permute.xlu0 %806 }
 0x1d6   :  { %v1664_v19 = vsel %vm17939_vm2, %v1631_v60, %v1352_v3  ;;  %vm17944_vm2 = vcmask 146432   ;;  %v12904_v60 = vld [vmem:[%s17797_s0 + $0x94] sm:$0xf] }
 0x1d7   :  { %v12801_v22 = vsel %vm17940_vm1, %v1664_v19, %v1433_v11  ;;  %1727 = vrot.lane.b32.xlu1 %v12324_v46, %s11422_s28  ;;  %vm17945_vm1 = vcmask 171008   ;;  %v12913_v19 = vld [vmem:[%s17797_s0 + $0xa4] sm:$0xf] }
 0x1d8   :  { %1896 = vrot.lane.b32.xlu0 %v12801_v22, %s17817_s21 }
 0x1d9   :  { %v743_v6 = vpop.permute.xlu1 %742  ;;  %v887_v8 = vpop.permute.xlu0 %886 }
 0x1da   :  { %v1468_v25 = vsel %vm1438_vm5, %v12535_v28, %v743_v6  ;;  %v11275_v28 = vld [vmem:[%s17799_s3] sm:$0xff]  }
 0x1db   :  { %1827 = vrot.lane.b32.xlu1 %v12747_v12, %s11425_s18  ;;  %v1501_v13 = vsel %vm1471_vm7, %v1468_v25, %v807_v7  ;;  %11115 = vmatpush3.bf16.msra.mxu1 %v11275_v28  ;;  %v10752_v6 = vld [vmem:[%s17797_s0 + $0x80] sm:$0xf]  ;;  %v10758_v25 = vld [vmem:[%s17797_s0 + $0x98] sm:$0xf] }
 0x1dc   :  { %1802 = vrot.lane.b32.xlu0 %v12735_v63, %s11421_s27  ;;  %v1534_v44 = vsel %vm1504_vm6, %v1501_v13, %v887_v8  ;;  %v12921_v8 = vld [vmem:[%s17797_s0 + $0x84] sm:$0xf] }
 0x1dd   :  { %v745_v2 = vpop.permute.xlu1 %744  ;;  %v935_v24 = vpop.permute.xlu0 %934  ;;  %v10784_v29 = vcombine.low %v10752_v6, %v12921_v8 }
 0x1de   :  { %v1567_v31 = vsel %vm1537_vm8, %v1534_v44, %v935_v24  ;;  %v1470_v48 = vsel %vm1438_vm5, %v12553_v52, %v745_v2  ;;  %v5633_v24 = vpack.i.b16 %v10752_v6, %v10752_v6 }
 0x1df   :  { %1852 = vrot.lane.b32.xlu1 %v12774_v45, %s11426_s9 }
 0x1e0   :  { %1752 = vrot.lane.b32.xlu0 %v12360_v14, %s11424_s12 }
 0x1e1   :  { %v809_v42 = vpop.permute.xlu1 %808  ;;  %v1080_v33 = vpop.permute.xlu0 %1079 }
 0x1e2   :  { %v1600_v35 = vsel %vm17943_vm4, %v1567_v31, %v1080_v33  ;;  %v1503_v26 = vsel %vm1471_vm7, %v1470_v48, %v809_v42  ;;  %v12933_v42 = vld [vmem:[%s17797_s0 + $0x9c] sm:$0xf]  ;;  %v10754_v33 = vld [vmem:[%s17797_s0 + $0x88] sm:$0xf] }
 0x1e3   :  { %1777 = vrot.lane.b32.xlu1 %v12404_v50, %s11428_s29  ;;  %v10787_v31 = vcombine.low %v10758_v25, %v12933_v42 }
 0x1e4   :  { %1729 = vrot.lane.b32.xlu0 %v12360_v14, %s11422_s28 }
 0x1e5   :  { %v889_v17 = vpop.permute.xlu1 %888  ;;  %v1177_v18 = vpop.permute.xlu0 %1176 }
 0x1e6   :  { %v1633_v37 = vsel %vm17944_vm2, %v1600_v35, %v1177_v18  ;;  %v1536_v32 = vsel %vm1504_vm6, %v1503_v26, %v889_v17  ;;  %v5654_v17 = vpack.i.b16 %v10758_v25, %v10758_v25  ;;  %v12945_v18 = vld [vmem:[%s17797_s0 + $0x8c] sm:$0xf]  ;;  %v10764_v25 = vld [vmem:[%s17797_s0 + $0xb0] sm:$0xf] }
 0x1e7   :  { %1829 = vrot.lane.b32.xlu1 %v12774_v45, %s11425_s18 }
 0x1e8   :  { %1804 = vrot.lane.b32.xlu0 %v12747_v12, %s11421_s27 }
 0x1e9   :  { %v937_v39 = vpop.permute.xlu1 %936  ;;  %v1354_v21 = vpop.permute.xlu0 %1353 }
 0x1ea   :  { %v1666_v27 = vsel %vm17945_vm1, %v1633_v37, %v1354_v21  ;;  %v1569_v59 = vsel %vm1537_vm8, %v1536_v32, %v937_v39  ;;  %v5638_v39 = vrot.slane %v5633_v24, %v11514_v15  ;;  %v12950_v21 = vrot.slane %v10784_v29, 7 }
 0x1eb   :  { %1754 = vrot.lane.b32.xlu1 %v12404_v50, %s11424_s12 }
 0x1ec   :  { %1876 = vrot.lane.b32.xlu0 %v12801_v22, %s11427_s26 }
 0x1ed   :  { %v1082_v9 = vpop.permute.xlu1 %1081  ;;  %v1435_v40 = vpop.permute.xlu0 %1434 }
 0x1ee   :  { %v1699_v10 = vsel %vm17946_vm9, %v1666_v27, %v1435_v40  ;;  %v1602_v36 = vsel %vm17943_vm4, %v1569_v59, %v1082_v9  ;;  %vm17947_vm9 = vmmov %vm17944_vm2  ;;  %vm17950_vm4 = vcmask 1040384   ;;  %v5659_v27 = vrot.slane %v5654_v17, %v11514_v15 }
 0x1ef   :  { %1898 = vrot.lane.b32.xlu1 %v1699_v10, %s17817_s21  ;;  %vm17948_vm2 = vmmov %vm17945_vm1  ;;  %vm17949_vm1 = vcmask 195584   ;;  %v5640_v9 = vpack.i.b16 %v10754_v33, %v10754_v33  ;;  %v10785_v40 = vcombine.low %v10754_v33, %v12945_v18  ;;  %v13027_v33 = vld [vmem:[%s17797_s0 + $0xb4] sm:$0xf] }
 0x1f0   :  { %1854 = vrot.lane.b32.xlu0 %v12801_v22, %s11426_s9  ;;  %17959 = vst [vmem:[#allocation11_spill] sm:$0xff] %v13027_v33 }
 0x1f1   :  { %v1179_v57 = vpop.permute.xlu1 %1178  ;;  %v1437_v38 = vpop.permute.xlu0 %1436 }
 0x1f2   :  { %v1635_v51 = vsel %vm17947_vm9, %v1602_v36, %v1179_v57  ;;  %vm17951_vm9 = vmmov %vm17950_vm4 }
 0x1f3   :  { %1878 = vrot.lane.b32.xlu1 %v1699_v10, %s11427_s26 }
 0x1f4   :  { %1779 = vrot.lane.b32.xlu0 %v12735_v63, %s11428_s29 }
 0x1f5   :  { %v1356_v52 = vpop.permute.xlu1 %1355  ;;  %v12877_v61 = vpop.permute.xlu0 %1794 }
 0x1f6   :  { %v1668_v23 = vsel %vm17948_vm2, %v1635_v51, %v1356_v52  ;;  %vm17953_vm2 = vmmov %vm17950_vm4 }
 0x1f7   :  { %1731 = vrot.lane.b32.xlu1 %v12404_v50, %s11422_s28  ;;  %v1701_v1 = vsel %vm17949_vm1, %v1668_v23, %v1437_v38  ;;  %v12971_v57 = vsel %vm17953_vm2, %v5638_v39, %v12950_v21  ;;  %v12987_v23 = vrot.slane %v10787_v31, 7  ;;  %vm17956_vm1 = vmmov %vm17953_vm2 }
 0x1f8   :  { %1900 = vrot.lane.b32.xlu0 %v1701_v1, %s17817_s21  ;;  %17954 = vst [vmem:[#allocation7_spill] sm:$0xff] %v12971_v57  ;;  %v12978_v36 = vshrl.u32 %v12971_v57, 16  ;;  %v12981_v51 = vshll.u32 %v12971_v57, 16  ;;  %vm17966_vm2 = vmmov %vm17956_vm1 }
 0x1f9   :  { %v1720_v41 = vpop.permute.xlu1 %1719  ;;  %v1745_v55 = vpop.permute.xlu0 %1744 }
 0x1fa   :  { %v1910_v62 = vsel %vm1902_vm14, %v12154_v56, %v1720_v41 }
 0x1fb   :  { %1831 = vrot.lane.b32.xlu1 %v12801_v22, %s11425_s18  ;;  %v1935_v32 = vsel %vm17853_vm15, %v1910_v62, %v1745_v55 }
 0x1fc   :  { %1806 = vrot.lane.b32.xlu0 %v12774_v45, %s11421_s27 }
 0x1fd   :  { %v1820_v34 = vpop.permute.xlu1 %1819  ;;  %v1722_v11 = vpop.permute.xlu0 %1721 }
 0x1fe   :  { %v2010_v41 = vsel %vm2000_vm13, %v12877_v61, %v1820_v34  ;;  %v13005_v34 = vsel %vm17956_vm1, %v5659_v27, %v12987_v23 }
 0x1ff   :  { %1856 = vrot.lane.b32.xlu1 %v1699_v10, %s11426_s9  ;;  %17957 = vst [vmem:[#allocation9_spill] sm:$0xff] %v13005_v34 }
 0x200   :  { %1756 = vrot.lane.b32.xlu0 %v12735_v63, %s11424_s12 }
 0x201   :  { %v12888_v54 = vpop.permute.xlu1 %1844  ;;  %v12896_v3 = vpop.permute.xlu0 %1796 }
 0x202   :  { %v2035_v24 = vsel %vm17852_vm12, %v2010_v41, %v12888_v54 }
 0x203   :  { %1880 = vrot.lane.b32.xlu1 %v1701_v1, %s11427_s26 }
 0x204   :  { %1781 = vrot.lane.b32.xlu0 %v12747_v12, %s11428_s29 }
 0x205   :  { %v1770_v16 = vpop.permute.xlu1 %1769  ;;  %v1869_v35 = vpop.permute.xlu0 %1868 }
 0x206   :  { %v2060_v54 = vsel %vm17843_vm11, %v2035_v24, %v1869_v35 }
 0x207   :  { %1808 = vrot.lane.b32.xlu1 %v12801_v22, %s11421_s27 }
 0x208   :  { %1733 = vrot.lane.b32.xlu0 %v12735_v63, %s11422_s28  ;;  %v10756_v63 = vld [vmem:[%s17797_s0 + $0x90] sm:$0xf] }
 0x209   :  { %v5647_v7 = vpack.i.b16 %v10756_v63, %v10756_v63  ;;  %v1822_v28 = vpop.permute.xlu1 %1821  ;;  %v1847_v29 = vpop.permute.xlu0 %1846 }
 0x20b   :  { %1758 = vrot.lane.b32.xlu1 %v12747_v12, %s11424_s12  ;;  %v10760_v12 = vld [vmem:[%s17797_s0 + $0xa0] sm:$0xf]  ;;  %v5652_v56 = vrot.slane %v5647_v7, %v11514_v15  ;;  %v10762_v7 = vld [vmem:[%s17797_s0 + $0xa8] sm:$0xf] }
 0x20c   :  { %1833 = vrot.lane.b32.xlu0 %v1699_v10, %s11425_s18  ;;  %v5661_v22 = vpack.i.b16 %v10760_v12, %v10760_v12  ;;  %v10788_v2 = vcombine.low %v10760_v12, %v12913_v19  ;;  %v12994_v12 = vrot.slane %v10785_v40, 7  ;;  %v5668_v17 = vpack.i.b16 %v10762_v7, %v10762_v7 }
 0x20d   :  { %v1747_v6 = vpop.permute.xlu1 %1746  ;;  %v1772_v24 = vpop.permute.xlu0 %1771 }
 0x20e   :  { %v5666_v13 = vrot.slane %v5661_v22, %v11514_v15  ;;  %v12947_v44 = vrot.slane %v10788_v2, 7  ;;  %17955 = vst [vmem:[#allocation8_spill] sm:$0xff] %v12994_v12  ;;  %v1960_v22 = vsel %vm17844_vm0, %v1935_v32, %v1770_v16  ;;  %v13010_v2 = vld [vmem:[%s17797_s0 + $0xac] sm:$0xf]  ;;  %v13019_v16 = vshll.u32 %v13005_v34, 16 }
 0x20f   :  { %1783 = vrot.lane.b32.xlu1 %v12774_v45, %s11428_s29  ;;  %v10786_v45 = vcombine.low %v10756_v63, %v12904_v60  ;;  %v6052_v63 = vrot.slane %v12981_v51, 1  ;;  %17958 = vst [vmem:[#allocation10_spill] sm:$0xff] %v13010_v2  ;;  %v1985_v39 = vsel %vm17840_vm10, %v1960_v22, %v12877_v61  ;;  %v10789_v35 = vcombine.low %v10762_v7, %v13010_v2 }
 0x210   :  { %1858 = vrot.lane.b32.xlu0 %v1701_v1, %s11426_s9  ;;  %v12967_v26 = vsel %vm17951_vm9, %v5666_v13, %v12947_v44  ;;  %v5645_v1 = vrot.slane %v5640_v9, %v11514_v15  ;;  %v6070_v31 = vrot.slane %v13019_v16, 1  ;;  %v2012_v9 = vsel %vm2000_vm13, %v12896_v3, %v1822_v28 }
 0x211   :  { %v12939_v20 = vrot.slane %v10786_v45, 7  ;;  %17952 = vst [vmem:[#allocation6_spill] sm:$0xff] %v12967_v26  ;;  %v12975_v59 = vshll.u32 %v12967_v26, 16  ;;  %v12985_v38 = vshrl.u32 %v12967_v26, 16  ;;  %v1912_v45 = vsel %vm1902_vm14, %v12174_v49, %v1722_v11 }
 0x212   :  { %v6053_v49 = vor.u32 %v6052_v63, %v12978_v36  ;;  %v13016_v11 = vshrl.u32 %v13005_v34, 16  ;;  %v5673_v32 = vrot.slane %v5668_v17, %v11514_v15  ;;  %v1937_v61 = vsel %vm17853_vm15, %v1912_v45, %v1747_v6 }
 0x213   :  { %v12955_v37 = vsel %vm17950_vm4, %v5652_v56, %v12939_v20  ;;  %v6076_v55 = vrot.slane %v12975_v59, 1  ;;  %vm17960_vm4 = vmmov %vm17956_vm1  ;;  %vm17963_vm9 = vcmask 719872   ;;  %v13051_v63 = vrot.slane %v10789_v35, 7 }
 0x214   :  { %v12960_v10 = vshrl.u32 %v12955_v37, 16  ;;  %v12963_v48 = vshll.u32 %v12955_v37, 16  ;;  %v13034_v13 = vsel %vm17960_vm4, %v5645_v1, %v12994_v12  ;;  %6144 = vrot.lane.b32.xlu0 %v6053_v49, %s11414_s30  ;;  %v10790_v1 = vcombine.low %v10764_v25, %v13027_v33  ;;  %vm17970_vm4 = vmmov %vm17963_vm9 }
 0x215   :  { %v6077_v56 = vor.u32 %v6076_v55, %v12985_v38  ;;  %17961 = vst [vmem:[#allocation12_spill] sm:$0xff] %v13034_v13  ;;  %v13041_v27 = vshll.u32 %v13034_v13, 16  ;;  %v6071_v55 = vor.u32 %v6070_v31, %v13016_v11  ;;  %17964 = vst [vmem:[#allocation14_spill] sm:$0xff] %v13051_v63  ;;  %v6194_v7 = vrot.slane %v12955_v37, 1 }
 0x216   :  { %v6064_v52 = vrot.slane %v12963_v48, 1  ;;  %v13056_v28 = vshrl.u32 %v13034_v13, 16  ;;  %v6192_v45 = vrot.slane %v12971_v57, 1  ;;  %v13063_v6 = vsel %vm17966_vm2, %v5673_v32, %v13051_v63  ;;  %vm17972_vm2 = vmmov %vm17970_vm4 }
 0x217   :  { %17962 = vst [vmem:[#allocation13_spill] sm:$0xff] %v13041_v27  ;;  %17967 = vst [vmem:[#allocation16_spill] sm:$0xff] %v13063_v6  ;;  %v13070_v17 = vshll.u32 %v13063_v6, 16  ;;  %v2037_v31 = vsel %vm17852_vm12, %v2012_v9, %v1847_v29  ;;  %v1962_v35 = vsel %vm17844_vm0, %v1937_v61, %v1772_v24  ;;  %v6195_v32 = vrot.slane %v13005_v34, 1 }
 0x218   :  { %v6065_v62 = vor.u32 %v6064_v52, %v12960_v10  ;;  %v5675_v52 = vpack.i.b16 %v10764_v25, %v10764_v25  ;;  %17965 = vst [vmem:[#allocation15_spill] sm:$0xff] %v13056_v28  ;;  %6150 = vrot.lane.b32.xlu0 %v6071_v55, %s11414_s30  ;;  %v13066_v25 = vrot.slane %v10790_v1, 7  ;;  %v6249_v63 = vrot.slane %v13016_v11, 1 }
 0x219   :  { %v6082_v1 = vrot.slane %v13070_v17, 1 }
 0x21a   :  { %6148 = vrot.lane.b32.xlu1 %v6065_v62, %s11414_s30  ;;  %v6058_v62 = vrot.slane %v13041_v27, 1  ;;  %v5680_v49 = vrot.slane %v5675_v52, %v11514_v15  ;;  %17968 = vst [vmem:[#allocation17_spill] sm:$0xff] %v13066_v25  ;;  %v13079_v52 = vshrl.u32 %v13063_v6, 16 }
 0x21c   :  { %6208 = vrot.lane.b32.xlu0 %v6192_v45, %s11413_s23  ;;  %v13084_v55 = vsel %vm17956_vm1, %v5680_v49, %v13066_v25  ;;  %v6196_v45 = vrot.slane %v12967_v26, 1 }
 0x21d   :  { %17969 = vst [vmem:[#allocation18_spill] sm:$0xff] %v13084_v55  ;;  %v13101_v49 = vshll.u32 %v13084_v55, 16  ;;  %v13111_v33 = vshrl.u32 %v13084_v55, 16 }
 0x21e   :  { %6152 = vrot.lane.b32.xlu1 %v6077_v56, %s11414_s30 }
 0x220   :  { %6214 = vrot.lane.b32.xlu0 %v6195_v32, %s11413_s23  ;;  %v6088_v32 = vrot.slane %v13101_v49, 1 }
 0x221   :  { %v1891_v40 = vpop.permute.xlu1 %1890 }
 0x222   :  { %v2084_v41 = vsel %vm17963_vm9, %v2060_v54, %v1891_v40  ;;  %6212 = vrot.lane.b32.xlu1 %v6194_v7, %s11413_s23  ;;  %v6059_v40 = vor.u32 %v6058_v62, %v13056_v28  ;;  %v13089_v62 = vsel %vm17840_vm10, %v1962_v35, %v12896_v3  ;;  %v6083_v3 = vor.u32 %v6082_v1, %v13079_v52 }
 0x223   :  { %v2194_v22 = vcombine.low %v1985_v39, %v2084_v41  ;;  %v2195_v29 = vcombine.high %v1985_v39, %v2084_v41  ;;  %v6246_v39 = vrot.slane %v12960_v10, 1  ;;  %v6247_v41 = vrot.slane %v12963_v48, 2 }
 0x224   :  { %6154 = vrot.lane.b32.xlu0 %v6083_v3, %s11414_s30  ;;  %vm17971_vm9 = vcmask 941056  }
 0x225   :  { %v2202_v54 = vrot.slane %v2194_v22, %v12624_v47  ;;  %v1871_v56 = vpop.permute.xlu1 %1870  ;;  %v2209_v35 = vrot.slane %v2195_v29, %v12624_v47  ;;  %v6248_v25 = vor.u32 %v6247_v41, %v6246_v39  ;;  %v6089_v41 = vor.u32 %v6088_v32, %v13111_v33  ;;  %vm17974_vm1 = vmmov %vm17971_vm9 }
 0x226   :  { %v2062_v61 = vsel %vm17843_vm11, %v2037_v31, %v1871_v56  ;;  %6146 = vrot.lane.b32.xlu1 %v6059_v40, %s11414_s30  ;;  %v6240_v56 = vrot.slane %v12978_v36, 1  ;;  %v6241_v31 = vrot.slane %v12981_v51, 2 }
 0x227   :  { %v2210_v9 = vcombine.high %v2202_v54, %v2202_v54 }
 0x228   :  { %v6242_v1 = vor.u32 %v6241_v31, %v6240_v56 }
 0x229   :  { %v1724_v22 = vpop.permute.xlu1 %1723  ;;  %v1893_v7 = vpop.permute.xlu0 %1892 }
 0x22a   :  { %v13092_v24 = vsel %vm17970_vm4, %v2062_v61, %v1893_v7  ;;  %v2385_v61 = vcombine.low %v2202_v54, %v2210_v9  ;;  %6216 = vrot.lane.b32.xlu1 %v6196_v45, %s11413_s23  ;;  %v6250_v54 = vrot.slane %v13019_v16, 2  ;;  %6288 = vrot.lane.b32.xlu0 %v6242_v1, %s11415_s8  ;;  %v6252_v1 = vrot.slane %v12985_v38, 1  ;;  %vm17976_vm4 = vmmov %vm17972_vm2 }
 0x22b   :  { %v2211_v58 = vcombine.low %v13089_v62, %v13092_v24 }
 0x22c   :  { %v6251_v3 = vor.u32 %v6250_v54, %v6249_v63  ;;  %v6253_v54 = vrot.slane %v12975_v59, 2 }
 0x22d   :  { %v2219_v40 = vrot.slane %v2211_v58, %v12624_v47  ;;  %v1824_v7 = vpop.permute.xlu1 %1823  ;;  %v1799_v43 = vpop.permute.xlu0 %1798  ;;  %v2393_v58 = vrot.slane %v2385_v61, %v12624_v47  ;;  %v1914_v61 = vsel %vm1902_vm14, %v12212_v30, %v1724_v22 }
 0x22e   :  { %6292 = vrot.lane.b32.xlu1 %v6248_v25, %s11415_s8  ;;  %v6193_v25 = vrot.slane %v13034_v13, 1  ;;  %v2014_v32 = vsel %vm2000_vm13, %v1799_v43, %v1824_v7  ;;  %6294 = vrot.lane.b32.xlu0 %v6251_v3, %s11415_s8 }
 0x22f   :  { %v2386_v4 = vcombine.low %v2209_v35, %v2219_v40  ;;  %v2227_v3 = vcombine.high %v2219_v40, %v2219_v40  ;;  %v6323_v40 = vrot.slane %v13005_v34, 2 }
 0x231   :  { %v2400_v29 = vrot.slane %v2386_v4, %v12624_v47  ;;  %v1849_v9 = vpop.permute.xlu1 %1848  ;;  %v1749_v35 = vpop.permute.xlu0 %1748 }
 0x232   :  { %v1939_v4 = vsel %vm17853_vm15, %v1914_v61, %v1749_v35  ;;  %6156 = vrot.lane.b32.xlu1 %v6089_v41, %s11414_s30  ;;  %v2039_v30 = vsel %vm17852_vm12, %v2014_v32, %v1849_v9  ;;  %v6320_v41 = vrot.slane %v12971_v57, 2  ;;  %6210 = vrot.lane.b32.xlu0 %v6193_v25, %s11413_s23  ;;  %v13154_v61 = vld [vmem:[%s17800_s2] ss:$0 sm:$0xff] }
 0x233   :  { %v2402_v45 = vcombine.high %v2393_v58, %v2400_v29  ;;  %v2401_v39 = vcombine.low %v2393_v58, %v2400_v29  ;;  %v6197_v58 = vrot.slane %v13063_v6, 1  ;;  %v2212_v29 = vcombine.high %v13089_v62, %v13092_v24 }
 0x234   :  { %v6254_v62 = vor.u32 %v6253_v54, %v6252_v1  ;;  %v2330_v54 = vcombine.high %v13154_v61, %v13154_v61 }
 0x235   :  { %v1873_v56 = vpop.permute.xlu1 %1872  ;;  %10589 = vmatprep.mubr.msk.bf16.mxu0 %vm17971_vm9, %v2402_v45  ;;  %v1774_v31 = vpop.permute.xlu0 %1773  ;;  %vm17978_vm9 = vmmov %vm17974_vm1 }
 0x236   :  { %2692 = vmatmul.mubr.bf16.gmra.mxu0 %v2401_v39  ;;  %v1964_v63 = vsel %vm17844_vm0, %v1939_v4, %v1774_v31  ;;  %v2064_v35 = vsel %vm17843_vm11, %v2039_v30, %v1873_v56  ;;  %6218 = vrot.lane.b32.xlu1 %v6197_v58, %s11413_s23  ;;  %v2226_v56 = vrot.slane %v2212_v29, %v12624_v47  ;;  %v6243_v4 = vrot.slane %v13056_v28, 1 }
 0x237   :  { %v13139_v39 = vsel %vm17840_vm10, %v1964_v63, %v1799_v43  ;;  %v6244_v58 = vrot.slane %v13041_v27, 2  ;;  %6296 = vrot.lane.b32.xlu0 %v6254_v62, %s11415_s8  ;;  %v6322_v63 = vrot.slane %v12955_v37, 2 }
 0x238   :  { %v2403_v25 = vcombine.low %v2227_v3, %v2226_v56  ;;  %v13169_v3 = vcombine.low %v13154_v61, %v2330_v54 }
 0x239   :  { %v1726_v22 = vpop.permute.xlu1 %1725 }
 0x23a   :  { %v1895_v45 = vpop.permute.xlu0 %1894  ;;  %6336 = vrot.lane.b32.xlu1 %v6320_v41, %s11416_s13  ;;  %17973 = vst [vmem:[#allocation19_spill] sm:$0xff] %v13169_v3  ;;  %v1916_v56 = vsel %vm1902_vm14, %v12259_v5, %v1726_v22 }
 0x23b   :  { %v13142_v7 = vsel %vm17972_vm2, %v2064_v35, %v1895_v45  ;;  %v6245_v35 = vor.u32 %v6244_v58, %v6243_v4  ;;  %v2411_v45 = vrot.slane %v2403_v25, %v12624_v47  ;;  %6340 = vrot.lane.b32.xlu0 %v6322_v63, %s11416_s13  ;;  %v6324_v58 = vrot.slane %v12967_v26, 2 }
 0x23c   :  { %v2228_v9 = vcombine.low %v13139_v39, %v13142_v7 }
 0x23d   :  { %v1826_v24 = vpop.permute.xlu1 %1825 }
 0x23e   :  { %v2236_v43 = vrot.slane %v2228_v9, %v12624_v47  ;;  %v1801_v31 = vpop.permute.xlu0 %1800  ;;  %6342 = vrot.lane.b32.xlu1 %v6323_v40, %s11416_s13 }
 0x23f   :  { %v2016_v25 = vsel %vm2000_vm13, %v1801_v31, %v1826_v24 }
 0x240   :  { %v2244_v32 = vcombine.high %v2236_v43, %v2236_v43 }
 0x241   :  { %v1851_v1 = vpop.permute.xlu1 %1850 }
 0x242   :  { %v2404_v30 = vcombine.low %v2236_v43, %v2244_v32  ;;  %v1751_v29 = vpop.permute.xlu0 %1750  ;;  %6290 = vrot.lane.b32.xlu1 %v6245_v35, %s11415_s8  ;;  %v2041_v5 = vsel %vm17852_vm12, %v2016_v25, %v1851_v1  ;;  %v13186_v35 = vcombine.low %v13154_v61, %v13154_v61 }
 0x243   :  { %v1941_v40 = vsel %vm17853_vm15, %v1916_v56, %v1751_v29 }
 0x244   :  { %v2418_v41 = vrot.slane %v2404_v30, %v12624_v47  ;;  %v10958_v9 = vpop.f32.mrf.mxu0  ;;  %17975 = vst [vmem:[#allocation20_spill] sm:$0xff] %v13186_v35 }
 0x245   :  { %v1875_v62 = vpop.permute.xlu1 %1874 }
 0x246   :  { %v10959_v34 = vpop.f32.mrf.mxu0  ;;  %v1776_v43 = vpop.permute.xlu0 %1775  ;;  %v2420_v32 = vcombine.high %v2411_v45, %v2418_v41  ;;  %v2419_v2 = vcombine.low %v2411_v45, %v2418_v41  ;;  %v2066_v29 = vsel %vm17843_vm11, %v2041_v5, %v1875_v62  ;;  %6344 = vrot.lane.b32.xlu1 %v6324_v58, %s11416_s13 }
 0x247   :  { %v10960_v4 = vadd.f32 %v10959_v34, %v10958_v9  ;;  %v1966_v63 = vsel %vm17844_vm0, %v1941_v40, %v1776_v43  ;;  %v2229_v34 = vcombine.high %v13139_v39, %v13142_v7 }
 0x248   :  { %v10961_v30 = vpop.f32.mrf.mxu0  ;;  %10590 = vmatprep.mubr.msk.bf16.mxu0 %vm17974_vm1, %v2420_v32  ;;  %v1991_v56 = vsel %vm17840_vm10, %v1966_v63, %v1801_v31  ;;  %vm3283_vm1 = vcmask 523264  }
 0x249   :  { %v2670_v22 = vadd.f32 %v10960_v4, %v13169_v3  ;;  %v1728_v12 = vpop.permute.xlu1 %1727  ;;  %2700 = vmatmul.mubr.bf16.gmra.mxu0 %v2419_v2  ;;  %v2243_v39 = vrot.slane %v2229_v34, %v12624_v47 }
 0x24a   :  { %v10962_v24 = vpop.f32.mrf.mxu0  ;;  %v1897_v45 = vpop.permute.xlu0 %1896 }
 0x24b   :  { %v2758_v41 = vcombine.high %v2670_v22, %v2670_v22  ;;  %v10963_v9 = vadd.f32 %v10962_v24, %v10961_v30  ;;  %v2090_v1 = vsel %vm17976_vm4, %v2066_v29, %v1897_v45  ;;  %v2794_v25 = vmax.f32 %v2670_v22, 0.0  ;;  %vm17979_vm4 = vmmov %vm17972_vm2 }
 0x24c   :  { %v2245_v2 = vcombine.low %v1991_v56, %v2090_v1  ;;  %v2246_v43 = vcombine.high %v1991_v56, %v2090_v1 }
 0x24d   :  { %v1828_v32 = vpop.permute.xlu1 %1827  ;;  %v2795_v7 = vmax.f32 %v2758_v41, 0.0  ;;  %v2673_v62 = vadd.f32 %v10963_v9, %v13186_v35 }
 0x24e   :  { %v2253_v40 = vrot.slane %v2245_v2, %v12624_v47  ;;  %v1803_v4 = vpop.permute.xlu0 %1802  ;;  %v2260_v30 = vrot.slane %v2246_v43, %v12624_v47  ;;  %v13198_v2 = vcombine.low %v2330_v54, %v13154_v61 }
 0x24f   :  { %v2854_v29 = vcombine.low %v2794_v25, %v2795_v7  ;;  %v2796_v24 = vmax.f32 %v2673_v62, 0.0 }
 0x250   :  { %v2261_v5 = vcombine.high %v2253_v40, %v2253_v40  ;;  %v2421_v31 = vcombine.low %v2243_v39, %v2253_v40  ;;  %17977 = vst [vmem:[#allocation21_spill] sm:$0xff] %v13198_v2  ;;  %v2759_v39 = vcombine.high %v2673_v62, %v2673_v62  ;;  %v1918_v62 = vsel %vm1902_vm14, %v12321_v53, %v1728_v12 }
 0x251   :  { %v1853_v63 = vpop.permute.xlu1 %1852  ;;  %v2878_v9 = vpack.c.bf16 %v2796_v24, %v2854_v29  ;;  %v10596_v28 = vpack.c.bf16 %v2796_v24, %v2796_v24 }
 0x252   :  { %v2422_v58 = vcombine.low %v2261_v5, %v2260_v30  ;;  %v1753_v45 = vpop.permute.xlu0 %1752  ;;  %v2429_v56 = vrot.slane %v2421_v31, %v12624_v47 }
 0x253   :  { %v2914_v30 = vrot.slane %v2878_v9, %v12624_v47  ;;  %v2018_v9 = vsel %vm2000_vm13, %v1803_v4, %v1828_v32  ;;  %v2921_v24 = vrot.slane %v10596_v28, %v12624_v47 }
 0x254   :  { %v2436_v34 = vrot.slane %v2422_v58, %v12624_v47  ;;  %v2797_v58 = vmax.f32 %v2759_v39, 0.0  ;;  %v2043_v39 = vsel %vm17852_vm12, %v2018_v9, %v1853_v63 }
 0x255   :  { %v10964_v41 = vpop.f32.mrf.mxu0  ;;  %v1778_v1 = vpop.permute.xlu1 %1777 }
 0x256   :  { %v1730_v26 = vpop.permute.xlu0 %1729  ;;  %v2438_v22 = vcombine.high %v2429_v56, %v2436_v34  ;;  %v2437_v43 = vcombine.low %v2429_v56, %v2436_v34  ;;  %v2922_v56 = vcombine.high %v2914_v30, %v2914_v30  ;;  %v1943_v34 = vsel %vm17853_vm15, %v1918_v62, %v1753_v45 }
 0x257   :  { %v10965_v57 = vpop.f32.mrf.mxu0  ;;  %v1920_v28 = vsel %vm1902_vm14, %v12324_v46, %v1730_v26 }
 0x258   :  { %v10966_v40 = vadd.f32 %v10965_v57, %v10964_v41  ;;  %10591 = vmatprep.mubr.msk.bf16.mxu0 %vm17978_vm9, %v2438_v22  ;;  %v3100_v32 = vcombine.low %v2914_v30, %v2922_v56 }
 0x259   :  { %v10967_v7 = vpop.f32.mrf.mxu0  ;;  %v1830_v25 = vpop.permute.xlu1 %1829  ;;  %2708 = vmatmul.mubr.bf16.gmra.mxu0 %v2437_v43 }
 0x25a   :  { %v2678_v5 = vadd.f32 %v10966_v40, %v13198_v2  ;;  %v1805_v31 = vpop.permute.xlu0 %1804  ;;  %v1968_v40 = vsel %vm17844_vm0, %v1943_v34, %v1778_v1 }
 0x25b   :  { %v10968_v29 = vpop.f32.mrf.mxu0  ;;  %v2020_v30 = vsel %vm2000_vm13, %v1805_v31, %v1830_v25 }
 0x25c   :  { %v2760_v27 = vcombine.high %v2678_v5, %v2678_v5  ;;  %v2798_v61 = vmax.f32 %v2678_v5, 0.0  ;;  %v10969_v54 = vadd.f32 %v10968_v29, %v10967_v7 }
 0x25d   :  { %v1755_v57 = vpop.permute.xlu1 %1754 }
 0x25e   :  { %v2799_v41 = vmax.f32 %v2760_v27, 0.0  ;;  %v2855_v22 = vcombine.low %v2797_v58, %v2798_v61  ;;  %v1877_v43 = vpop.permute.xlu0 %1876  ;;  %v2681_v7 = vadd.f32 %v10969_v54, %v13169_v3  ;;  %v1993_v27 = vsel %vm17840_vm10, %v1968_v40, %v1803_v4 }
 0x25f   :  { %v2068_v53 = vsel %vm17843_vm11, %v2043_v39, %v1877_v43  ;;  %v1945_v56 = vsel %vm17853_vm15, %v1920_v28, %v1755_v57 }
 0x260   :  { %v2879_v6 = vpack.c.bf16 %v2799_v41, %v2855_v22  ;;  %v2761_v61 = vcombine.high %v2681_v7, %v2681_v7  ;;  %v10597_v63 = vpack.c.bf16 %v2799_v41, %v2799_v41 }
 0x261   :  { %v1899_v12 = vpop.permute.xlu1 %1898 }
 0x262   :  { %v2930_v5 = vrot.slane %v2879_v6, %v12624_v47  ;;  %v2092_v45 = vsel %vm17972_vm2, %v2068_v53, %v1899_v12  ;;  %v1855_v29 = vpop.permute.xlu0 %1854  ;;  %v3108_v6 = vrot.slane %v3100_v32, %v12624_v47  ;;  %v2801_v40 = vmax.f32 %v2761_v61, 0.0 }
 0x263   :  { %v2262_v58 = vcombine.low %v1993_v27, %v2092_v45  ;;  %v2937_v46 = vrot.slane %v10597_v63, %v12624_v47  ;;  %v2045_v26 = vsel %vm17852_vm12, %v2020_v30, %v1855_v29 }
 0x264   :  { %v3101_v1 = vcombine.low %v2921_v24, %v2930_v5  ;;  %v2938_v43 = vcombine.high %v2930_v5, %v2930_v5 }
 0x265   :  { %v2270_v62 = vrot.slane %v2262_v58, %v12624_v47  ;;  %v10970_v54 = vpop.f32.mrf.mxu0  ;;  %v1879_v34 = vpop.permute.xlu1 %1878  ;;  %v2800_v58 = vmax.f32 %v2681_v7, 0.0 }
 0x266   :  { %v1780_v22 = vpop.permute.xlu0 %1779  ;;  %v3115_v4 = vrot.slane %v3101_v1, %v12624_v47  ;;  %v2263_v1 = vcombine.high %v1993_v27, %v2092_v45  ;;  %v2070_v5 = vsel %vm17843_vm11, %v2045_v26, %v1879_v34  ;;  %v13230_v61 = vcombine.low %v2938_v43, %v2937_v46 }
 0x267   :  { %v2278_v9 = vcombine.high %v2270_v62, %v2270_v62  ;;  %v10971_v41 = vpop.f32.mrf.mxu0  ;;  %v1970_v39 = vsel %vm17844_vm0, %v1945_v56, %v1780_v22  ;;  %v17980_v22 = vmov 0.0   ;;  %v2856_v7 = vcombine.low %v2800_v58, %v2801_v40 }
 0x268   :  { %v10972_v24 = vadd.f32 %v10971_v41, %v10970_v54  ;;  %v3116_v53 = vcombine.low %v3108_v6, %v3115_v4  ;;  %v1995_v28 = vsel %vm17840_vm10, %v1970_v39, %v1805_v31  ;;  %v2277_v43 = vrot.slane %v2263_v1, %v12624_v47 }
 0x269   :  { %v10973_v12 = vpop.f32.mrf.mxu0  ;;  %v1732_v32 = vpop.permute.xlu1 %1731  ;;  %v2439_v54 = vcombine.low %v2270_v62, %v2278_v9 }
 0x26a   :  { %v2686_v25 = vadd.f32 %v10972_v24, %v13186_v35  ;;  %11117 = vmatmul.mubr.msk.bf16.vlgmr.msra.gmra.mxu1 %vm3283_vm1, %v3116_v53  ;;  %v13228_v57 = vpop.permute.xlu0 %1900  ;;  %v1922_v39 = vsel %vm1902_vm14, %v12360_v14, %v1732_v32  ;;  %v3125_v24 = vrot.slane %v13230_v61, %v12624_v47 }
 0x26b   :  { %v2094_v29 = vsel %vm17979_vm4, %v2070_v5, %v13228_v57  ;;  %v10974_v63 = vpop.f32.mrf.mxu0  ;;  %11120 = vmatprep.mubr.msk.bf16.mxu1 %vm17872_vm3, %v17980_v22  ;;  %v2447_v41 = vrot.slane %v2439_v54, %v12624_v47  ;;  %v5761_v54 = vshrl.u32 %v12904_v60, 16  ;;  %v10766_v60 = vld [vmem:[%s17797_s0 + $0xb8] sm:$0xf]  ;;  %vm17981_vm4 = vcmask 1040384  }
 0x26c   :  { %v2762_v27 = vcombine.high %v2686_v25, %v2686_v25  ;;  %v2802_v45 = vmax.f32 %v2686_v25, 0.0  ;;  %v2279_v34 = vcombine.low %v1995_v28, %v2094_v29  ;;  %v2280_v6 = vcombine.high %v1995_v28, %v2094_v29 }
 0x26d   :  { %v10975_v4 = vadd.f32 %v10974_v63, %v10973_v12  ;;  %v1832_v30 = vpop.permute.xlu1 %1831 }
 0x26e   :  { %v2880_v56 = vpack.c.bf16 %v2802_v45, %v2856_v7  ;;  %v10598_v62 = vpack.c.bf16 %v2802_v45, %v2802_v45  ;;  %v2287_v31 = vrot.slane %v2279_v34, %v12624_v47  ;;  %v1807_v9 = vpop.permute.xlu0 %1806  ;;  %v2803_v53 = vmax.f32 %v2762_v27, 0.0 }
 0x26f   :  { %v2689_v40 = vadd.f32 %v10975_v4, %v13198_v2  ;;  %v2294_v58 = vrot.slane %v2280_v6, %v12624_v47  ;;  %v2022_v32 = vsel %vm2000_vm13, %v1807_v9, %v1832_v30  ;;  %v5762_v45 = vpack.i.b16 %v5761_v54, %v5761_v54  ;;  %v13258_v30 = vld [vmem:[%s17797_s0 + $0xbc] sm:$0xf] }
 0x270   :  { %v2946_v46 = vrot.slane %v2880_v56, %v12624_v47  ;;  %v2295_v26 = vcombine.high %v2287_v31, %v2287_v31  ;;  %v2440_v12 = vcombine.low %v2277_v43, %v2287_v31  ;;  %v2953_v28 = vrot.slane %v10598_v62, %v12624_v47 }
 0x271   :  { %v2763_v1 = vcombine.high %v2689_v40, %v2689_v40  ;;  %v2804_v5 = vmax.f32 %v2689_v40, 0.0  ;;  %v1857_v25 = vpop.permute.xlu1 %1856 }
 0x272   :  { %v2954_v14 = vcombine.high %v2946_v46, %v2946_v46  ;;  %v1757_v29 = vpop.permute.xlu0 %1756  ;;  %v2454_v61 = vrot.slane %v2440_v12, %v12624_v47  ;;  %v2457_v63 = vcombine.low %v2295_v26, %v2294_v58  ;;  %v2047_v6 = vsel %vm17852_vm12, %v2022_v32, %v1857_v25 }
 0x273   :  { %v2805_v7 = vmax.f32 %v2763_v1, 0.0  ;;  %v2857_v27 = vcombine.low %v2803_v53, %v2804_v5  ;;  %v1947_v31 = vsel %vm17853_vm15, %v1922_v39, %v1757_v29  ;;  %v5767_v53 = vrot.slane %v5762_v45, %v11681_v0 }
 0x274   :  { %v3118_v34 = vcombine.low %v2946_v46, %v2954_v14  ;;  %v2456_v4 = vcombine.high %v2447_v41, %v2454_v61  ;;  %v2455_v43 = vcombine.low %v2447_v41, %v2454_v61  ;;  %v5682_v12 = vpack.i.b16 %v10766_v60, %v10766_v60 }
 0x275   :  { %v2881_v56 = vpack.c.bf16 %v2805_v7, %v2857_v27  ;;  %v10599_v62 = vpack.c.bf16 %v2805_v7, %v2805_v7  ;;  %v13261_v40 = vpop.permute.xlu1 %1880  ;;  %v10791_v58 = vcombine.low %v10766_v60, %v13258_v30  ;;  %v13277_v32 = vsel %vm17981_vm4, %v12939_v20, %v5767_v53 }
 0x276   :  { %v2072_v41 = vsel %vm17843_vm11, %v2047_v6, %v13261_v40  ;;  %10592 = vmatprep.mubr.msk.bf16.mxu0 %vm17978_vm9, %v2456_v4  ;;  %v1782_v46 = vpop.permute.xlu0 %1781  ;;  %v3132_v26 = vrot.slane %v3118_v34, %v12624_v47  ;;  %v6382_v29 = vrot.slane %v12960_v10, 2  ;;  %v2465_v4 = vrot.slane %v2457_v63, %v12624_v47 }
 0x277   :  { %v2962_v1 = vrot.slane %v2881_v56, %v12624_v47  ;;  %v2969_v5 = vrot.slane %v10599_v62, %v12624_v47  ;;  %v2095_v39 = vsel %vm17972_vm2, %v2072_v41, %v13228_v57  ;;  %v1972_v25 = vsel %vm17844_vm0, %v1947_v31, %v1782_v46  ;;  %2716 = vmatmul.mubr.bf16.gmra.mxu0 %v2455_v43  ;;  %vm17983_vm2 = vmmov %vm17981_vm4 }
 0x278   :  { %v1997_v54 = vsel %vm17840_vm10, %v1972_v25, %v1807_v9  ;;  %v3133_v14 = vcombine.low %v3125_v24, %v3132_v26  ;;  %v6198_v43 = vrot.slane %v13084_v55, 1  ;;  %v6383_v9 = vrot.slane %v12963_v48, 3  ;;  %vm17985_vm4 = vmmov %vm17983_vm2 }
 0x279   :  { %v2970_v61 = vcombine.high %v2962_v1, %v2962_v1  ;;  %v2296_v7 = vcombine.low %v1997_v54, %v2095_v39  ;;  %v2297_v27 = vcombine.high %v1997_v54, %v2095_v39  ;;  %v1809_v45 = vpop.permute.xlu1 %1808  ;;  %v3134_v34 = vcombine.low %v2953_v28, %v2962_v1 }
 0x27a   :  { %11121 = vmatmul.mubr.msk.bf16.gmra.mxu1 %vm3283_vm1, %v3133_v14  ;;  %v1734_v6 = vpop.permute.xlu0 %1733  ;;  %v6385_v24 = vshll.u32 %v13277_v32, 16  ;;  %v5687_v56 = vrot.slane %v5682_v12, %v11514_v15  ;;  %6220 = vrot.lane.b32.xlu0 %v6198_v43, %s11413_s23  ;;  %v6384_v63 = vor.u32 %v6383_v9, %v6382_v29  ;;  %v6255_v53 = vrot.slane %v13079_v52, 1 }
 0x27b   :  { %v2304_v20 = vrot.slane %v2296_v7, %v12624_v47  ;;  %v13287_v60 = vrot.slane %v2297_v27, %v12624_v47  ;;  %11124 = vmatprep.mubr.msk.bf16.mxu1 %vm17872_vm3, %v17980_v22  ;;  %v3135_v28 = vcombine.low %v2970_v61, %v2969_v5  ;;  %v3142_v62 = vrot.slane %v3134_v34, %v12624_v47 }
 0x27c   :  { %v6387_v31 = vrot.slane %v6385_v24, 3  ;;  %v6256_v1 = vrot.slane %v13070_v17, 2  ;;  %v13299_v39 = vrot.slane %v10791_v58, 7  ;;  %v1924_v12 = vsel %vm1902_vm14, %v12404_v50, %v1734_v6 }
 0x27d   :  { %v2312_v41 = vcombine.high %v2304_v20, %v2304_v20  ;;  %v1759_v46 = vpop.permute.xlu1 %1758  ;;  %v3149_v26 = vrot.slane %v3135_v28, %v12624_v47  ;;  %vm17982_vm9 = vsmask.f32 5376  ;;  %v5745_v54 = vshrl.u32 %v12921_v8, 16 }
 0x27e   :  { %v1834_v5 = vpop.permute.xlu0 %1833  ;;  %v6388_v25 = vsel %vm17982_vm9, %v6384_v63, %v6387_v31  ;;  %v6368_v14 = vrot.slane %v12978_v36, 2  ;;  %v1949_v61 = vsel %vm17853_vm15, %v1924_v12, %v1759_v46  ;;  %v6257_v27 = vor.u32 %v6256_v1, %v6255_v53 }
 0x27f   :  { %v2458_v29 = vcombine.low %v2304_v20, %v2312_v41  ;;  %v3150_v7 = vcombine.low %v3142_v62, %v3149_v26  ;;  %6484 = vrot.lane.b32.xlu1 %v6388_v25, %s11417_s14  ;;  %v13310_v58 = vsel %vm17983_vm2, %v5687_v56, %v13299_v39  ;;  %v5746_v34 = vpack.i.b16 %v5745_v54, %v5745_v54 }
 0x280   :  { %17984 = vst [vmem:[#allocation22_spill] sm:$0xff] %v13310_v58  ;;  %v6369_v50 = vrot.slane %v12981_v51, 3  ;;  %v5769_v6 = vshrl.u32 %v12933_v42, 16  ;;  %v2024_v8 = vsel %vm2000_vm13, %v1809_v45, %v1834_v5  ;;  %6298 = vrot.lane.b32.xlu0 %v6257_v27, %s11415_s8  ;;  %v13318_v20 = vshrl.u32 %v13310_v58, 16 }
 0x281   :  { %v1784_v43 = vpop.permute.xlu1 %1783  ;;  %v2472_v9 = vrot.slane %v2458_v29, %v12624_v47  ;;  %v13321_v28 = vshll.u32 %v13310_v58, 16  ;;  %v5751_v42 = vrot.slane %v5746_v34, %v11681_v0  ;;  %v5777_v31 = vshrl.u32 %v12913_v19, 16 }
 0x282   :  { %v1974_v56 = vsel %vm17844_vm0, %v1949_v61, %v1784_v43  ;;  %11125 = vmatmul.mubr.msk.bf16.gmra.mxu1 %vm3283_vm1, %v3150_v7  ;;  %v1859_v62 = vpop.permute.xlu0 %1858  ;;  %v6370_v63 = vor.u32 %v6369_v50, %v6368_v14  ;;  %v5770_v25 = vpack.i.b16 %v5769_v6, %v5769_v6  ;;  %vm17986_vm9 = vcmask 719872  }
 0x283   :  { %v1999_v53 = vsel %vm17840_vm10, %v1974_v56, %v1809_v45  ;;  %v2049_v41 = vsel %vm17852_vm12, %v2024_v8, %v1859_v62  ;;  %v2474_v46 = vcombine.high %v2465_v4, %v2472_v9  ;;  %v2473_v26 = vcombine.low %v2465_v4, %v2472_v9  ;;  %11128 = vmatprep.mubr.msk.bf16.mxu1 %vm17872_vm3, %v17980_v22 }
 0x284   :  { %v2073_v1 = vsel %vm17843_vm11, %v2049_v41, %v13261_v40  ;;  %v6094_v12 = vrot.slane %v13321_v28, 1  ;;  %v13336_v5 = vsel %vm17985_vm4, %v12950_v21, %v5751_v42  ;;  %vm17987_vm2 = vcmask 941056  }
 0x285   :  { %v2096_v19 = vsel %vm17986_vm9, %v2073_v1, %v13228_v57  ;;  %10593 = vmatprep.mubr.msk.bf16.mxu0 %vm17987_vm2, %v2474_v46  ;;  %v6371_v45 = vshll.u32 %v13336_v5, 16  ;;  %v6389_v4 = vrot.slane %v13016_v11, 2  ;;  %v6390_v54 = vrot.slane %v13019_v16, 3  ;;  %vm17989_vm2 = vmmov %vm17985_vm4 }
 0x286   :  { %v2313_v14 = vcombine.low %v1999_v53, %v2096_v19  ;;  %v2314_v40 = vcombine.high %v1999_v53, %v2096_v19  ;;  %2724 = vmatmul.mubr.bf16.gmra.mxu0 %v2473_v26  ;;  %v6095_v29 = vor.u32 %v6094_v12, %v13318_v20  ;;  %v5775_v21 = vrot.slane %v5770_v25, %v11681_v0 }
 0x287   :  { %v6373_v61 = vrot.slane %v6371_v45, 3  ;;  %v6321_v57 = vrot.slane %v13034_v13, 2  ;;  %v6391_v7 = vor.u32 %v6390_v54, %v6389_v4  ;;  %v5778_v27 = vpack.i.b16 %v5777_v31, %v5777_v31 }
 0x288   :  { %v2321_v34 = vrot.slane %v2313_v14, %v12624_v47  ;;  %6158 = vrot.lane.b32.xlu1 %v6095_v29, %s11414_s30  ;;  %v13353_v50 = vsel %vm17985_vm4, %v12987_v23, %v5775_v21  ;;  %v6396_v6 = vrot.slane %v12985_v38, 2  ;;  %v6397_v8 = vrot.slane %v12975_v59, 3 }
 0x289   :  { %v2328_v43 = vrot.slane %v2314_v40, %v12624_v47  ;;  %vm17988_vm9 = vsmask.f32 5376  ;;  %v6392_v56 = vshll.u32 %v13353_v50, 16  ;;  %v5783_v62 = vrot.slane %v5778_v27, %v11681_v0 }
 0x28a   :  { %v6374_v9 = vsel %vm17988_vm9, %v6370_v63, %v6373_v61  ;;  %v2329_v42 = vcombine.high %v2321_v34, %v2321_v34  ;;  %v2475_v31 = vcombine.low %v13287_v60, %v2321_v34  ;;  %v6258_v23 = vrot.slane %v13111_v33, 1  ;;  %vm17990_vm4 = vmmov %vm17988_vm9  ;;  %v17995_v34 = vld [vmem:[#allocation15_spill] sm:$0xff] }
 0x28b   :  { %6480 = vrot.lane.b32.xlu0 %v6374_v9, %s11417_s14  ;;  %v6259_v53 = vrot.slane %v13101_v49, 2  ;;  %v6394_v41 = vrot.slane %v6392_v56, 3  ;;  %v13369_v46 = vsel %vm17989_vm2, %v12947_v44, %v5783_v62  ;;  %v6398_v26 = vor.u32 %v6397_v8, %v6396_v6  ;;  %vm17991_vm9 = vmmov %vm17990_vm4  ;;  %v17996_v8 = vld [vmem:[#allocation13_spill] sm:$0xff]  ;;  %v17997_v9 = vld [vmem:[#allocation7_spill] sm:$0xff] }
 0x28c   :  { %v2476_v63 = vcombine.low %v2329_v42, %v2328_v43  ;;  %6338 = vrot.lane.b32.xlu1 %v6321_v57, %s11416_s13  ;;  %v6399_v1 = vshll.u32 %v13369_v46, 16  ;;  %v6534_v12 = vrot.slane %v12955_v37, 3  ;;  %v6535_v25 = vrot.slane %v13277_v32, 3 }
 0x28d   :  { %v6395_v60 = vsel %vm17990_vm4, %v6391_v7, %v6394_v41  ;;  %v5753_v19 = vshrl.u32 %v12945_v18, 16  ;;  %v2483_v4 = vrot.slane %v2475_v31, %v12624_v47  ;;  %v6260_v14 = vor.u32 %v6259_v53, %v6258_v23  ;;  %v17994_v7 = vld [vmem:[#allocation16_spill] sm:$0xff]  ;;  %v18000_v53 = vld [vmem:[#allocation10_spill] sm:$0xff] }
 0x28e   :  { %v2490_v54 = vrot.slane %v2476_v63, %v12624_v47  ;;  %v6401_v44 = vrot.slane %v6399_v1, 3  ;;  %vm17992_vm2 = vcmask 941056   ;;  %vm17993_vm4 = vcmask 1044480   ;;  %v17998_v31 = vld [vmem:[#allocation8_spill] sm:$0xff] }
 0x28f   :  { %6486 = vrot.lane.b32.xlu0 %v6395_v60, %s11417_s14  ;;  %v5754_v40 = vpack.i.b16 %v5753_v19, %v5753_v19  ;;  %v6536_v18 = vsel %vm17993_vm4, %v6534_v12, %v6535_v25  ;;  %v6325_v27 = vrot.slane %v17994_v7, 2  ;;  %v6375_v6 = vrot.slane %v17995_v34, 2 }
 0x290   :  { %v2492_v29 = vcombine.high %v2483_v4, %v2490_v54  ;;  %v2491_v21 = vcombine.low %v2483_v4, %v2490_v54  ;;  %v6402_v61 = vsel %vm17991_vm9, %v6398_v26, %v6401_v44  ;;  %v6376_v43 = vrot.slane %v17996_v8, 3  ;;  %v18002_v54 = vld [vmem:[#allocation9_spill] sm:$0xff] }
 0x291   :  { %6488 = vrot.lane.b32.xlu1 %v6402_v61, %s11417_s14  ;;  %v5759_v57 = vrot.slane %v5754_v40, %v11681_v0  ;;  %v6528_v62 = vrot.slane %v17997_v9, 3  ;;  %v6529_v42 = vrot.slane %v13336_v5, 3  ;;  %vm17999_vm9 = vcmask 1040384  }
 0x292   :  { %10594 = vmatprep.mubr.msk.bf16.mxu0 %vm17992_vm2, %v2492_v29  ;;  %v5785_v41 = vshrl.u32 %v18000_v53, 16  ;;  %v6199_v26 = vrot.slane %v13310_v58, 1  ;;  %v6377_v12 = vor.u32 %v6376_v43, %v6375_v6  ;;  %v6629_v19 = vshrl.u32 %v13277_v32, 16  ;;  %vm18001_vm2 = vmmov %vm17993_vm4  ;;  %v18003_v29 = vld [vmem:[#allocation6_spill] sm:$0xff] }
 0x293   :  { %6300 = vrot.lane.b32.xlu0 %v6260_v14, %s11415_s8  ;;  %2732 = vmatmul.mubr.bf16.gmra.mxu0 %v2491_v21  ;;  %v13395_v23 = vsel %vm17999_vm9, %v17998_v31, %v5759_v57  ;;  %v6530_v4 = vsel %vm18001_vm2, %v6528_v62, %v6529_v42  ;;  %v6537_v44 = vrot.slane %v18002_v54, 3  ;;  %v6538_v14 = vrot.slane %v13353_v50, 3  ;;  %v18005_v62 = vld [vmem:[#allocation14_spill] sm:$0xff]  ;;  %vm18006_vm10 = vmmov %vm18001_vm2 }
 0x294   :  { %v6378_v63 = vshll.u32 %v13395_v23, 16  ;;  %v5786_v60 = vpack.i.b16 %v5785_v41, %v5785_v41  ;;  %v6540_v21 = vrot.slane %v18003_v29, 3  ;;  %v6541_v61 = vrot.slane %v13369_v46, 3 }
 0x295   :  { %6580 = vrot.lane.b32.xlu1 %v6536_v18, %s11418_s15  ;;  %v6626_v57 = vrot.slane %v12960_v10, 3  ;;  %v6627_v18 = vrot.slane %v12963_v48, 4  ;;  %vm18004_vm4 = vsmask.f32 5376  ;;  %v6631_v6 = vrot.slane %v6629_v19, 3 }
 0x296   :  { %v6380_v25 = vrot.slane %v6378_v63, 3  ;;  %v5791_v40 = vrot.slane %v5786_v60, %v11681_v0  ;;  %v6632_v43 = vrot.slane %v6385_v24, 4  ;;  %v6539_v31 = vsel %vm18001_vm2, %v6537_v44, %v6538_v14 }
 0x297   :  { %6346 = vrot.lane.b32.xlu0 %v6325_v27, %s11416_s13  ;;  %v6403_v53 = vrot.slane %v13079_v52, 2  ;;  %v6404_v10 = vrot.slane %v13070_v17, 3  ;;  %v6542_v41 = vsel %vm18006_vm10, %v6540_v21, %v6541_v61  ;;  %v6628_v60 = vor.u32 %v6627_v18, %v6626_v57 }
 0x298   :  { %v6381_v27 = vsel %vm18004_vm4, %v6377_v12, %v6380_v25  ;;  %v13420_v42 = vsel %vm17999_vm9, %v18005_v62, %v5791_v40  ;;  %v6611_v24 = vshrl.u32 %v13336_v5, 16  ;;  %v6633_v12 = vor.u32 %v6632_v43, %v6631_v6 }
 0x299   :  { %6222 = vrot.lane.b32.xlu1 %v6199_v26, %s11413_s23  ;;  %v6406_v48 = vshll.u32 %v13420_v42, 16  ;;  %v6326_v26 = vrot.slane %v13084_v55, 2  ;;  %v6608_v25 = vrot.slane %v12978_v36, 3  ;;  %v6609_v19 = vrot.slane %v12981_v51, 4 }
 0x29a   :  { %v6405_v44 = vor.u32 %v6404_v10, %v6403_v53  ;;  %v6613_v40 = vrot.slane %v6611_v24, 3  ;;  %v6261_v21 = vrot.slane %v13318_v20, 1  ;;  %v6262_v61 = vrot.slane %v13321_v28, 2 }
 0x29b   :  { %6576 = vrot.lane.b32.xlu0 %v6530_v4, %s11418_s15  ;;  %v6614_v4 = vrot.slane %v6371_v45, 4  ;;  %v6408_v14 = vrot.slane %v6406_v48, 3  ;;  %v6638_v57 = vshrl.u32 %v13353_v50, 16  ;;  %v6610_v18 = vor.u32 %v6609_v19, %v6608_v25 }
 0x29c   :  { %vm18008_vm10 = vsmask.f32 4352  ;;  %v6635_v6 = vrot.slane %v13016_v11, 3  ;;  %v6636_v43 = vrot.slane %v13019_v16, 4  ;;  %v6647_v62 = vshrl.u32 %v13369_v46, 16 }
 0x29d   :  { %6482 = vrot.lane.b32.xlu1 %v6381_v27, %s11417_s14  ;;  %v6615_v36 = vor.u32 %v6614_v4, %v6613_v40  ;;  %v18007_v27 = vld [vmem:[#allocation11_spill] sm:$0xff]  ;;  %v6634_v45 = vsel %vm18008_vm10, %v6628_v60, %v6633_v12  ;;  %v6640_v53 = vrot.slane %v6638_v57, 3  ;;  %v6641_v10 = vrot.slane %v6392_v56, 4  ;;  %vm18009_vm9 = vmmov %vm18008_vm10 }
 0x29e   :  { %v5793_v51 = vshrl.u32 %v18007_v27, 16  ;;  %v6531_v24 = vrot.slane %v13034_v13, 3  ;;  %v6532_v60 = vrot.slane %v13395_v23, 3  ;;  %v6644_v11 = vrot.slane %v12985_v38, 3  ;;  %v18010_v38 = vld [vmem:[#allocation17_spill] sm:$0xff] }
 0x29f   :  { %6582 = vrot.lane.b32.xlu0 %v6539_v31, %s11418_s15  ;;  %v6409_v31 = vsel %vm18004_vm4, %v6405_v44, %v6408_v14  ;;  %v6637_v12 = vor.u32 %v6636_v43, %v6635_v6  ;;  %v6645_v25 = vrot.slane %v12975_v59, 4  ;;  %v6649_v19 = vrot.slane %v6647_v62, 3  ;;  %vm18013_vm4 = vmmov %vm18009_vm9 }
 0x2a0   :  { %v5794_v16 = vpack.i.b16 %v5793_v51, %v5793_v51  ;;  %v6650_v56 = vrot.slane %v6399_v1, 4  ;;  %v6642_v4 = vor.u32 %v6641_v10, %v6640_v53  ;;  %v6410_v14 = vrot.slane %v13111_v33, 2 }
 0x2a1   :  { %6584 = vrot.lane.b32.xlu1 %v6542_v41, %s11418_s15  ;;  %v6263_v41 = vor.u32 %v6262_v61, %v6261_v21  ;;  %v6411_v40 = vrot.slane %v13101_v49, 3  ;;  %vm18011_vm2 = vcmask 1040384   ;;  %vm18012_vm10 = vcmask 1044480  }
 0x2a2   :  { %v5799_v44 = vrot.slane %v5794_v16, %v11681_v0  ;;  %v6533_v59 = vsel %vm18012_vm10, %v6531_v24, %v6532_v60  ;;  %v6646_v61 = vor.u32 %v6645_v25, %v6644_v11  ;;  %v6651_v57 = vor.u32 %v6650_v56, %v6649_v19 }
 0x2a3   :  { %6348 = vrot.lane.b32.xlu0 %v6326_v26, %s11416_s13  ;;  %v6616_v26 = vsel %vm18009_vm9, %v6610_v18, %v6615_v36  ;;  %v6643_v18 = vsel %vm18013_vm4, %v6637_v12, %v6642_v4  ;;  %v6412_v36 = vor.u32 %v6411_v40, %v6410_v14  ;;  %vm18014_vm9 = vmmov %vm18013_vm4  ;;  %v6791_v6 = vrot.slane %v13277_v32, 4 }
 0x2a4   :  { %v13465_v21 = vsel %vm18011_vm2, %v18010_v38, %v5799_v44  ;;  %v6652_v51 = vsel %vm18014_vm9, %v6646_v61, %v6651_v57  ;;  %vm18015_vm2 = vsmask.f32 5376  ;;  %v6543_v62 = vrot.slane %v17994_v7, 3 }
 0x2a5   :  { %6756 = vrot.lane.b32.xlu1 %v6634_v45, %s11419_s16  ;;  %v6413_v1 = vshll.u32 %v13465_v21, 16  ;;  %v6790_v45 = vrot.slane %v12955_v37, 4  ;;  %vm18016_vm10 = vcmask 1043456   ;;  %v6784_v10 = vrot.slane %v17997_v9, 4 }
 0x2a6   :  { %vm18017_vm4 = vcmask 1044480   ;;  %v6620_v32 = vshrl.u32 %v13395_v23, 16  ;;  %vm18018_vm9 = vmmov %vm18016_vm10  ;;  %v6793_v60 = vrot.slane %v18002_v54, 4  ;;  %v6327_v11 = vrot.slane %v13310_v58, 2 }
 0x2a7   :  { %6490 = vrot.lane.b32.xlu0 %v6409_v31, %s11417_s14  ;;  %v6415_v27 = vrot.slane %v6413_v1, 3  ;;  %v6544_v31 = vrot.slane %v13420_v42, 3  ;;  %v6792_v53 = vsel %vm18016_vm10, %v6790_v45, %v6791_v6  ;;  %v6794_v16 = vrot.slane %v13353_v50, 4 }
 0x2a8   :  { %v6617_v12 = vrot.slane %v17995_v34, 3  ;;  %v6622_v25 = vrot.slane %v6620_v32, 3  ;;  %v6623_v19 = vrot.slane %v6378_v63, 4  ;;  %vm18020_vm10 = vsmask.f32 4352 }
 0x2a9   :  { %6302 = vrot.lane.b32.xlu1 %v6263_v41, %s11415_s8  ;;  %v6416_v43 = vsel %vm18015_vm2, %v6412_v36, %v6415_v27  ;;  %v6785_v41 = vrot.slane %v13336_v5, 4  ;;  %v6545_v24 = vsel %vm18017_vm4, %v6543_v62, %v6544_v31  ;;  %v6618_v5 = vrot.slane %v17996_v8, 4  ;;  %vm18019_vm2 = vmmov %vm18018_vm9 }
 0x2aa   :  { %v6624_v4 = vor.u32 %v6623_v19, %v6622_v25  ;;  %v6795_v44 = vsel %vm18019_vm2, %v6793_v60, %v6794_v16  ;;  %v6546_v50 = vrot.slane %v13084_v55, 3  ;;  %v6547_v34 = vrot.slane %v13465_v21, 3 }
 0x2ab   :  { %6752 = vrot.lane.b32.xlu0 %v6616_v26, %s11419_s16  ;;  %v6786_v26 = vsel %vm18018_vm9, %v6784_v10, %v6785_v41  ;;  %v6619_v56 = vor.u32 %v6618_v5, %v6617_v12  ;;  %v6665_v63 = vshrl.u32 %v13465_v21, 16  ;;  %v13509_v38 = vrot.slane %v6413_v1, 4 }
 0x2ac   :  { %v6548_v8 = vsel %vm18017_vm4, %v6546_v50, %v6547_v34  ;;  %vm18028_vm9 = vcmask 1040384   ;;  %vm4169_vm2 = vcmask 1045504   ;;  %vm4206_vm4 = vcmask 261120  }
 0x2ad   :  { %6578 = vrot.lane.b32.xlu1 %v6533_v59, %s11418_s15  ;;  %v6625_v14 = vsel %vm18020_vm10, %v6619_v56, %v6624_v4  ;;  %v13507_v40 = vrot.slane %v6665_v63, 3  ;;  %v6656_v59 = vshrl.u32 %v13420_v42, 16  ;;  %vm3975_vm10 = vcmask 1046528  }
 0x2ae   :  { %vm18044_vm11 = vsmask.f32 4352  ;;  %vm3794_vm0 = vsmask.f32 7424  ;;  %vm18064_vm12 = vsmask.f32 5376 }
 0x2af   :  { %6758 = vrot.lane.b32.xlu0 %v6643_v18, %s11419_s16  ;;  %v13514_v57 = vrot.slane %v6656_v59, 3  ;;  %v13518_v18 = vrot.slane %v6406_v48, 4  ;;  %v13524_v48 = vpop.permute.xlu1 %6148 }
 0x2b1   :  { %6760 = vrot.lane.b32.xlu1 %v6652_v51, %s11419_s16 }
 0x2b3   :  { %6492 = vrot.lane.b32.xlu0 %v6416_v43, %s11417_s14  ;;  %v13528_v56 = vpop.permute.xlu1 %6152 }
 0x2b4   :  { %18021 = vst [vmem:[#allocation15_spill] sm:$0xff] %v13528_v56 }
 0x2b5   :  { %6836 = vrot.lane.b32.xlu1 %v6792_v53, %s11420_s17 }
 0x2b7   :  { %6586 = vrot.lane.b32.xlu0 %v6545_v24, %s11418_s15 }
 0x2b9   :  { %6350 = vrot.lane.b32.xlu1 %v6327_v11, %s11416_s13 }
 0x2bb   :  { %6832 = vrot.lane.b32.xlu0 %v6786_v26, %s11420_s17 }
 0x2bd   :  { %6754 = vrot.lane.b32.xlu1 %v6625_v14, %s11419_s16 }
 0x2bf   :  { %6838 = vrot.lane.b32.xlu0 %v6795_v44, %s11420_s17 }
 0x2c3   :  { %6588 = vrot.lane.b32.xlu0 %v6548_v8, %s11418_s15 }
 0x2f6   :  { %v10976_v27 = vpop.f32.mrf.mxu0 }
 0x2f8   :  { %v10977_v51 = vpop.f32.mrf.mxu0 }
 0x2f9   :  { %v10978_v45 = vadd.f32 %v10977_v51, %v10976_v27  ;;  %v13530_v51 = vpop.permute.xlu0 %6144 }
 0x2fa   :  { %v10979_v6 = vpop.f32.mrf.mxu0 }
 0x2fb   :  { %v2694_v1 = vadd.f32 %v10978_v45, %v13169_v3 }
 0x2fc   :  { %v10980_v43 = vpop.f32.mrf.mxu0 }
 0x2fd   :  { %v2764_v62 = vcombine.high %v2694_v1, %v2694_v1  ;;  %v10981_v31 = vadd.f32 %v10980_v43, %v10979_v6  ;;  %v2806_v41 = vmax.f32 %v2694_v1, 0.0  ;;  %v13533_v1 = vpop.permute.xlu1 %6212 }
 0x2ff   :  { %v2807_v53 = vmax.f32 %v2764_v62, 0.0  ;;  %v2697_v10 = vadd.f32 %v10981_v31, %v13186_v35 }
 0x301   :  { %v2858_v24 = vcombine.low %v2806_v41, %v2807_v53  ;;  %v2808_v32 = vmax.f32 %v2697_v10, 0.0  ;;  %v2765_v16 = vcombine.high %v2697_v10, %v2697_v10 }
 0x303   :  { %v2882_v60 = vpack.c.bf16 %v2808_v32, %v2858_v24  ;;  %v2809_v44 = vmax.f32 %v2765_v16, 0.0  ;;  %v10600_v8 = vpack.c.bf16 %v2808_v32, %v2808_v32  ;;  %v13540_v24 = vpop.permute.xlu0 %6150  ;;  %v11288_v32 = vld [vmem:[%s17801_s5 + $0x88] sm:$0xff]   ;;  %v17841_v16 = vmov 0  }
 0x304   :  { %4388 = vmatprep.subr.bf16.mxu0 %v17841_v16  ;;  %11196 = vmatprep.subr.bf16.mxu1 %v17841_v16 }
 0x305   :  { %v2978_v25 = vrot.slane %v2882_v60, %v12624_v47  ;;  %v2985_v43 = vrot.slane %v10600_v8, %v12624_v47  ;;  %4389 = vmatpush1.bf16.msra.mxu0 %v11288_v32  ;;  %11206 = vmatpush1.bf16.msra.mxu1 %v11288_v32 }
 0x306   :  { %4390 = vmatprep.subr.bf16.mxu0 %v17841_v16  ;;  %11197 = vmatprep.subr.bf16.mxu1 %v17841_v16 }
 0x307   :  { %v2986_v63 = vcombine.high %v2978_v25, %v2978_v25 }
 0x309   :  { %v10982_v26 = vpop.f32.mrf.mxu0  ;;  %v3151_v31 = vcombine.low %v2978_v25, %v2986_v63 }
 0x30b   :  { %v10983_v11 = vpop.f32.mrf.mxu0 }
 0x30c   :  { %v10984_v12 = vadd.f32 %v10983_v11, %v10982_v26  ;;  %v3159_v26 = vrot.slane %v3151_v31, %v12624_v47  ;;  %v13547_v11 = vpop.permute.xlu1 %6146  ;;  %v13569_v31 = vpop.permute.xlu0 %6208 }
 0x30d   :  { %v10985_v5 = vpop.f32.mrf.mxu0  ;;  %18022 = vst [vmem:[#allocation13_spill] sm:$0xff] %v13547_v11 }
 0x30e   :  { %v2702_v19 = vadd.f32 %v10984_v12, %v13198_v2 }
 0x30f   :  { %v10986_v4 = vpop.f32.mrf.mxu0 }
 0x310   :  { %v2766_v14 = vcombine.high %v2702_v19, %v2702_v19  ;;  %v2810_v50 = vmax.f32 %v2702_v19, 0.0  ;;  %v10987_v34 = vadd.f32 %v10986_v4, %v10985_v5  ;;  %v11289_v4 = vld [vmem:[%s17801_s5 + $0x80] sm:$0xff]  }
 0x311   :  { %4391 = vmatpush1.bf16.msra.mxu0 %v11289_v4  ;;  %11207 = vmatpush1.bf16.msra.mxu1 %v11289_v4 }
 0x312   :  { %v2811_v59 = vmax.f32 %v2766_v14, 0.0  ;;  %v2859_v27 = vcombine.low %v2809_v44, %v2810_v50  ;;  %v2705_v6 = vadd.f32 %v10987_v34, %v13169_v3  ;;  %v13559_v14 = vld [vmem:[%s17802_s4] ss:$0 sm:$0xff]  ;;  %v5801_v50 = vshrl.u32 %v13258_v30, 16  ;;  %4392 = vmatprep.subr.bf16.mxu0 %v17841_v16  ;;  %11198 = vmatprep.subr.bf16.mxu1 %v17841_v16  ;;  %s11434_s4 = smov 64  }
 0x313   :  { %v13579_v32 = vcombine.high %v13559_v14, %v13559_v14 }
 0x314   :  { %v2883_v45 = vpack.c.bf16 %v2811_v59, %v2859_v27  ;;  %v2767_v10 = vcombine.high %v2705_v6, %v2705_v6  ;;  %v2812_v34 = vmax.f32 %v2705_v6, 0.0  ;;  %v10601_v63 = vpack.c.bf16 %v2811_v59, %v2811_v59  ;;  %v13571_v6 = vpop.permute.xlu1 %6216  ;;  %v11290_v59 = vld [vmem:[%s17801_s5 + $0x78] sm:$0xff]  }
 0x315   :  { %18025 = vst [vmem:[#allocation8_spill] sm:$0xff] %v13571_v6  ;;  %4393 = vmatpush1.bf16.msra.mxu0 %v11290_v59  ;;  %11208 = vmatpush1.bf16.msra.mxu1 %v11290_v59 }
 0x316   :  { %v13537_v62 = vrot.slane %v2883_v45, %v12624_v47  ;;  %v2813_v5 = vmax.f32 %v2767_v10, 0.0  ;;  %v18023_v45 = vld [vmem:[#allocation2_spill] sm:$0xff]  ;;  %v3001_v4 = vrot.slane %v10601_v63, %v12624_v47  ;;  %4394 = vmatprep.subr.bf16.mxu0 %v17841_v16  ;;  %11199 = vmatprep.subr.bf16.mxu1 %v17841_v16 }
 0x318   :  { %v3152_v53 = vcombine.low %v2985_v43, %v13537_v62  ;;  %v13567_v43 = vsub.s32 5, %v18023_v45 }
 0x319   :  { %v10988_v41 = vpop.f32.mrf.mxu0 }
 0x31a   :  { %v3166_v60 = vrot.slane %v3152_v53, %v12624_v47  ;;  %18024 = vst [vmem:[#allocation7_spill] sm:$0xff] %v13567_v43  ;;  %v2860_v53 = vcombine.low %v2812_v34, %v2813_v5  ;;  %v3002_v5 = vcombine.high %v13537_v62, %v13537_v62  ;;  %v11291_v62 = vld [vmem:[%s17801_s5 + $0x70] sm:$0xff]  }
 0x31b   :  { %v10989_v12 = vpop.f32.mrf.mxu0  ;;  %4395 = vmatpush1.bf16.msra.mxu0 %v11291_v62  ;;  %11209 = vmatpush1.bf16.msra.mxu1 %v11291_v62 }
 0x31c   :  { %v10990_v25 = vadd.f32 %v10989_v12, %v10988_v41  ;;  %v3167_v19 = vcombine.low %v3159_v26, %v3166_v60  ;;  %v5802_v12 = vpack.i.b16 %v5801_v50, %v5801_v50  ;;  %v13600_v26 = vpop.permute.xlu0 %6214  ;;  %4396 = vmatprep.subr.bf16.mxu0 %v17841_v16  ;;  %11200 = vmatprep.subr.bf16.mxu1 %v17841_v16 }
 0x31d   :  { %v10991_v44 = vpop.f32.mrf.mxu0  ;;  %18026 = vst [vmem:[#allocation10_spill] sm:$0xff] %v13600_v26 }
 0x31e   :  { %v2710_v8 = vadd.f32 %v10990_v25, %v13186_v35  ;;  %11129 = vmatmul.mubr.msk.bf16.gmra.mxu1 %vm3283_vm1, %v3167_v19 }
 0x31f   :  { %v10992_v27 = vpop.f32.mrf.mxu0  ;;  %11132 = vmatprep.mubr.msk.bf16.mxu1 %vm17872_vm3, %v17980_v22 }
 0x320   :  { %v2768_v10 = vcombine.high %v2710_v8, %v2710_v8  ;;  %v2814_v41 = vmax.f32 %v2710_v8, 0.0  ;;  %v10993_v30 = vadd.f32 %v10992_v27, %v10991_v44  ;;  %v13603_v27 = vpop.permute.xlu1 %6292  ;;  %v13607_v8 = vcombine.low %v13559_v14, %v13579_v32 }
 0x322   :  { %v2884_v25 = vpack.c.bf16 %v2814_v41, %v2860_v53  ;;  %v2713_v19 = vadd.f32 %v10993_v30, %v13198_v2  ;;  %v2815_v50 = vmax.f32 %v2768_v10, 0.0  ;;  %v5807_v30 = vrot.slane %v5802_v12, %v11681_v0  ;;  %18027 = vst [vmem:[#allocation9_spill] sm:$0xff] %v13607_v8 }
 0x323   :  { %v3168_v10 = vcombine.low %v3002_v5, %v3001_v4  ;;  %v10602_v12 = vpack.c.bf16 %v2814_v41, %v2814_v41 }
 0x324   :  { %v3010_v45 = vrot.slane %v2884_v25, %v12624_v47  ;;  %v2769_v36 = vcombine.high %v2713_v19, %v2713_v19  ;;  %v2816_v61 = vmax.f32 %v2713_v19, 0.0  ;;  %v13640_v63 = vpop.permute.xlu1 %6156 }
 0x325   :  { %18031 = vst [vmem:[#allocation17_spill] sm:$0xff] %v13640_v63 }
 0x326   :  { %v3018_v25 = vcombine.high %v3010_v45, %v3010_v45  ;;  %v2817_v19 = vmax.f32 %v2769_v36, 0.0  ;;  %v2861_v60 = vcombine.low %v2815_v50, %v2816_v61  ;;  %v11292_v61 = vld [vmem:[%s17801_s5 + $0x68] sm:$0xff]   ;;  %v10768_v36 = vld [vmem:[%s17797_s0 + $0xc0] sm:$0xf]  ;;  %v3176_v50 = vrot.slane %v3168_v10, %v12624_v47  ;;  %v13636_v10 = vpop.permute.xlu0 %6154 }
 0x327   :  { %18030 = vst [vmem:[#allocation11_spill] sm:$0xff] %v13636_v10  ;;  %4397 = vmatpush1.bf16.msra.mxu0 %v11292_v61  ;;  %11210 = vmatpush1.bf16.msra.mxu1 %v11292_v61 }
 0x328   :  { %v3169_v53 = vcombine.low %v3010_v45, %v3018_v25  ;;  %v2885_v34 = vpack.c.bf16 %v2817_v19, %v2861_v60  ;;  %v10603_v44 = vpack.c.bf16 %v2817_v19, %v2817_v19  ;;  %v13623_v60 = vsel %vm18028_vm9, %v13299_v39, %v5807_v30  ;;  %v13628_v45 = vld [vmem:[%s17797_s0 + $0xc4] sm:$0xf]  ;;  %4398 = vmatprep.subr.bf16.mxu0 %v17841_v16 }
 0x329   :  { %v6420_v11 = vshll.u32 %v13623_v60, 16  ;;  %11201 = vmatprep.subr.bf16.mxu1 %v17841_v16  ;;  %v10792_v61 = vcombine.low %v10768_v36, %v13628_v45  ;;  %vm18042_vm9 = vcmask 1043456  }
 0x32a   :  { %v3026_v5 = vrot.slane %v2885_v34, %v12624_v47  ;;  %v3345_v4 = vpop.f32.mrf.mxu1  ;;  %v3183_v41 = vrot.slane %v3169_v53, %v12624_v47  ;;  %v13634_v34 = vcombine.low %v13559_v14, %v13559_v14  ;;  %v3017_v53 = vrot.slane %v10602_v12, %v12624_v47 }
 0x32b   :  { %v3346_v62 = vadd.f32 %v3345_v4, %v13607_v8  ;;  %v3033_v39 = vrot.slane %v10603_v44, %v12624_v47  ;;  %v11294_v4 = vld [vmem:[%s17801_s5 + $0x60] sm:$0xff]  }
 0x32c   :  { %18029 = vst [vmem:[#allocation14_spill] sm:$0xff] %v13634_v34  ;;  %v3034_v30 = vcombine.high %v3026_v5, %v3026_v5  ;;  %v11118_v25 = vpop.f32.mrf.mxu1  ;;  %v3184_v19 = vcombine.low %v3176_v50, %v3183_v41  ;;  %v3185_v44 = vcombine.low %v3017_v53, %v3026_v5  ;;  %v5689_v41 = vpack.i.b16 %v10768_v36, %v10768_v36 }
 0x32d   :  { %v3434_v59 = vcombine.high %v3346_v62, %v3346_v62  ;;  %v3470_v63 = vmax.f32 %v3346_v62, 0.0  ;;  %4399 = vmatpush1.bf16.msra.mxu0 %v11294_v4  ;;  %v6674_v53 = vshrl.u32 %v13623_v60, 16  ;;  %11211 = vmatpush1.bf16.msra.mxu1 %v11294_v4  ;;  %v18035_v50 = vrot.slane %v13079_v52, 3 }
 0x32e   :  { %v3348_v12 = vpop.f32.mrf.mxu1  ;;  %11133 = vmatmul.mubr.msk.bf16.gmra.mxu1 %vm3283_vm1, %v3184_v19  ;;  %v3186_v25 = vcombine.low %v3034_v30, %v3033_v39  ;;  %4400 = vmatprep.subr.bf16.mxu0 %v17841_v16  ;;  %v18032_v30 = vrot.slane %v13111_v33, 3  ;;  %v18033_v19 = vrot.slane %v13101_v49, 4  ;;  %v6671_v16 = vrot.slane %v13318_v20, 3  ;;  %v13679_v49 = vpop.permute.xlu1 %6218 }
 0x32f   :  { %v3471_v6 = vmax.f32 %v3434_v59, 0.0  ;;  %v13652_v56 = vadd.f32 %v3348_v12, %v13634_v34  ;;  %11136 = vmatprep.mubr.msk.bf16.mxu1 %vm17872_vm3, %v17980_v22  ;;  %v11295_v59 = vld [vmem:[%s17801_s5 + $0x58] sm:$0xff]   ;;  %v13668_v12 = vrot.slane %v6420_v11, 3  ;;  %v6672_v33 = vrot.slane %v13321_v28, 4  ;;  %18037 = vst [vmem:[#allocation23_spill] sm:$0xff] %v13679_v49 }
 0x330   :  { %v11119_v10 = vpop.f32.mrf.mxu1  ;;  %v3200_v5 = vrot.slane %v3186_v25, %v12624_v47  ;;  %v6664_v36 = vor.u32 %v18033_v19, %v18032_v30  ;;  %v3193_v25 = vrot.slane %v3185_v44, %v12624_v47  ;;  %v18038_v30 = vmov 0  }
 0x331   :  { %v3530_v62 = vcombine.low %v3470_v63, %v3471_v6  ;;  %v3472_v39 = vmax.f32 %v13652_v56, 0.0  ;;  %v13670_v10 = vpop.permute.xlu0 %6288  ;;  %v18036_v6 = vrot.slane %v13070_v17, 4  ;;  %11202 = vmatprep.subr.bf16.mxu1 %v18038_v30  ;;  %v5694_v44 = vrot.slane %v5689_v41, %v11514_v15  ;;  %4401 = vmatpush1.bf16.msra.mxu0 %v11295_v59 }
 0x332   :  { %18034 = vst [vmem:[#allocation2_spill] sm:$0xff] %v13670_v10  ;;  %v13684_v10 = vrot.slane %v10792_v61, 7  ;;  %v3201_v52 = vcombine.low %v3193_v25, %v3200_v5  ;;  %4402 = vmatprep.subr.bf16.mxu0 %v18038_v30  ;;  %v13697_v41 = vcombine.low %v13579_v32, %v13559_v14  ;;  %11212 = vmatpush1.bf16.msra.mxu1 %v11295_v59  ;;  %v18041_v5 = vrot.slane %v18003_v29, 4 }
 0x333   :  { %v6655_v63 = vor.u32 %v18036_v6, %v18035_v50  ;;  %v3554_v19 = vpack.c.bf16 %v3472_v39, %v3530_v62  ;;  %v13687_v50 = vrot.slane %v6674_v53, 3  ;;  %v13689_v6 = vrot.slane %v6420_v11, 4  ;;  %v11296_v62 = vld [vmem:[%s17801_s5 + $0x50] sm:$0xff]   ;;  %11203 = vmatprep.subr.bf16.mxu1 %v18038_v30 }
 0x334   :  { %18039 = vst [vmem:[#allocation24_spill] sm:$0xff] %v13697_v41  ;;  %v18040_v11 = vrot.slane %v13369_v46, 4  ;;  %v18043_v25 = vor.u32 %v13509_v38, %v13507_v40  ;;  %v11297_v38 = vld [vmem:[%s17801_s5 + $0x98] sm:$0xff]   ;;  %v18053_v32 = vrot.slane %v13321_v28, 3  ;;  %v5809_v49 = vshrl.u32 %v13628_v45, 16 }
 0x335   :  { %v3567_v39 = vpack.i.b16 %v3554_v19, %v3554_v19  ;;  %v3650_v4 = vshrl.u32 %v3554_v19, 16  ;;  %v13724_v40 = vpop.permute.xlu0 %6294  ;;  %4403 = vmatpush1.bf16.msra.mxu0 %v11296_v62 }
 0x336   :  { %11137 = vmatmul.mubr.msk.bf16.gmra.mxu1 %vm3283_vm1, %v3201_v52  ;;  %v13706_v53 = vsel %vm18042_vm9, %v18041_v5, %v18040_v11  ;;  %v13712_v17 = vsel %vm18044_vm11, %v6664_v36, %v18043_v25  ;;  %v3746_v52 = vrot.slane %v3554_v19, 6  ;;  %vm18045_vm9 = vcmask 1040384   ;;  %18047 = vst [vmem:[#allocation26_spill] sm:$0xff] %v13724_v40  ;;  %4416 = vmatprep.subr.bf16.mxu0 %v18038_v30 }
 0x337   :  { %v3572_v59 = vrot.slane %v3567_v39, %v11514_v15  ;;  %v3651_v46 = vpack.i.b16 %v3650_v4, %v3650_v4  ;;  %v10994_v61 = vpop.f32.mrf.mxu0  ;;  %v13720_v11 = vsel %vm18045_vm9, %v5694_v44, %v13684_v10  ;;  %11140 = vmatprep.mubr.msk.bf16.mxu1 %vm17872_vm3, %v17980_v22  ;;  %v3435_v36 = vcombine.high %v13652_v56, %v13652_v56  ;;  %v13750_v56 = vpop.permute.xlu1 %6336 }
 0x338   :  { %18046 = vst [vmem:[#allocation25_spill] sm:$0xff] %v13720_v11  ;;  %v18048_v19 = vor.u32 %v13518_v18, %v13514_v57  ;;  %v18049_v44 = vrot.slane %v13420_v42, 4  ;;  %v18050_v39 = vrot.slane %v17994_v7, 4  ;;  %vm18051_vm9 = vcmask 1043456   ;;  %18054 = vst [vmem:[#allocation27_spill] sm:$0xff] %v13750_v56  ;;  %11213 = vmatpush1.bf16.msra.mxu1 %v11296_v62 }
 0x339   :  { %v18052_v25 = vrot.slane %v13318_v20, 2  ;;  %v13754_v57 = vrot.slane %v3651_v46, %v13567_v43  ;;  %v10995_v18 = vpop.f32.mrf.mxu0  ;;  %11204 = vmatprep.subr.bf16.mxu1 %v18038_v30  ;;  %4417 = vmatpush2.bf16.msra.mxu0 %v11297_v38  ;;  %v13784_v26 = vpop.permute.xlu0 %6210 }
 0x33a   :  { %v13735_v4 = vsel %vm18044_vm11, %v6655_v63, %v18048_v19  ;;  %v13742_v5 = vsel %vm18051_vm9, %v18050_v39, %v18049_v44  ;;  %vm18055_vm11 = vcmask 1041408   ;;  %v13759_v63 = vor.u32 %v6672_v33, %v6671_v16  ;;  %v3353_v19 = vpop.f32.mrf.mxu1  ;;  %4418 = vmatprep.subr.bf16.mxu0 %v18038_v30  ;;  %18057 = vst [vmem:[#allocation29_spill] sm:$0xff] %v13784_v26 }
 0x33b   :  { %v13748_v14 = vor.u32 %v18053_v32, %v18052_v25  ;;  %v13757_v42 = vsel %vm18055_vm11, %v3572_v59, %v3746_v52  ;;  %v10996_v32 = vadd.f32 %v10995_v18, %v10994_v61  ;;  %v13766_v39 = vshll.u32 %v13720_v11, 16  ;;  %v10997_v33 = vpop.f32.mrf.mxu0  ;;  %v11298_v61 = vld [vmem:[%s17801_s5 + $0x90] sm:$0xff]  }
 0x33c   :  { %v4170_v28 = vrot.slane %v13757_v42, 2  ;;  %v3976_v44 = vrot.slane %v13757_v42, 1  ;;  %v4171_v59 = vrot.slane %v13754_v57, 2  ;;  %v3354_v16 = vadd.f32 %v3353_v19, %v13697_v41  ;;  %v11122_v18 = vpop.f32.mrf.mxu1  ;;  %11214 = vmatpush2.bf16.msra.mxu1 %v11297_v38 }
 0x33d   :  { %v3977_v46 = vrot.slane %v13754_v57, 1  ;;  %v3797_v62 = vshll.u32 %v13757_v42, 16  ;;  %v3473_v52 = vmax.f32 %v3435_v36, 0.0  ;;  %v2718_v25 = vadd.f32 %v10996_v32, %v13169_v3  ;;  %v10998_v56 = vpop.f32.mrf.mxu0  ;;  %4419 = vmatpush2.bf16.msra.mxu0 %v11298_v61  ;;  %11205 = vmatprep.subr.bf16.mxu1 %v18038_v30 }
 0x33e   :  { %v13781_v19 = vsel %vm4169_vm2, %v4170_v28, %v4171_v59  ;;  %v3436_v7 = vcombine.high %v3354_v16, %v3354_v16  ;;  %v3474_v29 = vmax.f32 %v3354_v16, 0.0  ;;  %v10999_v32 = vadd.f32 %v10998_v56, %v10997_v33  ;;  %v3356_v18 = vpop.f32.mrf.mxu1  ;;  %v13790_v59 = vpop.permute.xlu1 %6342  ;;  %4609 = vmatprep.subr.bf16.mxu0 %v18038_v30 }
 0x33f   :  { %18056 = vst [vmem:[#allocation28_spill] sm:$0xff] %v13781_v19  ;;  %v3978_v40 = vsel %vm3975_vm10, %v3976_v44, %v3977_v46  ;;  %v2770_v36 = vcombine.high %v2718_v25, %v2718_v25  ;;  %10631 = vmatprep.mubr.msk.bf16.mxu0 %vm4206_vm4, %v13781_v19  ;;  %v3795_v45 = vshrl.u32 %v13757_v42, 16  ;;  %v3799_v28 = vrot.slane %v3797_v62, 1 }
 0x340   :  { %4012 = vrot.lane.b32.xlu1 %v3978_v40, %s11434_s4  ;;  %v3475_v16 = vmax.f32 %v3436_v7, 0.0  ;;  %v3531_v20 = vcombine.low %v3473_v52, %v3474_v29  ;;  %v13793_v44 = vadd.f32 %v3356_v18, %v13607_v8  ;;  %v18058_v38 = vshll.u32 %v13754_v57, 16  ;;  %v11123_v46 = vpop.f32.mrf.mxu1  ;;  %11215 = vmatpush2.bf16.msra.mxu1 %v11298_v61 }
 0x341   :  { %v2819_v40 = vmax.f32 %v2770_v36, 0.0  ;;  %v13799_v33 = vadd.f32 %v10999_v32, %v13186_v35  ;;  %v3800_v26 = vor.u32 %v3799_v28, %v3795_v45  ;;  %vm17930_vm9 = vsmask.f32 6400  ;;  %4830 = vmatprep.subr.bf16.mxu1 %v18038_v30 }
 0x342   :  { %v3804_v56 = vrot.slane %v18058_v38, 1  ;;  %v4040_v19 = vshrl.u32 %v13754_v57, 16  ;;  %v2818_v7 = vmax.f32 %v2718_v25, 0.0  ;;  %v13803_v29 = vpack.c.bf16 %v3475_v16, %v3531_v20  ;;  %v3361_v38 = vpop.f32.mrf.mxu1  ;;  %v13820_v16 = vpop.permute.xlu0 %6296 }
 0x343   :  { %v6806_v52 = vrot.slane %v13623_v60, 4  ;;  %v5810_v18 = vpack.i.b16 %v5809_v49, %v5809_v49  ;;  %v3437_v36 = vcombine.high %v13793_v44, %v13793_v44  ;;  %v13812_v28 = vshrl.u32 %v13720_v11, 16  ;;  %18059 = vst [vmem:[#allocation30_spill] sm:$0xff] %v13820_v16  ;;  %v13830_v30 = vpop.permute.xlu1 %6290 }
 0x344   :  { %v3805_v32 = vsel %vm3794_vm0, %v3800_v26, %v3804_v56  ;;  %6840 = vrot.lane.b32.xlu1 %v13706_v53, %s11420_s17  ;;  %v2862_v20 = vcombine.low %v2818_v7, %v2819_v40  ;;  %v13817_v49 = vmax.f32 %v13799_v33, 0.0  ;;  %v4037_v61 = vrot.slane %v3795_v45, 1  ;;  %v11126_v56 = vpop.f32.mrf.mxu1  ;;  %18063 = vst [vmem:[#allocation31_spill] sm:$0xff] %v13830_v30 }
 0x345   :  { %3927 = vrot.lane.b32.xlu0 %v3805_v32, %s11435_s25  ;;  %v4038_v26 = vrot.slane %v3797_v62, 2  ;;  %v3574_v53 = vpack.i.b16 %v13803_v29, %v13803_v29  ;;  %v4042_v46 = vrot.slane %v4040_v19, 1  ;;  %v18060_v25 = vrot.slane %v13465_v21, 4 }
 0x346   :  { %v18061_v8 = vrot.slane %v13084_v55, 4  ;;  %vm18062_vm11 = vcmask 1043456   ;;  %v6100_v7 = vrot.slane %v13766_v39, 1  ;;  %v13835_v62 = vsel %vm18064_vm12, %v13748_v14, %v13668_v12  ;;  %v3364_v14 = vpop.f32.mrf.mxu1 }
 0x347   :  { %v18065_v45 = vrot.slane %v13395_v23, 4  ;;  %v18066_v32 = vrot.slane %v13034_v13, 4  ;;  %vm18067_vm15 = vmmov %vm18062_vm11  ;;  %v18068_v21 = vrot.slane %v13623_v60, 3  ;;  %v5815_v56 = vrot.slane %v5810_v18, %v11681_v0  ;;  %v11000_v23 = vpop.f32.mrf.mxu0 }
 0x348   :  { %v6804_v40 = vsel %vm18062_vm11, %v18061_v8, %v18060_v25  ;;  %v18069_v8 = vrot.slane %v13310_v58, 3  ;;  %vm18070_vm11 = vcmask 1044480   ;;  %v3477_v55 = vmax.f32 %v3437_v36, 0.0  ;;  %6764 = vrot.lane.b32.xlu1 %v13712_v17, %s11419_s16  ;;  %v11127_v13 = vpop.f32.mrf.mxu1 }
 0x349   :  { %v13842_v19 = vsel %vm18067_vm15, %v18066_v32, %v18065_v45  ;;  %v13853_v12 = vadd.f32 %v3361_v38, %v13634_v34  ;;  %v18071_v45 = vor.u32 %v13689_v6, %v13687_v50  ;;  %vm18072_vm12 = vsmask.f32 4352  ;;  %v11001_v50 = vpop.f32.mrf.mxu0 }
 0x34a   :  { %v13849_v25 = vsel %vm18070_vm11, %v18069_v8, %v18068_v21  ;;  %v6264_v32 = vrot.slane %v13812_v28, 1  ;;  %v3657_v18 = vshrl.u32 %v13803_v29, 16  ;;  %v2886_v36 = vpack.c.bf16 %v13817_v49, %v2862_v20 }
 0x34b   :  { %v13862_v60 = vsel %vm18072_vm12, %v13759_v63, %v18071_v45  ;;  %v4039_v38 = vor.u32 %v4038_v26, %v4037_v61  ;;  %v18073_v21 = vshll.u32 %v13754_v57, 16  ;;  %v3579_v17 = vrot.slane %v3574_v53, %v11514_v15  ;;  %v13880_v57 = vpop.permute.xlu0 %6340  ;;  %v11003_v53 = vpop.f32.mrf.mxu0 }
 0x34c   :  { %v3476_v30 = vmax.f32 %v13793_v44, 0.0  ;;  %v18074_v6 = vrot.slane %v13310_v58, 4  ;;  %v6265_v45 = vrot.slane %v13766_v39, 2  ;;  %v11002_v34 = vadd.f32 %v11001_v50, %v11000_v23  ;;  %6842 = vrot.lane.b32.xlu1 %v13742_v5, %s11420_s17 }
 0x34d   :  { %v4043_v8 = vrot.slane %v18073_v21, 2  ;;  %v13878_v20 = vor.u32 %v6100_v7, %v13812_v28  ;;  %vm18075_vm11 = vcmask 1040384   ;;  %v3747_v13 = vrot.slane %v13803_v29, 6 }
 0x34e   :  { %v13874_v63 = vsel %vm18067_vm15, %v18074_v6, %v6806_v52  ;;  %v13884_v61 = vsel %vm18075_vm11, %v13684_v10, %v5815_v56  ;;  %v2771_v44 = vcombine.high %v13799_v33, %v13799_v33  ;;  %v3532_v52 = vcombine.low %v3476_v30, %v3477_v55  ;;  %v11004_v55 = vpop.f32.mrf.mxu0 }
 0x34f   :  { %v4044_v16 = vor.u32 %v4043_v8, %v4042_v46  ;;  %v3478_v26 = vmax.f32 %v13853_v12, 0.0  ;;  %v13892_v46 = vpop.permute.xlu1 %6344  ;;  %v3658_v7 = vpack.i.b16 %v3657_v18, %v3657_v18  ;;  %v3042_v23 = vrot.slane %v2886_v36, %v12624_v47 }
 0x350   :  { %v2726_v56 = vadd.f32 %v11002_v34, %v13198_v2  ;;  %vm18076_vm12 = vcmask 1041408   ;;  %v13902_v5 = vor.u32 %v6265_v45, %v6264_v32  ;;  %v3365_v18 = vadd.f32 %v3364_v14, %v13697_v41  ;;  %6844 = vrot.lane.b32.xlu1 %v6804_v40, %s11420_s17  ;;  %v13915_v32 = vld [vmem:[%s17797_s0 + $0xc8] sm:$0xf] }
 0x351   :  { %v4045_v10 = vsel %vm17930_vm9, %v4039_v38, %v4044_v16  ;;  %v13898_v29 = vsel %vm18076_vm12, %v3579_v17, %v3747_v13  ;;  %v11005_v16 = vadd.f32 %v11004_v55, %v11003_v53  ;;  %v2821_v38 = vmax.f32 %v2771_v44, 0.0  ;;  %v13928_v44 = vpop.permute.xlu0 %6220  ;;  %vm18081_vm15 = vmmov %vm18076_vm12 }
 0x352   :  { %4145 = vrot.lane.b32.xlu0 %v4045_v10, %s11436_s10  ;;  %v2772_v36 = vcombine.high %v2726_v56, %v2726_v56  ;;  %v2822_v21 = vmax.f32 %v2726_v56, 0.0  ;;  %v3438_v34 = vcombine.high %v13853_v12, %v13853_v12  ;;  %v13908_v8 = vpack.c.bf16 %v3478_v26, %v3532_v52  ;;  %18077 = vst [vmem:[#allocation32_spill] sm:$0xff] %v13928_v44 }
 0x353   :  { %v13918_v14 = vrot.slane %v3658_v7, %v13567_v43  ;;  %v3050_v50 = vcombine.high %v3042_v23, %v3042_v23  ;;  %v3808_v45 = vshll.u32 %v13898_v29, 16  ;;  %v10604_v12 = vpack.c.bf16 %v13817_v49, %v13817_v49  ;;  %v13930_v52 = vpop.permute.xlu1 %6484 }
 0x354   :  { %v13920_v6 = vmax.f32 %v2772_v36, 0.0  ;;  %v2863_v13 = vcombine.low %v2821_v38, %v2822_v21  ;;  %v2729_v40 = vadd.f32 %v11005_v16, %v13169_v3  ;;  %v3439_v53 = vcombine.high %v3365_v18, %v3365_v18  ;;  %6766 = vrot.lane.b32.xlu1 %v13862_v60, %s11419_s16  ;;  %v11006_v16 = vpop.f32.mrf.mxu0 }
 0x355   :  { %v3480_v7 = vmax.f32 %v3365_v18, 0.0  ;;  %v3581_v49 = vpack.i.b16 %v13908_v8, %v13908_v8  ;;  %v3479_v21 = vmax.f32 %v3438_v34, 0.0  ;;  %v3202_v38 = vcombine.low %v3042_v23, %v3050_v50 }
 0x356   :  { %6762 = vrot.lane.b32.xlu0 %v13735_v4, %s11419_s16  ;;  %v3664_v4 = vshrl.u32 %v13908_v8, 16  ;;  %v2887_v55 = vpack.c.bf16 %v13920_v6, %v2863_v13  ;;  %v2773_v36 = vcombine.high %v2729_v40, %v2729_v40  ;;  %v3810_v18 = vrot.slane %v3808_v45, 1  ;;  %v11007_v56 = vpop.f32.mrf.mxu0 }
 0x357   :  { %v3813_v26 = vshll.u32 %v13918_v14, 16  ;;  %v3049_v10 = vrot.slane %v10604_v12, %v12624_v47  ;;  %v3748_v33 = vrot.slane %v13908_v8, 6  ;;  %v3806_v13 = vshrl.u32 %v13898_v29, 16 }
 0x358   :  { %v13946_v17 = vrot.slane %v2887_v55, %v12624_v47  ;;  %v3481_v30 = vmax.f32 %v3439_v53, 0.0  ;;  %v3533_v60 = vcombine.low %v3479_v21, %v3480_v7  ;;  %v2825_v34 = vmax.f32 %v2773_v36, 0.0  ;;  %6846 = vrot.lane.b32.xlu1 %v13874_v63, %s11420_s17  ;;  %v13956_v55 = vpop.permute.xlu0 %6298  ;;  %v11009_v53 = vpop.f32.mrf.mxu0 }
 0x359   :  { %v4049_v23 = vshrl.u32 %v13918_v14, 16  ;;  %v3586_v50 = vrot.slane %v3581_v49, %v11514_v15  ;;  %v3665_v3 = vpack.i.b16 %v3664_v4, %v3664_v4  ;;  %v11008_v8 = vadd.f32 %v11007_v56, %v11006_v16  ;;  %18078 = vst [vmem:[#allocation33_spill] sm:$0xff] %v13956_v55 }
 0x35a   :  { %6494 = vrot.lane.b32.xlu0 %v13835_v62, %s11417_s14  ;;  %v3203_v12 = vcombine.low %v3049_v10, %v13946_v17  ;;  %v13958_v62 = vpop.permute.xlu1 %6158  ;;  %v2824_v58 = vmax.f32 %v2729_v40, 0.0  ;;  %v3210_v7 = vrot.slane %v3202_v38, %v12624_v47  ;;  %v3811_v36 = vor.u32 %v3810_v18, %v3806_v13  ;;  %v10771_v40 = vld [vmem:[%s17797_s0 + $0xcc] sm:$0xf]  ;;  %v11010_v16 = vpop.f32.mrf.mxu0 }
 0x35b   :  { %18079 = vst [vmem:[#allocation34_spill] sm:$0xff] %v13958_v62  ;;  %v3815_v21 = vrot.slane %v3813_v26, 1  ;;  %v10605_v49 = vpack.c.bf16 %v13920_v6, %v13920_v6  ;;  %v2734_v10 = vadd.f32 %v11008_v8, %v13186_v35  ;;  %v4046_v56 = vrot.slane %v3806_v13, 1 }
 0x35c   :  { %v3217_v63 = vrot.slane %v3203_v12, %v12624_v47  ;;  %v2864_v4 = vcombine.low %v2824_v58, %v2825_v34  ;;  %v4047_v38 = vrot.slane %v3808_v45, 2  ;;  %v4051_v18 = vrot.slane %v4049_v23, 1  ;;  %v13989_v23 = vpop.permute.xlu0 %6480 }
 0x35d   :  { %v4052_v62 = vrot.slane %v3813_v26, 2  ;;  %v2774_v44 = vcombine.high %v2734_v10, %v2734_v10  ;;  %v2826_v55 = vmax.f32 %v2734_v10, 0.0  ;;  %v11011_v6 = vadd.f32 %v11010_v16, %v11009_v53 }
 0x35e   :  { %6834 = vrot.lane.b32.xlu0 %v13842_v19, %s11420_s17  ;;  %v18080_v19 = vrot.slane %v13720_v11, 2  ;;  %v3218_v8 = vcombine.low %v3210_v7, %v3217_v63  ;;  %v13974_v12 = vrot.slane %v3665_v3, %v13567_v43  ;;  %v13977_v13 = vsel %vm18081_vm15, %v3586_v50, %v3748_v33  ;;  %v13991_v33 = vpop.permute.xlu1 %6338 }
 0x35f   :  { %v13979_v35 = vpack.c.bf16 %v3481_v30, %v3533_v60  ;;  %v10793_v58 = vcombine.low %v13915_v32, %v10771_v40  ;;  %v3066_v45 = vcombine.high %v13946_v17, %v13946_v17  ;;  %v2888_v26 = vpack.c.bf16 %v2826_v55, %v2864_v4 }
 0x360   :  { %6352 = vrot.lane.b32.xlu1 %v18080_v19, %s11416_s13  ;;  %v2737_v34 = vadd.f32 %v11011_v6, %v13198_v2  ;;  %11141 = vmatmul.mubr.msk.bf16.gmra.mxu1 %vm3283_vm1, %v3218_v8  ;;  %v3065_v30 = vrot.slane %v10605_v49, %v12624_v47  ;;  %v3816_v60 = vsel %vm3794_vm0, %v3811_v36, %v3815_v21  ;;  %v5817_v21 = vshrl.u32 %v10771_v40, 16  ;;  %v14014_v40 = vpop.permute.xlu0 %6486 }
 0x361   :  { %v4048_v50 = vor.u32 %v4047_v38, %v4046_v56  ;;  %v4053_v17 = vor.u32 %v4052_v62, %v4051_v18  ;;  %11144 = vmatprep.mubr.msk.bf16.mxu1 %vm17872_vm3, %v17980_v22  ;;  %v3074_v53 = vrot.slane %v2888_v26, %v12624_v47  ;;  %v3588_v63 = vpack.i.b16 %v13979_v35, %v13979_v35 }
 0x362   :  { %6590 = vrot.lane.b32.xlu0 %v13849_v25, %s11418_s15  ;;  %v2827_v25 = vmax.f32 %v2774_v44, 0.0  ;;  %v2775_v7 = vcombine.high %v2737_v34, %v2737_v34  ;;  %v2828_v10 = vmax.f32 %v2737_v34, 0.0  ;;  %v3671_v4 = vshrl.u32 %v13979_v35, 16 }
 0x363   :  { %v18082_v36 = vpack.i.b16 %v13915_v32, %v13915_v32  ;;  %v3219_v49 = vcombine.low %v3066_v45, %v3065_v30  ;;  %v3082_v56 = vcombine.high %v3074_v53, %v3074_v53  ;;  %v4054_v38 = vsel %vm17930_vm9, %v4048_v50, %v4053_v17  ;;  %v14016_v45 = vpop.permute.xlu1 %6488 }
 0x364   :  { %3929 = vrot.lane.b32.xlu1 %v3816_v60, %s11435_s25  ;;  %v2829_v44 = vmax.f32 %v2775_v7, 0.0  ;;  %v2865_v16 = vcombine.low %v2827_v25, %v2828_v10  ;;  %v3982_v18 = vrot.slane %v13977_v13, 1  ;;  %v3983_v6 = vrot.slane %v13974_v12, 1 }
 0x365   :  { %v5701_v62 = vrot.slane %v18082_v36, %v11514_v15  ;;  %v14011_v19 = vrot.slane %v10793_v58, 7  ;;  %v10606_v8 = vpack.c.bf16 %v2826_v55, %v2826_v55  ;;  %v3220_v26 = vcombine.low %v3074_v53, %v3082_v56 }
 0x366   :  { %6160 = vrot.lane.b32.xlu0 %v13878_v20, %s11414_s30  ;;  %v2889_v32 = vpack.c.bf16 %v2829_v44, %v2865_v16  ;;  %v10607_v34 = vpack.c.bf16 %v2829_v44, %v2829_v44  ;;  %v3593_v20 = vrot.slane %v3588_v63, %v11514_v15  ;;  %v3672_v30 = vpack.i.b16 %v3671_v4, %v3671_v4 }
 0x367   :  { %v3819_v60 = vshll.u32 %v13977_v13, 16  ;;  %v5818_v50 = vpack.i.b16 %v5817_v21, %v5817_v21  ;;  %v18083_v55 = vrot.slane %v13720_v11, 1  ;;  %v3979_v58 = vrot.slane %v13898_v29, 1 }
 0x368   :  { %4147 = vrot.lane.b32.xlu1 %v4054_v38, %s11436_s10  ;;  %v3090_v17 = vrot.slane %v2889_v32, %v12624_v47  ;;  %v3227_v25 = vrot.slane %v3219_v49, %v12624_v47  ;;  %v3234_v53 = vrot.slane %v3220_v26, %v12624_v47  ;;  %v3980_v7 = vrot.slane %v13918_v14, 1 }
 0x369   :  { %v3984_v10 = vsel %vm3975_vm10, %v3982_v18, %v3983_v6  ;;  %v3817_v63 = vshrl.u32 %v13977_v13, 16  ;;  %v3824_v4 = vshll.u32 %v13974_v12, 16  ;;  %v3081_v36 = vrot.slane %v10606_v8, %v12624_v47 }
 0x36a   :  { %6224 = vrot.lane.b32.xlu0 %v18083_v55, %s11413_s23  ;;  %v3097_v21 = vrot.slane %v10607_v34, %v12624_v47  ;;  %v3098_v56 = vcombine.high %v3090_v17, %v3090_v17  ;;  %v3235_v44 = vcombine.low %v3227_v25, %v3234_v53  ;;  %v3749_v49 = vrot.slane %v13979_v35, 6  ;;  %v14048_v55 = vpop.permute.xlu0 %6300  ;;  %v14050_v25 = vpop.permute.xlu1 %6580 }
 0x36b   :  { %v3821_v16 = vrot.slane %v3819_v60, 1  ;;  %v18084_v38 = vrot.slane %v13884_v61, 3  ;;  %v18085_v26 = vrot.slane %v13720_v11, 3  ;;  %vm18086_vm11 = vcmask 1044480   ;;  %18087 = vst [vmem:[#allocation35_spill] sm:$0xff] %v14048_v55 }
 0x36c   :  { %4016 = vrot.lane.b32.xlu1 %v3984_v10, %s11434_s4  ;;  %v4058_v6 = vshrl.u32 %v13974_v12, 16  ;;  %v14042_v32 = vrot.slane %v3672_v30, %v13567_v43  ;;  %11145 = vmatmul.mubr.msk.bf16.gmra.mxu1 %vm3283_vm1, %v3235_v44  ;;  %v3236_v8 = vcombine.low %v3081_v36, %v3090_v17  ;;  %v3237_v34 = vcombine.low %v3098_v56, %v3097_v21 }
 0x36d   :  { %v6554_v18 = vsel %vm18086_vm11, %v18085_v26, %v18084_v38  ;;  %v6425_v35 = vrot.slane %v13766_v39, 3  ;;  %v14053_v53 = vsel %vm18076_vm12, %v3593_v20, %v3749_v49  ;;  %v18088_v10 = vrot.slane %v13884_v61, 4  ;;  %11148 = vmatprep.mubr.msk.bf16.mxu1 %vm17872_vm3, %v17980_v22 }
 0x36e   :  { %6304 = vrot.lane.b32.xlu0 %v13902_v5, %s11415_s8  ;;  %v18089_v30 = vrot.slane %v13720_v11, 4  ;;  %vm18090_vm15 = vcmask 1043456   ;;  %vm18091_vm11 = vcmask 1040384   ;;  %v5823_v17 = vrot.slane %v5818_v50, %v11681_v0 }
 0x36f   :  { %v14064_v5 = vsel %vm18091_vm11, %v5701_v62, %v14011_v19  ;;  %v3981_v36 = vsel %vm3975_vm10, %v3979_v58, %v3980_v7  ;;  %v3826_v21 = vrot.slane %v3824_v4, 1  ;;  %v4055_v20 = vrot.slane %v3817_v63, 1  ;;  %vm18093_vm12 = vmmov %vm18091_vm11 }
 0x370   :  { %v6810_v38 = vsel %vm18090_vm15, %v18089_v30, %v18088_v10  ;;  %18092 = vst [vmem:[#allocation36_spill] sm:$0xff] %v14064_v5  ;;  %6592 = vrot.lane.b32.xlu1 %v6554_v18, %s11418_s15  ;;  %v3251_v56 = vrot.slane %v3237_v34, %v12624_v47  ;;  %v3822_v44 = vor.u32 %v3821_v16, %v3817_v63  ;;  %v4056_v49 = vrot.slane %v3819_v60, 2  ;;  %v10772_v30 = vld [vmem:[%s17797_s0 + $0xd0] sm:$0xf]  ;;  %v10773_v60 = vld [vmem:[%s17797_s0 + $0xd4] sm:$0xf] }
 0x371   :  { %v4060_v26 = vrot.slane %v4058_v6, 1  ;;  %v4061_v10 = vrot.slane %v3824_v4, 2  ;;  %v3244_v62 = vrot.slane %v3236_v8, %v12624_v47  ;;  %v6427_v50 = vshll.u32 %v13884_v61, 16  ;;  %v14088_v6 = vpop.permute.xlu0 %6346  ;;  %v14090_v8 = vpop.permute.xlu1 %6222 }
 0x372   :  { %4014 = vrot.lane.b32.xlu0 %v3981_v36, %s11434_s4  ;;  %v4179_v58 = vrot.slane %v14053_v53, 2  ;;  %v4180_v7 = vrot.slane %v14042_v32, 2  ;;  %v6683_v63 = vshrl.u32 %v13884_v61, 16  ;;  %v6201_v16 = vrot.slane %v14064_v5, 1  ;;  %18094 = vst [vmem:[#allocation37_spill] sm:$0xff] %v14088_v6  ;;  %18095 = vst [vmem:[#allocation38_spill] sm:$0xff] %v14090_v8 }
 0x373   :  { %v3252_v4 = vcombine.low %v3244_v62, %v3251_v56  ;;  %v14086_v18 = vsel %vm18093_vm12, %v14011_v19, %v5823_v17  ;;  %v5703_v34 = vpack.i.b16 %v10772_v30, %v10772_v30  ;;  %v3827_v36 = vsel %vm3794_vm0, %v3822_v44, %v3826_v21 }
 0x374   :  { %6848 = vrot.lane.b32.xlu1 %v6810_v38, %s11420_s17  ;;  %v4057_v3 = vor.u32 %v4056_v49, %v4055_v20  ;;  %v4062_v2 = vor.u32 %v4061_v10, %v4060_v26  ;;  %v10794_v47 = vcombine.low %v10772_v30, %v10773_v60  ;;  %v18096_v61 = vrot.slane %v13812_v28, 2 }
 0x375   :  { %11149 = vmatmul.mubr.msk.bf16.gmra.mxu1 %vm3283_vm1, %v3252_v4  ;;  %v6429_v56 = vrot.slane %v6427_v50, 3  ;;  %v14098_v19 = vsel %vm4169_vm2, %v4179_v58, %v4180_v7  ;;  %v6680_v17 = vrot.slane %v13812_v28, 3  ;;  %v6681_v21 = vrot.slane %v13766_v39, 4  ;;  %v14112_v28 = vpop.permute.xlu0 %6576 }
 0x376   :  { %3931 = vrot.lane.b32.xlu0 %v3827_v36, %s11435_s25  ;;  %v6426_v38 = vor.u32 %v6425_v35, %v18096_v61  ;;  %18097 = vst [vmem:[#allocation39_spill] sm:$0xff] %v14098_v19  ;;  %10637 = vmatprep.mubr.msk.bf16.mxu1 %vm4206_vm4, %v14098_v19  ;;  %v6685_v20 = vrot.slane %v6683_v63, 3  ;;  %v6686_v44 = vrot.slane %v6427_v50, 4  ;;  %v6329_v49 = vrot.slane %v14064_v5, 2  ;;  %v14114_v50 = vpop.permute.xlu1 %6482 }
 0x377   :  { %v6555_v26 = vrot.slane %v14064_v5, 3  ;;  %v6556_v35 = vrot.slane %v14086_v18, 3  ;;  %v4063_v10 = vsel %vm17930_vm9, %v4057_v3, %v4062_v2  ;;  %v5708_v30 = vrot.slane %v5703_v34, %v11514_v15  ;;  %18098 = vst [vmem:[#allocation40_spill] sm:$0xff] %v14114_v50 }
 0x378   :  { %6226 = vrot.lane.b32.xlu1 %v6201_v16, %s11413_s23  ;;  %v5962_v62 = vrot.slane %v10794_v47, 7  ;;  %v5825_v58 = vshrl.u32 %v10773_v60, 16  ;;  %v6104_v39 = vshll.u32 %v14064_v5, 16  ;;  %vm18099_vm15 = vsmask.f32 5376 }
 0x379   :  { %v6430_v7 = vsel %vm18099_vm15, %v6426_v38, %v6429_v56  ;;  %v6682_v63 = vor.u32 %v6681_v21, %v6680_v17  ;;  %v6687_v4 = vor.u32 %v6686_v44, %v6685_v20  ;;  %v6811_v2 = vrot.slane %v14064_v5, 4  ;;  %v14134_v17 = vpop.permute.xlu0 %6582  ;;  %v10774_v20 = vld [vmem:[%s17797_s0 + $0xd8] sm:$0xf]  ;;  %v14144_v44 = vld [vmem:[%s17797_s0 + $0xdc] sm:$0xf] }
 0x37a   :  { %4149 = vrot.lane.b32.xlu0 %v4063_v10, %s11436_s10  ;;  %vm18100_vm11 = vcmask 1044480   ;;  %v6812_v47 = vrot.slane %v14086_v18, 4  ;;  %v14122_v60 = vsel %vm18093_vm12, %v5708_v30, %v5962_v62  ;;  %v5826_v16 = vpack.i.b16 %v5825_v58, %v5825_v58  ;;  %v14136_v21 = vpop.permute.xlu1 %6584 }
 0x37b   :  { %v6557_v3 = vsel %vm18100_vm11, %v6555_v26, %v6556_v35  ;;  %18101 = vst [vmem:[#allocation41_spill] sm:$0xff] %v14122_v60  ;;  %v6102_v34 = vshrl.u32 %v14064_v5, 16  ;;  %v6106_v36 = vrot.slane %v6104_v39, 1  ;;  %vm18102_vm15 = vsmask.f32 4352 }
 0x37c   :  { %6354 = vrot.lane.b32.xlu1 %v6329_v49, %s11416_s13  ;;  %v6688_v61 = vsel %vm18102_vm15, %v6682_v63, %v6687_v4  ;;  %v14129_v38 = vshrl.u32 %v14122_v60, 16  ;;  %v14132_v56 = vshll.u32 %v14122_v60, 16  ;;  %v6268_v26 = vrot.slane %v6104_v39, 2 }
 0x37d   :  { %v6267_v49 = vrot.slane %v6102_v34, 1  ;;  %vm18103_vm11 = vcmask 1043456   ;;  %v5831_v10 = vrot.slane %v5826_v16, %v11681_v0  ;;  %v6107_v30 = vor.u32 %v6106_v36, %v6102_v34  ;;  %v14160_v55 = vpop.permute.xlu0 %6348 }
 0x37e   :  { %6496 = vrot.lane.b32.xlu0 %v6430_v7, %s11417_s14  ;;  %v6813_v35 = vsel %vm18103_vm11, %v6811_v2, %v6812_v47  ;;  %v6431_v58 = vrot.slane %v6102_v34, 2  ;;  %v6432_v7 = vrot.slane %v6104_v39, 3  ;;  %v6434_v63 = vshll.u32 %v14086_v18, 16  ;;  %vm18105_vm11 = vmmov %vm18093_vm12 }
 0x37f   :  { %v6692_v4 = vshrl.u32 %v14086_v18, 16  ;;  %v10795_v22 = vcombine.low %v10774_v20, %v14144_v44  ;;  %v6202_v5 = vrot.slane %v14122_v60, 1  ;;  %v6270_v2 = vrot.slane %v14129_v38, 1 }
 0x380   :  { %6594 = vrot.lane.b32.xlu1 %v6557_v3, %s11418_s15  ;;  %v5710_v3 = vpack.i.b16 %v10774_v20, %v10774_v20  ;;  %v6271_v47 = vrot.slane %v14132_v56, 2  ;;  %v6269_v16 = vor.u32 %v6268_v26, %v6267_v49  ;;  %v14157_v36 = vsel %vm18093_vm12, %v5962_v62, %v5831_v10  ;;  %v14162_v20 = vpop.permute.xlu1 %6756 }
 0x381   :  { %v6436_v11 = vrot.slane %v6434_v63, 3  ;;  %v6689_v18 = vrot.slane %v6102_v34, 3  ;;  %v6690_v8 = vrot.slane %v6104_v39, 4  ;;  %v6695_v6 = vrot.slane %v6434_v63, 4 }
 0x382   :  { %6768 = vrot.lane.b32.xlu0 %v6688_v61, %s11419_s16  ;;  %v6433_v61 = vor.u32 %v6432_v7, %v6431_v58  ;;  %v5715_v50 = vrot.slane %v5710_v3, %v11514_v15  ;;  %v14165_v19 = vrot.slane %v10795_v22, 7  ;;  %v6272_v62 = vor.u32 %v6271_v47, %v6270_v2 }
 0x383   :  { %v6438_v49 = vrot.slane %v14129_v38, 2  ;;  %v6439_v26 = vrot.slane %v14132_v56, 3  ;;  %v6441_v34 = vshll.u32 %v14157_v36, 16  ;;  %v6869_v39 = vsel %vm1438_vm5, %v12955_v37, %v13524_v48  ;;  %v14184_v37 = vpop.permute.xlu0 %6490 }
 0x384   :  { %6850 = vrot.lane.b32.xlu1 %v6813_v35, %s11420_s17  ;;  %v6694_v35 = vrot.slane %v6692_v4, 3  ;;  %vm18104_vm15 = vsmask.f32 5376  ;;  %v6901_v58 = vsel %vm1471_vm7, %v6869_v39, %v13533_v1  ;;  %v6330_v7 = vrot.slane %v14122_v60, 2  ;;  %v14186_v48 = vpop.permute.xlu1 %6302  ;;  %v10776_v1 = vld [vmem:[%s17797_s0 + $0xe0] sm:$0xf] }
 0x385   :  { %v6437_v10 = vsel %vm18104_vm15, %v6433_v61, %v6436_v11  ;;  %v6440_v63 = vor.u32 %v6439_v26, %v6438_v49  ;;  %v6443_v4 = vrot.slane %v6441_v34, 3  ;;  %18106 = vst [vmem:[#allocation42_spill] sm:$0xff] %v14186_v48  ;;  %v6701_v11 = vshrl.u32 %v14157_v36, 16 }
 0x386   :  { %6162 = vrot.lane.b32.xlu0 %v6107_v30, %s11414_s30  ;;  %v6691_v30 = vor.u32 %v6690_v8, %v6689_v18  ;;  %v6696_v22 = vor.u32 %v6695_v6, %v6694_v35  ;;  %v6112_v6 = vrot.slane %v14132_v56, 1  ;;  %v6933_v3 = vsel %vm1504_vm6, %v6901_v58, %v13603_v27 }
 0x387   :  { %vm18107_vm12 = vsmask.f32 4352  ;;  %v6558_v47 = vrot.slane %v14122_v60, 3  ;;  %v6444_v61 = vsel %vm18104_vm15, %v6440_v63, %v6443_v4  ;;  %v6559_v18 = vrot.slane %v14157_v36, 3 }
 0x388   :  { %6228 = vrot.lane.b32.xlu1 %v6202_v5, %s11413_s23  ;;  %v14178_v5 = vsel %vm18105_vm11, %v5715_v50, %v14165_v19  ;;  %v10777_v50 = vld [vmem:[%s17797_s0 + $0xe4] sm:$0xf]  ;;  %v6697_v2 = vsel %vm18107_vm12, %v6691_v30, %v6696_v22  ;;  %v6698_v35 = vrot.slane %v14129_v38, 3  ;;  %v6703_v49 = vrot.slane %v6701_v11, 3  ;;  %v14216_v22 = vpop.permute.xlu0 %6752  ;;  %v14218_v58 = vpop.permute.xlu1 %6578 }
 0x389   :  { %v14192_v8 = vshll.u32 %v14178_v5, 16  ;;  %v6704_v26 = vrot.slane %v6441_v34, 4  ;;  %v5717_v39 = vpack.i.b16 %v10776_v1, %v10776_v1  ;;  %v10796_v27 = vcombine.low %v10776_v1, %v10777_v50 }
 0x38a   :  { %6306 = vrot.lane.b32.xlu0 %v6269_v16, %s11415_s8  ;;  %v5833_v16 = vshrl.u32 %v14144_v44, 16  ;;  %v14213_v44 = vshrl.u32 %v14178_v5, 16  ;;  %v6965_v34 = vsel %vm1537_vm8, %v6933_v3, %v13880_v57  ;;  %vm18108_vm11 = vcmask 1044480  }
 0x38b   :  { %v6118_v30 = vrot.slane %v14192_v8, 1  ;;  %v6705_v4 = vor.u32 %v6704_v26, %v6703_v49  ;;  %v5722_v11 = vrot.slane %v5717_v39, %v11514_v15  ;;  %vm18110_vm12 = vcmask 121856   ;;  %v18116_v49 = vld [vmem:[#allocation2_spill] sm:$0xff] }
 0x38c   :  { %6308 = vrot.lane.b32.xlu1 %v6272_v62, %s11415_s8  ;;  %v6699_v62 = vrot.slane %v14132_v56, 4  ;;  %v6865_v56 = vsel %vm1438_vm5, %v17997_v9, %v13530_v51  ;;  %v6997_v9 = vsel %vm18110_vm12, %v6965_v34, %v13930_v52  ;;  %v6871_v57 = vsel %vm1438_vm5, %v18002_v54, %v13540_v24  ;;  %v14241_v3 = vpop.permute.xlu0 %6758 }
 0x38d   :  { %v6119_v1 = vor.u32 %v6118_v30, %v14213_v44  ;;  %v6897_v50 = vsel %vm1471_vm7, %v6865_v56, %v13569_v31  ;;  %vm18111_vm15 = vsmask.f32 4352  ;;  %v6815_v52 = vrot.slane %v14157_v36, 4 }
 0x38e   :  { %6498 = vrot.lane.b32.xlu0 %v6437_v10, %s11417_s14  ;;  %v6113_v10 = vor.u32 %v6112_v6, %v14129_v38  ;;  %v6560_v38 = vsel %vm18108_vm11, %v6558_v47, %v6559_v18  ;;  %v6700_v63 = vor.u32 %v6699_v62, %v6698_v35  ;;  %v14228_v6 = vrot.slane %v10796_v27, 7  ;;  %v18115_v62 = vld [vmem:[#allocation10_spill] sm:$0xff] }
 0x38f   :  { %vm18112_vm11 = vcmask 1040384   ;;  %vm18113_vm12 = vcmask 146432   ;;  %v6203_v24 = vrot.slane %v14178_v5, 1  ;;  %v6273_v31 = vrot.slane %v14213_v44, 1 }
 0x390   :  { %6356 = vrot.lane.b32.xlu1 %v6330_v7, %s11416_s13  ;;  %v5834_v7 = vpack.i.b16 %v5833_v16, %v5833_v16  ;;  %18109 = vst [vmem:[#allocation43_spill] sm:$0xff] %v14228_v6  ;;  %v6706_v47 = vsel %vm18111_vm15, %v6700_v63, %v6705_v4  ;;  %v6814_v16 = vrot.slane %v14122_v60, 4  ;;  %v7029_v54 = vsel %vm18113_vm12, %v6997_v9, %v14050_v25  ;;  %vm18114_vm15 = vmmov %vm18112_vm11  ;;  %v18119_v4 = vld [vmem:[#allocation26_spill] sm:$0xff]  ;;  %v18148_v60 = vld [vmem:[#allocation9_spill] sm:$0xff] }
 0x391   :  { %v6274_v18 = vrot.slane %v14192_v8, 2  ;;  %v6903_v25 = vsel %vm1471_vm7, %v6871_v57, %v18115_v62  ;;  %v6929_v26 = vsel %vm1504_vm6, %v6897_v50, %v18116_v49  ;;  %vm18118_vm12 = vcmask 1043456  }
 0x392   :  { %6770 = vrot.lane.b32.xlu0 %v6697_v2, %s11419_s16  ;;  %v5839_v51 = vrot.slane %v5834_v7, %v11681_v0  ;;  %v14243_v2 = vpop.permute.xlu1 %6760  ;;  %v6816_v27 = vsel %vm18118_vm12, %v6814_v16, %v6815_v52  ;;  %v6445_v7 = vrot.slane %v14213_v44, 2  ;;  %v6446_v56 = vrot.slane %v14192_v8, 3 }
 0x393   :  { %v3828_v16 = vshrl.u32 %v14053_v53, 16  ;;  %v3835_v52 = vshll.u32 %v14042_v32, 16  ;;  %v6561_v49 = vrot.slane %v14178_v5, 3  ;;  %vm18124_vm12 = vsmask.f32 5376 }
 0x394   :  { %6500 = vrot.lane.b32.xlu1 %v6444_v61, %s11417_s14  ;;  %v14250_v61 = vsel %vm18112_vm11, %v5722_v11, %v14228_v6  ;;  %v14260_v35 = vsel %vm18114_vm15, %v14165_v19, %v5839_v51  ;;  %vm18117_vm11 = vcmask 171008   ;;  %v6275_v19 = vor.u32 %v6274_v18, %v6273_v31 }
 0x395   :  { %v14264_v36 = vshll.u32 %v14250_v61, 16  ;;  %v7061_v39 = vsel %vm18117_vm11, %v7029_v54, %v14162_v20  ;;  %v17874_v34 = vshll.u32 %v14260_v35, 16  ;;  %v14282_v20 = vshrl.u32 %v14250_v61, 16 }
 0x396   :  { %6164 = vrot.lane.b32.xlu0 %v6113_v10, %s11414_s30  ;;  %v14274_v10 = vpop.permute.xlu0 %6492  ;;  %v6837_v30 = vpop.permute.xlu1 %6836  ;;  %v6935_v11 = vsel %vm1504_vm6, %v6903_v25, %v18119_v4  ;;  %v6331_v51 = vrot.slane %v14178_v5, 2  ;;  %vm18121_vm15 = vcmask 195584   ;;  %v6447_v50 = vor.u32 %v6446_v56, %v6445_v7 }
 0x397   :  { %v6124_v63 = vrot.slane %v14264_v36, 1  ;;  %v14291_v57 = vsel %vm18121_vm15, %v7061_v39, %v6837_v30  ;;  %v6967_v62 = vsel %vm1537_vm8, %v6935_v11, %v13790_v59  ;;  %vm18123_vm11 = vcmask 121856  }
 0x398   :  { %6596 = vrot.lane.b32.xlu1 %v6560_v38, %s11418_s15  ;;  %v3830_v38 = vshll.u32 %v14053_v53, 16  ;;  %18122 = vst [vmem:[#allocation10_spill] sm:$0xff] %v14291_v57  ;;  %v6562_v39 = vrot.slane %v14260_v35, 3  ;;  %vm18125_vm15 = vcmask 146432   ;;  %vm18128_vm3 = vcmask 171008  }
 0x399   :  { %v6125_v18 = vor.u32 %v6124_v63, %v14282_v20  ;;  %v4070_v63 = vrot.slane %v3835_v52, 2 }
 0x39a   :  { %6166 = vrot.lane.b32.xlu0 %v6119_v1, %s11414_s30  ;;  %v18120_v1 = vld [vmem:[#allocation27_spill] sm:$0xff]  ;;  %v3832_v54 = vrot.slane %v3830_v38, 1  ;;  %v14301_v31 = vpop.permute.xlu0 %6586  ;;  %v4065_v7 = vrot.slane %v3830_v38, 2  ;;  %v14318_v11 = vpop.permute.xlu1 %6350 }
 0x39b   :  { %v6961_v9 = vsel %vm1537_vm8, %v6929_v26, %v18120_v1  ;;  %18126 = vst [vmem:[#allocation2_spill] sm:$0xff] %v14318_v11 }
 0x39c   :  { %6772 = vrot.lane.b32.xlu1 %v6706_v47, %s11419_s16  ;;  %v6450_v47 = vrot.slane %v17874_v34, 3  ;;  %v6993_v25 = vsel %vm18123_vm11, %v6961_v9, %v13989_v23  ;;  %v3833_v30 = vor.u32 %v3832_v54, %v3828_v16  ;;  %v6999_v23 = vsel %vm18123_vm11, %v6967_v62, %v14014_v40 }
 0x39d   :  { %v7025_v59 = vsel %vm18125_vm15, %v6993_v25, %v14112_v28  ;;  %v7031_v28 = vsel %vm18125_vm15, %v6999_v23, %v14134_v17  ;;  %vm18129_vm11 = vcmask 195584   ;;  %vm17928_vm15 = vcmask 785408  }
 0x39e   :  { %6230 = vrot.lane.b32.xlu0 %v6203_v24, %s11413_s23  ;;  %v4067_v24 = vshrl.u32 %v14042_v32, 16  ;;  %v6451_v26 = vsel %vm18124_vm12, %v6447_v50, %v6450_v47  ;;  %v6833_v4 = vpop.permute.xlu0 %6832  ;;  %vm18127_vm12 = vcmask 1044480   ;;  %v7057_v50 = vsel %vm18128_vm3, %v7025_v59, %v14216_v22  ;;  %v14335_v54 = vpop.permute.xlu1 %6754 }
 0x39f   :  { %v6563_v1 = vsel %vm18127_vm12, %v6561_v49, %v6562_v39  ;;  %v14329_v40 = vsel %vm18129_vm11, %v7057_v50, %v6833_v4  ;;  %vm18131_vm12 = vmmov %vm18128_vm3  ;;  %v3985_v22 = vrot.slane %v14053_v53, 1  ;;  %v18138_v23 = vmov 0  }
 0x3a0   :  { %6852 = vrot.lane.b32.xlu1 %v6816_v27, %s11420_s17  ;;  %v3837_v27 = vrot.slane %v3835_v52, 1  ;;  %v4069_v56 = vrot.slane %v4067_v24, 1  ;;  %18130 = vst [vmem:[#allocation26_spill] sm:$0xff] %v14329_v40  ;;  %vm18132_vm3 = vmmov %vm18129_vm11  ;;  %v3986_v24 = vrot.slane %v14042_v32, 1  ;;  %vm18157_vm11 = vcmask 1041408  }
 0x3a2   :  { %6310 = vrot.lane.b32.xlu0 %v6275_v19, %s11415_s8  ;;  %v4064_v19 = vrot.slane %v3828_v16, 1  ;;  %v3838_v9 = vsel %vm3794_vm0, %v3833_v30, %v3837_v27  ;;  %v7063_v16 = vsel %vm18131_vm12, %v7031_v28, %v14241_v3  ;;  %v6839_v52 = vpop.permute.xlu0 %6838  ;;  %v3987_v62 = vsel %vm3975_vm10, %v3985_v22, %v3986_v24  ;;  %v11299_v27 = vld [vmem:[%s17801_s5 + $0x38] sm:$0xff]   ;;  %v11304_v22 = vld [vmem:[%s17801_s5 + $0x10] sm:$0xff]  }
 0x3a3   :  { %v14340_v17 = vsel %vm18132_vm3, %v7063_v16, %v6839_v52  ;;  %vm18165_vm12 = vsmask.f32 4352  ;;  %vm18166_vm3 = vmmov %vm18157_vm11 }
 0x3a4   :  { %7204 = vrot.lane.b32.xlu1 %v14291_v57, %s11421_s27  ;;  %v4066_v38 = vor.u32 %v4065_v7, %v4064_v19 }
 0x3a6   :  { %6358 = vrot.lane.b32.xlu0 %v6331_v51, %s11416_s13  ;;  %v4071_v51 = vor.u32 %v4070_v63, %v4069_v56  ;;  %v14346_v3 = vpop.permute.xlu0 %6588  ;;  %v18137_v63 = vld [vmem:[#allocation28_spill] sm:$0xff] }
 0x3a7   :  { %18133 = vst [vmem:[#allocation27_spill] sm:$0xff] %v14346_v3 }
 0x3a8   :  { %6168 = vrot.lane.b32.xlu1 %v6125_v18, %s11414_s30  ;;  %v4072_v47 = vsel %vm17930_vm9, %v4066_v38, %v4071_v51  ;;  %v11302_v51 = vld [vmem:[%s17801_s5 + $0x20] sm:$0xff]  }
 0x3aa   :  { %6502 = vrot.lane.b32.xlu0 %v6451_v26, %s11417_s14 }
 0x3ac   :  { %3933 = vrot.lane.b32.xlu1 %v3838_v9, %s11435_s25 }
 0x3ae   :  { %6598 = vrot.lane.b32.xlu0 %v6563_v1, %s11418_s15  ;;  %v11301_v1 = vld [vmem:[%s17801_s5 + $0x28] sm:$0xff]  }
 0x3b0   :  { %4151 = vrot.lane.b32.xlu1 %v4072_v47, %s11436_s10  ;;  %v11303_v47 = vld [vmem:[%s17801_s5 + $0x18] sm:$0xff]  }
 0x3b2   :  { %7131 = vrot.lane.b32.xlu0 %v14329_v40, %s11422_s28  ;;  %v4013_v18 = vpop.permute.xlu1 %4012 }
 0x3b6   :  { %7229 = vrot.lane.b32.xlu0 %v14340_v17, %s11425_s18  ;;  %v14350_v25 = vpop.permute.xlu1 %6840 }
 0x3b7   :  { %v3928_v49 = vpop.permute.xlu0 %3927 }
 0x3b8   :  { %v4208_v39 = vsel %vm4206_vm4, %v13757_v42, %v3928_v49  ;;  %v11300_v42 = vld [vmem:[%s17801_s5 + $0x30] sm:$0xff]  }
 0x3b9   :  { %v4232_v19 = vsel %vm3283_vm1, %v4208_v39, %v4013_v18  ;;  %v4173_v18 = vrot.slane %v13898_v29, 2  ;;  %v11305_v39 = vld [vmem:[%s17801_s5 + $0x8] sm:$0xff]  }
 0x3ba   :  { %4018 = vrot.lane.b32.xlu0 %v3987_v62, %s11434_s4  ;;  %v14352_v26 = vpop.permute.xlu1 %6764  ;;  %v4174_v62 = vrot.slane %v13918_v14, 2  ;;  %v11306_v14 = vld [vmem:[%s17801_s5] sm:$0xff]  }
 0x3bb   :  { %18134 = vst [vmem:[#allocation44_spill] sm:$0xff] %v14352_v26 }
 0x3be   :  { %v14356_v32 = vpop.permute.xlu1 %6842 }
 0x3bf   :  { %18135 = vst [vmem:[#allocation45_spill] sm:$0xff] %v14356_v32 }
 0x3c2   :  { %v14366_v56 = vpop.permute.xlu1 %6844 }
 0x3c3   :  { %18136 = vst [vmem:[#allocation46_spill] sm:$0xff] %v14366_v56 }
 0x3c4   :  { %v4146_v30 = vpop.permute.xlu0 %4145 }
 0x3c5   :  { %v14363_v7 = vsel %vm17928_vm15, %v4232_v19, %v4146_v30  ;;  %v14422_v19 = vsel %vm4169_vm2, %v4173_v18, %v4174_v62 }
 0x3c6   :  { %4421 = vmatmul.mubr.bf16.vlgmr.msra.gmra.mxu0 %v14363_v7  ;;  %v14376_v4 = vpop.permute.xlu1 %6766 }
 0x3c7   :  { %10632 = vmatprep.mubr.msk.bf16.mxu0 %vm4206_vm4, %v18137_v63  ;;  %4610 = vmatpush1.bf16.msra.mxu0 %v11299_v27  ;;  %18139 = vst [vmem:[#allocation28_spill] sm:$0xff] %v14376_v4 }
 0x3c8   :  { %v14373_v59 = vpop.permute.xlu0 %6762  ;;  %4611 = vmatprep.subr.bf16.mxu0 %v18138_v23 }
 0x3ca   :  { %v14385_v38 = vpop.permute.xlu1 %6846 }
 0x3cb   :  { %4612 = vmatpush1.bf16.msra.mxu0 %v11300_v42  ;;  %18141 = vst [vmem:[#allocation48_spill] sm:$0xff] %v14385_v38 }
 0x3cc   :  { %v14381_v9 = vpop.permute.xlu0 %6494  ;;  %4613 = vmatprep.subr.bf16.mxu0 %v18138_v23 }
 0x3cd   :  { %18140 = vst [vmem:[#allocation47_spill] sm:$0xff] %v14381_v9 }
 0x3ce   :  { %4429 = vmatmul.mubr.bf16.gmra.mxu0 %v14363_v7 }
 0x3cf   :  { %10633 = vmatprep.mubr.msk.bf16.mxu0 %vm4206_vm4, %v18137_v63  ;;  %4614 = vmatpush1.bf16.msra.mxu0 %v11301_v1 }
 0x3d0   :  { %v14392_v50 = vpop.permute.xlu0 %6834  ;;  %4615 = vmatprep.subr.bf16.mxu0 %v18138_v23 }
 0x3d2   :  { %v14395_v28 = vpop.permute.xlu1 %6352 }
 0x3d3   :  { %18142 = vst [vmem:[#allocation49_spill] sm:$0xff] %v14395_v28  ;;  %4616 = vmatpush1.bf16.msra.mxu0 %v11302_v51  ;;  %v4176_v51 = vrot.slane %v13977_v13, 2 }
 0x3d4   :  { %v14400_v16 = vpop.permute.xlu0 %6590  ;;  %4617 = vmatprep.subr.bf16.mxu0 %v18138_v23 }
 0x3d5   :  { %18143 = vst [vmem:[#allocation50_spill] sm:$0xff] %v14400_v16 }
 0x3d6   :  { %4437 = vmatmul.mubr.bf16.gmra.mxu0 %v14363_v7  ;;  %v3930_v52 = vpop.permute.xlu1 %3929 }
 0x3d7   :  { %10634 = vmatprep.mubr.msk.bf16.mxu0 %vm4206_vm4, %v18137_v63  ;;  %4618 = vmatpush1.bf16.msra.mxu0 %v11303_v47  ;;  %v4177_v47 = vrot.slane %v13974_v12, 2 }
 0x3d8   :  { %v14409_v24 = vpop.permute.xlu0 %6160  ;;  %4619 = vmatprep.subr.bf16.mxu0 %v18138_v23 }
 0x3d9   :  { %18144 = vst [vmem:[#allocation51_spill] sm:$0xff] %v14409_v24 }
 0x3da   :  { %v4148_v49 = vpop.permute.xlu1 %4147 }
 0x3db   :  { %4620 = vmatpush1.bf16.msra.mxu0 %v11304_v22  ;;  %v4210_v22 = vsel %vm4206_vm4, %v13898_v29, %v3930_v52  ;;  %v14451_v29 = vsel %vm4169_vm2, %v4176_v51, %v4177_v47 }
 0x3dc   :  { %v14417_v27 = vpop.permute.xlu0 %6224  ;;  %4621 = vmatprep.subr.bf16.mxu0 %v18138_v23  ;;  %18150 = vst [vmem:[#allocation56_spill] sm:$0xff] %v14451_v29 }
 0x3dd   :  { %18145 = vst [vmem:[#allocation52_spill] sm:$0xff] %v14417_v27 }
 0x3de   :  { %4445 = vmatmul.mubr.bf16.gmra.mxu0 %v14363_v7  ;;  %v4017_v30 = vpop.permute.xlu1 %4016  ;;  %v3369_v62 = vpop.f32.mrf.mxu1 }
 0x3df   :  { %10635 = vmatprep.mubr.msk.bf16.mxu0 %vm4206_vm4, %v14422_v19  ;;  %4622 = vmatpush1.bf16.msra.mxu0 %v11305_v39  ;;  %v11307_v39 = vld [vmem:[%s17801_s5 + $0x48] sm:$0xff]  }
 0x3e0   :  { %v14429_v42 = vpop.permute.xlu0 %6304  ;;  %4623 = vmatprep.subr.bf16.mxu0 %v18138_v23 }
 0x3e1   :  { %18146 = vst [vmem:[#allocation53_spill] sm:$0xff] %v14429_v42 }
 0x3e2   :  { %v14432_v1 = vpop.permute.xlu1 %6592 }
 0x3e3   :  { %18147 = vst [vmem:[#allocation54_spill] sm:$0xff] %v14432_v1  ;;  %4624 = vmatpush1.bf16.msra.mxu0 %v11306_v14  ;;  %v3370_v1 = vadd.f32 %v3369_v62, %v18148_v60  ;;  %v11130_v14 = vpop.f32.mrf.mxu1  ;;  %v18151_v62 = vld [vmem:[#allocation14_spill] sm:$0xff] }
 0x3e4   :  { %v4015_v18 = vpop.permute.xlu0 %4014  ;;  %4637 = vmatprep.subr.bf16.mxu0 %v18138_v23 }
 0x3e5   :  { %v4234_v34 = vsel %vm3283_vm1, %v4210_v22, %v4015_v18  ;;  %v3440_v52 = vcombine.high %v3370_v1, %v3370_v1  ;;  %v3372_v27 = vpop.f32.mrf.mxu1  ;;  %v3482_v22 = vmax.f32 %v3370_v1, 0.0 }
 0x3e6   :  { %v14445_v28 = vsel %vm17928_vm15, %v4234_v34, %v4148_v49  ;;  %v14447_v12 = vpop.permute.xlu1 %6848  ;;  %v11308_v34 = vld [vmem:[%s17801_s5 + $0x40] sm:$0xff]   ;;  %v3373_v14 = vadd.f32 %v3372_v27, %v18151_v62 }
 0x3e7   :  { %18149 = vst [vmem:[#allocation55_spill] sm:$0xff] %v14447_v12  ;;  %4453 = vmatmul.mubr.bf16.gmra.mxu0 %v14445_v28  ;;  %v3483_v18 = vmax.f32 %v3440_v52, 0.0  ;;  %v11131_v47 = vpop.f32.mrf.mxu1 }
 0x3e8   :  { %10636 = vmatprep.mubr.msk.bf16.mxu0 %vm4206_vm4, %v14451_v29  ;;  %v3932_v42 = vpop.permute.xlu0 %3931  ;;  %4638 = vmatpush2.bf16.msra.mxu0 %v11307_v39  ;;  %v3484_v24 = vmax.f32 %v3373_v14, 0.0 }
 0x3e9   :  { %v4212_v49 = vsel %vm4206_vm4, %v13977_v13, %v3932_v42  ;;  %4639 = vmatprep.subr.bf16.mxu0 %v18138_v23  ;;  %v3534_v12 = vcombine.low %v3482_v22, %v3483_v18  ;;  %v6707_v22 = vrot.slane %v14213_v44, 3  ;;  %v6708_v18 = vrot.slane %v14192_v8, 4 }
 0x3ea   :  { %v14462_v51 = vpop.permute.xlu1 %6226  ;;  %v4236_v39 = vsel %vm3283_vm1, %v4212_v49, %v4017_v30  ;;  %v18159_v44 = vshll.u32 %v14260_v35, 16 }
 0x3eb   :  { %18152 = vst [vmem:[#allocation57_spill] sm:$0xff] %v14462_v51  ;;  %v3558_v57 = vpack.c.bf16 %v3484_v24, %v3534_v12 }
 0x3ec   :  { %v4150_v38 = vpop.permute.xlu0 %4149  ;;  %4640 = vmatpush2.bf16.msra.mxu0 %v11308_v34  ;;  %v14498_v8 = vrot.slane %v18159_v44, 4 }
 0x3ed   :  { %v14466_v4 = vsel %vm17928_vm15, %v4236_v39, %v4150_v38  ;;  %5083 = vmatprep.subr.bf16.mxu0 %v18138_v23  ;;  %v3595_v27 = vpack.i.b16 %v3558_v57, %v3558_v57  ;;  %v3678_v42 = vshrl.u32 %v3558_v57, 16  ;;  %v3750_v34 = vrot.slane %v3558_v57, 6 }
 0x3ee   :  { %18153 = vst [vmem:[#allocation58_spill] sm:$0xff] %v14466_v4  ;;  %v14469_v13 = vpop.permute.xlu1 %6354  ;;  %v3441_v38 = vcombine.high %v3373_v14, %v3373_v14  ;;  %v3377_v39 = vpop.f32.mrf.mxu1 }
 0x3ef   :  { %18154 = vst [vmem:[#allocation59_spill] sm:$0xff] %v14469_v13  ;;  %4461 = vmatmul.mubr.bf16.gmra.mxu0 %v14466_v4  ;;  %v3600_v30 = vrot.slane %v3595_v27, %v11514_v15  ;;  %v3679_v52 = vpack.i.b16 %v3678_v42, %v3678_v42  ;;  %v6710_v42 = vshrl.u32 %v14260_v35, 16 }
 0x3f0   :  { %10657 = vmatprep.mubr.msk.bf16.mxu0 %vm4206_vm4, %v18137_v63  ;;  %v14474_v1 = vpop.permute.xlu0 %6496  ;;  %v3485_v13 = vmax.f32 %v3441_v38, 0.0 }
 0x3f1   :  { %18155 = vst [vmem:[#allocation60_spill] sm:$0xff] %v14474_v1  ;;  %v14480_v24 = vrot.slane %v3679_v52, %v13567_v43  ;;  %v14483_v12 = vsel %vm18157_vm11, %v3600_v30, %v3750_v34  ;;  %v3378_v52 = vadd.f32 %v3377_v39, %v13697_v41  ;;  %vm18173_vm11 = vmmov %vm18166_vm3 }
 0x3f2   :  { %v14477_v49 = vpop.permute.xlu1 %6594  ;;  %v3988_v27 = vrot.slane %v14483_v12, 1  ;;  %v3839_v57 = vshrl.u32 %v14483_v12, 16  ;;  %v3841_v14 = vshll.u32 %v14483_v12, 16 }
 0x3f3   :  { %18156 = vst [vmem:[#allocation61_spill] sm:$0xff] %v14477_v49  ;;  %v3989_v30 = vrot.slane %v14480_v24, 1  ;;  %v3846_v34 = vshll.u32 %v14480_v24, 16  ;;  %v11309_v49 = vld [vmem:[%s17801_s5 + $0x128] sm:$0xff]   ;;  %v3442_v39 = vcombine.high %v3378_v52, %v3378_v52  ;;  %v3486_v9 = vmax.f32 %v3378_v52, 0.0 }
 0x3f4   :  { %v14487_v47 = vpop.permute.xlu0 %6768  ;;  %v3843_v1 = vrot.slane %v3841_v14, 1  ;;  %v4073_v16 = vrot.slane %v3839_v57, 1  ;;  %v4074_v56 = vrot.slane %v3841_v14, 2  ;;  %v6712_v14 = vrot.slane %v6710_v42, 3 }
 0x3f5   :  { %18158 = vst [vmem:[#allocation62_spill] sm:$0xff] %v14487_v47  ;;  %v11134_v47 = vpop.f32.mrf.mxu1  ;;  %v3990_v26 = vsel %vm3975_vm10, %v3988_v27, %v3989_v30  ;;  %v3848_v11 = vrot.slane %v3846_v34, 1  ;;  %v3487_v3 = vmax.f32 %v3442_v39, 0.0  ;;  %v3535_v48 = vcombine.low %v3485_v13, %v3486_v9  ;;  %v11310_v27 = vld [vmem:[%s17801_s5 + $0x120] sm:$0xff]  }
 0x3f6   :  { %v14503_v51 = vpop.permute.xlu1 %6850  ;;  %4020 = vrot.lane.b32.xlu1 %v3990_v26, %s11434_s4  ;;  %v3844_v38 = vor.u32 %v3843_v1, %v3839_v57  ;;  %v4076_v47 = vshrl.u32 %v14480_v24, 16  ;;  %v4075_v26 = vor.u32 %v4074_v56, %v4073_v16 }
 0x3f7   :  { %18160 = vst [vmem:[#allocation63_spill] sm:$0xff] %v14503_v51  ;;  %4642 = vmatmul.mubr.bf16.vlgmr.msra.gmra.mxu0 %v14363_v7  ;;  %v3380_v6 = vpop.f32.mrf.mxu1  ;;  %v4079_v51 = vrot.slane %v3846_v34, 2  ;;  %v3559_v57 = vpack.c.bf16 %v3487_v3, %v3535_v48  ;;  %v6714_v34 = vor.u32 %v14498_v8, %v6712_v14  ;;  %v11311_v48 = vld [vmem:[%s17801_s5 + $0x118] sm:$0xff]  }
 0x3f8   :  { %10658 = vmatprep.mubr.msk.bf16.mxu0 %vm4206_vm4, %v18137_v63  ;;  %v14509_v44 = vpop.permute.xlu0 %6162  ;;  %v3381_v52 = vadd.f32 %v3380_v6, %v18148_v60  ;;  %5084 = vmatpush1.bf16.msra.mxu0 %v11309_v49  ;;  %v3849_v32 = vsel %vm3794_vm0, %v3844_v38, %v3848_v11  ;;  %v4078_v1 = vrot.slane %v4076_v47, 1  ;;  %v6709_v49 = vor.u32 %v6708_v18, %v6707_v22 }
 0x3f9   :  { %18161 = vst [vmem:[#allocation64_spill] sm:$0xff] %v14509_v44  ;;  %v11135_v44 = vpop.f32.mrf.mxu1  ;;  %5085 = vmatprep.subr.bf16.mxu0 %v18138_v23  ;;  %3935 = vrot.lane.b32.xlu0 %v3849_v32, %s11435_s25  ;;  %v3602_v39 = vpack.i.b16 %v3559_v57, %v3559_v57  ;;  %v3685_v11 = vshrl.u32 %v3559_v57, 16  ;;  %v3751_v18 = vrot.slane %v3559_v57, 6 }
 0x3fa   :  { %v14517_v30 = vpop.permute.xlu1 %6228  ;;  %v3443_v42 = vcombine.high %v3381_v52, %v3381_v52  ;;  %7154 = vrot.lane.b32.xlu1 %v14329_v40, %s11424_s12  ;;  %v4080_v13 = vor.u32 %v4079_v51, %v4078_v1  ;;  %v3488_v3 = vmax.f32 %v3381_v52, 0.0  ;;  %v18171_v40 = vld [vmem:[#allocation6_spill] sm:$0xff] }
 0x3fb   :  { %18162 = vst [vmem:[#allocation65_spill] sm:$0xff] %v14517_v30  ;;  %v3385_v6 = vpop.f32.mrf.mxu1  ;;  %v3607_v51 = vrot.slane %v3602_v39, %v11514_v15  ;;  %v3686_v22 = vpack.i.b16 %v3685_v11, %v3685_v11 }
 0x3fc   :  { %v14522_v9 = vpop.permute.xlu0 %6306  ;;  %5086 = vmatpush1.bf16.msra.mxu0 %v11310_v27  ;;  %v3489_v56 = vmax.f32 %v3443_v42, 0.0  ;;  %v3386_v32 = vadd.f32 %v3385_v6, %v18151_v62  ;;  %v4081_v38 = vsel %vm17930_vm9, %v4075_v26, %v4080_v13  ;;  %v6715_v26 = vsel %vm18165_vm12, %v6709_v49, %v6714_v34  ;;  %vm18178_vm12 = vmmov %vm18166_vm3 }
 0x3fd   :  { %v11138_v44 = vpop.f32.mrf.mxu1  ;;  %5087 = vmatprep.subr.bf16.mxu0 %v18138_v23  ;;  %4153 = vrot.lane.b32.xlu0 %v4081_v38, %s11436_s10  ;;  %v14544_v1 = vrot.slane %v3686_v22, %v13567_v43  ;;  %v14547_v57 = vsel %vm18166_vm3, %v3607_v51, %v3751_v18  ;;  %vm18181_vm3 = vcmask 121856  }
 0x3fe   :  { %v14531_v16 = vpop.permute.xlu1 %6308  ;;  %v3536_v8 = vcombine.low %v3488_v3, %v3489_v56  ;;  %v3444_v14 = vcombine.high %v3386_v32, %v3386_v32  ;;  %v3490_v52 = vmax.f32 %v3386_v32, 0.0  ;;  %v3991_v11 = vrot.slane %v14547_v57, 1 }
 0x3ff   :  { %18163 = vst [vmem:[#allocation66_spill] sm:$0xff] %v14531_v16  ;;  %4650 = vmatmul.mubr.bf16.gmra.mxu0 %v14363_v7  ;;  %v3388_v27 = vpop.f32.mrf.mxu1  ;;  %v3992_v34 = vrot.slane %v14544_v1, 1  ;;  %v3852_v51 = vshll.u32 %v14547_v57, 16 }
 0x400   :  { %10659 = vmatprep.mubr.msk.bf16.mxu0 %vm4206_vm4, %v18137_v63  ;;  %v14540_v47 = vpop.permute.xlu0 %6498  ;;  %v3389_v42 = vadd.f32 %v3388_v27, %v13697_v41  ;;  %5088 = vmatpush1.bf16.msra.mxu0 %v11311_v48  ;;  %v3560_v6 = vpack.c.bf16 %v3490_v52, %v3536_v8  ;;  %v3491_v3 = vmax.f32 %v3444_v14, 0.0  ;;  %v3850_v48 = vshrl.u32 %v14547_v57, 16 }
 0x401   :  { %18164 = vst [vmem:[#allocation67_spill] sm:$0xff] %v14540_v47  ;;  %v11139_v39 = vpop.f32.mrf.mxu1  ;;  %5089 = vmatprep.subr.bf16.mxu0 %v18138_v23  ;;  %6774 = vrot.lane.b32.xlu0 %v6715_v26, %s11419_s16  ;;  %v3993_v8 = vsel %vm3975_vm10, %v3991_v11, %v3992_v34  ;;  %v3854_v26 = vrot.slane %v3852_v51, 1  ;;  %v3857_v11 = vshll.u32 %v14544_v1, 16  ;;  %v4083_v34 = vrot.slane %v3852_v51, 2 }
 0x402   :  { %v14550_v13 = vpop.permute.xlu1 %6356  ;;  %v3445_v56 = vcombine.high %v3389_v42, %v3389_v42  ;;  %v3492_v49 = vmax.f32 %v3389_v42, 0.0  ;;  %v3609_v32 = vpack.i.b16 %v3560_v6, %v3560_v6  ;;  %v3692_v44 = vshrl.u32 %v3560_v6, 16  ;;  %v11312_v42 = vld [vmem:[%s17801_s5 + $0x110] sm:$0xff]   ;;  %v18170_v39 = vld [vmem:[#allocation15_spill] sm:$0xff] }
 0x403   :  { %18167 = vst [vmem:[#allocation68_spill] sm:$0xff] %v14550_v13  ;;  %v6873_v13 = vsel %vm1438_vm5, %v18171_v40, %v18170_v39  ;;  %v3752_v16 = vrot.slane %v3560_v6, 6  ;;  %v3859_v39 = vrot.slane %v3857_v11, 1 }
 0x404   :  { %v14556_v38 = vpop.permute.xlu0 %6770  ;;  %v3493_v22 = vmax.f32 %v3445_v56, 0.0  ;;  %v3537_v18 = vcombine.low %v3491_v3, %v3492_v49  ;;  %v3614_v14 = vrot.slane %v3609_v32, %v11514_v15  ;;  %v3693_v52 = vpack.i.b16 %v3692_v44, %v3692_v44  ;;  %5090 = vmatpush1.bf16.msra.mxu0 %v11312_v42 }
 0x405   :  { %18168 = vst [vmem:[#allocation69_spill] sm:$0xff] %v14556_v38  ;;  %4022 = vrot.lane.b32.xlu0 %v3993_v8, %s11434_s4  ;;  %v3855_v56 = vor.u32 %v3854_v26, %v3850_v48  ;;  %v4082_v49 = vrot.slane %v3850_v48, 1  ;;  %v4085_v32 = vshrl.u32 %v14544_v1, 16  ;;  %5091 = vmatprep.subr.bf16.mxu0 %v18138_v23 }
 0x406   :  { %v14562_v27 = vpop.permute.xlu1 %6500  ;;  %v3561_v30 = vpack.c.bf16 %v3493_v22, %v3537_v18  ;;  %v14579_v40 = vsel %vm18173_vm11, %v3614_v14, %v3752_v16  ;;  %v18174_v22 = vld [vmem:[#allocation8_spill] sm:$0xff]  ;;  %v14585_v8 = vrot.slane %v3693_v52, %v13567_v43  ;;  %vm18182_vm11 = vcmask 146432  }
 0x407   :  { %18169 = vst [vmem:[#allocation70_spill] sm:$0xff] %v14562_v27  ;;  %4658 = vmatmul.mubr.bf16.gmra.mxu0 %v14363_v7  ;;  %v6905_v18 = vsel %vm1471_vm7, %v6873_v13, %v18174_v22  ;;  %v4087_v48 = vrot.slane %v4085_v32, 1  ;;  %v4088_v27 = vrot.slane %v3857_v11, 2  ;;  %v3860_v14 = vsel %vm3794_vm0, %v3855_v56, %v3859_v39  ;;  %v18177_v22 = vld [vmem:[#allocation30_spill] sm:$0xff] }
 0x408   :  { %10660 = vmatprep.mubr.msk.bf16.mxu0 %vm4206_vm4, %v18137_v63  ;;  %v14575_v3 = vpop.permute.xlu0 %6164  ;;  %v3616_v6 = vpack.i.b16 %v3561_v30, %v3561_v30  ;;  %v3699_v44 = vshrl.u32 %v3561_v30, 16  ;;  %v3861_v38 = vshrl.u32 %v14579_v40, 16  ;;  %v3863_v13 = vshll.u32 %v14579_v40, 16  ;;  %3937 = vrot.lane.b32.xlu1 %v3860_v14, %s11435_s25 }
 0x409   :  { %18172 = vst [vmem:[#allocation15_spill] sm:$0xff] %v14575_v3  ;;  %v4084_v3 = vor.u32 %v4083_v34, %v4082_v49  ;;  %v6937_v52 = vsel %vm1504_vm6, %v6905_v18, %v18177_v22  ;;  %v3753_v47 = vrot.slane %v3561_v30, 6  ;;  %v3994_v34 = vrot.slane %v14579_v40, 1 }
 0x40a   :  { %v14587_v26 = vpop.permute.xlu1 %6596  ;;  %v3621_v51 = vrot.slane %v3616_v6, %v11514_v15  ;;  %v3700_v42 = vpack.i.b16 %v3699_v44, %v3699_v44  ;;  %v4089_v6 = vor.u32 %v4088_v27, %v4087_v48  ;;  %v3865_v11 = vrot.slane %v3863_v13, 1 }
 0x40b   :  { %18175 = vst [vmem:[#allocation6_spill] sm:$0xff] %v14587_v26  ;;  %v3868_v44 = vshll.u32 %v14585_v8, 16  ;;  %v3995_v30 = vrot.slane %v14585_v8, 1  ;;  %v4091_v18 = vrot.slane %v3861_v38, 1  ;;  %v4094_v14 = vshrl.u32 %v14585_v8, 16 }
 0x40c   :  { %v14590_v16 = vpop.permute.xlu0 %6166  ;;  %v14599_v32 = vrot.slane %v3700_v42, %v13567_v43  ;;  %v14603_v56 = vsel %vm18178_vm12, %v3621_v51, %v3753_v47  ;;  %v4090_v27 = vsel %vm17930_vm9, %v4084_v3, %v4089_v6  ;;  %v3866_v48 = vor.u32 %v3865_v11, %v3861_v38  ;;  %v11314_v11 = vld [vmem:[%s17801_s5 + $0x108] sm:$0xff]  }
 0x40d   :  { %18176 = vst [vmem:[#allocation8_spill] sm:$0xff] %v14590_v16  ;;  %v3870_v42 = vrot.slane %v3868_v44, 1  ;;  %v4092_v47 = vrot.slane %v3863_v13, 2  ;;  %v6969_v51 = vsel %vm1537_vm8, %v6937_v52, %v13892_v46  ;;  %4155 = vrot.lane.b32.xlu1 %v4090_v27, %s11436_s10  ;;  %v4097_v22 = vrot.slane %v3868_v44, 2  ;;  %5092 = vmatpush1.bf16.msra.mxu0 %v11314_v11 }
 0x40e   :  { %v14606_v49 = vpop.permute.xlu1 %6772  ;;  %v3874_v26 = vshll.u32 %v14603_v56, 16  ;;  %v4096_v16 = vrot.slane %v4094_v14, 1  ;;  %v3872_v38 = vshrl.u32 %v14603_v56, 16  ;;  %v7001_v3 = vsel %vm18181_vm3, %v6969_v51, %v14016_v45  ;;  %5093 = vmatprep.subr.bf16.mxu0 %v18138_v23 }
 0x40f   :  { %4666 = vmatmul.mubr.bf16.gmra.mxu0 %v14363_v7  ;;  %18179 = vst [vmem:[#allocation30_spill] sm:$0xff] %v14606_v49  ;;  %v3871_v49 = vsel %vm3794_vm0, %v3866_v48, %v3870_v42  ;;  %v3996_v46 = vsel %vm3975_vm10, %v3994_v34, %v3995_v30  ;;  %v3879_v6 = vshll.u32 %v14599_v32, 16  ;;  %v4103_v45 = vshrl.u32 %v14599_v32, 16 }
 0x410   :  { %10661 = vmatprep.mubr.msk.bf16.mxu0 %vm4206_vm4, %v18137_v63  ;;  %v14612_v39 = vpop.permute.xlu0 %6230  ;;  %3939 = vrot.lane.b32.xlu0 %v3871_v49, %s11435_s25  ;;  %v3876_v52 = vrot.slane %v3874_v26, 1  ;;  %v4098_v49 = vor.u32 %v4097_v22, %v4096_v16  ;;  %v7033_v34 = vsel %vm18182_vm11, %v7001_v3, %v14136_v21  ;;  %v4100_v27 = vrot.slane %v3872_v38, 1 }
 0x411   :  { %18180 = vst [vmem:[#allocation71_spill] sm:$0xff] %v14612_v39  ;;  %v4093_v39 = vor.u32 %v4092_v47, %v4091_v18  ;;  %4024 = vrot.lane.b32.xlu1 %v3996_v46, %s11434_s4  ;;  %v6204_v18 = vrot.slane %v14250_v61, 1  ;;  %v4101_v48 = vrot.slane %v3874_v26, 2  ;;  %v3881_v47 = vrot.slane %v3879_v6, 1 }
 0x412   :  { %v14633_v44 = vpop.permute.xlu1 %6852  ;;  %v3877_v42 = vor.u32 %v3876_v52, %v3872_v38  ;;  %v4105_v51 = vrot.slane %v4103_v45, 1  ;;  %v4106_v14 = vrot.slane %v3879_v6, 2  ;;  %vm18183_vm12 = vcmask 171008  }
 0x413   :  { %v4099_v30 = vsel %vm17930_vm9, %v4093_v39, %v4098_v49  ;;  %v7065_v21 = vsel %vm18183_vm12, %v7033_v34, %v14243_v2  ;;  %vm18184_vm3 = vcmask 195584   ;;  %v3997_v22 = vrot.slane %v14603_v56, 1  ;;  %v18186_v2 = vld [vmem:[#allocation13_spill] sm:$0xff]  ;;  %v11317_v34 = vld [vmem:[%s17801_s5 + $0x100] sm:$0xff]  }
 0x414   :  { %v14625_v13 = vpop.permute.xlu0 %6310  ;;  %4157 = vrot.lane.b32.xlu0 %v4099_v30, %s11436_s10  ;;  %v14652_v26 = vsel %vm18184_vm3, %v7065_v21, %v14350_v25  ;;  %v3998_v3 = vrot.slane %v14599_v32, 1  ;;  %v3882_v38 = vsel %vm3794_vm0, %v3877_v42, %v3881_v47  ;;  %v4102_v52 = vor.u32 %v4101_v48, %v4100_v27  ;;  %v18187_v25 = vld [vmem:[#allocation12_spill] sm:$0xff]  ;;  %v18188_v30 = vld [vmem:[#allocation29_spill] sm:$0xff]  ;;  %5094 = vmatpush1.bf16.msra.mxu0 %v11317_v34 }
 0x415   :  { %6232 = vrot.lane.b32.xlu1 %v6204_v18, %s11413_s23  ;;  %v4107_v6 = vor.u32 %v4106_v14, %v4105_v51  ;;  %v6867_v11 = vsel %vm1438_vm5, %v18187_v25, %v18186_v2  ;;  %5095 = vmatprep.subr.bf16.mxu0 %v18138_v23  ;;  %v18190_v51 = vld [vmem:[#allocation31_spill] sm:$0xff]  ;;  %vm18195_vm11 = vcmask 121856   ;;  %vm18196_vm12 = vcmask 146432  }
 0x416   :  { %v14654_v39 = vpop.permute.xlu1 %7204  ;;  %v3999_v49 = vsel %vm3975_vm10, %v3997_v22, %v3998_v3  ;;  %v6899_v27 = vsel %vm1471_vm7, %v6867_v11, %v18188_v30  ;;  %vm18199_vm3 = vcmask 171008  }
 0x417   :  { %4674 = vmatmul.mubr.bf16.gmra.mxu0 %v14363_v7  ;;  %18185 = vst [vmem:[#allocation72_spill] sm:$0xff] %v14654_v39  ;;  %v4108_v45 = vsel %vm17930_vm9, %v4102_v52, %v4107_v6  ;;  %v6931_v14 = vsel %vm1504_vm6, %v6899_v27, %v18190_v51 }
 0x418   :  { %10662 = vmatprep.mubr.msk.bf16.mxu0 %vm4206_vm4, %v14422_v19  ;;  %v14644_v16 = vpop.permute.xlu0 %6358  ;;  %7254 = vrot.lane.b32.xlu0 %v14652_v26, %s11426_s9  ;;  %v6963_v52 = vsel %vm1537_vm8, %v6931_v14, %v13991_v33  ;;  %v4182_v33 = vrot.slane %v14483_v12, 2  ;;  %v4183_v14 = vrot.slane %v14480_v24, 2 }
 0x419   :  { %3941 = vrot.lane.b32.xlu1 %v3882_v38, %s11435_s25 }
 0x41a   :  { %v14680_v48 = vpop.permute.xlu1 %6168 }
 0x41b   :  { %18189 = vst [vmem:[#allocation13_spill] sm:$0xff] %v14680_v48 }
 0x41c   :  { %v14658_v46 = vpop.permute.xlu0 %6502  ;;  %4026 = vrot.lane.b32.xlu0 %v3999_v49, %s11434_s4  ;;  %v18192_v49 = vld [vmem:[#allocation39_spill] sm:$0xff] }
 0x41d   :  { %4159 = vrot.lane.b32.xlu1 %v4108_v45, %s11436_s10 }
 0x41e   :  { %v3934_v6 = vpop.permute.xlu1 %3933 }
 0x41f   :  { %4682 = vmatmul.mubr.bf16.gmra.mxu0 %v14445_v28 }
 0x420   :  { %10663 = vmatprep.mubr.msk.bf16.mxu0 %vm4206_vm4, %v14451_v29  ;;  %v14671_v18 = vpop.permute.xlu0 %6598  ;;  %v3393_v42 = vpop.f32.mrf.mxu1 }
 0x421   :  { %v3394_v47 = vadd.f32 %v3393_v42, %v18148_v60  ;;  %v18194_v42 = vld [vmem:[#allocation40_spill] sm:$0xff] }
 0x422   :  { %v11142_v22 = vpop.f32.mrf.mxu1  ;;  %v6995_v51 = vsel %vm18195_vm11, %v6963_v52, %v18194_v42  ;;  %v11318_v52 = vld [vmem:[%s17801_s5 + $0xf8] sm:$0xff]   ;;  %vm18200_vm11 = vcmask 1041408  }
 0x423   :  { %v3446_v3 = vcombine.high %v3394_v47, %v3394_v47  ;;  %v3494_v2 = vmax.f32 %v3394_v47, 0.0  ;;  %v4214_v47 = vsel %vm4206_vm4, %v14053_v53, %v3934_v6  ;;  %v7027_v39 = vsel %vm18196_vm12, %v6995_v51, %v14218_v58  ;;  %5096 = vmatpush1.bf16.msra.mxu0 %v11318_v52 }
 0x424   :  { %v14687_v21 = vpop.permute.xlu0 %7131  ;;  %v3396_v38 = vpop.f32.mrf.mxu1  ;;  %v7059_v42 = vsel %vm18199_vm3, %v7027_v39, %v14335_v54  ;;  %5097 = vmatprep.subr.bf16.mxu0 %v18138_v23  ;;  %vm18201_vm12 = vcmask 195584   ;;  %vm18203_vm3 = vmmov %vm18200_vm11 }
 0x425   :  { %18191 = vst [vmem:[#allocation12_spill] sm:$0xff] %v14687_v21  ;;  %v3495_v25 = vmax.f32 %v3446_v3, 0.0  ;;  %v3397_v11 = vadd.f32 %v3396_v38, %v18151_v62 }
 0x426   :  { %v11143_v34 = vpop.f32.mrf.mxu1 }
 0x427   :  { %4690 = vmatmul.mubr.bf16.gmra.mxu0 %v14466_v4  ;;  %v3538_v30 = vcombine.low %v3494_v2, %v3495_v25  ;;  %v3496_v27 = vmax.f32 %v3397_v11, 0.0  ;;  %v3447_v3 = vcombine.high %v3397_v11, %v3397_v11 }
 0x428   :  { %10664 = vmatprep.mubr.msk.bf16.mxu0 %vm4206_vm4, %v18192_v49  ;;  %v14695_v45 = vpop.permute.xlu0 %7229 }
 0x429   :  { %18193 = vst [vmem:[#allocation29_spill] sm:$0xff] %v14695_v45  ;;  %v3562_v22 = vpack.c.bf16 %v3496_v27, %v3538_v30  ;;  %v4152_v45 = vpop.permute.xlu1 %4151  ;;  %v14713_v30 = vsel %vm4169_vm2, %v4182_v33, %v4183_v14  ;;  %v3497_v51 = vmax.f32 %v3447_v3, 0.0  ;;  %v6817_v33 = vrot.slane %v14178_v5, 4 }
 0x42a   :  { %18198 = vst [vmem:[#allocation40_spill] sm:$0xff] %v14713_v30 }
 0x42b   :  { %v3623_v34 = vpack.i.b16 %v3562_v22, %v3562_v22  ;;  %v3706_v2 = vshrl.u32 %v3562_v22, 16  ;;  %v3754_v58 = vrot.slane %v3562_v22, 6 }
 0x42c   :  { %v4019_v38 = vpop.permute.xlu0 %4018  ;;  %v3401_v53 = vpop.f32.mrf.mxu1 }
 0x42d   :  { %v4238_v25 = vsel %vm3283_vm1, %v4214_v47, %v4019_v38  ;;  %v3628_v6 = vrot.slane %v3623_v34, %v11514_v15  ;;  %v3707_v11 = vpack.i.b16 %v3706_v2, %v3706_v2  ;;  %v3402_v27 = vadd.f32 %v3401_v53, %v13697_v41 }
 0x42e   :  { %v14710_v24 = vsel %vm17928_vm15, %v4238_v25, %v4152_v45  ;;  %v11146_v45 = vpop.f32.mrf.mxu1  ;;  %v6818_v2 = vrot.slane %v14260_v35, 4 }
 0x42f   :  { %18197 = vst [vmem:[#allocation31_spill] sm:$0xff] %v14710_v24  ;;  %4469 = vmatmul.mubr.bf16.vlgmr.msra.gmra.mxu1 %v14710_v24  ;;  %4698 = vmatmul.mubr.bf16.gmra.mxu0 %v14710_v24  ;;  %v14727_v14 = vrot.slane %v3707_v11, %v13567_v43  ;;  %v14730_v22 = vsel %vm18200_vm11, %v3628_v6, %v3754_v58  ;;  %v3498_v38 = vmax.f32 %v3402_v27, 0.0  ;;  %vm18204_vm11 = vcmask 1043456  }
 0x430   :  { %10638 = vmatprep.mubr.msk.bf16.mxu1 %vm4206_vm4, %v14713_v30  ;;  %10665 = vmatprep.mubr.msk.bf16.mxu0 %vm4206_vm4, %v14713_v30  ;;  %v3448_v47 = vcombine.high %v3402_v27, %v3402_v27  ;;  %v3404_v54 = vpop.f32.mrf.mxu1  ;;  %v4000_v39 = vrot.slane %v14730_v22, 1  ;;  %v3883_v3 = vshrl.u32 %v14730_v22, 16  ;;  %v3885_v34 = vshll.u32 %v14730_v22, 16 }
 0x431   :  { %v3539_v53 = vcombine.low %v3497_v51, %v3498_v38  ;;  %v3405_v11 = vadd.f32 %v3404_v54, %v18148_v60  ;;  %v4001_v6 = vrot.slane %v14727_v14, 1  ;;  %v3890_v52 = vshll.u32 %v14727_v14, 16 }
 0x432   :  { %v3499_v25 = vmax.f32 %v3448_v47, 0.0  ;;  %v11147_v58 = vpop.f32.mrf.mxu1  ;;  %v3887_v27 = vrot.slane %v3885_v34, 1  ;;  %v4109_v45 = vrot.slane %v3883_v3, 1  ;;  %v4110_v21 = vrot.slane %v3885_v34, 2 }
 0x433   :  { %v14742_v30 = vsel %vm18201_vm12, %v7059_v42, %v14392_v50  ;;  %v3449_v35 = vcombine.high %v3405_v11, %v3405_v11  ;;  %v4002_v49 = vsel %vm3975_vm10, %v4000_v39, %v4001_v6  ;;  %v3500_v47 = vmax.f32 %v3405_v11, 0.0  ;;  %vm18205_vm12 = vmmov %vm18203_vm3 }
 0x434   :  { %18202 = vst [vmem:[#allocation73_spill] sm:$0xff] %v14742_v30  ;;  %v3563_v24 = vpack.c.bf16 %v3499_v25, %v3539_v53  ;;  %4028 = vrot.lane.b32.xlu1 %v4002_v49, %s11434_s4  ;;  %v3888_v38 = vor.u32 %v3887_v27, %v3883_v3  ;;  %v3892_v54 = vrot.slane %v3890_v52, 1  ;;  %v4112_v58 = vshrl.u32 %v14727_v14, 16  ;;  %v11319_v3 = vld [vmem:[%s17801_s5 + $0xf0] sm:$0xff]  }
 0x435   :  { %v3409_v51 = vpop.f32.mrf.mxu1  ;;  %v3501_v29 = vmax.f32 %v3449_v35, 0.0  ;;  %v4111_v34 = vor.u32 %v4110_v21, %v4109_v45  ;;  %v4115_v53 = vrot.slane %v3890_v52, 2  ;;  %5098 = vmatpush1.bf16.msra.mxu0 %v11319_v3 }
 0x436   :  { %v3630_v60 = vpack.i.b16 %v3563_v24, %v3563_v24  ;;  %v3713_v4 = vshrl.u32 %v3563_v24, 16  ;;  %v3410_v48 = vadd.f32 %v3409_v51, %v18151_v62  ;;  %v3893_v42 = vsel %vm3794_vm0, %v3888_v38, %v3892_v54  ;;  %v11320_v54 = vld [vmem:[%s17801_s5 + $0xd8] sm:$0xff]   ;;  %5111 = vmatprep.subr.bf16.mxu0 %v18138_v23 }
 0x437   :  { %v11150_v50 = vpop.f32.mrf.mxu1  ;;  %v4114_v25 = vrot.slane %v4112_v58, 1  ;;  %v3755_v49 = vrot.slane %v3563_v24, 6  ;;  %v3540_v6 = vcombine.low %v3500_v47, %v3501_v29  ;;  %3943 = vrot.lane.b32.xlu0 %v3893_v42, %s11435_s25  ;;  %v6819_v29 = vsel %vm18204_vm11, %v6817_v33, %v6818_v2  ;;  %4831 = vmatpush1.bf16.msra.mxu1 %v11320_v54 }
 0x438   :  { %v3635_v39 = vrot.slane %v3630_v60, %v11514_v15  ;;  %v3714_v11 = vpack.i.b16 %v3713_v4, %v3713_v4  ;;  %v3450_v27 = vcombine.high %v3410_v48, %v3410_v48  ;;  %v3502_v21 = vmax.f32 %v3410_v48, 0.0  ;;  %7179 = vrot.lane.b32.xlu1 %v14742_v30, %s11428_s29  ;;  %4832 = vmatprep.subr.bf16.mxu1 %v18138_v23 }
 0x439   :  { %v3412_v45 = vpop.f32.mrf.mxu1  ;;  %v4116_v35 = vor.u32 %v4115_v53, %v4114_v25  ;;  %vm18214_vm11 = vcmask 121856  }
 0x43a   :  { %v14757_v52 = vrot.slane %v3714_v11, %v13567_v43  ;;  %v14760_v60 = vsel %vm18203_vm3, %v3635_v39, %v3755_v49  ;;  %v3413_v4 = vadd.f32 %v3412_v45, %v13697_v41  ;;  %v3503_v24 = vmax.f32 %v3450_v27, 0.0 }
 0x43b   :  { %v3564_v47 = vpack.c.bf16 %v3502_v21, %v3540_v6  ;;  %v11151_v51 = vpop.f32.mrf.mxu1  ;;  %v4117_v48 = vsel %vm17930_vm9, %v4111_v34, %v4116_v35  ;;  %v3894_v38 = vshrl.u32 %v14760_v60, 16  ;;  %v3896_v33 = vshll.u32 %v14760_v60, 16  ;;  %v11321_v35 = vld [vmem:[%s17801_s5 + $0xd0] sm:$0xff]  }
 0x43c   :  { %v3451_v58 = vcombine.high %v3413_v4, %v3413_v4  ;;  %v3504_v50 = vmax.f32 %v3413_v4, 0.0  ;;  %4161 = vrot.lane.b32.xlu0 %v4117_v48, %s11436_s10  ;;  %v3901_v2 = vshll.u32 %v14757_v52, 16  ;;  %v4003_v34 = vrot.slane %v14760_v60, 1  ;;  %4833 = vmatpush1.bf16.msra.mxu1 %v11321_v35 }
 0x43d   :  { %v3637_v42 = vpack.i.b16 %v3564_v47, %v3564_v47  ;;  %v3720_v25 = vshrl.u32 %v3564_v47, 16  ;;  %v3756_v53 = vrot.slane %v3564_v47, 6  ;;  %v3898_v49 = vrot.slane %v3896_v33, 1  ;;  %4834 = vmatprep.subr.bf16.mxu1 %v18138_v23 }
 0x43e   :  { %v3505_v39 = vmax.f32 %v3451_v58, 0.0  ;;  %v3541_v11 = vcombine.low %v3503_v24, %v3504_v50  ;;  %v3903_v6 = vrot.slane %v3901_v2, 1  ;;  %v4004_v21 = vrot.slane %v14757_v52, 1 }
 0x43f   :  { %v3642_v3 = vrot.slane %v3637_v42, %v11514_v15  ;;  %v3721_v27 = vpack.i.b16 %v3720_v25, %v3720_v25  ;;  %v4118_v45 = vrot.slane %v3894_v38, 1  ;;  %v3899_v47 = vor.u32 %v3898_v49, %v3894_v38 }
 0x440   :  { %v3565_v4 = vpack.c.bf16 %v3505_v39, %v3541_v11  ;;  %6854 = vrot.lane.b32.xlu0 %v6819_v29, %s11420_s17  ;;  %v4119_v51 = vrot.slane %v3896_v33, 2  ;;  %v4121_v24 = vshrl.u32 %v14757_v52, 16  ;;  %v4124_v58 = vrot.slane %v3901_v2, 2  ;;  %v11322_v2 = vld [vmem:[%s17801_s5 + $0xc8] sm:$0xff]  }
 0x441   :  { %v14783_v48 = vrot.slane %v3721_v27, %v13567_v43  ;;  %v14786_v54 = vsel %vm18205_vm12, %v3642_v3, %v3756_v53  ;;  %v3904_v25 = vsel %vm3794_vm0, %v3899_v47, %v3903_v6  ;;  %v4005_v39 = vsel %vm3975_vm10, %v4003_v34, %v4004_v21  ;;  %v18206_v3 = vld [vmem:[#allocation11_spill] sm:$0xff]  ;;  %v18207_v27 = vld [vmem:[#allocation16_spill] sm:$0xff]  ;;  %4835 = vmatpush1.bf16.msra.mxu1 %v11322_v2  ;;  %v11324_v2 = vld [vmem:[%s17801_s5 + $0x138] sm:$0xff]  }
 0x442   :  { %v3644_v50 = vpack.i.b16 %v3565_v4, %v3565_v4  ;;  %v3727_v42 = vshrl.u32 %v3565_v4, 16  ;;  %3945 = vrot.lane.b32.xlu1 %v3904_v25, %s11435_s25  ;;  %v4120_v29 = vor.u32 %v4119_v51, %v4118_v45  ;;  %v4123_v38 = vrot.slane %v4121_v24, 1  ;;  %4836 = vmatprep.subr.bf16.mxu1 %v18138_v23 }
 0x443   :  { %v3905_v33 = vshrl.u32 %v14786_v54, 16  ;;  %v3907_v11 = vshll.u32 %v14786_v54, 16  ;;  %v3757_v6 = vrot.slane %v3565_v4, 6  ;;  %v3912_v34 = vshll.u32 %v14783_v48, 16  ;;  %5112 = vmatpush2.bf16.msra.mxu0 %v11324_v2  ;;  %v18211_v2 = vld [vmem:[#allocation18_spill] sm:$0xff] }
 0x444   :  { %v3649_v53 = vrot.slane %v3644_v50, %v11514_v15  ;;  %v3728_v49 = vpack.i.b16 %v3727_v42, %v3727_v42  ;;  %4030 = vrot.lane.b32.xlu0 %v4005_v39, %s11434_s4  ;;  %v6875_v21 = vsel %vm1438_vm5, %v18207_v27, %v18206_v3  ;;  %v4125_v45 = vor.u32 %v4124_v58, %v4123_v38  ;;  %v11323_v38 = vld [vmem:[%s17801_s5 + $0xc0] sm:$0xff]  }
 0x445   :  { %v3909_v35 = vrot.slane %v3907_v11, 1  ;;  %v4127_v47 = vrot.slane %v3905_v33, 1  ;;  %v3914_v50 = vrot.slane %v3912_v34, 1  ;;  %v4128_v4 = vrot.slane %v3907_v11, 2  ;;  %4837 = vmatpush1.bf16.msra.mxu1 %v11323_v38  ;;  %5113 = vmatprep.subr.bf16.mxu0 %v18138_v23  ;;  %v18210_v38 = vld [vmem:[#allocation17_spill] sm:$0xff] }
 0x446   :  { %v14804_v51 = vrot.slane %v3728_v49, %v13567_v43  ;;  %v14807_v24 = vsel %vm18203_vm3, %v3649_v53, %v3757_v6  ;;  %v4126_v42 = vsel %vm17930_vm9, %v4120_v29, %v4125_v45  ;;  %v4006_v39 = vrot.slane %v14786_v54, 1  ;;  %v18208_v53 = vld [vmem:[#allocation23_spill] sm:$0xff]  ;;  %4838 = vmatprep.subr.bf16.mxu1 %v18138_v23 }
 0x447   :  { %v3910_v25 = vor.u32 %v3909_v35, %v3905_v33  ;;  %v4007_v58 = vrot.slane %v14783_v48, 1  ;;  %v6907_v11 = vsel %vm1471_vm7, %v6875_v21, %v18208_v53  ;;  %4163 = vrot.lane.b32.xlu1 %v4126_v42, %s11436_s10  ;;  %v4130_v29 = vshrl.u32 %v14783_v48, 16  ;;  %v18209_v21 = vld [vmem:[#allocation33_spill] sm:$0xff] }
 0x448   :  { %v4133_v33 = vrot.slane %v3912_v34, 2  ;;  %v3918_v6 = vshll.u32 %v14807_v24, 16  ;;  %v4129_v3 = vor.u32 %v4128_v4, %v4127_v47  ;;  %v3916_v45 = vshrl.u32 %v14807_v24, 16 }
 0x449   :  { %v3915_v49 = vsel %vm3794_vm0, %v3910_v25, %v3914_v50  ;;  %v4132_v27 = vrot.slane %v4130_v29, 1  ;;  %v3923_v35 = vshll.u32 %v14804_v51, 16  ;;  %v6939_v42 = vsel %vm1504_vm6, %v6907_v11, %v18209_v21  ;;  %v11325_v25 = vld [vmem:[%s17801_s5 + $0xb8] sm:$0xff]  }
 0x44a   :  { %3947 = vrot.lane.b32.xlu0 %v3915_v49, %s11435_s25  ;;  %v4008_v34 = vsel %vm3975_vm10, %v4006_v39, %v4007_v58  ;;  %v3920_v50 = vrot.slane %v3918_v6, 1  ;;  %v4139_v4 = vshrl.u32 %v14804_v51, 16  ;;  %v6877_v53 = vsel %vm1438_vm5, %v18211_v2, %v18210_v38  ;;  %4839 = vmatpush1.bf16.msra.mxu1 %v11325_v25  ;;  %v18212_v11 = vld [vmem:[#allocation37_spill] sm:$0xff]  ;;  %v11326_v38 = vld [vmem:[%s17801_s5 + $0xb0] sm:$0xff]  }
 0x44b   :  { %4032 = vrot.lane.b32.xlu1 %v4008_v34, %s11434_s4  ;;  %v4134_v47 = vor.u32 %v4133_v33, %v4132_v27  ;;  %v6971_v39 = vsel %vm1537_vm8, %v6939_v42, %v18212_v11  ;;  %v3925_v29 = vrot.slane %v3923_v35, 1  ;;  %v4136_v49 = vrot.slane %v3916_v45, 1  ;;  %4840 = vmatprep.subr.bf16.mxu1 %v18138_v23  ;;  %v18213_v25 = vld [vmem:[#allocation32_spill] sm:$0xff]  ;;  %v11327_v11 = vld [vmem:[%s17801_s5 + $0xa8] sm:$0xff]  }
 0x44c   :  { %v3921_v21 = vor.u32 %v3920_v50, %v3916_v45  ;;  %v4137_v33 = vrot.slane %v3918_v6, 2  ;;  %v4141_v27 = vrot.slane %v4139_v4, 1  ;;  %v4142_v34 = vrot.slane %v3923_v35, 2  ;;  %v11342_v45 = vld [vmem:[%s17797_s0 + $0xe4] sm:$0xf]  ;;  %v18215_v50 = vld [vmem:[#allocation35_spill] sm:$0xff] }
 0x44d   :  { %v4135_v58 = vsel %vm17930_vm9, %v4129_v3, %v4134_v47  ;;  %v6909_v2 = vsel %vm1471_vm7, %v6877_v53, %v18213_v25  ;;  %v7003_v3 = vsel %vm18214_vm11, %v6971_v39, %v14184_v37  ;;  %v5841_v6 = vshrl.u32 %v11342_v45, 16  ;;  %v11328_v39 = vld [vmem:[%s17801_s5 + $0x130] sm:$0xff]   ;;  %v11329_v45 = vld [vmem:[%s17801_s5 + $0xa0] sm:$0xff]  }
 0x44e   :  { %4165 = vrot.lane.b32.xlu0 %v4135_v58, %s11436_s10  ;;  %4841 = vmatpush1.bf16.msra.mxu1 %v11326_v38  ;;  %v4009_v35 = vrot.slane %v14807_v24, 1  ;;  %v4010_v42 = vrot.slane %v14804_v51, 1  ;;  %v6941_v47 = vsel %vm1504_vm6, %v6909_v2, %v18215_v50  ;;  %v3926_v37 = vsel %vm3794_vm0, %v3921_v21, %v3925_v29  ;;  %v18217_v29 = vld [vmem:[#allocation34_spill] sm:$0xff] }
 0x44f   :  { %7231 = vrot.lane.b32.xlu1 %v14652_v26, %s11425_s18  ;;  %4842 = vmatprep.subr.bf16.mxu1 %v18138_v23  ;;  %v4138_v4 = vor.u32 %v4137_v33, %v4136_v49  ;;  %v4143_v53 = vor.u32 %v4142_v34, %v4141_v27  ;;  %vm18216_vm12 = vcmask 146432   ;;  %v6276_v38 = vrot.slane %v14282_v20, 1  ;;  %v18218_v49 = vld [vmem:[#allocation22_spill] sm:$0xff] }
 0x450   :  { %v7035_v58 = vsel %vm18216_vm12, %v7003_v3, %v14301_v31  ;;  %v6277_v25 = vrot.slane %v14264_v36, 2  ;;  %v6879_v21 = vsel %vm1438_vm5, %v18218_v49, %v18217_v29  ;;  %v5842_v33 = vpack.i.b16 %v5841_v6, %v5841_v6  ;;  %5114 = vmatpush2.bf16.msra.mxu0 %v11328_v39  ;;  %v18219_v31 = vld [vmem:[#allocation4_spill] sm:$0xff]  ;;  %v18221_v6 = vld [vmem:[#allocation38_spill] sm:$0xff]  ;;  %v11330_v49 = vld [vmem:[%s17801_s5 + $0xe8] sm:$0xff]  }
 0x451   :  { %v6973_v27 = vsel %vm1537_vm8, %v6941_v47, %v14160_v55  ;;  %v4011_v34 = vsel %vm3975_vm10, %v4009_v35, %v4010_v42  ;;  %11025 = vmatprep.subr.bf16.mxu0 %v18219_v31  ;;  %vm18220_vm3 = vcmask 171008   ;;  %v4144_v3 = vsel %vm17930_vm9, %v4138_v4, %v4143_v53  ;;  %v18226_v53 = vld [vmem:[#allocation27_spill] sm:$0xff] }
 0x452   :  { %7206 = vrot.lane.b32.xlu0 %v14340_v17, %s11421_s27  ;;  %4843 = vmatpush1.bf16.msra.mxu1 %v11327_v11  ;;  %v7067_v2 = vsel %vm18220_vm3, %v7035_v58, %v14373_v59  ;;  %v6911_v55 = vsel %vm1471_vm7, %v6879_v21, %v18221_v6  ;;  %v6278_v35 = vor.u32 %v6277_v25, %v6276_v38  ;;  %v18222_v59 = vld [vmem:[#allocation45_spill] sm:$0xff]  ;;  %vm18223_vm12 = vcmask 195584   ;;  %v18230_v58 = vld [vmem:[#allocation2_spill] sm:$0xff]  ;;  %v18231_v25 = vld [vmem:[#allocation44_spill] sm:$0xff] }
 0x453   :  { %3949 = vrot.lane.b32.xlu1 %v3926_v37, %s11435_s25  ;;  %4844 = vmatprep.subr.bf16.mxu1 %v18138_v23  ;;  %v7005_v42 = vsel %vm18214_vm11, %v6973_v27, %v14274_v10  ;;  %v5847_v50 = vrot.slane %v5842_v33, %v11681_v0  ;;  %v14900_v47 = vsel %vm18223_vm12, %v7067_v2, %v18222_v59  ;;  %v18225_v37 = vld [vmem:[#allocation42_spill] sm:$0xff]  ;;  %vm18227_vm3 = vcmask 146432   ;;  %v18228_v10 = vld [vmem:[#allocation43_spill] sm:$0xff] }
 0x454   :  { %18224 = vst [vmem:[#allocation11_spill] sm:$0xff] %v14900_v47  ;;  %v6943_v4 = vsel %vm1504_vm6, %v6911_v55, %v18225_v37  ;;  %v7037_v11 = vsel %vm18227_vm3, %v7005_v42, %v18226_v53  ;;  %vm18229_vm11 = vcmask 1040384   ;;  %vm18232_vm12 = vcmask 171008   ;;  %v18233_v31 = vld [vmem:[#allocation47_spill] sm:$0xff]  ;;  %v18235_v6 = vld [vmem:[#allocation46_spill] sm:$0xff] }
 0x455   :  { %v6041_v39 = vsel %vm18229_vm11, %v18228_v10, %v5847_v50  ;;  %v6975_v38 = vsel %vm1537_vm8, %v6943_v4, %v18230_v58  ;;  %v7069_v29 = vsel %vm18232_vm12, %v7037_v11, %v18231_v25  ;;  %v6332_v21 = vrot.slane %v14250_v61, 2  ;;  %v18241_v10 = vld [vmem:[#allocation10_spill] sm:$0xff]  ;;  %v18242_v25 = vld [vmem:[#allocation28_spill] sm:$0xff] }
 0x456   :  { %4034 = vrot.lane.b32.xlu0 %v4011_v34, %s11434_s4  ;;  %4845 = vmatpush1.bf16.msra.mxu1 %v11329_v45  ;;  %v6452_v33 = vrot.slane %v14282_v20, 2  ;;  %v6453_v27 = vrot.slane %v14264_v36, 3  ;;  %v6455_v34 = vshll.u32 %v6041_v39, 16  ;;  %vm18234_vm3 = vcmask 121856   ;;  %v11331_v45 = vld [vmem:[%s17801_s5 + $0xe0] sm:$0xff]  }
 0x457   :  { %4167 = vrot.lane.b32.xlu1 %v4144_v3, %s11436_s10  ;;  %4858 = vmatprep.subr.bf16.mxu1 %v18138_v23  ;;  %v7007_v2 = vsel %vm18234_vm3, %v6975_v38, %v18233_v31  ;;  %v6719_v3 = vshrl.u32 %v6041_v39, 16  ;;  %vm18236_vm11 = vcmask 195584   ;;  %vm18240_vm12 = vcmask 146432  }
 0x458   :  { %v14933_v55 = vsel %vm18236_vm11, %v7069_v29, %v18235_v6  ;;  %v6454_v50 = vor.u32 %v6453_v27, %v6452_v33  ;;  %v6457_v59 = vrot.slane %v6455_v34, 3  ;;  %v6716_v37 = vrot.slane %v14282_v20, 3  ;;  %v10779_v33 = vld [vmem:[%s17797_s0 + $0xec] sm:$0xf]  ;;  %v18245_v27 = vld [vmem:[#allocation48_spill] sm:$0xff] }
 0x459   :  { %18237 = vst [vmem:[#allocation16_spill] sm:$0xff] %v14933_v55  ;;  %v6717_v4 = vrot.slane %v14264_v36, 4  ;;  %v6721_v53 = vrot.slane %v6719_v3, 3  ;;  %v6722_v11 = vrot.slane %v6455_v34, 4  ;;  %v6564_v58 = vrot.slane %v14250_v61, 3 }
 0x45a   :  { %7278 = vrot.lane.b32.xlu0 %v14900_v47, %s11427_s26  ;;  %4859 = vmatpush2.bf16.msra.mxu1 %v11330_v49  ;;  %v6565_v38 = vrot.slane %v6041_v39, 3  ;;  %vm18243_vm3 = vcmask 171008   ;;  %vm18244_vm11 = vsmask.f32 5376  ;;  %v6820_v3 = vrot.slane %v14250_v61, 4 }
 0x45b   :  { %6312 = vrot.lane.b32.xlu1 %v6278_v35, %s11415_s8  ;;  %4860 = vmatprep.subr.bf16.mxu1 %v18138_v23  ;;  %v18239_v35 = vld [vmem:[#allocation50_spill] sm:$0xff]  ;;  %v6458_v20 = vsel %vm18244_vm11, %v6454_v50, %v6457_v59  ;;  %v6718_v36 = vor.u32 %v6717_v4, %v6716_v37  ;;  %v6723_v49 = vor.u32 %v6722_v11, %v6721_v53  ;;  %vm18249_vm11 = vsmask.f32 4352  ;;  %v18250_v59 = vld [vmem:[#allocation51_spill] sm:$0xff]  ;;  %v18251_v37 = vld [vmem:[#allocation25_spill] sm:$0xff] }
 0x45c   :  { %v7039_v42 = vsel %vm18240_vm12, %v7007_v2, %v18239_v35  ;;  %vm18246_vm12 = vcmask 195584   ;;  %v6881_v4 = vsel %vm1438_vm5, %v18251_v37, %v18250_v59  ;;  %v4185_v53 = vrot.slane %v14547_v57, 2 }
 0x45d   :  { %v7071_v29 = vsel %vm18243_vm3, %v7039_v42, %v18242_v25  ;;  %vm18248_vm3 = vcmask 1044480   ;;  %v6724_v50 = vsel %vm18249_vm11, %v6718_v36, %v6723_v49  ;;  %v4186_v11 = vrot.slane %v14544_v1, 2 }
 0x45e   :  { %7156 = vrot.lane.b32.xlu0 %v14742_v30, %s11424_s12  ;;  %4861 = vmatpush2.bf16.msra.mxu1 %v11331_v45  ;;  %v14960_v34 = vsel %vm18246_vm12, %v7071_v29, %v18245_v27  ;;  %v6566_v31 = vsel %vm18248_vm3, %v6564_v58, %v6565_v38  ;;  %v6821_v45 = vrot.slane %v6041_v39, 4  ;;  %vm18252_vm12 = vcmask 1043456   ;;  %v18256_v27 = vld [vmem:[#allocation53_spill] sm:$0xff] }
 0x45f   :  { %7256 = vrot.lane.b32.xlu1 %v14900_v47, %s11426_s9  ;;  %5336 = vmatprep.subr.bf16.mxu1 %v18138_v23  ;;  %18247 = vst [vmem:[#allocation23_spill] sm:$0xff] %v14960_v34  ;;  %v14988_v1 = vsel %vm4169_vm2, %v4185_v53, %v4186_v11  ;;  %vm18257_vm3 = vcmask 1040384   ;;  %vm18261_vm11 = vcmask 121856   ;;  %v10780_v11 = vld [vmem:[%s17797_s0 + $0xf0] sm:$0xf] }
 0x460   :  { %v6822_v39 = vsel %vm18252_vm12, %v6820_v3, %v6821_v45  ;;  %18255 = vst [vmem:[#allocation17_spill] sm:$0xff] %v14988_v1  ;;  %v18259_v3 = vld [vmem:[#allocation49_spill] sm:$0xff]  ;;  %vm18264_vm12 = vcmask 146432  }
 0x462   :  { %7300 = vrot.lane.b32.xlu0 %v14933_v55, %s18238_s19 }
 0x463   :  { %6360 = vrot.lane.b32.xlu1 %v6332_v21, %s11416_s13  ;;  %v10778_v21 = vld [vmem:[%s17797_s0 + $0xe8] sm:$0xf] }
 0x464   :  { %v5724_v6 = vpack.i.b16 %v10778_v21, %v10778_v21  ;;  %v10797_v35 = vcombine.low %v10778_v21, %v10779_v33  ;;  %v5849_v21 = vshrl.u32 %v10779_v33, 16 }
 0x466   :  { %7181 = vrot.lane.b32.xlu0 %v18241_v10, %s11428_s29  ;;  %v5729_v25 = vrot.slane %v5724_v6, %v11514_v15  ;;  %v5965_v29 = vrot.slane %v10797_v35, 7  ;;  %v5850_v6 = vpack.i.b16 %v5849_v21, %v5849_v21  ;;  %v18260_v35 = vld [vmem:[#allocation60_spill] sm:$0xff] }
 0x467   :  { %7280 = vrot.lane.b32.xlu1 %v14933_v55, %s11427_s26 }
 0x468   :  { %v4021_v58 = vpop.permute.xlu1 %4020  ;;  %v5855_v53 = vrot.slane %v5850_v6, %v11681_v0 }
 0x46a   :  { %6504 = vrot.lane.b32.xlu0 %v6458_v20, %s11417_s14  ;;  %v18253_v20 = vld [vmem:[#allocation52_spill] sm:$0xff] }
 0x46b   :  { %7302 = vrot.lane.b32.xlu1 %v14960_v34, %s18238_s19  ;;  %v3936_v2 = vpop.permute.xlu0 %3935  ;;  %v6913_v36 = vsel %vm1471_vm7, %v6881_v4, %v18253_v20  ;;  %v5731_v20 = vpack.i.b16 %v10780_v11, %v10780_v11 }
 0x46c   :  { %v4216_v42 = vsel %vm4206_vm4, %v14483_v12, %v3936_v2  ;;  %v15000_v2 = vsel %vm18257_vm3, %v5729_v25, %v5965_v29  ;;  %v4188_v25 = vrot.slane %v14579_v40, 2 }
 0x46d   :  { %v4240_v38 = vsel %vm3283_vm1, %v4216_v42, %v4021_v58  ;;  %18258 = vst [vmem:[#allocation18_spill] sm:$0xff] %v15000_v2  ;;  %v15007_v33 = vshll.u32 %v15000_v2, 16  ;;  %v15020_v37 = vshrl.u32 %v15000_v2, 16  ;;  %v15032_v58 = vld [vmem:[%s17797_s0 + $0xf4] sm:$0xf]  ;;  %v5736_v43 = vrot.slane %v5731_v20, %v11514_v15 }
 0x46e   :  { %6600 = vrot.lane.b32.xlu0 %v6566_v31, %s11418_s15  ;;  %v6945_v31 = vsel %vm1504_vm6, %v6913_v36, %v18256_v27  ;;  %v15043_v27 = vsel %vm18257_vm3, %v5965_v29, %v5855_v53  ;;  %v15058_v29 = vld [vmem:[%s17797_s0 + $0xfc] sm:$0xf] }
 0x46f   :  { %6776 = vrot.lane.b32.xlu1 %v6724_v50, %s11419_s16  ;;  %v4154_v12 = vpop.permute.xlu0 %4153  ;;  %v6977_v45 = vsel %vm1537_vm8, %v6945_v31, %v18259_v3  ;;  %v15013_v50 = vpop.permute.xlu1 %7154  ;;  %v6130_v4 = vrot.slane %v15007_v33, 1  ;;  %v10798_v31 = vcombine.low %v10780_v11, %v15032_v58  ;;  %v18265_v3 = vld [vmem:[#allocation62_spill] sm:$0xff]  ;;  %v6280_v53 = vrot.slane %v15007_v33, 2 }
 0x470   :  { %v14983_v49 = vsel %vm17928_vm15, %v4240_v38, %v4154_v12  ;;  %v7009_v42 = vsel %vm18261_vm11, %v6977_v45, %v18260_v35  ;;  %18262 = vst [vmem:[#allocation37_spill] sm:$0xff] %v15013_v50  ;;  %vm18266_vm11 = vcmask 171008   ;;  %v4189_v35 = vrot.slane %v14585_v8, 2 }
 0x471   :  { %18254 = vst [vmem:[#allocation33_spill] sm:$0xff] %v14983_v49  ;;  %4477 = vmatmul.mubr.bf16.gmra.mxu1 %v14983_v49  ;;  %4706 = vmatmul.mubr.bf16.gmra.mxu0 %v14983_v49  ;;  %v6131_v21 = vor.u32 %v6130_v4, %v15020_v37  ;;  %v6279_v4 = vrot.slane %v15020_v37, 1  ;;  %v6459_v11 = vrot.slane %v15020_v37, 2  ;;  %v15072_v62 = vrot.slane %v10798_v31, 7 }
 0x472   :  { %6856 = vrot.lane.b32.xlu0 %v6822_v39, %s11420_s17  ;;  %10639 = vmatprep.mubr.msk.bf16.mxu1 %vm4206_vm4, %v14988_v1  ;;  %v18263_v39 = vld [vmem:[#allocation54_spill] sm:$0xff]  ;;  %v15082_v20 = vsel %vm4169_vm2, %v4188_v25, %v4189_v35 }
 0x473   :  { %7133 = vrot.lane.b32.xlu1 %v14742_v30, %s11422_s28  ;;  %10666 = vmatprep.mubr.msk.bf16.mxu0 %vm4206_vm4, %v14988_v1  ;;  %v15015_v59 = vpop.permute.xlu0 %6774  ;;  %v7041_v38 = vsel %vm18264_vm12, %v7009_v42, %v18263_v39  ;;  %v10782_v42 = vld [vmem:[%s17797_s0 + $0xf8] sm:$0xf]  ;;  %v6460_v39 = vrot.slane %v15007_v33, 3  ;;  %v18268_v1 = vld [vmem:[#allocation55_spill] sm:$0xff]  ;;  %vm18269_vm12 = vcmask 195584   ;;  %18271 = vst [vmem:[#allocation34_spill] sm:$0xff] %v15082_v20 }
 0x474   :  { %v7073_v45 = vsel %vm18266_vm11, %v7041_v38, %v18265_v3  ;;  %v6728_v3 = vshrl.u32 %v15043_v27, 16  ;;  %v5738_v30 = vpack.i.b16 %v10782_v42, %v10782_v42  ;;  %v10799_v50 = vcombine.low %v10782_v42, %v15058_v29 }
 0x475   :  { %v15077_v49 = vsel %vm18269_vm12, %v7073_v45, %v18268_v1  ;;  %v6281_v1 = vor.u32 %v6280_v53, %v6279_v4  ;;  %v6333_v45 = vrot.slane %v15000_v2, 2  ;;  %v6725_v42 = vrot.slane %v15020_v37, 3  ;;  %vm18275_vm12 = vmmov %vm18257_vm3 }
 0x476   :  { %7208 = vrot.lane.b32.xlu0 %v14652_v26, %s11421_s27  ;;  %18270 = vst [vmem:[#allocation35_spill] sm:$0xff] %v15077_v49  ;;  %v6461_v35 = vor.u32 %v6460_v39, %v6459_v11  ;;  %v15101_v4 = vsel %vm18257_vm3, %v5736_v43, %v15072_v62  ;;  %v5743_v53 = vrot.slane %v5738_v30, %v11514_v15  ;;  %v15104_v37 = vrot.slane %v10799_v50, 7 }
 0x477   :  { %7233 = vrot.lane.b32.xlu1 %v14900_v47, %s11425_s18  ;;  %v4023_v6 = vpop.permute.xlu0 %4022  ;;  %v4192_v11 = vrot.slane %v14599_v32, 2  ;;  %v6567_v39 = vrot.slane %v15000_v2, 3  ;;  %v15117_v30 = vshll.u32 %v15101_v4, 16  ;;  %vm18274_vm11 = vsmask.f32 5376 }
 0x478   :  { %vm18278_vm3 = vcmask 1044480  }
 0x47a   :  { %7158 = vrot.lane.b32.xlu0 %v18241_v10, %s11424_s12  ;;  %v3938_v12 = vpop.permute.xlu1 %3937 }
 0x47b   :  { %7258 = vrot.lane.b32.xlu1 %v14933_v55, %s11426_s9  ;;  %v4218_v36 = vsel %vm4206_vm4, %v14547_v57, %v3938_v12  ;;  %v6205_v57 = vrot.slane %v15000_v2, 1  ;;  %v6462_v12 = vshll.u32 %v15043_v27, 16 }
 0x47c   :  { %v4242_v38 = vsel %vm3283_vm1, %v4218_v36, %v4023_v6  ;;  %v4191_v6 = vrot.slane %v14603_v56, 2 }
 0x47e   :  { %7183 = vrot.lane.b32.xlu0 %v14340_v17, %s11428_s29 }
 0x47f   :  { %7282 = vrot.lane.b32.xlu1 %v14960_v34, %s11427_s26  ;;  %v4156_v8 = vpop.permute.xlu1 %4155 }
 0x480   :  { %v15069_v41 = vsel %vm17928_vm15, %v4242_v38, %v4156_v8  ;;  %v6464_v8 = vrot.slane %v6462_v12, 3  ;;  %v6726_v38 = vrot.slane %v15007_v33, 4  ;;  %v6568_v33 = vrot.slane %v15043_v27, 3 }
 0x481   :  { %18267 = vst [vmem:[#allocation32_spill] sm:$0xff] %v15069_v41  ;;  %4485 = vmatmul.mubr.bf16.gmra.mxu1 %v15069_v41  ;;  %4714 = vmatmul.mubr.bf16.gmra.mxu0 %v15069_v41  ;;  %v6731_v41 = vrot.slane %v6462_v12, 4  ;;  %v5857_v12 = vshrl.u32 %v15032_v58, 16  ;;  %v15126_v58 = vsel %vm18275_vm12, %v5743_v53, %v15104_v37  ;;  %vm18281_vm12 = vcmask 1043456  }
 0x482   :  { %6170 = vrot.lane.b32.xlu0 %v6131_v21, %s11414_s30  ;;  %v3940_v36 = vpop.permute.xlu0 %3939  ;;  %10640 = vmatprep.mubr.msk.bf16.mxu1 %vm4206_vm4, %v15082_v20  ;;  %v6727_v43 = vor.u32 %v6726_v38, %v6725_v42  ;;  %18276 = vst [vmem:[#allocation38_spill] sm:$0xff] %v15126_v58  ;;  %v6569_v42 = vsel %vm18278_vm3, %v6567_v39, %v6568_v33  ;;  %vm18284_vm3 = vcmask 1040384  }
 0x483   :  { %v4220_v31 = vsel %vm4206_vm4, %v14579_v40, %v3940_v36  ;;  %10667 = vmatprep.mubr.msk.bf16.mxu0 %vm4206_vm4, %v15082_v20  ;;  %v4025_v25 = vpop.permute.xlu1 %4024  ;;  %7304 = vrot.lane.b32.xlu1 %v15077_v49, %s18238_s19  ;;  %v6730_v40 = vrot.slane %v6728_v3, 3 }
 0x484   :  { %v4244_v20 = vsel %vm3283_vm1, %v4220_v31, %v4025_v25  ;;  %v6465_v31 = vsel %vm18274_vm11, %v6461_v35, %v6464_v8  ;;  %v5858_v35 = vpack.i.b16 %v5857_v12, %v5857_v12  ;;  %vm18280_vm11 = vsmask.f32 4352 }
 0x485   :  { %v6732_v25 = vor.u32 %v6731_v41, %v6730_v40  ;;  %v6136_v40 = vrot.slane %v15117_v30, 1  ;;  %v4195_v12 = vrot.slane %v14727_v14, 2 }
 0x486   :  { %v15085_v21 = vpop.f32.mrf.mxu0  ;;  %6234 = vrot.lane.b32.xlu0 %v6205_v57, %s11413_s23  ;;  %v4158_v57 = vpop.permute.xlu0 %4157 }
 0x487   :  { %6314 = vrot.lane.b32.xlu1 %v6281_v1, %s11415_s8  ;;  %v15120_v32 = vsel %vm17928_vm15, %v4244_v20, %v4158_v57  ;;  %v15131_v1 = vsel %vm4169_vm2, %v4191_v6, %v4192_v11  ;;  %v6823_v20 = vrot.slane %v15000_v2, 4  ;;  %v15146_v6 = vshrl.u32 %v15101_v4, 16 }
 0x488   :  { %v4424_v36 = vpop.f32.mrf.mxu0  ;;  %18273 = vst [vmem:[#allocation4_spill] sm:$0xff] %v15120_v32  ;;  %18277 = vst [vmem:[#allocation45_spill] sm:$0xff] %v15131_v1  ;;  %v6733_v39 = vsel %vm18280_vm11, %v6727_v43, %v6732_v25  ;;  %v4194_v57 = vrot.slane %v14730_v22, 2  ;;  %v15167_v25 = vshrl.u32 %v15126_v58, 16 }
 0x489   :  { %v15113_v36 = vpop.permute.xlu1 %6232  ;;  %4493 = vmatmul.mubr.bf16.gmra.mxu1 %v15120_v32  ;;  %4722 = vmatmul.mubr.bf16.gmra.mxu0 %v15120_v32  ;;  %v6137_v43 = vor.u32 %v6136_v40, %v15146_v6  ;;  %vm18285_vm11 = vmmov %vm18284_vm3 }
 0x48a   :  { %v15110_v3 = vpop.f32.mrf.mxu0  ;;  %18272 = vst [vmem:[#allocation22_spill] sm:$0xff] %v15113_v36  ;;  %6362 = vrot.lane.b32.xlu0 %v6333_v45, %s11416_s13  ;;  %v6824_v45 = vrot.slane %v15043_v27, 4  ;;  %v15138_v41 = vpop.permute.xlu0 %7254  ;;  %10641 = vmatprep.mubr.msk.bf16.mxu1 %vm4206_vm4, %v15131_v1  ;;  %v15150_v27 = vshll.u32 %v15126_v58, 16 }
 0x48b   :  { %18279 = vst [vmem:[#allocation42_spill] sm:$0xff] %v15138_v41  ;;  %10668 = vmatprep.mubr.msk.bf16.mxu0 %vm4206_vm4, %v15131_v1  ;;  %6506 = vrot.lane.b32.xlu1 %v6465_v31, %s11417_s14 }
 0x48c   :  { %v4427_v50 = vpop.f32.mrf.mxu0  ;;  %v6825_v33 = vsel %vm18281_vm12, %v6823_v20, %v6824_v45  ;;  %v6206_v20 = vrot.slane %v15101_v4, 1  ;;  %v6283_v45 = vrot.slane %v15117_v30, 2  ;;  %vm18286_vm12 = vsmask.f32 5376 }
 0x48d   :  { %v3942_v8 = vpop.permute.xlu1 %3941  ;;  %v5865_v50 = vshrl.u32 %v15058_v29, 16 }
 0x48e   :  { %v15136_v38 = vpop.f32.mrf.mxu0  ;;  %v4222_v11 = vsel %vm4206_vm4, %v14603_v56, %v3942_v8  ;;  %6602 = vrot.lane.b32.xlu0 %v6569_v42, %s11418_s15  ;;  %v4027_v15 = vpop.permute.xlu0 %4026  ;;  %v6142_v42 = vrot.slane %v15150_v27, 1 }
 0x48f   :  { %v4246_v41 = vsel %vm3283_vm1, %v4222_v11, %v4027_v15  ;;  %6778 = vrot.lane.b32.xlu1 %v6733_v39, %s11419_s16  ;;  %v6282_v15 = vrot.slane %v15146_v6, 1  ;;  %v5866_v8 = vpack.i.b16 %v5865_v50, %v5865_v50 }
 0x490   :  { %v4432_v53 = vpop.f32.mrf.mxu0  ;;  %v6143_v11 = vor.u32 %v6142_v42, %v15167_v25 }
 0x491   :  { %v5863_v53 = vrot.slane %v5858_v35, %v11681_v0  ;;  %v4160_v56 = vpop.permute.xlu1 %4159  ;;  %v15180_v35 = vsel %vm4169_vm2, %v4194_v57, %v4195_v12  ;;  %v6466_v57 = vrot.slane %v15146_v6, 2  ;;  %v6467_v12 = vrot.slane %v15117_v30, 3 }
 0x492   :  { %v15160_v31 = vpop.f32.mrf.mxu0  ;;  %v15171_v29 = vsel %vm17928_vm15, %v4246_v41, %v4160_v56  ;;  %6858 = vrot.lane.b32.xlu0 %v6825_v33, %s11420_s17  ;;  %18283 = vst [vmem:[#allocation43_spill] sm:$0xff] %v15180_v35  ;;  %v6284_v33 = vor.u32 %v6283_v45, %v6282_v15  ;;  %v5871_v56 = vrot.slane %v5866_v8, %v11681_v0 }
 0x493   :  { %18282 = vst [vmem:[#allocation27_spill] sm:$0xff] %v15171_v29  ;;  %4501 = vmatmul.mubr.bf16.gmra.mxu1 %v15171_v29  ;;  %4730 = vmatmul.mubr.bf16.gmra.mxu0 %v15171_v29  ;;  %v15190_v41 = vsel %vm18284_vm3, %v15072_v62, %v5863_v53  ;;  %v6207_v62 = vrot.slane %v15126_v58, 1  ;;  %v6285_v53 = vrot.slane %v15167_v25, 1  ;;  %v6468_v15 = vor.u32 %v6467_v12, %v6466_v57 }
 0x494   :  { %v4435_v14 = vpop.f32.mrf.mxu0  ;;  %10642 = vmatprep.mubr.msk.bf16.mxu1 %vm4206_vm4, %v15180_v35  ;;  %10669 = vmatprep.mubr.msk.bf16.mxu0 %vm4206_vm4, %v15180_v35  ;;  %v6469_v50 = vshll.u32 %v15190_v41, 16  ;;  %v15209_v0 = vsel %vm18285_vm11, %v15104_v37, %v5871_v56  ;;  %v6737_v8 = vshrl.u32 %v15190_v41, 16  ;;  %v6570_v35 = vrot.slane %v15101_v4, 3  ;;  %vm18288_vm11 = vmmov %vm18286_vm12 }
 0x495   :  { %6172 = vrot.lane.b32.xlu1 %v6137_v43, %s11414_s30  ;;  %v6286_v43 = vrot.slane %v15150_v27, 2  ;;  %v6473_v57 = vrot.slane %v15167_v25, 2  ;;  %v6474_v12 = vrot.slane %v15150_v27, 3  ;;  %v6476_v37 = vshll.u32 %v15209_v0, 16 }
 0x496   :  { %v15182_v40 = vpop.f32.mrf.mxu0  ;;  %6236 = vrot.lane.b32.xlu0 %v6206_v20, %s11413_s23  ;;  %v6334_v20 = vrot.slane %v15101_v4, 2  ;;  %v6471_v45 = vrot.slane %v6469_v50, 3  ;;  %v6734_v56 = vrot.slane %v15146_v6, 3  ;;  %v6746_v36 = vshrl.u32 %v15209_v0, 16 }
 0x497   :  { %v6475_v32 = vor.u32 %v6474_v12, %v6473_v57  ;;  %v6478_v2 = vrot.slane %v6476_v37, 3  ;;  %vm18287_vm3 = vcmask 1044480   ;;  %v6574_v57 = vrot.slane %v15209_v0, 3 }
 0x498   :  { %v4440_v39 = vpop.f32.mrf.mxu0  ;;  %v6472_v29 = vsel %vm18286_vm12, %v6468_v15, %v6471_v45  ;;  %v6748_v12 = vrot.slane %v6746_v36, 3  ;;  %vm18289_vm12 = vsmask.f32 4352 }
 0x499   :  { %6174 = vrot.lane.b32.xlu1 %v6143_v11, %s11414_s30  ;;  %v6287_v39 = vor.u32 %v6286_v43, %v6285_v53  ;;  %v6739_v53 = vrot.slane %v6737_v8, 3  ;;  %v6740_v43 = vrot.slane %v6469_v50, 4  ;;  %v6573_v50 = vrot.slane %v15126_v58, 3 }
 0x49a   :  { %v15199_v14 = vpop.f32.mrf.mxu0  ;;  %6316 = vrot.lane.b32.xlu0 %v6284_v33, %s11415_s8  ;;  %v6743_v8 = vrot.slane %v15167_v25, 3  ;;  %v6829_v25 = vrot.slane %v15126_v58, 4 }
 0x49b   :  { %v6741_v45 = vor.u32 %v6740_v43, %v6739_v53  ;;  %v6827_v53 = vrot.slane %v15190_v41, 4  ;;  %v6575_v36 = vsel %vm18287_vm3, %v6573_v50, %v6574_v57 }
 0x49c   :  { %v4443_v42 = vpop.f32.mrf.mxu0 }
 0x49d   :  { %6238 = vrot.lane.b32.xlu1 %v6207_v62, %s11413_s23  ;;  %v6571_v42 = vrot.slane %v15190_v41, 3  ;;  %v6735_v62 = vrot.slane %v15117_v30, 4 }
 0x49e   :  { %v15212_v11 = vpop.f32.mrf.mxu0  ;;  %6364 = vrot.lane.b32.xlu0 %v6334_v20, %s11416_s13  ;;  %v6335_v20 = vrot.slane %v15126_v58, 2 }
 0x49f   :  { %v6572_v6 = vsel %vm18287_vm3, %v6570_v35, %v6571_v42  ;;  %v6736_v15 = vor.u32 %v6735_v62, %v6734_v56  ;;  %v6749_v35 = vrot.slane %v6476_v37, 4  ;;  %v6826_v62 = vrot.slane %v15101_v4, 4 }
 0x4a0   :  { %v4448_v33 = vpop.f32.mrf.mxu0 }
 0x4a1   :  { %6318 = vrot.lane.b32.xlu1 %v6287_v39, %s11415_s8  ;;  %v6744_v39 = vrot.slane %v15150_v27, 4  ;;  %v6742_v56 = vsel %vm18289_vm12, %v6736_v15, %v6741_v45  ;;  %v6750_v37 = vor.u32 %v6749_v35, %v6748_v12  ;;  %v4197_v15 = vrot.slane %v14760_v60, 2 }
 0x4a2   :  { %v15224_v1 = vpop.f32.mrf.mxu0  ;;  %6508 = vrot.lane.b32.xlu0 %v6472_v29, %s11417_s14  ;;  %v6479_v29 = vsel %vm18288_vm11, %v6475_v32, %v6478_v2  ;;  %vm18290_vm11 = vcmask 1043456   ;;  %v4198_v45 = vrot.slane %v14757_v52, 2 }
 0x4a3   :  { %v6745_v32 = vor.u32 %v6744_v39, %v6743_v8  ;;  %v6828_v41 = vsel %vm18290_vm11, %v6826_v62, %v6827_v53  ;;  %v18293_v39 = vld [vmem:[#allocation57_spill] sm:$0xff]  ;;  %vm18294_vm3 = vmmov %vm18290_vm11  ;;  %vm18299_vm11 = vcmask 121856  }
 0x4a4   :  { %v4451_v33 = vpop.f32.mrf.mxu0  ;;  %v15273_v35 = vsel %vm4169_vm2, %v4197_v15, %v4198_v45  ;;  %v4200_v15 = vrot.slane %v14786_v54, 2  ;;  %v4201_v45 = vrot.slane %v14783_v48, 2  ;;  %v18301_v48 = vld [vmem:[#allocation61_spill] sm:$0xff] }
 0x4a5   :  { %6366 = vrot.lane.b32.xlu1 %v6335_v20, %s11416_s13  ;;  %18295 = vst [vmem:[#allocation2_spill] sm:$0xff] %v15273_v35 }
 0x4a6   :  { %6604 = vrot.lane.b32.xlu0 %v6572_v6, %s11418_s15  ;;  %v4029_v20 = vpop.permute.xlu1 %4028  ;;  %v6830_v6 = vrot.slane %v15209_v0, 4  ;;  %v6751_v0 = vsel %vm18289_vm12, %v6745_v32, %v6750_v37  ;;  %vm18302_vm12 = vcmask 146432  }
 0x4a7   :  { %v15231_v30 = vpop.f32.mrf.mxu0 }
 0x4a8   :  { %v6831_v12 = vsel %vm18294_vm3, %v6829_v25, %v6830_v6  ;;  %vm18304_vm3 = vcmask 171008  }
 0x4a9   :  { %v4456_v42 = vpop.f32.mrf.mxu0  ;;  %6510 = vrot.lane.b32.xlu1 %v6479_v29, %s11417_s14  ;;  %v3944_v27 = vpop.permute.xlu0 %3943  ;;  %v18291_v29 = vld [vmem:[#allocation64_spill] sm:$0xff] }
 0x4aa   :  { %6780 = vrot.lane.b32.xlu0 %v6742_v56, %s11419_s16  ;;  %v4224_v2 = vsel %vm4206_vm4, %v14730_v22, %v3944_v27  ;;  %v18292_v42 = vld [vmem:[#allocation36_spill] sm:$0xff]  ;;  %v15275_v62 = vpop.permute.xlu1 %7179 }
 0x4ab   :  { %v15243_v43 = vpop.f32.mrf.mxu0  ;;  %v6883_v56 = vsel %vm1438_vm5, %v18292_v42, %v18291_v29  ;;  %v4248_v22 = vsel %vm3283_vm1, %v4224_v2, %v4029_v20  ;;  %v18298_v29 = vld [vmem:[#allocation67_spill] sm:$0xff] }
 0x4ac   :  { %v6915_v52 = vsel %vm1471_vm7, %v6883_v56, %v18293_v39 }
 0x4ad   :  { %v4459_v33 = vpop.f32.mrf.mxu0  ;;  %6606 = vrot.lane.b32.xlu1 %v6575_v36, %s11418_s15  ;;  %v6947_v25 = vsel %vm1504_vm6, %v6915_v52, %v14522_v9  ;;  %v18296_v36 = vld [vmem:[#allocation59_spill] sm:$0xff] }
 0x4ae   :  { %v4162_v50 = vpop.permute.xlu0 %4161  ;;  %6860 = vrot.lane.b32.xlu0 %v6828_v41, %s11420_s17  ;;  %v6979_v32 = vsel %vm1537_vm8, %v6947_v25, %v18296_v36 }
 0x4af   :  { %v15258_v58 = vpop.f32.mrf.mxu0  ;;  %v15264_v8 = vsel %vm17928_vm15, %v4248_v22, %v4162_v50  ;;  %v7011_v42 = vsel %vm18299_vm11, %v6979_v32, %v18298_v29  ;;  %v4204_v32 = vrot.slane %v14804_v51, 2  ;;  %vm18307_vm11 = vcmask 195584  }
 0x4b0   :  { %4509 = vmatmul.mubr.bf16.gmra.mxu1 %v15264_v8  ;;  %4738 = vmatmul.mubr.bf16.gmra.mxu0 %v15264_v8 }
 0x4b1   :  { %v4464_v57 = vpop.f32.mrf.mxu0  ;;  %10643 = vmatprep.mubr.msk.bf16.mxu1 %vm4206_vm4, %v15273_v35  ;;  %10670 = vmatprep.mubr.msk.bf16.mxu0 %vm4206_vm4, %v15273_v35 }
 0x4b2   :  { %6782 = vrot.lane.b32.xlu1 %v6751_v0, %s11419_s16  ;;  %v15284_v27 = vpop.permute.xlu0 %6854  ;;  %6862 = vrot.lane.b32.xlu0 %v6831_v12, %s11420_s17  ;;  %v7043_v0 = vsel %vm18302_vm12, %v7011_v42, %v18301_v48  ;;  %v15320_v57 = vsel %vm4169_vm2, %v4200_v15, %v4201_v45  ;;  %vm18321_vm12 = vcmask 121856  }
 0x4b3   :  { %v15281_v53 = vpop.f32.mrf.mxu0 }
 0x4b4   :  { %v3946_v2 = vpop.permute.xlu1 %3945 }
 0x4b5   :  { %v4467_v20 = vpop.f32.mrf.mxu0  ;;  %v4226_v6 = vsel %vm4206_vm4, %v14760_v60, %v3946_v2 }
 0x4b6   :  { %7135 = vrot.lane.b32.xlu1 %v18241_v10, %s11422_s28  ;;  %v4031_v33 = vpop.permute.xlu0 %4030  ;;  %7210 = vrot.lane.b32.xlu0 %v14900_v47, %s11421_s27  ;;  %v18303_v20 = vld [vmem:[#allocation69_spill] sm:$0xff] }
 0x4b7   :  { %v4643_v37 = vpop.f32.mrf.mxu0  ;;  %v4250_v22 = vsel %vm3283_vm1, %v4226_v6, %v4031_v33  ;;  %v7075_v2 = vsel %vm18304_vm3, %v7043_v0, %v18303_v20  ;;  %vm18324_vm3 = vcmask 146432  }
 0x4b8   :  { %v15294_v41 = vadd.f32 %v4643_v37, %v15085_v21 }
 0x4b9   :  { %v4645_v9 = vpop.f32.mrf.mxu0  ;;  %v4164_v21 = vpop.permute.xlu1 %4163 }
 0x4ba   :  { %18297 = vst [vmem:[#allocation44_spill] sm:$0xff] %v15294_v41  ;;  %7235 = vrot.lane.b32.xlu1 %v14933_v55, %s11425_s18  ;;  %v15311_v50 = vsel %vm17928_vm15, %v4250_v22, %v4164_v21  ;;  %7160 = vrot.lane.b32.xlu0 %v14340_v17, %s11424_s12  ;;  %v18306_v9 = vld [vmem:[#allocation63_spill] sm:$0xff] }
 0x4bb   :  { %v4646_v56 = vpop.f32.mrf.mxu0  ;;  %4517 = vmatmul.mubr.bf16.gmra.mxu1 %v15311_v50  ;;  %4746 = vmatmul.mubr.bf16.gmra.mxu0 %v15311_v50  ;;  %v15342_v15 = vsel %vm18307_vm11, %v7075_v2, %v18306_v9  ;;  %vm18327_vm11 = vcmask 171008   ;;  %v18363_v41 = vld [vmem:[#allocation27_spill] sm:$0xff] }
 0x4bc   :  { %v15308_v60 = vadd.f32 %v4646_v56, %v15110_v3  ;;  %v3948_v52 = vpop.permute.xlu0 %3947  ;;  %10644 = vmatprep.mubr.msk.bf16.mxu1 %vm4206_vm4, %v15320_v57  ;;  %10671 = vmatprep.mubr.msk.bf16.mxu0 %vm4206_vm4, %v15320_v57  ;;  %18308 = vst [vmem:[#allocation50_spill] sm:$0xff] %v15342_v15 }
 0x4bd   :  { %v4648_v39 = vpop.f32.mrf.mxu0  ;;  %v4228_v3 = vsel %vm4206_vm4, %v14786_v54, %v3948_v52  ;;  %v4033_v25 = vpop.permute.xlu1 %4032  ;;  %v4203_v54 = vrot.slane %v14807_v24, 2  ;;  %v18312_v52 = vld [vmem:[#allocation41_spill] sm:$0xff] }
 0x4be   :  { %18300 = vst [vmem:[#allocation47_spill] sm:$0xff] %v15308_v60  ;;  %7260 = vrot.lane.b32.xlu1 %v14960_v34, %s11426_s9  ;;  %7185 = vrot.lane.b32.xlu0 %v14652_v26, %s11428_s29  ;;  %v4252_v33 = vsel %vm3283_vm1, %v4228_v3, %v4033_v25  ;;  %v18311_v39 = vld [vmem:[#allocation15_spill] sm:$0xff] }
 0x4bf   :  { %v4651_v12 = vpop.f32.mrf.mxu0  ;;  %v15357_v51 = vsel %vm4169_vm2, %v4203_v54, %v4204_v32  ;;  %v6885_v3 = vsel %vm1438_vm5, %v18312_v52, %v18311_v39  ;;  %v18313_v54 = vld [vmem:[#allocation65_spill] sm:$0xff]  ;;  %v18318_v52 = vld [vmem:[#allocation8_spill] sm:$0xff] }
 0x4c0   :  { %v15333_v36 = vadd.f32 %v4651_v12, %v15136_v38  ;;  %v4166_v6 = vpop.permute.xlu0 %4165  ;;  %v6917_v32 = vsel %vm1471_vm7, %v6885_v3, %v18313_v54  ;;  %v6887_v3 = vsel %vm1438_vm5, %v14178_v5, %v18318_v52  ;;  %v18322_v54 = vld [vmem:[#allocation71_spill] sm:$0xff] }
 0x4c1   :  { %v4653_v37 = vpop.f32.mrf.mxu0  ;;  %v15346_v38 = vpop.permute.xlu1 %7231  ;;  %v15352_v42 = vsel %vm17928_vm15, %v4252_v33, %v4166_v6  ;;  %v6919_v5 = vsel %vm1471_vm7, %v6887_v3, %v18322_v54  ;;  %v11344_v3 = vld [vmem:[%s17798_s1 + $0x70] sm:$0xff]  }
 0x4c2   :  { %18305 = vst [vmem:[#allocation46_spill] sm:$0xff] %v15333_v36  ;;  %7284 = vrot.lane.b32.xlu1 %v15077_v49, %s11427_s26  ;;  %7306 = vrot.lane.b32.xlu0 %v15342_v15, %s18238_s19 }
 0x4c3   :  { %v4654_v45 = vpop.f32.mrf.mxu0  ;;  %4525 = vmatmul.mubr.bf16.gmra.mxu1 %v15352_v42  ;;  %4754 = vmatmul.mubr.bf16.gmra.mxu0 %v15352_v42 }
 0x4c4   :  { %v15349_v29 = vadd.f32 %v4654_v45, %v15160_v31  ;;  %v15361_v22 = vpop.permute.xlu0 %7206  ;;  %10645 = vmatprep.mubr.msk.bf16.mxu1 %vm4206_vm4, %v15357_v51  ;;  %10672 = vmatprep.mubr.msk.bf16.mxu0 %vm4206_vm4, %v15357_v51 }
 0x4c5   :  { %v4656_v56 = vpop.f32.mrf.mxu0  ;;  %v3950_v21 = vpop.permute.xlu1 %3949 }
 0x4c6   :  { %18309 = vst [vmem:[#allocation10_spill] sm:$0xff] %v15349_v29  ;;  %7137 = vrot.lane.b32.xlu1 %v14340_v17, %s11422_s28  ;;  %v4230_v0 = vsel %vm4206_vm4, %v14807_v24, %v3950_v21  ;;  %7212 = vrot.lane.b32.xlu0 %v14933_v55, %s11421_s27  ;;  %v18362_v29 = vld [vmem:[#allocation45_spill] sm:$0xff] }
 0x4c7   :  { %v4659_v31 = vpop.f32.mrf.mxu0 }
 0x4c8   :  { %v15370_v48 = vadd.f32 %v4659_v31, %v15182_v40  ;;  %v4035_v25 = vpop.permute.xlu0 %4034 }
 0x4c9   :  { %v4661_v12 = vpop.f32.mrf.mxu0  ;;  %v4254_v2 = vsel %vm3283_vm1, %v4230_v0, %v4035_v25  ;;  %v4168_v40 = vpop.permute.xlu1 %4167  ;;  %v18317_v0 = vld [vmem:[#allocation68_spill] sm:$0xff] }
 0x4ca   :  { %18310 = vst [vmem:[#allocation28_spill] sm:$0xff] %v15370_v48  ;;  %7237 = vrot.lane.b32.xlu1 %v14960_v34, %s11425_s18  ;;  %v15388_v37 = vsel %vm17928_vm15, %v4254_v2, %v4168_v40  ;;  %7162 = vrot.lane.b32.xlu0 %v14652_v26, %s11424_s12  ;;  %v18320_v2 = vld [vmem:[#allocation70_spill] sm:$0xff]  ;;  %vm18369_vm15 = vcmask 195584  }
 0x4cb   :  { %v4662_v20 = vpop.f32.mrf.mxu0  ;;  %4533 = vmatmul.mubr.bf16.gmra.mxu1 %v15388_v37  ;;  %4762 = vmatmul.mubr.bf16.gmra.mxu0 %v15388_v37  ;;  %v18359_v48 = vld [vmem:[#allocation34_spill] sm:$0xff] }
 0x4cc   :  { %v15385_v24 = vadd.f32 %v4662_v20, %v15199_v14  ;;  %v15394_v6 = vpop.permute.xlu0 %7278  ;;  %10646 = vmatprep.mubr.msk.bf16.mxu1 %vm4206_vm4, %v15357_v51  ;;  %10709 = vmatprep.mubr.msk.bf16.mxu0 %vm4206_vm4, %v18137_v63  ;;  %v18315_v14 = vld [vmem:[#allocation66_spill] sm:$0xff] }
 0x4cd   :  { %v4664_v33 = vpop.f32.mrf.mxu0  ;;  %v6949_v9 = vsel %vm1504_vm6, %v6917_v32, %v18315_v14  ;;  %v15404_v56 = vpop.permute.xlu1 %6312 }
 0x4ce   :  { %18314 = vst [vmem:[#allocation48_spill] sm:$0xff] %v15385_v24  ;;  %7262 = vrot.lane.b32.xlu1 %v15077_v49, %s11426_s9  ;;  %7139 = vrot.lane.b32.xlu0 %v14652_v26, %s11422_s28  ;;  %v6981_v39 = vsel %vm1537_vm8, %v6949_v9, %v18317_v0  ;;  %v11343_v9 = vld [vmem:[%s17798_s1 + $0x38] sm:$0xff]   ;;  %v6951_v0 = vsel %vm1504_vm6, %v6919_v5, %v14625_v13  ;;  %v11345_v5 = vld [vmem:[%s17798_s1 + $0x30] sm:$0xff]  }
 0x4cf   :  { %v4667_v45 = vpop.f32.mrf.mxu0  ;;  %v7013_v40 = vsel %vm18321_vm12, %v6981_v39, %v18320_v2  ;;  %v18326_v2 = vld [vmem:[#allocation30_spill] sm:$0xff]  ;;  %v6983_v13 = vsel %vm1537_vm8, %v6951_v0, %v14644_v16  ;;  %v11332_v16 = vld [vmem:[%s17801_s5 + $0x178] sm:$0xff]   ;;  %vm18329_vm12 = vcmask 195584  }
 0x4d0   :  { %v15407_v31 = vadd.f32 %v4667_v45, %v15212_v11  ;;  %v15416_v12 = vpop.permute.xlu0 %7156  ;;  %v18323_v45 = vld [vmem:[#allocation6_spill] sm:$0xff] }
 0x4d1   :  { %v4669_v21 = vpop.f32.mrf.mxu0  ;;  %v15420_v20 = vpop.permute.xlu1 %7256 }
 0x4d2   :  { %18316 = vst [vmem:[#allocation51_spill] sm:$0xff] %v15407_v31  ;;  %7187 = vrot.lane.b32.xlu1 %v14900_v47, %s11428_s29  ;;  %7214 = vrot.lane.b32.xlu0 %v14960_v34, %s11421_s27  ;;  %v7045_v21 = vsel %vm18324_vm3, %v7013_v40, %v18323_v45  ;;  %vm18330_vm3 = vcmask 121856  }
 0x4d3   :  { %v4670_v25 = vpop.f32.mrf.mxu0  ;;  %4541 = vmatmul.mubr.bf16.gmra.mxu1 %v15388_v37  ;;  %5116 = vmatmul.mubr.bf16.vlgmr.msra.gmra.mxu0 %v14363_v7  ;;  %v7077_v40 = vsel %vm18327_vm11, %v7045_v21, %v18326_v2  ;;  %vm18332_vm11 = vcmask 146432  }
 0x4d4   :  { %v15423_v11 = vadd.f32 %v4670_v25, %v15224_v1  ;;  %v15433_v33 = vpop.permute.xlu0 %7300  ;;  %10683 = vmatprep.mubr.msk.bf16.mxu1 %vm4206_vm4, %v18137_v63  ;;  %10710 = vmatprep.mubr.msk.bf16.mxu0 %vm4206_vm4, %v18137_v63 }
 0x4d5   :  { %v4672_v32 = vpop.f32.mrf.mxu0  ;;  %v15441_v14 = vpop.permute.xlu1 %6360  ;;  %11026 = vmatpush3.bf16.msra.mxu0 %v11343_v9  ;;  %v15483_v9 = vsel %vm18329_vm12, %v7077_v40, %v14633_v44  ;;  %v11346_v44 = vld [vmem:[%s17798_s1 + $0x68] sm:$0xff]   ;;  %v11348_v40 = vld [vmem:[%s17798_s1 + $0x60] sm:$0xff]   ;;  %vm18333_vm12 = vcmask 171008  }
 0x4d6   :  { %18319 = vst [vmem:[#allocation25_spill] sm:$0xff] %v15423_v11  ;;  %7239 = vrot.lane.b32.xlu1 %v15077_v49, %s11425_s18  ;;  %7286 = vrot.lane.b32.xlu0 %v15342_v15, %s11427_s26 }
 0x4d7   :  { %v4675_v1 = vpop.f32.mrf.mxu0  ;;  %11027 = vmatprep.subr.bf16.mxu0 %v11344_v3 }
 0x4d8   :  { %v15451_v39 = vadd.f32 %v4675_v1, %v15231_v30  ;;  %v15458_v25 = vpop.permute.xlu0 %7181 }
 0x4d9   :  { %v4677_v52 = vpop.f32.mrf.mxu0  ;;  %v15466_v30 = vpop.permute.xlu1 %7280  ;;  %11028 = vmatpush3.bf16.msra.mxu0 %v11345_v5 }
 0x4da   :  { %18325 = vst [vmem:[#allocation52_spill] sm:$0xff] %v15451_v39  ;;  %7164 = vrot.lane.b32.xlu1 %v14900_v47, %s11424_s12  ;;  %7264 = vrot.lane.b32.xlu0 %v15342_v15, %s11426_s9  ;;  %v11347_v52 = vld [vmem:[%s17798_s1 + $0x28] sm:$0xff]  }
 0x4db   :  { %v4678_v54 = vpop.f32.mrf.mxu0  ;;  %4863 = vmatmul.mubr.bf16.vlgmr.msra.gmra.mxu1 %v14363_v7  ;;  %5124 = vmatmul.mubr.bf16.gmra.mxu0 %v14363_v7 }
 0x4dc   :  { %v15472_v32 = vadd.f32 %v4678_v54, %v15243_v43  ;;  %v7015_v43 = vsel %vm18330_vm3, %v6983_v13, %v14658_v46  ;;  %v6505_v45 = vpop.permute.xlu0 %6504  ;;  %10684 = vmatprep.mubr.msk.bf16.mxu1 %vm4206_vm4, %v18137_v63  ;;  %10711 = vmatprep.mubr.msk.bf16.mxu0 %vm4206_vm4, %v14422_v19  ;;  %vm18334_vm3 = vcmask 195584  }
 0x4dd   :  { %v4680_v1 = vpop.f32.mrf.mxu0  ;;  %v15493_v0 = vpop.permute.xlu1 %7302  ;;  %11029 = vmatprep.subr.bf16.mxu0 %v11346_v44  ;;  %v7047_v3 = vsel %vm18332_vm11, %v7015_v43, %v14671_v18  ;;  %5337 = vmatpush1.bf16.msra.mxu1 %v11332_v16  ;;  %v18336_v43 = vld [vmem:[#allocation13_spill] sm:$0xff]  ;;  %v18337_v44 = vld [vmem:[#allocation56_spill] sm:$0xff]  ;;  %vm18339_vm11 = vcmask 121856  }
 0x4de   :  { %18328 = vst [vmem:[#allocation53_spill] sm:$0xff] %v15472_v32  ;;  %7308 = vrot.lane.b32.xlu1 %v15483_v9, %s18238_s19  ;;  %7189 = vrot.lane.b32.xlu0 %v14933_v55, %s11428_s29  ;;  %v11337_v32 = vld [vmem:[%s17801_s5 + $0x150] sm:$0xff]  }
 0x4df   :  { %v4683_v21 = vpop.f32.mrf.mxu0  ;;  %11030 = vmatpush3.bf16.msra.mxu0 %v11347_v52  ;;  %5338 = vmatprep.subr.bf16.mxu1 %v18138_v23 }
 0x4e0   :  { %v15499_v46 = vadd.f32 %v4683_v21, %v15258_v58  ;;  %11031 = vmatprep.subr.bf16.mxu0 %v11348_v40  ;;  %v7079_v58 = vsel %vm18333_vm12, %v7047_v3, %v15015_v59  ;;  %v6601_v13 = vpop.permute.xlu0 %6600  ;;  %v11349_v59 = vld [vmem:[%s17798_s1 + $0x20] sm:$0xff]   ;;  %vm18340_vm12 = vcmask 146432  }
 0x4e1   :  { %v4685_v2 = vpop.f32.mrf.mxu0  ;;  %v15516_v54 = vsel %vm18334_vm3, %v7079_v58, %v15284_v27  ;;  %v6777_v18 = vpop.permute.xlu1 %6776  ;;  %v11333_v27 = vld [vmem:[%s17801_s5 + $0x170] sm:$0xff]   ;;  %v18338_v40 = vld [vmem:[#allocation22_spill] sm:$0xff]  ;;  %vm18344_vm3 = vcmask 171008  }
 0x4e2   :  { %18331 = vst [vmem:[#allocation49_spill] sm:$0xff] %v15499_v46  ;;  %7288 = vrot.lane.b32.xlu1 %v15483_v9, %s11427_s26  ;;  %7310 = vrot.lane.b32.xlu0 %v15516_v54, %s18238_s19  ;;  %v11350_v2 = vld [vmem:[%s17798_s1 + $0x58] sm:$0xff]  }
 0x4e3   :  { %v4686_v5 = vpop.f32.mrf.mxu0  ;;  %11032 = vmatpush3.bf16.msra.mxu0 %v11349_v59  ;;  %4871 = vmatmul.mubr.bf16.gmra.mxu1 %v14363_v7  ;;  %v11352_v59 = vld [vmem:[%s17798_s1 + $0x50] sm:$0xff]  }
 0x4e4   :  { %v15521_v1 = vadd.f32 %v4686_v5, %v15281_v53  ;;  %5132 = vmatmul.mubr.bf16.gmra.mxu0 %v14445_v28  ;;  %v6889_v53 = vsel %vm1438_vm5, %v14250_v61, %v18336_v43  ;;  %v6857_v21 = vpop.permute.xlu0 %6856  ;;  %10685 = vmatprep.mubr.msk.bf16.mxu1 %vm4206_vm4, %v18137_v63  ;;  %v11351_v61 = vld [vmem:[%s17798_s1 + $0x18] sm:$0xff]  }
 0x4e5   :  { %v4688_v16 = vpop.f32.mrf.mxu0  ;;  %10712 = vmatprep.mubr.msk.bf16.mxu0 %vm4206_vm4, %v18337_v44  ;;  %v15542_v3 = vpop.permute.xlu1 %7133  ;;  %11033 = vmatprep.subr.bf16.mxu0 %v11350_v2  ;;  %v6921_v58 = vsel %vm1471_vm7, %v6889_v53, %v18338_v40 }
 0x4e6   :  { %18335 = vst [vmem:[#allocation60_spill] sm:$0xff] %v15521_v1  ;;  %7141 = vrot.lane.b32.xlu1 %v14900_v47, %s11422_s28  ;;  %7216 = vrot.lane.b32.xlu0 %v15077_v49, %s11421_s27  ;;  %v6953_v16 = vsel %vm1504_vm6, %v6921_v58, %v15404_v56  ;;  %v11353_v56 = vld [vmem:[%s17798_s1 + $0x10] sm:$0xff]  }
 0x4e7   :  { %v4691_v52 = vpop.f32.mrf.mxu0  ;;  %11034 = vmatpush3.bf16.msra.mxu0 %v11351_v61  ;;  %5339 = vmatpush1.bf16.msra.mxu1 %v11333_v27  ;;  %v6985_v2 = vsel %vm1537_vm8, %v6953_v16, %v15441_v14  ;;  %v18341_v14 = vld [vmem:[#allocation58_spill] sm:$0xff] }
 0x4e8   :  { %11035 = vmatprep.subr.bf16.mxu0 %v11352_v59  ;;  %v15559_v43 = vpop.permute.xlu0 %7208  ;;  %5340 = vmatprep.subr.bf16.mxu1 %v18138_v23  ;;  %v7017_v40 = vsel %vm18339_vm11, %v6985_v2, %v6505_v45  ;;  %v18342_v59 = vld [vmem:[#allocation39_spill] sm:$0xff]  ;;  %vm18346_vm11 = vcmask 195584  }
 0x4e9   :  { %v4693_v5 = vpop.f32.mrf.mxu0  ;;  %v15566_v53 = vpop.permute.xlu1 %7233  ;;  %v7049_v27 = vsel %vm18340_vm12, %v7017_v40, %v6601_v13  ;;  %v11354_v13 = vld [vmem:[%s17798_s1 + $0x48] sm:$0xff]   ;;  %vm18355_vm12 = vcmask 121856  }
 0x4ea   :  { %7241 = vrot.lane.b32.xlu1 %v15342_v15, %s11425_s18  ;;  %7166 = vrot.lane.b32.xlu0 %v14933_v55, %s11424_s12  ;;  %v11334_v5 = vld [vmem:[%s17801_s5 + $0x168] sm:$0xff]   ;;  %v7081_v40 = vsel %vm18344_vm3, %v7049_v27, %v6777_v18  ;;  %vm18356_vm3 = vcmask 146432  }
 0x4eb   :  { %v4694_v61 = vpop.f32.mrf.mxu0  ;;  %11036 = vmatpush3.bf16.msra.mxu0 %v11353_v56  ;;  %4879 = vmatmul.mubr.bf16.gmra.mxu1 %v14363_v7 }
 0x4ec   :  { %5140 = vmatmul.mubr.bf16.gmra.mxu0 %v18341_v14  ;;  %v15580_v45 = vpop.permute.xlu0 %7158  ;;  %10686 = vmatprep.mubr.msk.bf16.mxu1 %vm4206_vm4, %v14422_v19 }
 0x4ed   :  { %v4696_v58 = vpop.f32.mrf.mxu0  ;;  %10713 = vmatprep.mubr.msk.bf16.mxu0 %vm4206_vm4, %v18342_v59  ;;  %11037 = vmatprep.subr.bf16.mxu0 %v11354_v13  ;;  %v11356_v13 = vld [vmem:[%s17798_s1 + $0x40] sm:$0xff]  }
 0x4ee   :  { %7266 = vrot.lane.b32.xlu1 %v15483_v9, %s11426_s9  ;;  %v15596_v58 = vpop.permute.xlu1 %7258  ;;  %7191 = vrot.lane.b32.xlu0 %v14960_v34, %s11428_s29 }
 0x4ef   :  { %v4470_v16 = vpop.f32.mrf.mxu1  ;;  %v15586_v2 = vpop.f32.mrf.mxu0  ;;  %5341 = vmatpush1.bf16.msra.mxu1 %v11334_v5 }
 0x4f0   :  { %18343 = vst [vmem:[#allocation54_spill] sm:$0xff] %v15586_v2  ;;  %v15594_v56 = vadd.f32 %v4691_v52, %v4470_v16  ;;  %v11355_v2 = vld [vmem:[%s17798_s1 + $0x8] sm:$0xff]   ;;  %v15606_v18 = vpop.permute.xlu0 %7183  ;;  %5342 = vmatprep.subr.bf16.mxu1 %v18138_v23  ;;  %v15610_v52 = vsel %vm18346_vm11, %v7081_v40, %v6857_v21  ;;  %v11357_v21 = vld [vmem:[%s17798_s1] sm:$0xff]   ;;  %vm18358_vm11 = vcmask 171008  }
 0x4f1   :  { %11038 = vmatpush3.bf16.msra.mxu0 %v11355_v2  ;;  %v4472_v1 = vpop.f32.mrf.mxu1  ;;  %v4701_v46 = vpop.f32.mrf.mxu0 }
 0x4f2   :  { %18345 = vst [vmem:[#allocation62_spill] sm:$0xff] %v15594_v56  ;;  %11039 = vmatprep.subr.bf16.mxu0 %v11356_v13  ;;  %7290 = vrot.lane.b32.xlu1 %v15516_v54, %s11427_s26  ;;  %v11335_v46 = vld [vmem:[%s17801_s5 + $0x160] sm:$0xff]   ;;  %v15621_v5 = vpop.permute.xlu1 %7282  ;;  %v18349_v13 = vld [vmem:[#allocation31_spill] sm:$0xff] }
 0x4f3   :  { %v4473_v27 = vpop.f32.mrf.mxu1  ;;  %v15612_v16 = vpop.f32.mrf.mxu0  ;;  %7312 = vrot.lane.b32.xlu0 %v15610_v52, %s18238_s19  ;;  %4887 = vmatmul.mubr.bf16.gmra.mxu1 %v14445_v28 }
 0x4f4   :  { %18347 = vst [vmem:[#allocation55_spill] sm:$0xff] %v15612_v16  ;;  %v15619_v1 = vadd.f32 %v4694_v61, %v4473_v27  ;;  %5148 = vmatmul.mubr.bf16.gmra.mxu0 %v18349_v13  ;;  %v6171_v16 = vpop.permute.xlu0 %6170  ;;  %10687 = vmatprep.mubr.msk.bf16.mxu1 %vm4206_vm4, %v18337_v44  ;;  %v18350_v61 = vld [vmem:[#allocation40_spill] sm:$0xff]  ;;  %v11336_v27 = vld [vmem:[%s17801_s5 + $0x158] sm:$0xff]  }
 0x4f5   :  { %11040 = vmatpush3.bf16.msra.mxu0 %v11357_v21  ;;  %v4475_v2 = vpop.f32.mrf.mxu1  ;;  %v4704_v40 = vpop.f32.mrf.mxu0  ;;  %10714 = vmatprep.mubr.msk.bf16.mxu0 %vm4206_vm4, %v18350_v61 }
 0x4f6   :  { %18348 = vst [vmem:[#allocation64_spill] sm:$0xff] %v15619_v1  ;;  %7143 = vrot.lane.b32.xlu1 %v14933_v55, %s11422_s28  ;;  %5343 = vmatpush1.bf16.msra.mxu1 %v11335_v46  ;;  %v15642_v21 = vpop.permute.xlu1 %7304  ;;  %v18351_v2 = vmov 0.0   ;;  %v18352_v40 = vld [vmem:[#allocation18_spill] sm:$0xff] }
 0x4f7   :  { %7218 = vrot.lane.b32.xlu0 %v15342_v15, %s11421_s27  ;;  %5344 = vmatprep.subr.bf16.mxu1 %v18138_v23  ;;  %v6891_v1 = vsel %vm1438_vm5, %v18352_v40, %v6171_v16  ;;  %v18353_v16 = vld [vmem:[#allocation33_spill] sm:$0xff] }
 0x4f8   :  { %11152 = vmatprep.subr.bf16.mxu0 %v18351_v2  ;;  %v6235_v56 = vpop.permute.xlu0 %6234 }
 0x4f9   :  { %v6923_v46 = vsel %vm1471_vm7, %v6891_v1, %v6235_v56  ;;  %v18354_v56 = vld [vmem:[#allocation17_spill] sm:$0xff] }
 0x4fa   :  { %7243 = vrot.lane.b32.xlu1 %v15483_v9, %s11425_s18  ;;  %5345 = vmatpush1.bf16.msra.mxu1 %v11336_v27  ;;  %v6315_v39 = vpop.permute.xlu1 %6314  ;;  %v11338_v27 = vld [vmem:[%s17801_s5 + $0x148] sm:$0xff]  }
 0x4fb   :  { %7168 = vrot.lane.b32.xlu0 %v14960_v34, %s11424_s12  ;;  %5346 = vmatprep.subr.bf16.mxu1 %v18138_v23  ;;  %v6955_v40 = vsel %vm1504_vm6, %v6923_v46, %v6315_v39 }
 0x4fc   :  { %4895 = vmatmul.mubr.bf16.gmra.mxu1 %v18341_v14  ;;  %5156 = vmatmul.mubr.bf16.gmra.mxu0 %v18353_v16  ;;  %v6363_v11 = vpop.permute.xlu0 %6362 }
 0x4fd   :  { %10688 = vmatprep.mubr.msk.bf16.mxu1 %vm4206_vm4, %v18342_v59  ;;  %10715 = vmatprep.mubr.msk.bf16.mxu0 %vm4206_vm4, %v18354_v56  ;;  %v6987_v1 = vsel %vm1537_vm8, %v6955_v40, %v6363_v11  ;;  %v11339_v11 = vld [vmem:[%s17801_s5 + $0x140] sm:$0xff]   ;;  %v18357_v40 = vld [vmem:[#allocation32_spill] sm:$0xff] }
 0x4fe   :  { %7268 = vrot.lane.b32.xlu1 %v15516_v54, %s11426_s9  ;;  %5347 = vmatpush1.bf16.msra.mxu1 %v11337_v32  ;;  %v6507_v39 = vpop.permute.xlu1 %6506 }
 0x4ff   :  { %7193 = vrot.lane.b32.xlu0 %v15077_v49, %s11428_s29  ;;  %5348 = vmatprep.subr.bf16.mxu1 %v18138_v23  ;;  %v7019_v46 = vsel %vm18355_vm12, %v6987_v1, %v6507_v39  ;;  %vm18360_vm12 = vcmask 195584  }
 0x500   :  { %v6603_v31 = vpop.permute.xlu0 %6602 }
 0x501   :  { %v7051_v24 = vsel %vm18356_vm3, %v7019_v46, %v6603_v31  ;;  %vm18366_vm3 = vcmask 121856  }
 0x502   :  { %7292 = vrot.lane.b32.xlu1 %v15610_v52, %s11427_s26  ;;  %5349 = vmatpush1.bf16.msra.mxu1 %v11338_v27  ;;  %v6779_v32 = vpop.permute.xlu1 %6778  ;;  %v11340_v27 = vld [vmem:[%s17801_s5 + $0x188] sm:$0xff]   ;;  %vm18370_vm9 = vmmov %vm18366_vm3 }
 0x503   :  { %5350 = vmatprep.subr.bf16.mxu1 %v18138_v23  ;;  %v7083_v1 = vsel %vm18358_vm11, %v7051_v24, %v6779_v32  ;;  %v11341_v32 = vld [vmem:[%s17801_s5 + $0x180] sm:$0xff]   ;;  %vm18367_vm11 = vcmask 146432  }
 0x504   :  { %4903 = vmatmul.mubr.bf16.gmra.mxu1 %v18349_v13  ;;  %5164 = vmatmul.mubr.bf16.gmra.mxu0 %v18357_v40  ;;  %v6859_v39 = vpop.permute.xlu0 %6858 }
 0x505   :  { %10689 = vmatprep.mubr.msk.bf16.mxu1 %vm4206_vm4, %v18350_v61  ;;  %10716 = vmatprep.mubr.msk.bf16.mxu0 %vm4206_vm4, %v18359_v48  ;;  %v15690_v31 = vsel %vm18360_vm12, %v7083_v1, %v6859_v39  ;;  %v18361_v1 = vld [vmem:[#allocation4_spill] sm:$0xff]  ;;  %vm18368_vm12 = vcmask 171008  }
 0x506   :  { %7145 = vrot.lane.b32.xlu1 %v14960_v34, %s11422_s28  ;;  %5351 = vmatpush1.bf16.msra.mxu1 %v11339_v11 }
 0x507   :  { %7314 = vrot.lane.b32.xlu0 %v15690_v31, %s18238_s19  ;;  %5364 = vmatprep.subr.bf16.mxu1 %v18138_v23  ;;  %v6173_v24 = vpop.permute.xlu1 %6172 }
 0x508   :  { %v6237_v46 = vpop.permute.xlu0 %6236 }
 0x50a   :  { %7245 = vrot.lane.b32.xlu1 %v15516_v54, %s11425_s18  ;;  %5365 = vmatpush2.bf16.msra.mxu1 %v11340_v27 }
 0x50b   :  { %7220 = vrot.lane.b32.xlu0 %v15483_v9, %s11421_s27  ;;  %5366 = vmatprep.subr.bf16.mxu1 %v18138_v23  ;;  %v6175_v11 = vpop.permute.xlu1 %6174 }
 0x50c   :  { %4911 = vmatmul.mubr.bf16.gmra.mxu1 %v18353_v16  ;;  %5172 = vmatmul.mubr.bf16.gmra.mxu0 %v18361_v1  ;;  %v6317_v39 = vpop.permute.xlu0 %6316  ;;  %v18365_v16 = vld [vmem:[#allocation38_spill] sm:$0xff] }
 0x50d   :  { %10690 = vmatprep.mubr.msk.bf16.mxu1 %vm4206_vm4, %v18354_v56  ;;  %10717 = vmatprep.mubr.msk.bf16.mxu0 %vm4206_vm4, %v18362_v29  ;;  %v6895_v61 = vsel %vm1438_vm5, %v18365_v16, %v6175_v11 }
 0x50e   :  { %7270 = vrot.lane.b32.xlu1 %v15610_v52, %s11426_s9  ;;  %5367 = vmatpush2.bf16.msra.mxu1 %v11341_v32  ;;  %v18364_v32 = vld [vmem:[#allocation43_spill] sm:$0xff] }
 0x50f   :  { %7170 = vrot.lane.b32.xlu0 %v15077_v49, %s11424_s12  ;;  %9583 = vmatprep.subr.bf16.mxu1 %v18138_v23  ;;  %v6239_v27 = vpop.permute.xlu1 %6238 }
 0x510   :  { %v6365_v36 = vpop.permute.xlu0 %6364 }
 0x512   :  { %7195 = vrot.lane.b32.xlu1 %v15342_v15, %s11428_s29 }
 0x513   :  { %7147 = vrot.lane.b32.xlu0 %v15077_v49, %s11422_s28  ;;  %v6319_v60 = vpop.permute.xlu1 %6318  ;;  %v6893_v49 = vsel %vm1438_vm5, %v15101_v4, %v6173_v24 }
 0x514   :  { %4919 = vmatmul.mubr.bf16.gmra.mxu1 %v18357_v40  ;;  %5180 = vmatmul.mubr.bf16.gmra.mxu0 %v18363_v41  ;;  %v6509_v34 = vpop.permute.xlu0 %6508 }
 0x515   :  { %10691 = vmatprep.mubr.msk.bf16.mxu1 %vm4206_vm4, %v18359_v48  ;;  %10718 = vmatprep.mubr.msk.bf16.mxu0 %vm4206_vm4, %v18364_v32  ;;  %v6925_v48 = vsel %vm1471_vm7, %v6893_v49, %v6237_v46  ;;  %v6927_v46 = vsel %vm1471_vm7, %v6895_v61, %v6239_v27  ;;  %vm18371_vm7 = vmmov %vm18367_vm11 }
 0x516   :  { %7247 = vrot.lane.b32.xlu1 %v15610_v52, %s11425_s18  ;;  %v6957_v47 = vsel %vm1504_vm6, %v6925_v48, %v6317_v39  ;;  %v6959_v48 = vsel %vm1504_vm6, %v6927_v46, %v6319_v60  ;;  %vm18372_vm6 = vmmov %vm18368_vm12  ;;  %v18375_v46 = vld [vmem:[#allocation12_spill] sm:$0xff] }
 0x517   :  { %7222 = vrot.lane.b32.xlu0 %v15516_v54, %s11421_s27  ;;  %v6367_v55 = vpop.permute.xlu1 %6366  ;;  %v6989_v24 = vsel %vm1537_vm8, %v6957_v47, %v6365_v36 }
 0x518   :  { %v6605_v40 = vpop.permute.xlu0 %6604  ;;  %v7021_v49 = vsel %vm18366_vm3, %v6989_v24, %v6509_v34  ;;  %vm18383_vm3 = vcmask 662528  }
 0x519   :  { %v7053_v16 = vsel %vm18367_vm11, %v7021_v49, %v6605_v40  ;;  %vm18384_vm11 = vcmask 498688  }
 0x51a   :  { %7172 = vrot.lane.b32.xlu1 %v15342_v15, %s11424_s12 }
 0x51b   :  { %7294 = vrot.lane.b32.xlu0 %v15690_v31, %s11427_s26  ;;  %v6511_v56 = vpop.permute.xlu1 %6510 }
 0x51c   :  { %4927 = vmatmul.mubr.bf16.gmra.mxu1 %v18361_v1  ;;  %5188 = vmatmul.mubr.bf16.gmra.mxu0 %v15264_v8  ;;  %v6781_v4 = vpop.permute.xlu0 %6780  ;;  %v6991_v1 = vsel %vm1537_vm8, %v6959_v48, %v6367_v55  ;;  %vm18373_vm8 = vmmov %vm18369_vm15  ;;  %v18377_v48 = vld [vmem:[#allocation29_spill] sm:$0xff] }
 0x51d   :  { %10692 = vmatprep.mubr.msk.bf16.mxu1 %vm4206_vm4, %v18362_v29  ;;  %10719 = vmatprep.mubr.msk.bf16.mxu0 %vm4206_vm4, %v15273_v35  ;;  %v7085_v39 = vsel %vm18368_vm12, %v7053_v16, %v6781_v4  ;;  %v7023_v47 = vsel %vm18370_vm9, %v6991_v1, %v6511_v56  ;;  %v18376_v16 = vld [vmem:[#allocation26_spill] sm:$0xff]  ;;  %vm18380_vm9 = vcmask 441344  }
 0x51e   :  { %vm18385_vm12 = vmmov %vm18380_vm9 }
 0x51f   :  { %7272 = vrot.lane.b32.xlu0 %v15690_v31, %s11426_s9  ;;  %v6607_v11 = vpop.permute.xlu1 %6606 }
 0x520   :  { %v6861_v29 = vpop.permute.xlu0 %6860  ;;  %v7055_v34 = vsel %vm18371_vm7, %v7023_v47, %v6607_v11  ;;  %v7321_v11 = vsel %vm1902_vm14, %v18376_v16, %v18375_v46 }
 0x521   :  { %v15757_v13 = vsel %vm18369_vm15, %v7085_v39, %v6861_v29  ;;  %v18378_v39 = vld [vmem:[#allocation72_spill] sm:$0xff]  ;;  %vm18382_vm15 = vcmask 277504  }
 0x522   :  { %7316 = vrot.lane.b32.xlu1 %v15757_v13, %s18238_s19  ;;  %v7415_v47 = vsel %vm2000_vm13, %v18378_v39, %v18377_v48  ;;  %vm18386_vm7 = vmmov %vm18382_vm15 }
 0x523   :  { %7197 = vrot.lane.b32.xlu0 %v15483_v9, %s11428_s29 }
 0x524   :  { %v6783_v36 = vpop.permute.xlu1 %6782  ;;  %4935 = vmatmul.mubr.bf16.gmra.mxu1 %v18363_v41  ;;  %5196 = vmatmul.mubr.bf16.gmra.mxu0 %v15311_v50  ;;  %v6863_v60 = vpop.permute.xlu0 %6862 }
 0x525   :  { %v7087_v55 = vsel %vm18372_vm6, %v7055_v34, %v6783_v36  ;;  %10693 = vmatprep.mubr.msk.bf16.mxu1 %vm4206_vm4, %v18364_v32  ;;  %10720 = vmatprep.mubr.msk.bf16.mxu0 %vm4206_vm4, %v15320_v57  ;;  %v18379_v34 = vld [vmem:[#allocation37_spill] sm:$0xff]  ;;  %vm18387_vm6 = vcmask 719872  }
 0x526   :  { %v15773_v29 = vsel %vm18373_vm8, %v7087_v55, %v6863_v60  ;;  %7296 = vrot.lane.b32.xlu1 %v15757_v13, %s11427_s26  ;;  %v7343_v36 = vsel %vm18380_vm9, %v7321_v11, %v18379_v34  ;;  %v18381_v55 = vld [vmem:[#allocation42_spill] sm:$0xff]  ;;  %vm18388_vm8 = vmmov %vm18383_vm3 }
 0x527   :  { %7318 = vrot.lane.b32.xlu0 %v15773_v29, %s18238_s19  ;;  %v7439_v60 = vsel %vm18382_vm15, %v7415_v47, %v18381_v55  ;;  %v7367_v48 = vsel %vm18383_vm3, %v7343_v36, %v15275_v62  ;;  %v7345_v55 = vsel %vm18385_vm12, %v7321_v11, %v15416_v12  ;;  %vm18389_vm9 = vmmov %vm18384_vm11  ;;  %vm18390_vm15 = vcmask 883712  }
 0x528   :  { %v15779_v61 = vpop.permute.xlu1 %7135  ;;  %v15781_v56 = vpop.permute.xlu0 %7210  ;;  %vm18391_vm3 = vmmov %vm18387_vm6 }
 0x52a   :  { %7149 = vrot.lane.b32.xlu1 %v15342_v15, %s11422_s28  ;;  %v7417_v15 = vsel %vm2000_vm13, %v15361_v22, %v15346_v38 }
 0x52b   :  { %7224 = vrot.lane.b32.xlu0 %v15610_v52, %s11421_s27  ;;  %v7441_v62 = vsel %vm18386_vm7, %v7417_v15, %v15420_v20  ;;  %v7391_v15 = vsel %vm18390_vm15, %v7367_v48, %v18378_v39 }
 0x52c   :  { %v15787_v40 = vpop.permute.xlu1 %7235  ;;  %4943 = vmatmul.mubr.bf16.gmra.mxu1 %v15264_v8  ;;  %5204 = vmatmul.mubr.bf16.gmra.mxu0 %v15352_v42  ;;  %v15791_v1 = vpop.permute.xlu0 %7160 }
 0x52d   :  { %10694 = vmatprep.mubr.msk.bf16.mxu1 %vm4206_vm4, %v15273_v35  ;;  %10721 = vmatprep.mubr.msk.bf16.mxu0 %vm4206_vm4, %v15357_v51  ;;  %v7463_v35 = vsel %vm18384_vm11, %v7439_v60, %v15394_v6  ;;  %v7369_v6 = vsel %vm18388_vm8, %v7345_v55, %v15458_v25  ;;  %v7465_v60 = vsel %vm18389_vm9, %v7441_v62, %v15466_v30  ;;  %vm18392_vm11 = vmmov %vm18390_vm15 }
 0x52e   :  { %7249 = vrot.lane.b32.xlu1 %v15690_v31, %s11425_s18  ;;  %v7486_v38 = vsel %vm18387_vm6, %v7463_v35, %v15433_v33  ;;  %v15858_v35 = vsel %vm18391_vm3, %v7465_v60, %v15493_v0  ;;  %v7323_v30 = vsel %vm1902_vm14, %v18376_v16, %v15542_v3  ;;  %v7393_v39 = vsel %vm18392_vm11, %v7369_v6, %v15361_v22  ;;  %vm18393_vm6 = vmmov %vm18388_vm8  ;;  %v18399_v60 = vld [vmem:[#allocation73_spill] sm:$0xff] }
 0x52f   :  { %7174 = vrot.lane.b32.xlu0 %v15483_v9, %s11424_s12  ;;  %v7531_v25 = vcombine.low %v7391_v15, %v7486_v38  ;;  %v7347_v0 = vsel %vm18385_vm12, %v7323_v30, %v15580_v45  ;;  %vm18394_vm8 = vmmov %vm18389_vm9  ;;  %v7421_v55 = vsel %vm2000_vm13, %v15781_v56, %v15787_v40 }
 0x530   :  { %v15801_v27 = vpop.permute.xlu1 %7260  ;;  %v15803_v4 = vpop.permute.xlu0 %7185  ;;  %v7371_v3 = vsel %vm18393_vm6, %v7347_v0, %v15606_v18  ;;  %vm18395_vm9 = vmmov %vm18391_vm3  ;;  %v18396_v18 = vld [vmem:[#allocation5_spill] sm:$0xff] }
 0x531   :  { %v15805_v24 = vpop.f32.mrf.mxu1  ;;  %v15807_v49 = vpop.f32.mrf.mxu0  ;;  %v7539_v16 = vrot.slane %v7531_v25, %v18396_v18  ;;  %vm18397_vm15 = vmmov %vm18392_vm11 }
 0x532   :  { %18374 = vst [vmem:[#allocation36_spill] sm:$0xff] %v15805_v24  ;;  %7274 = vrot.lane.b32.xlu1 %v15757_v13, %s11426_s9  ;;  %vm18398_vm3 = vmmov %vm18386_vm7 }
 0x533   :  { %7199 = vrot.lane.b32.xlu0 %v15516_v54, %s11428_s29  ;;  %v4480_v46 = vpop.f32.mrf.mxu1  ;;  %v4709_v47 = vpop.f32.mrf.mxu0  ;;  %v7445_v62 = vsel %vm18398_vm3, %v7421_v55, %v15801_v27  ;;  %v7547_v6 = vcombine.high %v7539_v16, %v7539_v16  ;;  %vm18400_vm11 = vmmov %vm18394_vm8 }
 0x534   :  { %v7285_v24 = vpop.permute.xlu1 %7284  ;;  %4951 = vmatmul.mubr.bf16.gmra.mxu1 %v15311_v50  ;;  %5212 = vmatmul.mubr.bf16.gmra.mxu0 %v15388_v37  ;;  %v7307_v34 = vpop.permute.xlu0 %7306  ;;  %v7548_v47 = vcombine.low %v7393_v39, %v15858_v35 }
 0x535   :  { %10695 = vmatprep.mubr.msk.bf16.mxu1 %vm4206_vm4, %v15320_v57  ;;  %10722 = vmatprep.mubr.msk.bf16.mxu0 %vm4206_vm4, %v15357_v51  ;;  %v15842_v36 = vpop.f32.mrf.mxu1  ;;  %v15852_v12 = vpop.f32.mrf.mxu0 }
 0x536   :  { %7298 = vrot.lane.b32.xlu1 %v15773_v29, %s11427_s26 }
 0x537   :  { %7151 = vrot.lane.b32.xlu0 %v15483_v9, %s11422_s28  ;;  %v4483_v33 = vpop.f32.mrf.mxu1  ;;  %v7419_v9 = vsel %vm2000_vm13, %v15559_v43, %v15566_v53  ;;  %v4712_v46 = vpop.f32.mrf.mxu0 }
 0x538   :  { %v15860_v20 = vpop.permute.xlu1 %7137  ;;  %v15868_v11 = vpop.permute.xlu0 %7212  ;;  %v7443_v48 = vsel %vm18386_vm7, %v7419_v9, %v15596_v58  ;;  %v7532_v58 = vcombine.high %v7391_v15, %v7486_v38  ;;  %v7325_v15 = vsel %vm1902_vm14, %v18399_v60, %v15779_v61  ;;  %v7469_v33 = vsel %vm18400_vm11, %v7445_v62, %v7285_v24  ;;  %vm18401_vm7 = vmmov %vm18393_vm6 }
 0x539   :  { %v7467_v53 = vsel %vm18394_vm8, %v7443_v48, %v15621_v5  ;;  %vm18402_vm6 = vmmov %vm18395_vm9  ;;  %v7735_v24 = vcombine.low %v7539_v16, %v7547_v6  ;;  %vm18407_vm11 = vcmask 277504  }
 0x53a   :  { %7226 = vrot.lane.b32.xlu1 %v15690_v31, %s11421_s27  ;;  %v15887_v22 = vsel %vm18395_vm9, %v7467_v53, %v15642_v21  ;;  %v7556_v21 = vrot.slane %v7548_v47, %v18396_v18  ;;  %v7546_v38 = vrot.slane %v7532_v58, %v18396_v18  ;;  %v7492_v30 = vsel %vm18402_vm6, %v7469_v33, %v7307_v34  ;;  %vm18403_vm8 = vmmov %vm18397_vm15 }
 0x53b   :  { %7251 = vrot.lane.b32.xlu0 %v15757_v13, %s11425_s18  ;;  %v15900_v13 = vsel %vm18397_vm15, %v7371_v3, %v15559_v43  ;;  %vm18404_vm9 = vmmov %vm18385_vm12  ;;  %vm18405_vm15 = vcmask 941056  }
 0x53c   :  { %v15889_v45 = vpop.permute.xlu1 %7237  ;;  %4959 = vmatmul.mubr.bf16.gmra.mxu1 %v15352_v42  ;;  %5220 = vmatmul.mubr.bf16.gmra.mxu0 %v15388_v37  ;;  %v7163_v5 = vpop.permute.xlu0 %7162  ;;  %v7565_v31 = vcombine.low %v15900_v13, %v15887_v22  ;;  %v7736_v25 = vcombine.low %v7546_v38, %v7556_v21  ;;  %v7564_v53 = vcombine.high %v7556_v21, %v7556_v21  ;;  %vm18406_vm3 = vmmov %vm18401_vm7 }
 0x53d   :  { %10696 = vmatprep.mubr.msk.bf16.mxu1 %vm4206_vm4, %v15357_v51  ;;  %10723 = vmatprep.mubr.msk.bf16.mxu0 %vm4206_vm4, %v15357_v51 }
 0x53e   :  { %7176 = vrot.lane.b32.xlu1 %v15516_v54, %s11424_s12  ;;  %v7349_v54 = vsel %vm18385_vm12, %v7325_v15, %v15791_v1  ;;  %v15944_v48 = vrot.slane %v7736_v25, %v18396_v18  ;;  %vm18408_vm12 = vcmask 498688  }
 0x53f   :  { %7276 = vrot.lane.b32.xlu0 %v15773_v29, %s11426_s9  ;;  %v7573_v29 = vrot.slane %v7565_v31, %v18396_v18  ;;  %v7373_v27 = vsel %vm18401_vm7, %v7349_v54, %v15803_v4  ;;  %v7743_v31 = vrot.slane %v7735_v24, %v18396_v18  ;;  %v7327_v54 = vsel %vm1902_vm14, %v18241_v10, %v15860_v20  ;;  %vm18409_vm7 = vmmov %vm18403_vm8 }
 0x540   :  { %v7263_v43 = vpop.permute.xlu1 %7262  ;;  %v15919_v40 = vpop.permute.xlu0 %7139  ;;  %v7397_v4 = vsel %vm18403_vm8, %v7373_v27, %v15781_v56  ;;  %v7566_v10 = vcombine.high %v15900_v13, %v15887_v22  ;;  %v7423_v20 = vsel %vm2000_vm13, %v15868_v11, %v15889_v45  ;;  %vm18410_vm8 = vmmov %vm18404_vm9 }
 0x541   :  { %v4486_v61 = vpop.f32.mrf.mxu1  ;;  %v4715_v46 = vpop.f32.mrf.mxu0  ;;  %v7582_v47 = vcombine.low %v7397_v4, %v7492_v30  ;;  %v7752_v15 = vcombine.high %v7743_v31, %v15944_v48  ;;  %v7583_v33 = vcombine.high %v7397_v4, %v7492_v30  ;;  %v7447_v4 = vsel %vm18407_vm11, %v7423_v20, %v7263_v43 }
 0x542   :  { %7201 = vrot.lane.b32.xlu1 %v15610_v52, %s11428_s29  ;;  %v15932_v1 = vadd.f32 %v15807_v49, %v4486_v61  ;;  %v7549_v52 = vcombine.high %v7393_v39, %v15858_v35  ;;  %v7581_v49 = vcombine.high %v7573_v29, %v7573_v29 }
 0x543   :  { %v4488_v34 = vpop.f32.mrf.mxu1  ;;  %v4717_v3 = vpop.f32.mrf.mxu0  ;;  %v15952_v6 = vrot.slane %v7582_v47, %v18396_v18  ;;  %v7597_v22 = vrot.slane %v7583_v33, %v18396_v18 }
 0x544   :  { %v7188_v9 = vpop.permute.xlu1 %7187  ;;  %4967 = vmatmul.mubr.bf16.gmra.mxu1 %v15388_v37  ;;  %5228 = vmatmul.mubr.bf16.gmra.mxu0 %v15388_v37  ;;  %v15934_v0 = vpop.permute.xlu0 %7214  ;;  %v7563_v39 = vrot.slane %v7549_v52, %v18396_v18  ;;  %v7754_v38 = vcombine.low %v7573_v29, %v7581_v49  ;;  %v7351_v29 = vsel %vm18404_vm9, %v7327_v54, %v7163_v5  ;;  %vm18411_vm9 = vmmov %vm18406_vm3 }
 0x545   :  { %10697 = vmatprep.mubr.msk.bf16.mxu1 %vm4206_vm4, %v15357_v51  ;;  %10724 = vmatprep.mubr.msk.bf16.mxu0 %vm4206_vm4, %v15357_v51  ;;  %v4489_v16 = vpop.f32.mrf.mxu1  ;;  %v4718_v62 = vpop.f32.mrf.mxu0  ;;  %v7375_v30 = vsel %vm18406_vm3, %v7351_v29, %v7188_v9  ;;  %v7329_v9 = vsel %vm1902_vm14, %v14340_v17, %v15919_v40  ;;  %vm18413_vm3 = vmmov %vm18408_vm12 }
 0x546   :  { %v15948_v55 = vadd.f32 %v15852_v12, %v4489_v16  ;;  %v7753_v21 = vcombine.low %v7564_v53, %v7563_v39  ;;  %v15973_v5 = vrot.slane %v7754_v38, %v18396_v18  ;;  %v7399_v3 = vsel %vm18409_vm7, %v7375_v30, %v15868_v11 }
 0x547   :  { %v4491_v56 = vpop.f32.mrf.mxu1  ;;  %v4720_v60 = vpop.f32.mrf.mxu0  ;;  %v7580_v38 = vrot.slane %v7566_v10, %v18396_v18 }
 0x548   :  { %v7240_v58 = vpop.permute.xlu1 %7239  ;;  %v7287_v35 = vpop.permute.xlu0 %7286  ;;  %v15979_v49 = vrot.slane %v7753_v21, %v18396_v18  ;;  %v7751_v56 = vcombine.low %v7743_v31, %v15944_v48 }
 0x549   :  { %v4494_v25 = vpop.f32.mrf.mxu1  ;;  %v4723_v61 = vpop.f32.mrf.mxu0  ;;  %v7471_v13 = vsel %vm18408_vm12, %v7447_v4, %v7287_v35  ;;  %v7425_v17 = vsel %vm2000_vm13, %v15934_v0, %v7240_v58  ;;  %v7771_v33 = vcombine.low %v7580_v38, %v15952_v6  ;;  %vm18415_vm12 = vmmov %vm18409_vm7 }
 0x54a   :  { %v15961_v27 = vadd.f32 %v4715_v46, %v4494_v25  ;;  %v7598_v46 = vcombine.high %v15952_v6, %v15952_v6  ;;  %vm18416_vm7 = vmmov %vm18402_vm6 }
 0x54b   :  { %v4496_v52 = vpop.f32.mrf.mxu1  ;;  %v4725_v34 = vpop.f32.mrf.mxu0  ;;  %v7779_v4 = vrot.slane %v7771_v33, %v18396_v18 }
 0x54c   :  { %v7165_v12 = vpop.permute.xlu1 %7164  ;;  %4975 = vmatmul.mubr.bf16.gmra.mxu1 %v15388_v37  ;;  %5236 = vmatmul.mubr.bf16.gmra.mxu0 %v15388_v37  ;;  %v7265_v24 = vpop.permute.xlu0 %7264  ;;  %v7772_v21 = vcombine.low %v7598_v46, %v7597_v22 }
 0x54d   :  { %10698 = vmatprep.mubr.msk.bf16.mxu1 %vm4206_vm4, %v15357_v51  ;;  %10800 = vmatprep.mubr.msk.bf16.mxu0 %vm18405_vm15, %v7752_v15  ;;  %v4497_v47 = vpop.f32.mrf.mxu1  ;;  %v4726_v16 = vpop.f32.mrf.mxu0  ;;  %v7353_v35 = vsel %vm18410_vm8, %v7329_v9, %v7165_v12  ;;  %vm18412_vm15 = vmmov %vm18407_vm11  ;;  %vm18414_vm11 = vcmask 941056  }
 0x54e   :  { %v15989_v43 = vadd.f32 %v4718_v62, %v4497_v47  ;;  %v7770_v62 = vcombine.high %v15979_v49, %v15973_v5  ;;  %v7449_v48 = vsel %vm18412_vm15, %v7425_v17, %v7265_v24  ;;  %v7786_v52 = vrot.slane %v7772_v21, %v18396_v18 }
 0x54f   :  { %v4499_v15 = vpop.f32.mrf.mxu1  ;;  %v4728_v40 = vpop.f32.mrf.mxu0 }
 0x550   :  { %v7309_v45 = vpop.permute.xlu1 %7308  ;;  %v7190_v39 = vpop.permute.xlu0 %7189  ;;  %v7787_v33 = vcombine.low %v7779_v4, %v7786_v52 }
 0x551   :  { %v7494_v53 = vsel %vm18402_vm6, %v7471_v13, %v7309_v45  ;;  %v7377_v11 = vsel %vm18411_vm9, %v7353_v35, %v7190_v39  ;;  %v7769_v39 = vcombine.low %v15979_v49, %v15973_v5  ;;  %vm18417_vm6 = vmmov %vm18414_vm11  ;;  %v11360_v5 = vld [vmem:[%s17799_s3 + $0x8] sm:$0xff]  }
 0x552   :  { %v7599_v60 = vcombine.low %v7399_v3, %v7494_v53  ;;  %v7600_v31 = vcombine.high %v7399_v3, %v7494_v53  ;;  %v16013_v24 = vsel %vm18415_vm12, %v7377_v11, %v15934_v0  ;;  %v11361_v49 = vld [vmem:[%s17801_s5 + $0x88] sm:$0xff]  }
 0x553   :  { %v4502_v25 = vpop.f32.mrf.mxu1  ;;  %v16006_v10 = vpop.f32.mrf.mxu0 }
 0x554   :  { %v7289_v54 = vpop.permute.xlu1 %7288  ;;  %4983 = vmatmul.mubr.bf16.gmra.mxu1 %v15388_v37  ;;  %7966 = vmatmul.mubr.bf16.vlgmr.msra.gmra.mxu0 %v7751_v56  ;;  %v7607_v12 = vrot.slane %v7599_v60, %v18396_v18  ;;  %v16004_v29 = vadd.f32 %v4723_v61, %v4502_v25  ;;  %v7311_v20 = vpop.permute.xlu0 %7310  ;;  %v11358_v61 = vld [vmem:[%s17799_s3 + $0x18] sm:$0xff]   ;;  %v7614_v22 = vrot.slane %v7600_v31, %v18396_v18  ;;  %v11359_v56 = vld [vmem:[%s17799_s3 + $0x10] sm:$0xff]   ;;  %v11363_v31 = vld [vmem:[%s17801_s5 + $0x80] sm:$0xff]  }
 0x555   :  { %v7473_v58 = vsel %vm18413_vm3, %v7449_v48, %v7289_v54  ;;  %10735 = vmatprep.mubr.msk.bf16.mxu1 %vm4206_vm4, %v18137_v63  ;;  %10801 = vmatprep.mubr.msk.bf16.mxu0 %vm18414_vm11, %v7770_v62  ;;  %v4504_v6 = vpop.f32.mrf.mxu1  ;;  %v4733_v46 = vpop.f32.mrf.mxu0  ;;  %v7788_v60 = vcombine.high %v7779_v4, %v7786_v52  ;;  %v11362_v48 = vld [vmem:[%s17799_s3] sm:$0xff]   ;;  %vm18418_vm11 = vmmov %vm18417_vm6 }
 0x556   :  { %v16016_v30 = vsel %vm18416_vm7, %v7473_v58, %v7311_v20  ;;  %11153 = vmatpush3.bf16.msra.mxu0 %v11358_v61  ;;  %v7615_v13 = vcombine.high %v7607_v12, %v7607_v12 }
 0x557   :  { %v7616_v63 = vcombine.low %v16013_v24, %v16016_v30  ;;  %11154 = vmatprep.subr.bf16.mxu0 %v18351_v2  ;;  %v4505_v34 = vpop.f32.mrf.mxu1  ;;  %v16032_v9 = vpop.f32.mrf.mxu0  ;;  %v7617_v20 = vcombine.high %v16013_v24, %v16016_v30 }
 0x558   :  { %v7142_v0 = vpop.permute.xlu1 %7141  ;;  %v16030_v47 = vadd.f32 %v4726_v16, %v4505_v34  ;;  %v7217_v3 = vpop.permute.xlu0 %7216  ;;  %v7789_v15 = vcombine.low %v7607_v12, %v7615_v13 }
 0x559   :  { %v16028_v45 = vrot.slane %v7616_v63, %v18396_v18  ;;  %v4507_v53 = vpop.f32.mrf.mxu1  ;;  %v4736_v35 = vpop.f32.mrf.mxu0  ;;  %v7331_v40 = vsel %vm1902_vm14, %v14652_v26, %v7142_v0  ;;  %v7631_v63 = vrot.slane %v7617_v20, %v18396_v18 }
 0x55a   :  { %11155 = vmatpush3.bf16.msra.mxu0 %v11359_v56  ;;  %v11366_v56 = vld [vmem:[%s17801_s5 + $0x68] sm:$0xff]  }
 0x55b   :  { %v7790_v38 = vcombine.low %v7614_v22, %v16028_v45  ;;  %11156 = vmatprep.subr.bf16.mxu0 %v18351_v2  ;;  %v7632_v24 = vcombine.high %v16028_v45, %v16028_v45  ;;  %v11365_v22 = vld [vmem:[%s17801_s5 + $0x70] sm:$0xff]  }
 0x55c   :  { %v7242_v16 = vpop.permute.xlu1 %7241  ;;  %5369 = vmatmul.mubr.bf16.vlgmr.msra.gmra.mxu1 %v14363_v7  ;;  %7974 = vmatmul.mubr.bf16.gmra.mxu0 %v7769_v39  ;;  %v7167_v21 = vpop.permute.xlu0 %7166 }
 0x55d   :  { %10736 = vmatprep.mubr.msk.bf16.mxu1 %vm4206_vm4, %v14422_v19  ;;  %10802 = vmatprep.mubr.msk.bf16.mxu0 %vm18417_vm6, %v7788_v60  ;;  %v7804_v7 = vrot.slane %v7790_v38, %v18396_v18  ;;  %v7797_v19 = vrot.slane %v7789_v15, %v18396_v18  ;;  %v7355_v62 = vsel %vm18410_vm8, %v7331_v40, %v7167_v21  ;;  %v18419_v40 = vld [vmem:[#allocation31_spill] sm:$0xff] }
 0x55e   :  { %11157 = vmatpush3.bf16.msra.mxu0 %v11360_v5  ;;  %9584 = vmatpush1.bf16.msra.mxu1 %v11361_v49  ;;  %v7427_v54 = vsel %vm2000_vm13, %v7217_v3, %v7242_v16  ;;  %v7807_v13 = vcombine.low %v7632_v24, %v7631_v63  ;;  %v11367_v49 = vld [vmem:[%s17801_s5 + $0x60] sm:$0xff]   ;;  %v11369_v63 = vld [vmem:[%s17801_s5 + $0x50] sm:$0xff]  }
 0x55f   :  { %11158 = vmatprep.subr.bf16.mxu0 %v18351_v2  ;;  %9585 = vmatprep.subr.bf16.mxu1 %v18138_v23  ;;  %v7806_v12 = vcombine.high %v7797_v19, %v7804_v7  ;;  %v7805_v34 = vcombine.low %v7797_v19, %v7804_v7 }
 0x560   :  { %v7267_v17 = vpop.permute.xlu1 %7266  ;;  %v7192_v11 = vpop.permute.xlu0 %7191  ;;  %v7815_v38 = vrot.slane %v7807_v13, %v18396_v18 }
 0x561   :  { %v7379_v25 = vsel %vm18411_vm9, %v7355_v62, %v7192_v11  ;;  %v7451_v26 = vsel %vm18412_vm15, %v7427_v54, %v7267_v17  ;;  %v18420_v11 = vld [vmem:[#allocation11_spill] sm:$0xff] }
 0x562   :  { %11159 = vmatpush3.bf16.msra.mxu0 %v11362_v48  ;;  %9586 = vmatpush1.bf16.msra.mxu1 %v11363_v31  ;;  %v16077_v52 = vsel %vm18415_vm12, %v7379_v25, %v7217_v3  ;;  %v18421_v31 = vld [vmem:[#allocation40_spill] sm:$0xff] }
 0x563   :  { %9587 = vmatprep.subr.bf16.mxu1 %v18138_v23  ;;  %9744 = vmatprep.subr.bf16.mxu0 %v18138_v23 }
 0x564   :  { %v7291_v58 = vpop.permute.xlu1 %7290  ;;  %5377 = vmatmul.mubr.bf16.gmra.mxu1 %v14445_v28  ;;  %7982 = vmatmul.mubr.bf16.gmra.mxu0 %v7787_v33  ;;  %v11364_v28 = vld [vmem:[%s17801_s5 + $0x78] sm:$0xff]  }
 0x565   :  { %v7475_v6 = vsel %vm18413_vm3, %v7451_v26, %v7291_v58  ;;  %v7313_v61 = vpop.permute.xlu0 %7312  ;;  %10737 = vmatprep.mubr.msk.bf16.mxu1 %vm4206_vm4, %v18337_v44  ;;  %10803 = vmatprep.mubr.msk.bf16.mxu0 %vm18418_vm11, %v7806_v12  ;;  %v11368_v12 = vld [vmem:[%s17801_s5 + $0x58] sm:$0xff]   ;;  %vm18422_vm11 = vmmov %vm18415_vm12 }
 0x566   :  { %v16080_v46 = vsel %vm18416_vm7, %v7475_v6, %v7313_v61  ;;  %9588 = vmatpush1.bf16.msra.mxu1 %v11364_v28  ;;  %vm18423_vm12 = vmmov %vm18416_vm7 }
 0x567   :  { %v7633_v30 = vcombine.low %v16077_v52, %v16080_v46  ;;  %9589 = vmatprep.subr.bf16.mxu1 %v18138_v23  ;;  %v7634_v61 = vcombine.high %v16077_v52, %v16080_v46  ;;  %v18424_v52 = vld [vmem:[#allocation33_spill] sm:$0xff]  ;;  %vm18428_vm7 = vmmov %vm18417_vm6 }
 0x568   :  { %v7144_v44 = vpop.permute.xlu1 %7143 }
 0x569   :  { %v7641_v4 = vrot.slane %v7633_v30, %v18396_v18  ;;  %v7219_v0 = vpop.permute.xlu0 %7218  ;;  %v7333_v62 = vsel %vm1902_vm14, %v18420_v11, %v7144_v44  ;;  %v7648_v46 = vrot.slane %v7634_v61, %v18396_v18 }
 0x56a   :  { %9590 = vmatpush1.bf16.msra.mxu1 %v11365_v22 }
 0x56b   :  { %v7649_v3 = vcombine.high %v7641_v4, %v7641_v4  ;;  %9591 = vmatprep.subr.bf16.mxu1 %v18138_v23 }
 0x56c   :  { %v7244_v45 = vpop.permute.xlu1 %7243  ;;  %5385 = vmatmul.mubr.bf16.gmra.mxu1 %v18341_v14  ;;  %7990 = vmatmul.mubr.bf16.gmra.mxu0 %v7805_v34 }
 0x56d   :  { %v7808_v53 = vcombine.low %v7641_v4, %v7649_v3  ;;  %v7169_v39 = vpop.permute.xlu0 %7168  ;;  %10738 = vmatprep.mubr.msk.bf16.mxu1 %vm4206_vm4, %v18342_v59  ;;  %v7429_v26 = vsel %vm2000_vm13, %v7219_v0, %v7244_v45 }
 0x56e   :  { %9592 = vmatpush1.bf16.msra.mxu1 %v11366_v56  ;;  %v7357_v54 = vsel %vm18410_vm8, %v7333_v62, %v7169_v39  ;;  %v18425_v39 = vld [vmem:[#allocation17_spill] sm:$0xff] }
 0x56f   :  { %v7822_v35 = vrot.slane %v7808_v53, %v18396_v18  ;;  %9593 = vmatprep.subr.bf16.mxu1 %v18138_v23 }
 0x570   :  { %v7269_v60 = vpop.permute.xlu1 %7268  ;;  %v4510_v16 = vpop.f32.mrf.mxu1 }
 0x571   :  { %v16106_v14 = vadd.f32 %v16006_v10, %v4510_v16  ;;  %v4739_v15 = vpop.f32.mrf.mxu0  ;;  %v7824_v21 = vcombine.high %v7815_v38, %v7822_v35  ;;  %v7823_v59 = vcombine.low %v7815_v38, %v7822_v35  ;;  %v7194_v7 = vpop.permute.xlu0 %7193  ;;  %v11370_v38 = vld [vmem:[%s17801_s5 + $0x98] sm:$0xff]  }
 0x572   :  { %v4512_v5 = vpop.f32.mrf.mxu1  ;;  %9594 = vmatpush1.bf16.msra.mxu1 %v11367_v49  ;;  %v7381_v58 = vsel %vm18411_vm9, %v7357_v54, %v7194_v7 }
 0x573   :  { %10804 = vmatprep.mubr.msk.bf16.mxu0 %vm18417_vm6, %v7824_v21  ;;  %v4741_v17 = vpop.f32.mrf.mxu0  ;;  %9595 = vmatprep.subr.bf16.mxu1 %v18138_v23  ;;  %v7405_v30 = vsel %vm18422_vm11, %v7381_v58, %v7219_v0  ;;  %v18427_v58 = vld [vmem:[#allocation34_spill] sm:$0xff]  ;;  %vm18432_vm6 = vmmov %vm18410_vm8 }
 0x574   :  { %v7293_v19 = vpop.permute.xlu1 %7292  ;;  %5393 = vmatmul.mubr.bf16.gmra.mxu1 %v18419_v40  ;;  %7998 = vmatmul.mubr.bf16.gmra.mxu0 %v7823_v59  ;;  %v4513_v10 = vpop.f32.mrf.mxu1  ;;  %v11371_v40 = vld [vmem:[%s17801_s5 + $0x90] sm:$0xff]   ;;  %vm18433_vm8 = vmmov %vm18411_vm9 }
 0x575   :  { %v16117_v33 = vadd.f32 %v16032_v9, %v4513_v10  ;;  %v4742_v48 = vpop.f32.mrf.mxu0  ;;  %10739 = vmatprep.mubr.msk.bf16.mxu1 %vm4206_vm4, %v18421_v31  ;;  %v7453_v9 = vsel %vm18412_vm15, %v7429_v26, %v7269_v60  ;;  %vm18434_vm9 = vmmov %vm18412_vm15 }
 0x576   :  { %v4515_v25 = vpop.f32.mrf.mxu1  ;;  %9596 = vmatpush1.bf16.msra.mxu1 %v11368_v12  ;;  %v7477_v28 = vsel %vm18413_vm3, %v7453_v9, %v7293_v19  ;;  %vm18435_vm15 = vmmov %vm18413_vm3 }
 0x577   :  { %v4744_v20 = vpop.f32.mrf.mxu0  ;;  %9597 = vmatprep.subr.bf16.mxu1 %v18138_v23  ;;  %v18426_v25 = vld [vmem:[#allocation32_spill] sm:$0xff]  ;;  %vm18437_vm3 = vmmov %vm18422_vm11 }
 0x578   :  { %v16129_v6 = vpop.permute.xlu1 %7145  ;;  %vm18438_vm11 = vmmov %vm18423_vm12 }
 0x579   :  { %v7315_v24 = vpop.permute.xlu0 %7314 }
 0x57a   :  { %v7500_v44 = vsel %vm18423_vm12, %v7477_v28, %v7315_v24  ;;  %9598 = vmatpush1.bf16.msra.mxu1 %v11369_v63  ;;  %vm18439_vm12 = vmmov %vm18432_vm6 }
 0x57b   :  { %v7650_v4 = vcombine.low %v7405_v30, %v7500_v44  ;;  %v7651_v34 = vcombine.high %v7405_v30, %v7500_v44  ;;  %9611 = vmatprep.subr.bf16.mxu1 %v18138_v23  ;;  %v4518_v13 = vpop.f32.mrf.mxu1  ;;  %v4747_v45 = vpop.f32.mrf.mxu0 }
 0x57c   :  { %v16140_v22 = vpop.permute.xlu1 %7245  ;;  %5401 = vmatmul.mubr.bf16.gmra.mxu1 %v18424_v52  ;;  %v16145_v3 = vadd.f32 %v4739_v15, %v4518_v13 }
 0x57d   :  { %v7658_v0 = vrot.slane %v7650_v4, %v18396_v18  ;;  %v16147_v53 = vpop.permute.xlu0 %7220  ;;  %10740 = vmatprep.mubr.msk.bf16.mxu1 %vm4206_vm4, %v18425_v39  ;;  %v4520_v56 = vpop.f32.mrf.mxu1  ;;  %v7665_v35 = vrot.slane %v7651_v34, %v18396_v18 }
 0x57e   :  { %9612 = vmatpush2.bf16.msra.mxu1 %v11370_v38  ;;  %v4749_v21 = vpop.f32.mrf.mxu0  ;;  %v18430_v56 = vld [vmem:[#allocation45_spill] sm:$0xff] }
 0x57f   :  { %v7666_v60 = vcombine.high %v7658_v0, %v7658_v0  ;;  %v7825_v16 = vcombine.low %v7648_v46, %v7658_v0  ;;  %9613 = vmatprep.subr.bf16.mxu1 %v18138_v23  ;;  %v4521_v5 = vpop.f32.mrf.mxu1  ;;  %v18429_v46 = vld [vmem:[#allocation4_spill] sm:$0xff] }
 0x580   :  { %v7271_v15 = vpop.permute.xlu1 %7270  ;;  %v16156_v49 = vadd.f32 %v4742_v48, %v4521_v5  ;;  %v4750_v7 = vpop.f32.mrf.mxu0 }
 0x581   :  { %v7826_v59 = vcombine.low %v7666_v60, %v7665_v35  ;;  %v7171_v17 = vpop.permute.xlu0 %7170  ;;  %v4523_v19 = vpop.f32.mrf.mxu1  ;;  %v7833_v10 = vrot.slane %v7825_v16, %v18396_v18  ;;  %v18431_v35 = vld [vmem:[#allocation16_spill] sm:$0xff] }
 0x582   :  { %9614 = vmatpush2.bf16.msra.mxu1 %v11371_v40  ;;  %v4752_v62 = vpop.f32.mrf.mxu0  ;;  %v7335_v60 = vsel %vm1902_vm14, %v18431_v35, %v16129_v6 }
 0x583   :  { %v7840_v11 = vrot.slane %v7826_v59, %v18396_v18  ;;  %9905 = vmatprep.subr.bf16.mxu1 %v18138_v23  ;;  %v4526_v54 = vpop.f32.mrf.mxu1  ;;  %v7359_v21 = vsel %vm18432_vm6, %v7335_v60, %v7171_v17  ;;  %vm18441_vm6 = vmmov %vm18434_vm9 }
 0x584   :  { %v7196_v31 = vpop.permute.xlu1 %7195  ;;  %5409 = vmatmul.mubr.bf16.gmra.mxu1 %v18426_v25  ;;  %v16165_v48 = vadd.f32 %v4747_v45, %v4526_v54  ;;  %v4755_v12 = vpop.f32.mrf.mxu0 }
 0x585   :  { %v7148_v26 = vpop.permute.xlu0 %7147  ;;  %10741 = vmatprep.mubr.msk.bf16.mxu1 %vm4206_vm4, %v18427_v58  ;;  %v7842_v20 = vcombine.high %v7833_v10, %v7840_v11  ;;  %v7841_v9 = vcombine.low %v7833_v10, %v7840_v11  ;;  %v4528_v61 = vpop.f32.mrf.mxu1  ;;  %v7383_v62 = vsel %vm18433_vm8, %v7359_v21, %v7196_v31 }
 0x586   :  { %v4757_v28 = vpop.f32.mrf.mxu0  ;;  %v7407_v31 = vsel %vm18437_vm3, %v7383_v62, %v16147_v53  ;;  %v18446_v62 = vld [vmem:[#allocation2_spill] sm:$0xff] }
 0x587   :  { %10805 = vmatprep.mubr.msk.bf16.mxu0 %vm18428_vm7, %v7842_v20  ;;  %v4529_v24 = vpop.f32.mrf.mxu1  ;;  %vm18440_vm7 = vmmov %vm18433_vm8 }
 0x588   :  { %8006 = vmatmul.mubr.bf16.gmra.mxu0 %v7841_v9  ;;  %v16170_v30 = vadd.f32 %v4750_v7, %v4529_v24  ;;  %v4758_v44 = vpop.f32.mrf.mxu0  ;;  %v7248_v4 = vpop.permute.xlu1 %7247  ;;  %v7431_v7 = vsel %vm2000_vm13, %v16147_v53, %v16140_v22  ;;  %v18436_v22 = vld [vmem:[#allocation23_spill] sm:$0xff]  ;;  %vm18442_vm8 = vmmov %vm18435_vm15 }
 0x589   :  { %v7223_v63 = vpop.permute.xlu0 %7222  ;;  %v4531_v34 = vpop.f32.mrf.mxu1  ;;  %v7455_v25 = vsel %vm18434_vm9, %v7431_v7, %v7271_v15  ;;  %v7337_v9 = vsel %vm1902_vm14, %v18436_v22, %v7148_v26  ;;  %vm18443_vm9 = vmmov %vm18437_vm3  ;;  %v18445_v7 = vld [vmem:[#allocation44_spill] sm:$0xff]  ;;  %vm18450_vm3 = vcmask 941056  }
 0x58a   :  { %v4760_v13 = vpop.f32.mrf.mxu0  ;;  %v7433_v34 = vsel %vm2000_vm13, %v7223_v63, %v7248_v4 }
 0x58b   :  { %v4534_v52 = vpop.f32.mrf.mxu1 }
 0x58c   :  { %5417 = vmatmul.mubr.bf16.gmra.mxu1 %v18429_v46  ;;  %v16173_v0 = vadd.f32 %v4755_v12, %v4534_v52  ;;  %v4763_v45 = vpop.f32.mrf.mxu0  ;;  %v7173_v5 = vpop.permute.xlu1 %7172 }
 0x58d   :  { %v7295_v39 = vpop.permute.xlu0 %7294  ;;  %10742 = vmatprep.mubr.msk.bf16.mxu1 %vm4206_vm4, %v18430_v56  ;;  %v4536_v38 = vpop.f32.mrf.mxu1 }
 0x58e   :  { %v4765_v16 = vpop.f32.mrf.mxu0  ;;  %v7479_v17 = vsel %vm18435_vm15, %v7455_v25, %v7295_v39  ;;  %vm18444_vm15 = vmmov %vm18438_vm11 }
 0x58f   :  { %v4537_v59 = vpop.f32.mrf.mxu1 }
 0x590   :  { %v16184_v19 = vadd.f32 %v4758_v44, %v4537_v59  ;;  %v4766_v40 = vpop.f32.mrf.mxu0 }
 0x591   :  { %v7273_v10 = vpop.permute.xlu0 %7272  ;;  %v4539_v11 = vpop.f32.mrf.mxu1 }
 0x592   :  { %v4768_v54 = vpop.f32.mrf.mxu0 }
 0x593   :  { %v4542_v6 = vpop.f32.mrf.mxu1 }
 0x594   :  { %5425 = vmatmul.mubr.bf16.gmra.mxu1 %v18363_v41  ;;  %v16190_v12 = vadd.f32 %v4763_v45, %v4542_v6  ;;  %v5117_v58 = vpop.f32.mrf.mxu0  ;;  %v7317_v20 = vpop.permute.xlu1 %7316  ;;  %v7361_v41 = vsel %vm18439_vm12, %v7337_v9, %v7173_v5 }
 0x595   :  { %10743 = vmatprep.mubr.msk.bf16.mxu1 %vm4206_vm4, %v18364_v32  ;;  %v7502_v15 = vsel %vm18438_vm11, %v7479_v17, %v7317_v20  ;;  %v7198_v61 = vpop.permute.xlu0 %7197  ;;  %v4544_v28 = vpop.f32.mrf.mxu1  ;;  %v7457_v32 = vsel %vm18441_vm6, %v7433_v34, %v7273_v10  ;;  %vm18451_vm11 = vmmov %vm18439_vm12 }
 0x596   :  { %v7667_v24 = vcombine.low %v7407_v31, %v7502_v15  ;;  %v5119_v44 = vpop.f32.mrf.mxu0  ;;  %v7385_v13 = vsel %vm18440_vm7, %v7361_v41, %v7198_v61  ;;  %v7668_v39 = vcombine.high %v7407_v31, %v7502_v15  ;;  %vm18452_vm12 = vmmov %vm18440_vm7 }
 0x597   :  { %v4545_v52 = vpop.f32.mrf.mxu1  ;;  %v16210_v4 = vsel %vm18443_vm9, %v7385_v13, %v7223_v63  ;;  %vm18453_vm7 = vmmov %vm18441_vm6 }
 0x598   :  { %v7675_v26 = vrot.slane %v7667_v24, %v18396_v18  ;;  %v16204_v46 = vadd.f32 %v4766_v40, %v4545_v52  ;;  %v5120_v53 = vpop.f32.mrf.mxu0  ;;  %v7297_v45 = vpop.permute.xlu1 %7296  ;;  %v7682_v63 = vrot.slane %v7668_v39, %v18396_v18  ;;  %vm18455_vm6 = vmmov %vm18442_vm8 }
 0x599   :  { %v7481_v56 = vsel %vm18442_vm8, %v7457_v32, %v7297_v45  ;;  %v16207_v38 = vpop.permute.xlu0 %7318  ;;  %v4547_v35 = vpop.f32.mrf.mxu1  ;;  %v18448_v45 = vld [vmem:[#allocation46_spill] sm:$0xff]  ;;  %vm18456_vm8 = vmmov %vm18443_vm9 }
 0x59a   :  { %v7683_v60 = vcombine.high %v7675_v26, %v7675_v26  ;;  %v16214_v16 = vsel %vm18444_vm15, %v7481_v56, %v16207_v38  ;;  %v5122_v21 = vpop.f32.mrf.mxu0  ;;  %vm18457_vm9 = vmmov %vm18444_vm15 }
 0x59b   :  { %v7684_v5 = vcombine.low %v16210_v4, %v16214_v16  ;;  %v4864_v59 = vpop.f32.mrf.mxu1  ;;  %vm18460_vm15 = vmmov %vm18453_vm7 }
 0x59c   :  { %5433 = vmatmul.mubr.bf16.gmra.mxu1 %v15264_v8  ;;  %v4991_v40 = vadd.f32 %v4864_v59, %v18445_v7  ;;  %v5125_v10 = vpop.f32.mrf.mxu0  ;;  %v7150_v11 = vpop.permute.xlu1 %7149  ;;  %v7843_v54 = vcombine.low %v7675_v26, %v7683_v60  ;;  %v18447_v8 = vld [vmem:[#allocation47_spill] sm:$0xff] }
 0x59d   :  { %10744 = vmatprep.mubr.msk.bf16.mxu1 %vm4206_vm4, %v18446_v62  ;;  %v7692_v25 = vrot.slane %v7684_v5, %v18396_v18  ;;  %v7225_v6 = vpop.permute.xlu0 %7224  ;;  %v4866_v17 = vpop.f32.mrf.mxu1  ;;  %v18449_v60 = vld [vmem:[#allocation35_spill] sm:$0xff] }
 0x59e   :  { %v5127_v20 = vpop.f32.mrf.mxu0  ;;  %v16224_v22 = vadd.f32 %v5117_v58, %v4991_v40  ;;  %v7851_v41 = vrot.slane %v7843_v54, %v18396_v18  ;;  %v7339_v21 = vsel %vm1902_vm14, %v18449_v60, %v7150_v11  ;;  %v18454_v54 = vld [vmem:[#allocation10_spill] sm:$0xff] }
 0x59f   :  { %v7844_v9 = vcombine.low %v7682_v63, %v7692_v25  ;;  %v4867_v31 = vpop.f32.mrf.mxu1 }
 0x5a0   :  { %v4992_v15 = vadd.f32 %v4867_v31, %v18447_v8  ;;  %v5128_v61 = vpop.f32.mrf.mxu0  ;;  %v7250_v28 = vpop.permute.xlu1 %7249 }
 0x5a1   :  { %v7175_v24 = vpop.permute.xlu0 %7174  ;;  %v4869_v44 = vpop.f32.mrf.mxu1  ;;  %v7858_v34 = vrot.slane %v7844_v9, %v18396_v18  ;;  %v7435_v40 = vsel %vm2000_vm13, %v7225_v6, %v7250_v28  ;;  %v7685_v9 = vcombine.high %v16210_v4, %v16214_v16 }
 0x5a2   :  { %v5130_v13 = vpop.f32.mrf.mxu0  ;;  %v16229_v52 = vadd.f32 %v5120_v53, %v4992_v15  ;;  %v7363_v59 = vsel %vm18451_vm11, %v7339_v21, %v7175_v24  ;;  %v7700_v44 = vcombine.high %v7692_v25, %v7692_v25 }
 0x5a3   :  { %v4872_v32 = vpop.f32.mrf.mxu1  ;;  %v7860_v58 = vcombine.high %v7851_v41, %v7858_v34  ;;  %v7859_v26 = vcombine.low %v7851_v41, %v7858_v34 }
 0x5a4   :  { %5441 = vmatmul.mubr.bf16.gmra.mxu1 %v15311_v50  ;;  %v4993_v39 = vadd.f32 %v4872_v32, %v18448_v45  ;;  %v5133_v56 = vpop.f32.mrf.mxu0  ;;  %v7275_v35 = vpop.permute.xlu1 %7274  ;;  %v18458_v32 = vld [vmem:[#allocation28_spill] sm:$0xff] }
 0x5a5   :  { %10745 = vmatprep.mubr.msk.bf16.mxu1 %vm4206_vm4, %v15320_v57  ;;  %v7200_v5 = vpop.permute.xlu0 %7199  ;;  %10806 = vmatprep.mubr.msk.bf16.mxu0 %vm18450_vm3, %v7860_v58  ;;  %v4874_v53 = vpop.f32.mrf.mxu1  ;;  %v7459_v57 = vsel %vm18453_vm7, %v7435_v40, %v7275_v35  ;;  %vm18462_vm3 = vmmov %vm18455_vm6  ;;  %vm18468_vm7 = vcmask 941056  }
 0x5a6   :  { %v5135_v7 = vpop.f32.mrf.mxu0  ;;  %8014 = vmatmul.mubr.bf16.gmra.mxu0 %v7859_v26  ;;  %v16239_v50 = vadd.f32 %v5125_v10, %v4993_v39  ;;  %v7387_v62 = vsel %vm18452_vm12, %v7363_v59, %v7200_v5 }
 0x5a7   :  { %v4875_v63 = vpop.f32.mrf.mxu1  ;;  %v7411_v10 = vsel %vm18456_vm8, %v7387_v62, %v7225_v6  ;;  %v7699_v6 = vrot.slane %v7685_v9, %v18396_v18  ;;  %v18461_v9 = vld [vmem:[#allocation50_spill] sm:$0xff] }
 0x5a8   :  { %v4994_v17 = vadd.f32 %v4875_v63, %v18454_v54  ;;  %v5136_v11 = vpop.f32.mrf.mxu0  ;;  %v7299_v20 = vpop.permute.xlu1 %7298 }
 0x5a9   :  { %v7483_v31 = vsel %vm18455_vm6, %v7459_v57, %v7299_v20  ;;  %v7152_v8 = vpop.permute.xlu0 %7151  ;;  %v4877_v15 = vpop.f32.mrf.mxu1  ;;  %v7861_v25 = vcombine.low %v7700_v44, %v7699_v6  ;;  %vm18472_vm6 = vmmov %vm18468_vm7 }
 0x5aa   :  { %v7505_v28 = vsel %vm18457_vm9, %v7483_v31, %v16207_v38  ;;  %v5138_v41 = vpop.f32.mrf.mxu0  ;;  %v16251_v24 = vadd.f32 %v5128_v61, %v4994_v17 }
 0x5ab   :  { %v7701_v34 = vcombine.low %v7411_v10, %v7505_v28  ;;  %v4880_v13 = vpop.f32.mrf.mxu1  ;;  %v7869_v41 = vrot.slane %v7861_v25, %v18396_v18 }
 0x5ac   :  { %5449 = vmatmul.mubr.bf16.gmra.mxu1 %v15352_v42  ;;  %v4995_v58 = vadd.f32 %v4880_v13, %v18458_v32  ;;  %v5141_v4 = vpop.f32.mrf.mxu0  ;;  %v7227_v16 = vpop.permute.xlu1 %7226  ;;  %v18459_v42 = vld [vmem:[#allocation48_spill] sm:$0xff]  ;;  %v18464_v13 = vld [vmem:[#allocation51_spill] sm:$0xff] }
 0x5ad   :  { %10746 = vmatprep.mubr.msk.bf16.mxu1 %vm4206_vm4, %v15357_v51  ;;  %v7709_v26 = vrot.slane %v7701_v34, %v18396_v18  ;;  %v7252_v45 = vpop.permute.xlu0 %7251  ;;  %v4882_v39 = vpop.f32.mrf.mxu1 }
 0x5ae   :  { %v5143_v61 = vpop.f32.mrf.mxu0  ;;  %v16259_v35 = vadd.f32 %v5133_v56, %v4995_v58  ;;  %v7437_v40 = vsel %vm2000_vm13, %v7227_v16, %v7252_v45  ;;  %v7341_v56 = vsel %vm1902_vm14, %v18461_v9, %v7152_v8  ;;  %vm18463_vm13 = vmmov %vm18451_vm11  ;;  %v18470_v9 = vld [vmem:[#allocation52_spill] sm:$0xff] }
 0x5af   :  { %v7717_v60 = vcombine.high %v7709_v26, %v7709_v26  ;;  %v4883_v21 = vpop.f32.mrf.mxu1  ;;  %vm18465_vm14 = vmmov %vm18452_vm12 }
 0x5b0   :  { %v4996_v5 = vadd.f32 %v4883_v21, %v18459_v42  ;;  %v5144_v53 = vpop.f32.mrf.mxu0  ;;  %v7177_v59 = vpop.permute.xlu1 %7176  ;;  %vm18466_vm11 = vmmov %vm18456_vm8  ;;  %vm18474_vm8 = vmmov 0  }
 0x5b1   :  { %v7862_v7 = vcombine.low %v7709_v26, %v7717_v60  ;;  %v7277_v62 = vpop.permute.xlu0 %7276  ;;  %v4885_v63 = vpop.f32.mrf.mxu1  ;;  %v7365_v34 = vsel %vm18463_vm13, %v7341_v56, %v7177_v59  ;;  %vm18467_vm12 = vmmov %vm18457_vm9  ;;  %v18469_v59 = vld [vmem:[#allocation25_spill] sm:$0xff]  ;;  %vm18489_vm9 = vcmask 1041408   ;;  %vm18492_vm13 = vsmask.f32 6400 }
 0x5b2   :  { %v7461_v57 = vsel %vm18460_vm15, %v7437_v40, %v7277_v62  ;;  %v5146_v54 = vpop.f32.mrf.mxu0  ;;  %v16264_v17 = vadd.f32 %v5136_v11, %v4996_v5  ;;  %v7702_v11 = vcombine.high %v7411_v10, %v7505_v28  ;;  %vm18490_vm15 = vmmov %vm18489_vm9 }
 0x5b3   :  { %v7484_v31 = vsel %vm18462_vm3, %v7461_v57, %v7299_v20  ;;  %v4888_v15 = vpop.f32.mrf.mxu1  ;;  %v7876_v44 = vrot.slane %v7862_v7, %v18396_v18  ;;  %vm18491_vm3 = vmmov %vm18489_vm9 }
 0x5b4   :  { %5457 = vmatmul.mubr.bf16.gmra.mxu1 %v15388_v37  ;;  %v4997_v32 = vadd.f32 %v4888_v15, %v18464_v13  ;;  %v5149_v58 = vpop.f32.mrf.mxu0  ;;  %v7202_v6 = vpop.permute.xlu1 %7201  ;;  %v7506_v61 = vsel %vm18467_vm12, %v7484_v31, %v16207_v38  ;;  %v7716_v7 = vrot.slane %v7702_v11, %v18396_v18  ;;  %vm18495_vm12 = vmmov %vm18492_vm13 }
 0x5b5   :  { %10747 = vmatprep.mubr.msk.bf16.mxu1 %vm4206_vm4, %v15357_v51  ;;  %v7389_v8 = vsel %vm18465_vm14, %v7365_v34, %v7202_v6  ;;  %v4890_v20 = vpop.f32.mrf.mxu1  ;;  %v7878_v26 = vcombine.high %v7869_v41, %v7876_v44  ;;  %v7877_v45 = vcombine.low %v7869_v41, %v7876_v44  ;;  %v18471_v6 = vld [vmem:[#allocation53_spill] sm:$0xff]  ;;  %vm18493_vm14 = vmmov %vm18491_vm3 }
 0x5b6   :  { %v7413_v39 = vsel %vm18466_vm11, %v7389_v8, %v7227_v16  ;;  %v5151_v25 = vpop.f32.mrf.mxu0  ;;  %v16280_v60 = vadd.f32 %v5141_v4, %v4997_v32  ;;  %vm18494_vm11 = vmmov %vm18491_vm3 }
 0x5b7   :  { %v7718_v21 = vcombine.low %v7413_v39, %v7506_v61  ;;  %v7719_v42 = vcombine.high %v7413_v39, %v7506_v61  ;;  %10807 = vmatprep.mubr.msk.bf16.mxu0 %vm18468_vm7, %v7878_v26  ;;  %v4891_v5 = vpop.f32.mrf.mxu1  ;;  %vm18496_vm7 = vmmov %vm18495_vm12 }
 0x5b8   :  { %v4998_v10 = vadd.f32 %v4891_v5, %v18469_v59  ;;  %v5152_v28 = vpop.f32.mrf.mxu0  ;;  %8022 = vmatmul.mubr.bf16.gmra.mxu0 %v7877_v45 }
 0x5b9   :  { %v7726_v40 = vrot.slane %v7718_v21, %v18396_v18  ;;  %v4893_v16 = vpop.f32.mrf.mxu1  ;;  %v7733_v38 = vrot.slane %v7719_v42, %v18396_v18 }
 0x5ba   :  { %v5154_v62 = vpop.f32.mrf.mxu0  ;;  %v16286_v63 = vadd.f32 %v5144_v53, %v4998_v10 }
 0x5bb   :  { %v7734_v4 = vcombine.high %v7726_v40, %v7726_v40  ;;  %v7879_v57 = vcombine.low %v7716_v7, %v7726_v40  ;;  %v18475_v7 = vld [vmem:[#allocation60_spill] sm:$0xff] }
 0x5bc   :  { %v4896_v54 = vpop.f32.mrf.mxu1  ;;  %5465 = vmatmul.mubr.bf16.gmra.mxu1 %v15388_v37  ;;  %v5157_v31 = vpop.f32.mrf.mxu0 }
 0x5bd   :  { %v4999_v56 = vadd.f32 %v4896_v54, %v18470_v9  ;;  %10748 = vmatprep.mubr.msk.bf16.mxu1 %vm4206_vm4, %v15357_v51  ;;  %v7880_v15 = vcombine.low %v7734_v4, %v7733_v38  ;;  %v7887_v13 = vrot.slane %v7879_v57, %v18396_v18  ;;  %v18476_v54 = vld [vmem:[#allocation62_spill] sm:$0xff] }
 0x5be   :  { %v4898_v41 = vpop.f32.mrf.mxu1  ;;  %v5159_v44 = vpop.f32.mrf.mxu0 }
 0x5bf   :  { %v16293_v34 = vadd.f32 %v5149_v58, %v4999_v56  ;;  %v7894_v32 = vrot.slane %v7880_v15, %v18396_v18  ;;  %v18473_v58 = vld [vmem:[#allocation49_spill] sm:$0xff] }
 0x5c0   :  { %v4899_v53 = vpop.f32.mrf.mxu1  ;;  %v5160_v8 = vpop.f32.mrf.mxu0 }
 0x5c1   :  { %v5000_v11 = vadd.f32 %v4899_v53, %v18471_v6  ;;  %v7896_v26 = vcombine.high %v7887_v13, %v7894_v32  ;;  %v7895_v45 = vcombine.low %v7887_v13, %v7894_v32  ;;  %v18477_v53 = vld [vmem:[#allocation64_spill] sm:$0xff] }
 0x5c2   :  { %v4901_v20 = vpop.f32.mrf.mxu1  ;;  %v5162_v39 = vpop.f32.mrf.mxu0 }
 0x5c3   :  { %v16298_v61 = vadd.f32 %v5152_v28, %v5000_v11  ;;  %10808 = vmatprep.mubr.msk.bf16.mxu0 %vm18472_vm6, %v7896_v26  ;;  %v18478_v11 = vld [vmem:[#allocation36_spill] sm:$0xff]  ;;  %vm18497_vm6 = vmmov %vm18496_vm7 }
 0x5c4   :  { %v4904_v25 = vpop.f32.mrf.mxu1  ;;  %5473 = vmatmul.mubr.bf16.gmra.mxu1 %v15388_v37  ;;  %v5165_v42 = vpop.f32.mrf.mxu0  ;;  %8030 = vmatmul.mubr.bf16.gmra.mxu0 %v7895_v45 }
 0x5c5   :  { %v5001_v21 = vadd.f32 %v4904_v25, %v18473_v58  ;;  %10749 = vmatprep.mubr.msk.bf16.mxu1 %vm4206_vm4, %v15357_v51  ;;  %11160 = vmatprep.mubr.msk.bf16.mxu0 %vm18474_vm8, %v18351_v2 }
 0x5c6   :  { %v4906_v5 = vpop.f32.mrf.mxu1  ;;  %v5167_v59 = vpop.f32.mrf.mxu0 }
 0x5c7   :  { %v16307_v10 = vadd.f32 %v5157_v31, %v5001_v21  ;;  %v18480_v21 = vld [vmem:[#allocation55_spill] sm:$0xff] }
 0x5c8   :  { %v4907_v28 = vpop.f32.mrf.mxu1  ;;  %v5168_v16 = vpop.f32.mrf.mxu0 }
 0x5c9   :  { %v5002_v40 = vadd.f32 %v4907_v28, %v18475_v7 }
 0x5ca   :  { %v4909_v62 = vpop.f32.mrf.mxu1  ;;  %v5170_v38 = vpop.f32.mrf.mxu0 }
 0x5cb   :  { %v16310_v4 = vadd.f32 %v5160_v8, %v5002_v40  ;;  %v18479_v8 = vld [vmem:[#allocation54_spill] sm:$0xff] }
 0x5cc   :  { %v4912_v57 = vpop.f32.mrf.mxu1  ;;  %5481 = vmatmul.mubr.bf16.gmra.mxu1 %v15388_v37  ;;  %v5173_v56 = vpop.f32.mrf.mxu0  ;;  %v4700_v20 = vadd.f32 %v18479_v8, %v18478_v11 }
 0x5cd   :  { %v5003_v9 = vadd.f32 %v4912_v57, %v18476_v54  ;;  %10750 = vmatprep.mubr.msk.bf16.mxu1 %vm4206_vm4, %v15357_v51 }
 0x5ce   :  { %v4914_v15 = vpop.f32.mrf.mxu1  ;;  %v5175_v31 = vpop.f32.mrf.mxu0 }
 0x5cf   :  { %v16316_v41 = vadd.f32 %v5165_v42, %v5003_v9  ;;  %v4703_v42 = vadd.f32 %v18480_v21, %v15842_v36 }
 0x5d0   :  { %v4915_v44 = vpop.f32.mrf.mxu1  ;;  %v5176_v32 = vpop.f32.mrf.mxu0 }
 0x5d1   :  { %v5004_v13 = vadd.f32 %v4915_v44, %v18477_v53 }
 0x5d2   :  { %v4917_v6 = vpop.f32.mrf.mxu1  ;;  %v5178_v26 = vpop.f32.mrf.mxu0 }
 0x5d3   :  { %v16321_v45 = vadd.f32 %v5168_v16, %v5004_v13 }
 0x5d4   :  { %v4920_v39 = vpop.f32.mrf.mxu1  ;;  %5489 = vmatmul.mubr.bf16.gmra.mxu1 %v15388_v37  ;;  %v5181_v51 = vpop.f32.mrf.mxu0 }
 0x5d5   :  { %v5005_v25 = vadd.f32 %v4920_v39, %v4700_v20 }
 0x5d6   :  { %v4922_v58 = vpop.f32.mrf.mxu1  ;;  %v5183_v5 = vpop.f32.mrf.mxu0 }
 0x5d7   :  { %v16326_v59 = vadd.f32 %v5173_v56, %v5005_v25 }
 0x5d8   :  { %v4923_v28 = vpop.f32.mrf.mxu1  ;;  %v5184_v40 = vpop.f32.mrf.mxu0 }
 0x5d9   :  { %v5006_v7 = vadd.f32 %v4923_v28, %v4703_v42 }
 0x5da   :  { %v4925_v62 = vpop.f32.mrf.mxu1  ;;  %v5186_v38 = vpop.f32.mrf.mxu0 }
 0x5db   :  { %v16328_v57 = vadd.f32 %v5176_v32, %v5006_v7 }
 0x5dc   :  { %v4928_v16 = vpop.f32.mrf.mxu1  ;;  %v5189_v37 = vpop.f32.mrf.mxu0 }
 0x5dd   :  { %v5007_v54 = vadd.f32 %v4928_v16, %v15932_v1 }
 0x5de   :  { %v4930_v9 = vpop.f32.mrf.mxu1  ;;  %v5191_v15 = vpop.f32.mrf.mxu0 }
 0x5df   :  { %v16331_v31 = vadd.f32 %v5181_v51, %v5007_v54 }
 0x5e0   :  { %v4931_v44 = vpop.f32.mrf.mxu1  ;;  %v5192_v56 = vpop.f32.mrf.mxu0 }
 0x5e1   :  { %v5008_v36 = vadd.f32 %v4931_v44, %v15948_v55 }
 0x5e2   :  { %v4933_v53 = vpop.f32.mrf.mxu1  ;;  %v5194_v13 = vpop.f32.mrf.mxu0 }
 0x5e3   :  { %v16334_v6 = vadd.f32 %v5184_v40, %v5008_v36 }
 0x5e4   :  { %v4936_v11 = vpop.f32.mrf.mxu1  ;;  %v5197_v8 = vpop.f32.mrf.mxu0 }
 0x5e5   :  { %v5009_v32 = vadd.f32 %v4936_v11, %v15961_v27 }
 0x5e6   :  { %v4938_v20 = vpop.f32.mrf.mxu1  ;;  %v5199_v26 = vpop.f32.mrf.mxu0 }
 0x5e7   :  { %v16337_v1 = vadd.f32 %v5189_v37, %v5009_v32 }
 0x5e8   :  { %v4939_v39 = vpop.f32.mrf.mxu1  ;;  %v5200_v51 = vpop.f32.mrf.mxu0 }
 0x5e9   :  { %v5010_v25 = vadd.f32 %v4939_v39, %v15989_v43 }
 0x5ea   :  { %v4941_v58 = vpop.f32.mrf.mxu1  ;;  %v5202_v21 = vpop.f32.mrf.mxu0 }
 0x5eb   :  { %v16340_v55 = vadd.f32 %v5192_v56, %v5010_v25 }
 0x5ec   :  { %v4944_v42 = vpop.f32.mrf.mxu1  ;;  %v5205_v28 = vpop.f32.mrf.mxu0 }
 0x5ed   :  { %v5011_v5 = vadd.f32 %v4944_v42, %v16004_v29 }
 0x5ee   :  { %v4946_v7 = vpop.f32.mrf.mxu1  ;;  %v5207_v40 = vpop.f32.mrf.mxu0 }
 0x5ef   :  { %v16343_v27 = vadd.f32 %v5197_v8, %v5011_v5 }
 0x5f0   :  { %v4947_v62 = vpop.f32.mrf.mxu1  ;;  %v5208_v16 = vpop.f32.mrf.mxu0 }
 0x5f1   :  { %v5012_v38 = vadd.f32 %v4947_v62, %v16030_v47 }
 0x5f2   :  { %v4949_v54 = vpop.f32.mrf.mxu1  ;;  %v5210_v37 = vpop.f32.mrf.mxu0 }
 0x5f3   :  { %v16346_v43 = vadd.f32 %v5200_v51, %v5012_v38 }
 0x5f4   :  { %v4952_v9 = vpop.f32.mrf.mxu1  ;;  %v5213_v44 = vpop.f32.mrf.mxu0 }
 0x5f5   :  { %v5013_v15 = vadd.f32 %v4952_v9, %v16106_v14 }
 0x5f6   :  { %v4954_v36 = vpop.f32.mrf.mxu1  ;;  %v5215_v56 = vpop.f32.mrf.mxu0 }
 0x5f7   :  { %v16349_v29 = vadd.f32 %v5205_v28, %v5013_v15 }
 0x5f8   :  { %v4955_v53 = vpop.f32.mrf.mxu1  ;;  %v5216_v11 = vpop.f32.mrf.mxu0 }
 0x5f9   :  { %v5014_v13 = vadd.f32 %v4955_v53, %v16117_v33 }
 0x5fa   :  { %v4957_v32 = vpop.f32.mrf.mxu1  ;;  %v5218_v8 = vpop.f32.mrf.mxu0 }
 0x5fb   :  { %v16352_v47 = vadd.f32 %v5208_v16, %v5014_v13 }
 0x5fc   :  { %v4960_v20 = vpop.f32.mrf.mxu1  ;;  %v5221_v39 = vpop.f32.mrf.mxu0 }
 0x5fd   :  { %v5015_v26 = vadd.f32 %v4960_v20, %v16145_v3 }
 0x5fe   :  { %v4962_v25 = vpop.f32.mrf.mxu1  ;;  %v5223_v51 = vpop.f32.mrf.mxu0 }
 0x5ff   :  { %v16355_v14 = vadd.f32 %v5213_v44, %v5015_v26 }
 0x600   :  { %v4963_v58 = vpop.f32.mrf.mxu1  ;;  %v5224_v42 = vpop.f32.mrf.mxu0 }
 0x601   :  { %v5016_v21 = vadd.f32 %v4963_v58, %v16156_v49 }
 0x602   :  { %v4965_v5 = vpop.f32.mrf.mxu1  ;;  %v5226_v28 = vpop.f32.mrf.mxu0 }
 0x603   :  { %v16358_v33 = vadd.f32 %v5216_v11, %v5016_v21 }
 0x604   :  { %v4968_v7 = vpop.f32.mrf.mxu1  ;;  %v5229_v62 = vpop.f32.mrf.mxu0 }
 0x605   :  { %v5017_v40 = vadd.f32 %v4968_v7, %v16165_v48 }
 0x606   :  { %v4970_v38 = vpop.f32.mrf.mxu1  ;;  %v5231_v16 = vpop.f32.mrf.mxu0 }
 0x607   :  { %v16361_v3 = vadd.f32 %v5221_v39, %v5017_v40 }
 0x608   :  { %v4971_v54 = vpop.f32.mrf.mxu1  ;;  %v5232_v9 = vpop.f32.mrf.mxu0 }
 0x609   :  { %v5018_v37 = vadd.f32 %v4971_v54, %v16170_v30 }
 0x60a   :  { %v4973_v15 = vpop.f32.mrf.mxu1  ;;  %v5234_v44 = vpop.f32.mrf.mxu0 }
 0x60b   :  { %v16364_v49 = vadd.f32 %v5224_v42, %v5018_v37 }
 0x60c   :  { %v4976_v36 = vpop.f32.mrf.mxu1  ;;  %v5237_v53 = vpop.f32.mrf.mxu0 }
 0x60d   :  { %v5019_v56 = vadd.f32 %v4976_v36, %v16173_v0 }
 0x60e   :  { %v4978_v13 = vpop.f32.mrf.mxu1  ;;  %v5239_v11 = vpop.f32.mrf.mxu0 }
 0x60f   :  { %v16367_v48 = vadd.f32 %v5229_v62, %v5019_v56  ;;  %v18481_v62 = vld [vmem:[#allocation19_spill] sm:$0xff] }
 0x610   :  { %v4979_v32 = vpop.f32.mrf.mxu1  ;;  %v5240_v20 = vpop.f32.mrf.mxu0 }
 0x611   :  { %v5020_v8 = vadd.f32 %v4979_v32, %v16184_v19 }
 0x612   :  { %v4981_v26 = vpop.f32.mrf.mxu1  ;;  %v5242_v39 = vpop.f32.mrf.mxu0 }
 0x613   :  { %v16370_v30 = vadd.f32 %v5232_v9, %v5020_v8 }
 0x614   :  { %v4984_v25 = vpop.f32.mrf.mxu1  ;;  %v11041_v58 = vpop.f32.mrf.mxu0 }
 0x615   :  { %v5021_v51 = vadd.f32 %v4984_v25, %v16190_v12  ;;  %v16382_v12 = vld [vmem:[%s17803_s6] ss:$0 sm:$0xff] }
 0x616   :  { %v4986_v21 = vpop.f32.mrf.mxu1  ;;  %v11042_v42 = vpop.f32.mrf.mxu0 }
 0x617   :  { %v16373_v0 = vadd.f32 %v5237_v53, %v5021_v51  ;;  %v11043_v5 = vadd.f32 %v11042_v42, %v11041_v58  ;;  %v18482_v53 = vld [vmem:[#allocation20_spill] sm:$0xff]  ;;  %v18483_v42 = vld [vmem:[#allocation21_spill] sm:$0xff] }
 0x618   :  { %v4987_v28 = vpop.f32.mrf.mxu1  ;;  %v11044_v40 = vpop.f32.mrf.mxu0 }
 0x619   :  { %v5022_v7 = vadd.f32 %v4987_v28, %v16204_v46  ;;  %v7968_v19 = vadd.f32 %v11043_v5, %v18481_v62 }
 0x61a   :  { %v4989_v38 = vpop.f32.mrf.mxu1  ;;  %v11045_v16 = vpop.f32.mrf.mxu0 }
 0x61b   :  { %v16377_v54 = vadd.f32 %v5240_v20, %v5022_v7  ;;  %v8056_v37 = vcombine.high %v7968_v19, %v7968_v19  ;;  %v11046_v9 = vadd.f32 %v11045_v16, %v11044_v40  ;;  %v8092_v56 = vmax.f32 %v7968_v19, 0.0 }
 0x61c   :  { %v5370_v15 = vpop.f32.mrf.mxu1  ;;  %v11047_v36 = vpop.f32.mrf.mxu0 }
 0x61d   :  { %v5497_v44 = vadd.f32 %v5370_v15, %v16224_v22  ;;  %v8093_v46 = vmax.f32 %v8056_v37, 0.0  ;;  %v7971_v13 = vadd.f32 %v11046_v9, %v18482_v53 }
 0x61e   :  { %v5372_v11 = vpop.f32.mrf.mxu1  ;;  %v11048_v8 = vpop.f32.mrf.mxu0 }
 0x61f   :  { %v5535_v32 = vadd.f32 %v16382_v12, %v5497_v44  ;;  %v8152_v20 = vcombine.low %v8092_v56, %v8093_v46  ;;  %v8057_v26 = vcombine.high %v7971_v13, %v7971_v13  ;;  %v8094_v39 = vmax.f32 %v7971_v13, 0.0 }
 0x620   :  { %v11049_v25 = vadd.f32 %v11048_v8, %v11047_v36  ;;  %v5373_v51 = vpop.f32.mrf.mxu1  ;;  %v11050_v58 = vpop.f32.mrf.mxu0 }
 0x621   :  { %5567 = vst.msk [vmem:[%s17804_s7] sm:$0xff] %vm1438_vm5, %v5535_v32  ;;  %v5498_v22 = vadd.f32 %v5373_v51, %v16229_v52  ;;  %v8176_v21 = vpack.c.bf16 %v8094_v39, %v8152_v20  ;;  %v8095_v19 = vmax.f32 %v8057_v26, 0.0  ;;  %v10809_v36 = vpack.c.bf16 %v8094_v39, %v8094_v39 }
 0x622   :  { %v7976_v5 = vadd.f32 %v11049_v25, %v18483_v42  ;;  %v5375_v28 = vpop.f32.mrf.mxu1  ;;  %v11051_v40 = vpop.f32.mrf.mxu0 }
 0x623   :  { %v5536_v7 = vadd.f32 %v16382_v12, %v5498_v22  ;;  %v8207_v38 = vrot.slane %v8176_v21, %v18396_v18  ;;  %v11052_v52 = vadd.f32 %v11051_v40, %v11050_v58  ;;  %v8214_v58 = vrot.slane %v10809_v36, %v18396_v18 }
 0x624   :  { %v8058_v16 = vcombine.high %v7976_v5, %v7976_v5  ;;  %v8096_v37 = vmax.f32 %v7976_v5, 0.0  ;;  %v5378_v9 = vpop.f32.mrf.mxu1  ;;  %v11053_v44 = vpop.f32.mrf.mxu0 }
 0x625   :  { %5568 = vst.msk [vmem:[%s17804_s7 + $0x8] sm:$0xff] %vm1438_vm5, %v5536_v7  ;;  %v5499_v15 = vadd.f32 %v5378_v9, %v16239_v50  ;;  %v8215_v56 = vcombine.high %v8207_v38, %v8207_v38  ;;  %v7979_v32 = vadd.f32 %v11052_v52, %v18481_v62 }
 0x626   :  { %v8097_v46 = vmax.f32 %v8058_v16, 0.0  ;;  %v8153_v13 = vcombine.low %v8095_v19, %v8096_v37  ;;  %v5380_v11 = vpop.f32.mrf.mxu1  ;;  %v11054_v20 = vpop.f32.mrf.mxu0 }
 0x627   :  { %v5537_v8 = vadd.f32 %v16382_v12, %v5499_v15  ;;  %v11055_v25 = vadd.f32 %v11054_v20, %v11053_v44  ;;  %v8059_v22 = vcombine.high %v7979_v32, %v7979_v32  ;;  %v8392_v21 = vcombine.low %v8207_v38, %v8215_v56 }
 0x628   :  { %v8177_v26 = vpack.c.bf16 %v8097_v46, %v8153_v13  ;;  %v5381_v51 = vpop.f32.mrf.mxu1  ;;  %v11056_v39 = vpop.f32.mrf.mxu0  ;;  %v8098_v40 = vmax.f32 %v7979_v32, 0.0  ;;  %v10810_v9 = vpack.c.bf16 %v8097_v46, %v8097_v46 }
 0x629   :  { %5569 = vst.msk [vmem:[%s17804_s7 + $0x10] sm:$0xff] %vm1438_vm5, %v5537_v8  ;;  %v5500_v50 = vadd.f32 %v5381_v51, %v16251_v24  ;;  %v7984_v28 = vadd.f32 %v11055_v25, %v18482_v53  ;;  %v8099_v19 = vmax.f32 %v8059_v22, 0.0  ;;  %v8400_v11 = vrot.slane %v8392_v21, %v18396_v18 }
 0x62a   :  { %v8223_v5 = vrot.slane %v8177_v26, %v18396_v18  ;;  %v5383_v7 = vpop.f32.mrf.mxu1  ;;  %v11057_v37 = vpop.f32.mrf.mxu0  ;;  %v8230_v22 = vrot.slane %v10810_v9, %v18396_v18 }
 0x62b   :  { %v5538_v16 = vadd.f32 %v16382_v12, %v5500_v50  ;;  %v8060_v15 = vcombine.high %v7984_v28, %v7984_v28  ;;  %v8100_v44 = vmax.f32 %v7984_v28, 0.0  ;;  %v8154_v24 = vcombine.low %v8098_v40, %v8099_v19 }
 0x62c   :  { %v8393_v52 = vcombine.low %v8214_v58, %v8223_v5  ;;  %v5386_v13 = vpop.f32.mrf.mxu1  ;;  %v11058_v38 = vadd.f32 %v11057_v37, %v11056_v39  ;;  %v11059_v56 = vpop.f32.mrf.mxu0  ;;  %v8231_v32 = vcombine.high %v8223_v5, %v8223_v5 }
 0x62d   :  { %5570 = vst.msk [vmem:[%s17804_s7 + $0x18] sm:$0xff] %vm1438_vm5, %v5538_v16  ;;  %v5501_v36 = vadd.f32 %v5386_v13, %v16259_v35  ;;  %v8178_v20 = vpack.c.bf16 %v8100_v44, %v8154_v24  ;;  %v8101_v58 = vmax.f32 %v8060_v15, 0.0  ;;  %v10811_v16 = vpack.c.bf16 %v8100_v44, %v8100_v44 }
 0x62e   :  { %v8407_v8 = vrot.slane %v8393_v52, %v18396_v18  ;;  %v5388_v46 = vpop.f32.mrf.mxu1  ;;  %v7987_v26 = vadd.f32 %v11058_v38, %v18483_v42  ;;  %v11060_v51 = vpop.f32.mrf.mxu0  ;;  %v8409_v19 = vcombine.low %v8231_v32, %v8230_v22 }
 0x62f   :  { %v5539_v25 = vadd.f32 %v16382_v12, %v5501_v36  ;;  %v11061_v39 = vadd.f32 %v11060_v51, %v11059_v56  ;;  %v8239_v35 = vrot.slane %v8178_v20, %v18396_v18 }
 0x630   :  { %v8408_v50 = vcombine.low %v8400_v11, %v8407_v8  ;;  %v5389_v28 = vpop.f32.mrf.mxu1  ;;  %v8061_v7 = vcombine.high %v7987_v26, %v7987_v26  ;;  %v8102_v21 = vmax.f32 %v7987_v26, 0.0  ;;  %v11062_v40 = vpop.f32.mrf.mxu0  ;;  %v8417_v26 = vrot.slane %v8409_v19, %v18396_v18 }
 0x631   :  { %5571 = vst.msk [vmem:[%s17804_s7 + $0x20] sm:$0xff] %vm1438_vm5, %v5539_v25  ;;  %v5502_v5 = vadd.f32 %v5389_v28, %v16264_v17  ;;  %v7992_v37 = vadd.f32 %v11061_v39, %v18481_v62  ;;  %v8247_v52 = vcombine.high %v8239_v35, %v8239_v35  ;;  %v11372_v17 = vld [vmem:[%s17801_s5 + $0x38] sm:$0xff]  }
 0x632   :  { %11161 = vmatmul.mubr.msk.bf16.vlgmr.msra.gmra.mxu0 %vm3283_vm1, %v8408_v50  ;;  %v5391_v9 = vpop.f32.mrf.mxu1  ;;  %v8103_v15 = vmax.f32 %v8061_v7, 0.0  ;;  %v8155_v13 = vcombine.low %v8101_v58, %v8102_v21  ;;  %v11063_v38 = vpop.f32.mrf.mxu0  ;;  %v8246_v58 = vrot.slane %v10811_v16, %v18396_v18 }
 0x633   :  { %v5540_v24 = vadd.f32 %v16382_v12, %v5502_v5  ;;  %11164 = vmatprep.mubr.msk.bf16.mxu0 %vm18474_vm8, %v18351_v2  ;;  %9745 = vmatpush1.bf16.msra.mxu0 %v11372_v17  ;;  %v8062_v44 = vcombine.high %v7992_v37, %v7992_v37  ;;  %v11064_v36 = vadd.f32 %v11063_v38, %v11062_v40  ;;  %v8104_v25 = vmax.f32 %v7992_v37, 0.0 }
 0x634   :  { %v5394_v56 = vpop.f32.mrf.mxu1  ;;  %9746 = vmatprep.subr.bf16.mxu0 %v18138_v23  ;;  %v8410_v11 = vcombine.low %v8239_v35, %v8247_v52  ;;  %v8179_v32 = vpack.c.bf16 %v8103_v15, %v8155_v13  ;;  %v10812_v8 = vpack.c.bf16 %v8103_v15, %v8103_v15  ;;  %v11065_v20 = vpop.f32.mrf.mxu0 }
 0x635   :  { %5572 = vst.msk [vmem:[%s17804_s7 + $0x28] sm:$0xff] %vm1438_vm5, %v5540_v24  ;;  %v5503_v46 = vadd.f32 %v5394_v56, %v16280_v60  ;;  %v8105_v51 = vmax.f32 %v8062_v44, 0.0  ;;  %v7995_v22 = vadd.f32 %v11064_v36, %v18482_v53  ;;  %v11373_v60 = vld [vmem:[%s17801_s5 + $0x30] sm:$0xff]  }
 0x636   :  { %v5396_v50 = vpop.f32.mrf.mxu1  ;;  %v8424_v39 = vrot.slane %v8410_v11, %v18396_v18  ;;  %v8255_v28 = vrot.slane %v8179_v32, %v18396_v18  ;;  %v11066_v7 = vpop.f32.mrf.mxu0  ;;  %v8262_v16 = vrot.slane %v10812_v8, %v18396_v18 }
 0x637   :  { %v5541_v35 = vadd.f32 %v16382_v12, %v5503_v46  ;;  %9747 = vmatpush1.bf16.msra.mxu0 %v11373_v60  ;;  %v8156_v21 = vcombine.low %v8104_v25, %v8105_v51  ;;  %v8063_v5 = vcombine.high %v7995_v22, %v7995_v22  ;;  %v8106_v40 = vmax.f32 %v7995_v22, 0.0 }
 0x638   :  { %v11067_v19 = vadd.f32 %v11066_v7, %v11065_v20  ;;  %v5397_v37 = vpop.f32.mrf.mxu1  ;;  %9748 = vmatprep.subr.bf16.mxu0 %v18138_v23  ;;  %v8263_v9 = vcombine.high %v8255_v28, %v8255_v28  ;;  %v11068_v15 = vpop.f32.mrf.mxu0  ;;  %v8425_v13 = vcombine.low %v8417_v26, %v8424_v39  ;;  %v8426_v44 = vcombine.low %v8246_v58, %v8255_v28 }
 0x639   :  { %5573 = vst.msk [vmem:[%s17804_s7 + $0x30] sm:$0xff] %vm1438_vm5, %v5541_v35  ;;  %v5504_v52 = vadd.f32 %v5397_v37, %v16286_v63  ;;  %v8180_v24 = vpack.c.bf16 %v8106_v40, %v8156_v21  ;;  %v8107_v32 = vmax.f32 %v8063_v5, 0.0  ;;  %v11374_v63 = vld [vmem:[%s17801_s5 + $0x28] sm:$0xff]   ;;  %v10813_v26 = vpack.c.bf16 %v8106_v40, %v8106_v40 }
 0x63a   :  { %v8000_v38 = vadd.f32 %v11067_v19, %v18483_v42  ;;  %v5399_v17 = vpop.f32.mrf.mxu1  ;;  %v8427_v36 = vcombine.low %v8263_v9, %v8262_v16  ;;  %11165 = vmatmul.mubr.msk.bf16.gmra.mxu0 %vm3283_vm1, %v8425_v13  ;;  %v11069_v11 = vpop.f32.mrf.mxu0  ;;  %v8434_v60 = vrot.slane %v8426_v44, %v18396_v18 }
 0x63b   :  { %v5542_v56 = vadd.f32 %v16382_v12, %v5504_v52  ;;  %v8271_v8 = vrot.slane %v8180_v24, %v18396_v18  ;;  %11168 = vmatprep.mubr.msk.bf16.mxu0 %vm18474_vm8, %v18351_v2  ;;  %9749 = vmatpush1.bf16.msra.mxu0 %v11374_v63  ;;  %v11070_v28 = vadd.f32 %v11069_v11, %v11068_v15 }
 0x63c   :  { %v8064_v46 = vcombine.high %v8000_v38, %v8000_v38  ;;  %v8108_v20 = vmax.f32 %v8000_v38, 0.0  ;;  %v5402_v25 = vpop.f32.mrf.mxu1  ;;  %v8441_v22 = vrot.slane %v8427_v36, %v18396_v18  ;;  %9750 = vmatprep.subr.bf16.mxu0 %v18138_v23  ;;  %v8278_v37 = vrot.slane %v10813_v26, %v18396_v18 }
 0x63d   :  { %5574 = vst.msk [vmem:[%s17804_s7 + $0x38] sm:$0xff] %vm1438_vm5, %v5542_v56  ;;  %v5505_v51 = vadd.f32 %v5402_v25, %v16293_v34  ;;  %v8279_v50 = vcombine.high %v8271_v8, %v8271_v8  ;;  %v11375_v34 = vld [vmem:[%s17801_s5 + $0x20] sm:$0xff]   ;;  %v8003_v52 = vadd.f32 %v11070_v28, %v18481_v62  ;;  %v11377_v25 = vld [vmem:[%s17801_s5 + $0x10] sm:$0xff]  }
 0x63e   :  { %v16473_v58 = vmax.f32 %v8064_v46, 0.0  ;;  %v8157_v39 = vcombine.low %v8107_v32, %v8108_v20  ;;  %v5404_v35 = vpop.f32.mrf.mxu1  ;;  %v8442_v19 = vcombine.low %v8434_v60, %v8441_v22 }
 0x63f   :  { %v5543_v7 = vadd.f32 %v16382_v12, %v5505_v51  ;;  %9751 = vmatpush1.bf16.msra.mxu0 %v11375_v34  ;;  %v8443_v16 = vcombine.low %v8271_v8, %v8279_v50  ;;  %v8065_v56 = vcombine.high %v8003_v52, %v8003_v52 }
 0x640   :  { %v8181_v21 = vpack.c.bf16 %v16473_v58, %v8157_v39  ;;  %v5405_v5 = vpop.f32.mrf.mxu1  ;;  %9752 = vmatprep.subr.bf16.mxu0 %v18138_v23  ;;  %v8110_v39 = vmax.f32 %v8003_v52, 0.0 }
 0x641   :  { %5575 = vst.msk [vmem:[%s17804_s7 + $0x40] sm:$0xff] %vm1438_vm5, %v5543_v7  ;;  %v5506_v40 = vadd.f32 %v5405_v5, %v16298_v61  ;;  %v11376_v61 = vld [vmem:[%s17801_s5 + $0x18] sm:$0xff]   ;;  %v8451_v44 = vrot.slane %v8443_v16, %v18396_v18  ;;  %v8111_v63 = vmax.f32 %v8065_v56, 0.0 }
 0x642   :  { %v16489_v9 = vrot.slane %v8181_v21, %v18396_v18  ;;  %v5407_v15 = vpop.f32.mrf.mxu1  ;;  %11169 = vmatmul.mubr.msk.bf16.gmra.mxu0 %vm3283_vm1, %v8442_v19  ;;  %v10814_v21 = vpack.c.bf16 %v16473_v58, %v16473_v58 }
 0x643   :  { %v5544_v13 = vadd.f32 %v16382_v12, %v5506_v40  ;;  %11172 = vmatprep.mubr.msk.bf16.mxu0 %vm18474_vm8, %v18351_v2  ;;  %9753 = vmatpush1.bf16.msra.mxu0 %v11376_v61  ;;  %v8158_v5 = vcombine.low %v8110_v39, %v8111_v63 }
 0x644   :  { %v8444_v24 = vcombine.low %v8278_v37, %v16489_v9  ;;  %v5410_v38 = vpop.f32.mrf.mxu1  ;;  %9754 = vmatprep.subr.bf16.mxu0 %v18138_v23  ;;  %v8295_v15 = vcombine.high %v16489_v9, %v16489_v9 }
 0x645   :  { %5576 = vst.msk [vmem:[%s17804_s7 + $0x48] sm:$0xff] %vm1438_vm5, %v5544_v13  ;;  %v5507_v17 = vadd.f32 %v5410_v38, %v16307_v10  ;;  %v8294_v38 = vrot.slane %v10814_v21, %v18396_v18 }
 0x646   :  { %v8458_v36 = vrot.slane %v8444_v24, %v18396_v18  ;;  %v5412_v11 = vpop.f32.mrf.mxu1 }
 0x647   :  { %v5545_v32 = vadd.f32 %v16382_v12, %v5507_v17  ;;  %9755 = vmatpush1.bf16.msra.mxu0 %v11377_v25  ;;  %v8460_v11 = vcombine.low %v8295_v15, %v8294_v38 }
 0x648   :  { %v11071_v8 = vpop.f32.mrf.mxu0  ;;  %v5413_v46 = vpop.f32.mrf.mxu1  ;;  %v8459_v20 = vcombine.low %v8451_v44, %v8458_v36  ;;  %9756 = vmatprep.subr.bf16.mxu0 %v18138_v23 }
 0x649   :  { %5577 = vst.msk [vmem:[%s17804_s7 + $0x50] sm:$0xff] %vm1438_vm5, %v5545_v32  ;;  %v5508_v10 = vadd.f32 %v5413_v46, %v16310_v4  ;;  %v11378_v4 = vld [vmem:[%s17801_s5 + $0x8] sm:$0xff]  }
 0x64a   :  { %v11072_v26 = vpop.f32.mrf.mxu0  ;;  %v5415_v51 = vpop.f32.mrf.mxu1  ;;  %11173 = vmatmul.mubr.msk.bf16.gmra.mxu0 %vm3283_vm1, %v8459_v20  ;;  %v11380_v46 = vld [vmem:[%s17801_s5 + $0x48] sm:$0xff]  }
 0x64b   :  { %v5546_v22 = vadd.f32 %v16382_v12, %v5508_v10  ;;  %v11073_v50 = vadd.f32 %v11072_v26, %v11071_v8  ;;  %11176 = vmatprep.mubr.msk.bf16.mxu0 %vm18474_vm8, %v18351_v2  ;;  %9757 = vmatpush1.bf16.msra.mxu0 %v11378_v4 }
 0x64c   :  { %v11074_v28 = vpop.f32.mrf.mxu0  ;;  %v5418_v35 = vpop.f32.mrf.mxu1  ;;  %9758 = vmatprep.subr.bf16.mxu0 %v18138_v23 }
 0x64d   :  { %5578 = vst.msk [vmem:[%s17804_s7 + $0x58] sm:$0xff] %vm1438_vm5, %v5546_v22  ;;  %v8008_v7 = vadd.f32 %v11073_v50, %v18482_v53  ;;  %v5509_v60 = vadd.f32 %v5418_v35, %v16316_v41  ;;  %v11379_v41 = vld [vmem:[%s17801_s5] sm:$0xff]  }
 0x64e   :  { %v11075_v34 = vpop.f32.mrf.mxu0  ;;  %v5420_v40 = vpop.f32.mrf.mxu1  ;;  %v11381_v35 = vld [vmem:[%s17801_s5 + $0x40] sm:$0xff]  }
 0x64f   :  { %v8066_v19 = vcombine.high %v8008_v7, %v8008_v7  ;;  %v8112_v37 = vmax.f32 %v8008_v7, 0.0  ;;  %v5547_v16 = vadd.f32 %v16382_v12, %v5509_v60  ;;  %v11076_v52 = vadd.f32 %v11075_v34, %v11074_v28  ;;  %9759 = vmatpush1.bf16.msra.mxu0 %v11379_v41 }
 0x650   :  { %v5421_v13 = vpop.f32.mrf.mxu1  ;;  %9772 = vmatprep.subr.bf16.mxu0 %v18138_v23 }
 0x651   :  { %v8182_v24 = vpack.c.bf16 %v8112_v37, %v8158_v5  ;;  %5579 = vst.msk [vmem:[%s17804_s7 + $0x60] sm:$0xff] %vm1438_vm5, %v5547_v16  ;;  %v8011_v58 = vadd.f32 %v11076_v52, %v18483_v42  ;;  %v5510_v9 = vadd.f32 %v5421_v13, %v16321_v45  ;;  %v8113_v17 = vmax.f32 %v8066_v19, 0.0 }
 0x652   :  { %v5423_v61 = vpop.f32.mrf.mxu1  ;;  %v10815_v63 = vpack.c.bf16 %v8112_v37, %v8112_v37 }
 0x653   :  { %v8303_v44 = vrot.slane %v8182_v24, %v18396_v18  ;;  %v8067_v36 = vcombine.high %v8011_v58, %v8011_v58  ;;  %v8114_v56 = vmax.f32 %v8011_v58, 0.0  ;;  %v5548_v32 = vadd.f32 %v16382_v12, %v5510_v9  ;;  %9773 = vmatpush2.bf16.msra.mxu0 %v11380_v46 }
 0x654   :  { %v5426_v8 = vpop.f32.mrf.mxu1  ;;  %9774 = vmatprep.subr.bf16.mxu0 %v18138_v23  ;;  %v8310_v21 = vrot.slane %v10815_v63, %v18396_v18 }
 0x655   :  { %v8311_v20 = vcombine.high %v8303_v44, %v8303_v44  ;;  %v8115_v25 = vmax.f32 %v8067_v36, 0.0  ;;  %v8159_v10 = vcombine.low %v8113_v17, %v8114_v56  ;;  %v5511_v45 = vadd.f32 %v5426_v8, %v16326_v59  ;;  %5580 = vst.msk [vmem:[%s17804_s7 + $0x68] sm:$0xff] %vm1438_vm5, %v5548_v32 }
 0x656   :  { %v5428_v26 = vpop.f32.mrf.mxu1  ;;  %v8468_v59 = vrot.slane %v8460_v11, %v18396_v18 }
 0x657   :  { %v8461_v51 = vcombine.low %v8303_v44, %v8311_v20  ;;  %v8183_v22 = vpack.c.bf16 %v8115_v25, %v8159_v10  ;;  %v10816_v50 = vpack.c.bf16 %v8115_v25, %v8115_v25  ;;  %v5549_v39 = vadd.f32 %v16382_v12, %v5511_v45  ;;  %9775 = vmatpush2.bf16.msra.mxu0 %v11381_v35 }
 0x658   :  { %v5429_v28 = vpop.f32.mrf.mxu1  ;;  %10098 = vmatprep.subr.bf16.mxu0 %v18138_v23 }
 0x659   :  { %v8475_v4 = vrot.slane %v8461_v51, %v18396_v18  ;;  %v8319_v7 = vrot.slane %v8183_v22, %v18396_v18  ;;  %5581 = vst.msk [vmem:[%s17804_s7 + $0x70] sm:$0xff] %vm1438_vm5, %v5549_v39  ;;  %v5512_v60 = vadd.f32 %v5429_v28, %v16328_v57  ;;  %v8326_v34 = vrot.slane %v10816_v50, %v18396_v18 }
 0x65a   :  { %v5431_v5 = vpop.f32.mrf.mxu1 }
 0x65b   :  { %v8327_v40 = vcombine.high %v8319_v7, %v8319_v7  ;;  %v5550_v19 = vadd.f32 %v16382_v12, %v5512_v60  ;;  %v8476_v37 = vcombine.low %v8468_v59, %v8475_v4  ;;  %v8477_v52 = vcombine.low %v8310_v21, %v8319_v7 }
 0x65c   :  { %v5434_v16 = vpop.f32.mrf.mxu1 }
 0x65d   :  { %v8478_v15 = vcombine.low %v8327_v40, %v8326_v34  ;;  %5582 = vst.msk [vmem:[%s17804_s7 + $0x78] sm:$0xff] %vm1438_vm5, %v5550_v19  ;;  %v5513_v57 = vadd.f32 %v5434_v16, %v16331_v31  ;;  %11177 = vmatmul.mubr.msk.bf16.gmra.mxu0 %vm3283_vm1, %v8476_v37  ;;  %v8485_v31 = vrot.slane %v8477_v52, %v18396_v18 }
 0x65e   :  { %v5436_v13 = vpop.f32.mrf.mxu1  ;;  %11180 = vmatprep.mubr.msk.bf16.mxu0 %vm18474_vm8, %v18351_v2 }
 0x65f   :  { %v5551_v41 = vadd.f32 %v16382_v12, %v5513_v57  ;;  %v8492_v24 = vrot.slane %v8478_v15, %v18396_v18 }
 0x660   :  { %v5437_v58 = vpop.f32.mrf.mxu1 }
 0x661   :  { %5583 = vst.msk [vmem:[%s17804_s7 + $0x80] sm:$0xff] %vm1438_vm5, %v5551_v41  ;;  %v5514_v38 = vadd.f32 %v5437_v58, %v16334_v6  ;;  %v8493_v17 = vcombine.low %v8485_v31, %v8492_v24 }
 0x662   :  { %v5439_v9 = vpop.f32.mrf.mxu1 }
 0x663   :  { %v5552_v61 = vadd.f32 %v16382_v12, %v5514_v38 }
 0x664   :  { %v5442_v44 = vpop.f32.mrf.mxu1 }
 0x665   :  { %5584 = vst.msk [vmem:[%s17804_s7 + $0x88] sm:$0xff] %vm1438_vm5, %v5552_v61  ;;  %v5515_v36 = vadd.f32 %v5442_v44, %v16337_v1  ;;  %11181 = vmatmul.mubr.msk.bf16.gmra.mxu0 %vm3283_vm1, %v8493_v17 }
 0x666   :  { %v5444_v56 = vpop.f32.mrf.mxu1  ;;  %11184 = vmatprep.mubr.msk.bf16.mxu0 %vm18474_vm8, %v18351_v2  ;;  %v11077_v11 = vpop.f32.mrf.mxu0 }
 0x667   :  { %v5553_v6 = vadd.f32 %v16382_v12, %v5515_v36 }
 0x668   :  { %v5445_v32 = vpop.f32.mrf.mxu1  ;;  %v11078_v46 = vpop.f32.mrf.mxu0 }
 0x669   :  { %5585 = vst.msk [vmem:[%s17804_s7 + $0x90] sm:$0xff] %vm1438_vm5, %v5553_v6  ;;  %v5516_v8 = vadd.f32 %v5445_v32, %v16340_v55  ;;  %v11079_v20 = vadd.f32 %v11078_v46, %v11077_v11 }
 0x66a   :  { %v5447_v1 = vpop.f32.mrf.mxu1  ;;  %v11080_v10 = vpop.f32.mrf.mxu0 }
 0x66b   :  { %v5554_v25 = vadd.f32 %v16382_v12, %v5516_v8  ;;  %v8016_v45 = vadd.f32 %v11079_v20, %v18481_v62 }
 0x66c   :  { %v5450_v63 = vpop.f32.mrf.mxu1  ;;  %v11081_v51 = vpop.f32.mrf.mxu0 }
 0x66d   :  { %5586 = vst.msk [vmem:[%s17804_s7 + $0x98] sm:$0xff] %vm1438_vm5, %v5554_v25  ;;  %v5517_v26 = vadd.f32 %v5450_v63, %v16343_v27  ;;  %v8068_v50 = vcombine.high %v8016_v45, %v8016_v45  ;;  %v11082_v39 = vadd.f32 %v11081_v51, %v11080_v10  ;;  %v8116_v21 = vmax.f32 %v8016_v45, 0.0 }
 0x66e   :  { %v5452_v22 = vpop.f32.mrf.mxu1 }
 0x66f   :  { %v5555_v55 = vadd.f32 %v16382_v12, %v5517_v26  ;;  %v8117_v4 = vmax.f32 %v8068_v50, 0.0  ;;  %v8019_v7 = vadd.f32 %v11082_v39, %v18482_v53 }
 0x670   :  { %v5453_v28 = vpop.f32.mrf.mxu1 }
 0x671   :  { %5587 = vst.msk [vmem:[%s17804_s7 + $0xa0] sm:$0xff] %vm1438_vm5, %v5555_v55  ;;  %v5518_v35 = vadd.f32 %v5453_v28, %v16346_v43  ;;  %v8160_v40 = vcombine.low %v8116_v21, %v8117_v4  ;;  %v8118_v19 = vmax.f32 %v8019_v7, 0.0 }
 0x672   :  { %v5455_v59 = vpop.f32.mrf.mxu1 }
 0x673   :  { %v5556_v27 = vadd.f32 %v16382_v12, %v5518_v35  ;;  %v8184_v57 = vpack.c.bf16 %v8118_v19, %v8160_v40  ;;  %v10817_v8 = vpack.c.bf16 %v8118_v19, %v8118_v19 }
 0x674   :  { %v5458_v60 = vpop.f32.mrf.mxu1 }
 0x675   :  { %5588 = vst.msk [vmem:[%s17804_s7 + $0xa8] sm:$0xff] %vm1438_vm5, %v5556_v27  ;;  %v5519_v5 = vadd.f32 %v5458_v60, %v16349_v29  ;;  %v8069_v29 = vcombine.high %v8019_v7, %v8019_v7  ;;  %v8335_v61 = vrot.slane %v8184_v57, %v18396_v18  ;;  %v8342_v50 = vrot.slane %v10817_v8, %v18396_v18 }
 0x676   :  { %v5460_v34 = vpop.f32.mrf.mxu1 }
 0x677   :  { %v5557_v43 = vadd.f32 %v16382_v12, %v5519_v5  ;;  %v8119_v36 = vmax.f32 %v8069_v29, 0.0  ;;  %v8343_v10 = vcombine.high %v8335_v61, %v8335_v61 }
 0x678   :  { %v5461_v37 = vpop.f32.mrf.mxu1  ;;  %v11083_v52 = vpop.f32.mrf.mxu0 }
 0x679   :  { %5589 = vst.msk [vmem:[%s17804_s7 + $0xb0] sm:$0xff] %vm1438_vm5, %v5557_v43  ;;  %v5520_v16 = vadd.f32 %v5461_v37, %v16352_v47  ;;  %v8494_v39 = vcombine.low %v8335_v61, %v8343_v10 }
 0x67a   :  { %v5463_v15 = vpop.f32.mrf.mxu1  ;;  %v11084_v41 = vpop.f32.mrf.mxu0 }
 0x67b   :  { %v5558_v13 = vadd.f32 %v16382_v12, %v5520_v16  ;;  %v11085_v24 = vadd.f32 %v11084_v41, %v11083_v52  ;;  %v8502_v19 = vrot.slane %v8494_v39, %v18396_v18 }
 0x67c   :  { %v5466_v58 = vpop.f32.mrf.mxu1  ;;  %v11086_v31 = vpop.f32.mrf.mxu0 }
 0x67d   :  { %5590 = vst.msk [vmem:[%s17804_s7 + $0xb8] sm:$0xff] %vm1438_vm5, %v5558_v13  ;;  %v5521_v38 = vadd.f32 %v5466_v58, %v16355_v14  ;;  %v8024_v9 = vadd.f32 %v11085_v24, %v18483_v42 }
 0x67e   :  { %v5468_v47 = vpop.f32.mrf.mxu1  ;;  %v11087_v44 = vpop.f32.mrf.mxu0 }
 0x67f   :  { %v5559_v17 = vadd.f32 %v16382_v12, %v5521_v38  ;;  %v8070_v56 = vcombine.high %v8024_v9, %v8024_v9  ;;  %v8120_v6 = vmax.f32 %v8024_v9, 0.0  ;;  %v11088_v11 = vadd.f32 %v11087_v44, %v11086_v31 }
 0x680   :  { %v5469_v32 = vpop.f32.mrf.mxu1 }
 0x681   :  { %5591 = vst.msk [vmem:[%s17804_s7 + $0xc0] sm:$0xff] %vm1438_vm5, %v5559_v17  ;;  %v5522_v14 = vadd.f32 %v5469_v32, %v16358_v33  ;;  %v8121_v46 = vmax.f32 %v8070_v56, 0.0  ;;  %v8161_v20 = vcombine.low %v8119_v36, %v8120_v6  ;;  %v8027_v1 = vadd.f32 %v11088_v11, %v18481_v62 }
 0x682   :  { %v5471_v25 = vpop.f32.mrf.mxu1 }
 0x683   :  { %v5560_v45 = vadd.f32 %v16382_v12, %v5522_v14  ;;  %v8185_v63 = vpack.c.bf16 %v8121_v46, %v8161_v20  ;;  %v8071_v26 = vcombine.high %v8027_v1, %v8027_v1  ;;  %v8122_v5 = vmax.f32 %v8027_v1, 0.0 }
 0x684   :  { %v5474_v51 = vpop.f32.mrf.mxu1  ;;  %v11089_v33 = vpop.f32.mrf.mxu0  ;;  %v10818_v43 = vpack.c.bf16 %v8121_v46, %v8121_v46 }
 0x685   :  { %5592 = vst.msk [vmem:[%s17804_s7 + $0xc8] sm:$0xff] %vm1438_vm5, %v5560_v45  ;;  %v5523_v22 = vadd.f32 %v5474_v51, %v16361_v3  ;;  %v8351_v55 = vrot.slane %v8185_v63, %v18396_v18  ;;  %v8123_v4 = vmax.f32 %v8071_v26, 0.0 }
 0x686   :  { %v5476_v62 = vpop.f32.mrf.mxu1  ;;  %v11090_v35 = vpop.f32.mrf.mxu0  ;;  %v8358_v31 = vrot.slane %v10818_v43, %v18396_v18 }
 0x687   :  { %v5561_v28 = vadd.f32 %v16382_v12, %v5523_v22  ;;  %v8495_v59 = vcombine.low %v8342_v50, %v8351_v55  ;;  %v11091_v7 = vadd.f32 %v11090_v35, %v11089_v33  ;;  %v8162_v52 = vcombine.low %v8122_v5, %v8123_v4 }
 0x688   :  { %v5477_v27 = vpop.f32.mrf.mxu1  ;;  %v11092_v60 = vpop.f32.mrf.mxu0  ;;  %v8359_v29 = vcombine.high %v8351_v55, %v8351_v55 }
 0x689   :  { %5593 = vst.msk [vmem:[%s17804_s7 + $0xd0] sm:$0xff] %vm1438_vm5, %v5561_v28  ;;  %v5524_v3 = vadd.f32 %v5477_v27, %v16364_v49  ;;  %v8509_v21 = vrot.slane %v8495_v59, %v18396_v18  ;;  %v8032_v34 = vadd.f32 %v11091_v7, %v18482_v53 }
 0x68a   :  { %v5479_v40 = vpop.f32.mrf.mxu1  ;;  %v11093_v16 = vpop.f32.mrf.mxu0 }
 0x68b   :  { %v5562_v37 = vadd.f32 %v16382_v12, %v5524_v3  ;;  %v8072_v15 = vcombine.high %v8032_v34, %v8032_v34  ;;  %v8124_v57 = vmax.f32 %v8032_v34, 0.0  ;;  %v11094_v13 = vadd.f32 %v11093_v16, %v11092_v60  ;;  %v18484_v3 = vld [vmem:[#allocation9_spill] sm:$0xff]  ;;  %v18485_v40 = vld [vmem:[#allocation14_spill] sm:$0xff] }
 0x68c   :  { %v5482_v41 = vpop.f32.mrf.mxu1  ;;  %v8510_v53 = vcombine.low %v8502_v19, %v8509_v21 }
 0x68d   :  { %5594 = vst.msk [vmem:[%s17804_s7 + $0xd8] sm:$0xff] %vm1438_vm5, %v5562_v37  ;;  %v5525_v49 = vadd.f32 %v5482_v41, %v16367_v48  ;;  %v8186_v24 = vpack.c.bf16 %v8124_v57, %v8162_v52  ;;  %v8035_v58 = vadd.f32 %v11094_v13, %v18483_v42  ;;  %v8125_v47 = vmax.f32 %v8072_v15, 0.0 }
 0x68e   :  { %v5484_v38 = vpop.f32.mrf.mxu1  ;;  %11185 = vmatmul.mubr.msk.bf16.gmra.mxu0 %vm3283_vm1, %v8510_v53  ;;  %v8511_v42 = vcombine.low %v8359_v29, %v8358_v31  ;;  %v10819_v8 = vpack.c.bf16 %v8124_v57, %v8124_v57 }
 0x68f   :  { %v5563_v9 = vadd.f32 %v16382_v12, %v5525_v49  ;;  %v8367_v61 = vrot.slane %v8186_v24, %v18396_v18  ;;  %v8073_v17 = vcombine.high %v8035_v58, %v8035_v58  ;;  %v8126_v44 = vmax.f32 %v8035_v58, 0.0  ;;  %11188 = vmatprep.mubr.msk.bf16.mxu0 %vm18474_vm8, %v18351_v2  ;;  %v18487_v38 = vld [vmem:[#allocation3_spill] sm:$0xff] }
 0x690   :  { %v5485_v36 = vpop.f32.mrf.mxu1  ;;  %v8374_v22 = vrot.slane %v10819_v8, %v18396_v18 }
 0x691   :  { %5595 = vst.msk [vmem:[%s17804_s7 + $0xe0] sm:$0xff] %vm1438_vm5, %v5563_v9  ;;  %v5526_v48 = vadd.f32 %v5485_v36, %v16370_v30  ;;  %v8375_v56 = vcombine.high %v8367_v61, %v8367_v61  ;;  %v8127_v6 = vmax.f32 %v8073_v17, 0.0  ;;  %v8163_v11 = vcombine.low %v8125_v47, %v8126_v44 }
 0x692   :  { %v5487_v32 = vpop.f32.mrf.mxu1  ;;  %v8519_v30 = vrot.slane %v8511_v42, %v18396_v18 }
 0x693   :  { %v5564_v14 = vadd.f32 %v16382_v12, %v5526_v48  ;;  %v8512_v46 = vcombine.low %v8367_v61, %v8375_v56  ;;  %v8187_v20 = vpack.c.bf16 %v8127_v6, %v8163_v11  ;;  %v10820_v1 = vpack.c.bf16 %v8127_v6, %v8127_v6  ;;  %v18488_v48 = vld [vmem:[#allocation7_spill] sm:$0xff] }
 0x694   :  { %v5490_v25 = vpop.f32.mrf.mxu1 }
 0x695   :  { %5596 = vst.msk [vmem:[%s17804_s7 + $0xe8] sm:$0xff] %vm1438_vm5, %v5564_v14  ;;  %v5527_v10 = vadd.f32 %v5490_v25, %v16373_v0  ;;  %v8526_v45 = vrot.slane %v8512_v46, %v18396_v18  ;;  %v8383_v63 = vrot.slane %v8187_v20, %v18396_v18  ;;  %v8390_v33 = vrot.slane %v10820_v1, %v18396_v18 }
 0x696   :  { %v5492_v26 = vpop.f32.mrf.mxu1 }
 0x697   :  { %v5565_v51 = vadd.f32 %v16382_v12, %v5527_v10  ;;  %v8391_v50 = vcombine.high %v8383_v63, %v8383_v63  ;;  %v8527_v62 = vcombine.low %v8519_v30, %v8526_v45  ;;  %v8528_v39 = vcombine.low %v8374_v22, %v8383_v63 }
 0x698   :  { %v5493_v55 = vpop.f32.mrf.mxu1 }
 0x699   :  { %5597 = vst.msk [vmem:[%s17804_s7 + $0xf0] sm:$0xff] %vm1438_vm5, %v5565_v51  ;;  %v5528_v0 = vadd.f32 %v5493_v55, %v16377_v54  ;;  %v8529_v28 = vcombine.low %v8391_v50, %v8390_v33  ;;  %11189 = vmatmul.mubr.msk.bf16.gmra.mxu0 %vm3283_vm1, %v8527_v62  ;;  %v8536_v7 = vrot.slane %v8528_v39, %v18396_v18 }
 0x69a   :  { %v5495_v35 = vpop.f32.mrf.mxu1  ;;  %11192 = vmatprep.mubr.msk.bf16.mxu0 %vm18474_vm8, %v18351_v2  ;;  %vm18498_vm8 = vmmov %vm18491_vm3 }
 0x69b   :  { %v5566_v59 = vadd.f32 %v16382_v12, %v5528_v0  ;;  %v8543_v4 = vrot.slane %v8529_v28, %v18396_v18  ;;  %v18486_v18 = vld [vmem:[#allocation24_spill] sm:$0xff] }
 0x69d   :  { %5598 = vst.msk [vmem:[%s17804_s7 + $0xf8] sm:$0xff] %vm1438_vm5, %v5566_v59  ;;  %v8544_v54 = vcombine.low %v8536_v7, %v8543_v4 }
 0x6a1   :  { %11193 = vmatmul.mubr.msk.bf16.gmra.mxu0 %vm3283_vm1, %v8544_v54 }
 0x6f2   :  { %v8606_v27 = vpop.f32.mrf.mxu0 }
 0x6f3   :  { %v8607_v60 = vadd.f32 %v8606_v27, %v18484_v3 }
 0x6f4   :  { %v11162_v21 = vpop.f32.mrf.mxu0 }
 0x6f5   :  { %v8695_v12 = vcombine.high %v8607_v60, %v8607_v60  ;;  %v8731_v34 = vmax.f32 %v8607_v60, 0.0 }
 0x6f6   :  { %v8609_v5 = vpop.f32.mrf.mxu0 }
 0x6f7   :  { %v8732_v2 = vmax.f32 %v8695_v12, 0.0  ;;  %v8610_v19 = vadd.f32 %v8609_v5, %v18485_v40 }
 0x6f8   :  { %v11163_v43 = vpop.f32.mrf.mxu0 }
 0x6f9   :  { %v8791_v37 = vcombine.low %v8731_v34, %v8732_v2  ;;  %v8733_v16 = vmax.f32 %v8610_v19, 0.0  ;;  %v8696_v52 = vcombine.high %v8610_v19, %v8610_v19 }
 0x6fa   :  { %v8614_v57 = vpop.f32.mrf.mxu0 }
 0x6fb   :  { %v8815_v15 = vpack.c.bf16 %v8733_v16, %v8791_v37  ;;  %v8615_v13 = vadd.f32 %v8614_v57, %v18486_v18  ;;  %v8734_v29 = vmax.f32 %v8696_v52, 0.0 }
 0x6fc   :  { %v11166_v53 = vpop.f32.mrf.mxu0 }
 0x6fd   :  { %v8828_v41 = vpack.i.b16 %v8815_v15, %v8815_v15  ;;  %v8911_v49 = vshrl.u32 %v8815_v15, 16  ;;  %v8697_v24 = vcombine.high %v8615_v13, %v8615_v13  ;;  %v8735_v58 = vmax.f32 %v8615_v13, 0.0 }
 0x6fe   :  { %v9007_v47 = vrot.slane %v8815_v15, 6  ;;  %v8617_v61 = vpop.f32.mrf.mxu0 }
 0x6ff   :  { %v8833_v31 = vrot.slane %v8828_v41, %v18487_v38  ;;  %v8912_v9 = vpack.i.b16 %v8911_v49, %v8911_v49  ;;  %v8736_v17 = vmax.f32 %v8697_v24, 0.0  ;;  %v8792_v44 = vcombine.low %v8734_v29, %v8735_v58 }
 0x700   :  { %v8618_v36 = vadd.f32 %v8617_v61, %v18484_v3  ;;  %v11167_v6 = vpop.f32.mrf.mxu0 }
 0x701   :  { %v8917_v42 = vrot.slane %v8912_v9, %v18488_v48  ;;  %v16717_v56 = vsel %vm18489_vm9, %v8833_v31, %v9007_v47  ;;  %v8816_v32 = vpack.c.bf16 %v8736_v17, %v8792_v44  ;;  %vm18499_vm9 = vmmov %vm18497_vm6 }
 0x702   :  { %v9427_v11 = vrot.slane %v16717_v56, 2  ;;  %v8698_v14 = vcombine.high %v8618_v36, %v8618_v36  ;;  %v8737_v8 = vmax.f32 %v8618_v36, 0.0  ;;  %v8622_v20 = vpop.f32.mrf.mxu0  ;;  %v9235_v1 = vrot.slane %v16717_v56, 1 }
 0x703   :  { %v9428_v46 = vrot.slane %v8917_v42, 2  ;;  %v9236_v25 = vrot.slane %v8917_v42, 1  ;;  %v9055_v10 = vshrl.u32 %v16717_v56, 16  ;;  %v8835_v30 = vpack.i.b16 %v8816_v32, %v8816_v32 }
 0x704   :  { %v8918_v45 = vshrl.u32 %v8816_v32, 16  ;;  %v9008_v63 = vrot.slane %v8816_v32, 6  ;;  %v8738_v26 = vmax.f32 %v8698_v14, 0.0  ;;  %v8623_v22 = vadd.f32 %v8622_v20, %v18485_v40  ;;  %v11170_v33 = vpop.f32.mrf.mxu0 }
 0x705   :  { %v16723_v51 = vsel %vm4169_vm2, %v9427_v11, %v9428_v46  ;;  %v9237_v50 = vsel %vm3975_vm10, %v9235_v1, %v9236_v25  ;;  %v9057_v55 = vshll.u32 %v16717_v56, 16  ;;  %v8840_v62 = vrot.slane %v8835_v30, %v18487_v38 }
 0x706   :  { %v8919_v0 = vpack.i.b16 %v8918_v45, %v8918_v45  ;;  %v8793_v39 = vcombine.low %v8737_v8, %v8738_v26  ;;  %10830 = vmatprep.mubr.msk.bf16.mxu1 %vm4206_vm4, %v16723_v51  ;;  %9271 = vrot.lane.b32.xlu1 %v9237_v50, %s11434_s4  ;;  %v9062_v28 = vshll.u32 %v8917_v42, 16  ;;  %v8699_v35 = vcombine.high %v8623_v22, %v8623_v22  ;;  %v8625_v4 = vpop.f32.mrf.mxu0 }
 0x707   :  { %v8739_v59 = vmax.f32 %v8623_v22, 0.0  ;;  %10846 = vmatprep.mubr.msk.bf16.mxu0 %vm4206_vm4, %v16723_v51  ;;  %v9059_v7 = vrot.slane %v9057_v55, 1  ;;  %v9295_v54 = vrot.slane %v9055_v10, 1  ;;  %v16738_v60 = vsel %vm18490_vm15, %v8840_v62, %v9008_v63  ;;  %vm18500_vm15 = vmmov %vm18491_vm3 }
 0x708   :  { %v16735_v27 = vrot.slane %v8919_v0, %v18488_v48  ;;  %v8626_v21 = vadd.f32 %v8625_v4, %v18486_v18  ;;  %v9064_v12 = vrot.slane %v9062_v28, 1  ;;  %v8740_v5 = vmax.f32 %v8699_v35, 0.0  ;;  %v11171_v2 = vpop.f32.mrf.mxu0 }
 0x709   :  { %v8817_v34 = vpack.c.bf16 %v8739_v59, %v8793_v39  ;;  %v9060_v19 = vor.u32 %v9059_v7, %v9055_v10  ;;  %v9296_v43 = vrot.slane %v9057_v55, 2  ;;  %v9298_v52 = vshrl.u32 %v8917_v42, 16 }
 0x70a   :  { %v8700_v37 = vcombine.high %v8626_v21, %v8626_v21  ;;  %v8741_v16 = vmax.f32 %v8626_v21, 0.0  ;;  %v9301_v15 = vrot.slane %v9062_v28, 2  ;;  %v8630_v53 = vpop.f32.mrf.mxu0  ;;  %v9066_v44 = vshrl.u32 %v16738_v60, 16 }
 0x70b   :  { %v8842_v57 = vpack.i.b16 %v8817_v34, %v8817_v34  ;;  %v8925_v13 = vshrl.u32 %v8817_v34, 16  ;;  %v9009_v41 = vrot.slane %v8817_v34, 6  ;;  %v9065_v49 = vsel %vm3794_vm0, %v9060_v19, %v9064_v12 }
 0x70c   :  { %v8742_v29 = vmax.f32 %v8700_v37, 0.0  ;;  %v8794_v24 = vcombine.low %v8740_v5, %v8741_v16  ;;  %9187 = vrot.lane.b32.xlu0 %v9065_v49, %s11435_s25  ;;  %v8631_v58 = vadd.f32 %v8630_v53, %v18484_v3  ;;  %v9297_v31 = vor.u32 %v9296_v43, %v9295_v54  ;;  %v11174_v61 = vpop.f32.mrf.mxu0 }
 0x70d   :  { %v8847_v9 = vrot.slane %v8842_v57, %v18487_v38  ;;  %v8926_v47 = vpack.i.b16 %v8925_v13, %v8925_v13  ;;  %v9300_v17 = vrot.slane %v9298_v52, 1  ;;  %v9068_v11 = vshll.u32 %v16738_v60, 16 }
 0x70e   :  { %v8818_v36 = vpack.c.bf16 %v8742_v29, %v8794_v24  ;;  %v8701_v42 = vcombine.high %v8631_v58, %v8631_v58  ;;  %v8743_v6 = vmax.f32 %v8631_v58, 0.0  ;;  %v8633_v46 = vpop.f32.mrf.mxu0  ;;  %v9073_v20 = vshll.u32 %v16735_v27, 16 }
 0x70f   :  { %v16748_v32 = vrot.slane %v8926_v47, %v18488_v48  ;;  %v16751_v14 = vsel %vm18491_vm3, %v8847_v9, %v9009_v41  ;;  %v9302_v8 = vor.u32 %v9301_v15, %v9300_v17  ;;  %v8634_v63 = vadd.f32 %v8633_v46, %v18485_v40  ;;  %vm18501_vm3 = vmmov %vm18497_vm6 }
 0x710   :  { %v8849_v1 = vpack.i.b16 %v8818_v36, %v8818_v36  ;;  %v8932_v25 = vshrl.u32 %v8818_v36, 16  ;;  %v9010_v10 = vrot.slane %v8818_v36, 6  ;;  %v8744_v30 = vmax.f32 %v8701_v42, 0.0  ;;  %v11175_v33 = vpop.f32.mrf.mxu0 }
 0x711   :  { %v9303_v45 = vsel %vm18492_vm13, %v9297_v31, %v9302_v8  ;;  %v9070_v26 = vrot.slane %v9068_v11, 1  ;;  %v9075_v22 = vrot.slane %v9073_v20, 1  ;;  %v9238_v0 = vrot.slane %v16738_v60, 1  ;;  %vm18502_vm13 = vmmov %vm18498_vm8 }
 0x712   :  { %v8854_v50 = vrot.slane %v8849_v1, %v18487_v38  ;;  %v8933_v55 = vpack.i.b16 %v8932_v25, %v8932_v25  ;;  %v8795_v62 = vcombine.low %v8743_v6, %v8744_v30  ;;  %9403 = vrot.lane.b32.xlu0 %v9303_v45, %s11436_s10  ;;  %v8702_v39 = vcombine.high %v8634_v63, %v8634_v63 }
 0x713   :  { %v8745_v28 = vmax.f32 %v8634_v63, 0.0  ;;  %v9071_v35 = vor.u32 %v9070_v26, %v9066_v44  ;;  %v9239_v59 = vrot.slane %v16735_v27, 1  ;;  %v9304_v54 = vrot.slane %v9066_v44, 1 }
 0x714   :  { %v16761_v4 = vrot.slane %v8933_v55, %v18488_v48  ;;  %v16764_v7 = vsel %vm18493_vm14, %v8854_v50, %v9010_v10  ;;  %v9305_v21 = vrot.slane %v9068_v11, 2  ;;  %v8746_v12 = vmax.f32 %v8702_v39, 0.0  ;;  %vm18503_vm14 = vmmov %vm18501_vm3 }
 0x715   :  { %v8819_v5 = vpack.c.bf16 %v8745_v28, %v8795_v62  ;;  %v9076_v34 = vsel %vm3794_vm0, %v9071_v35, %v9075_v22  ;;  %v9240_v2 = vsel %vm3975_vm10, %v9238_v0, %v9239_v59  ;;  %v9307_v43 = vshrl.u32 %v16735_v27, 16 }
 0x716   :  { %9189 = vrot.lane.b32.xlu1 %v9076_v34, %s11435_s25  ;;  %9273 = vrot.lane.b32.xlu0 %v9240_v2, %s11434_s4  ;;  %v9306_v19 = vor.u32 %v9305_v21, %v9304_v54  ;;  %v9310_v37 = vrot.slane %v9073_v20, 2  ;;  %v9077_v16 = vshrl.u32 %v16751_v14, 16  ;;  %v9079_v13 = vshll.u32 %v16751_v14, 16 }
 0x717   :  { %v8856_v52 = vpack.i.b16 %v8819_v5, %v8819_v5  ;;  %v8939_v15 = vshrl.u32 %v8819_v5, 16  ;;  %v9011_v57 = vrot.slane %v8819_v5, 6  ;;  %v9309_v41 = vrot.slane %v9307_v43, 1 }
 0x718   :  { %v9084_v49 = vshll.u32 %v16748_v32, 16  ;;  %v9241_v53 = vrot.slane %v16751_v14, 1  ;;  %v9242_v29 = vrot.slane %v16748_v32, 1  ;;  %v9081_v31 = vrot.slane %v9079_v13, 1 }
 0x719   :  { %v8861_v24 = vrot.slane %v8856_v52, %v18487_v38  ;;  %v8940_v58 = vpack.i.b16 %v8939_v15, %v8939_v15  ;;  %v9313_v9 = vrot.slane %v9077_v16, 1  ;;  %v9311_v47 = vor.u32 %v9310_v37, %v9309_v41 }
 0x71a   :  { %v9086_v61 = vrot.slane %v9084_v49, 1  ;;  %v9243_v17 = vsel %vm3975_vm10, %v9241_v53, %v9242_v29  ;;  %v9314_v44 = vrot.slane %v9079_v13, 2  ;;  %v9082_v6 = vor.u32 %v9081_v31, %v9077_v16 }
 0x71b   :  { %v16779_v36 = vrot.slane %v8940_v58, %v18488_v48  ;;  %v16782_v42 = vsel %vm18494_vm11, %v8861_v24, %v9011_v57  ;;  %v9316_v11 = vshrl.u32 %v16748_v32, 16  ;;  %v9312_v8 = vsel %vm18495_vm12, %v9306_v19, %v9311_v47  ;;  %vm18504_vm11 = vmmov %vm18501_vm3 }
 0x71c   :  { %v9315_v46 = vor.u32 %v9314_v44, %v9313_v9  ;;  %v9319_v20 = vrot.slane %v9084_v49, 2  ;;  %v9088_v1 = vshrl.u32 %v16764_v7, 16  ;;  %9405 = vrot.lane.b32.xlu1 %v9312_v8, %s11436_s10  ;;  %v9087_v25 = vsel %vm3794_vm0, %v9082_v6, %v9086_v61  ;;  %vm18505_vm12 = vmmov %vm18498_vm8 }
 0x71d   :  { %v9318_v10 = vrot.slane %v9316_v11, 1  ;;  %v9090_v30 = vshll.u32 %v16764_v7, 16  ;;  %v9095_v45 = vshll.u32 %v16761_v4, 16  ;;  %v8638_v63 = vpop.f32.mrf.mxu0  ;;  %9191 = vrot.lane.b32.xlu0 %v9087_v25, %s11435_s25  ;;  %v9244_v26 = vrot.slane %v16764_v7, 1 }
 0x71e   :  { %v9245_v22 = vrot.slane %v16761_v4, 1  ;;  %v8639_v33 = vadd.f32 %v8638_v63, %v18486_v18  ;;  %v9322_v50 = vrot.slane %v9088_v1, 1  ;;  %v9325_v21 = vshrl.u32 %v16761_v4, 16 }
 0x71f   :  { %v9320_v55 = vor.u32 %v9319_v20, %v9318_v10  ;;  %v9092_v62 = vrot.slane %v9090_v30, 1  ;;  %v9097_v0 = vrot.slane %v9095_v45, 1  ;;  %v9323_v39 = vrot.slane %v9090_v30, 2  ;;  %v11178_v28 = vpop.f32.mrf.mxu0 }
 0x720   :  { %v9246_v35 = vsel %vm3975_vm10, %v9244_v26, %v9245_v22  ;;  %v8703_v59 = vcombine.high %v8639_v33, %v8639_v33  ;;  %v8747_v54 = vmax.f32 %v8639_v33, 0.0  ;;  %9275 = vrot.lane.b32.xlu1 %v9243_v17, %s11434_s4  ;;  %v9328_v19 = vrot.slane %v9095_v45, 2 }
 0x721   :  { %v9321_v5 = vsel %vm18496_vm7, %v9315_v46, %v9320_v55  ;;  %v9093_v34 = vor.u32 %v9092_v62, %v9088_v1  ;;  %v9324_v2 = vor.u32 %v9323_v39, %v9322_v50  ;;  %v8641_v43 = vpop.f32.mrf.mxu0  ;;  %v9327_v52 = vrot.slane %v9325_v21, 1  ;;  %vm18506_vm7 = vmmov %vm18498_vm8 }
 0x722   :  { %9407 = vrot.lane.b32.xlu0 %v9321_v5, %s11436_s10  ;;  %v8748_v37 = vmax.f32 %v8703_v59, 0.0  ;;  %v8796_v16 = vcombine.low %v8746_v12, %v8747_v54  ;;  %v9099_v15 = vshrl.u32 %v16782_v42, 16  ;;  %v9101_v13 = vshll.u32 %v16782_v42, 16 }
 0x723   :  { %v9098_v57 = vsel %vm3794_vm0, %v9093_v34, %v9097_v0  ;;  %v9106_v41 = vshll.u32 %v16779_v36, 16  ;;  %v8642_v49 = vadd.f32 %v8641_v43, %v18484_v3  ;;  %v11179_v53 = vpop.f32.mrf.mxu0  ;;  %v9329_v24 = vor.u32 %v9328_v19, %v9327_v52 }
 0x724   :  { %v8820_v29 = vpack.c.bf16 %v8748_v37, %v8796_v16  ;;  %v9247_v58 = vrot.slane %v16782_v42, 1  ;;  %v9248_v31 = vrot.slane %v16779_v36, 1  ;;  %9193 = vrot.lane.b32.xlu1 %v9098_v57, %s11435_s25  ;;  %v9103_v12 = vrot.slane %v9101_v13, 1 }
 0x725   :  { %v9108_v9 = vrot.slane %v9106_v41, 1  ;;  %v8704_v47 = vcombine.high %v8642_v49, %v8642_v49  ;;  %v8749_v61 = vmax.f32 %v8642_v49, 0.0  ;;  %v8646_v17 = vpop.f32.mrf.mxu0  ;;  %v9330_v8 = vsel %vm18497_vm6, %v9324_v2, %v9329_v24  ;;  %vm18507_vm6 = vmmov %vm18501_vm3 }
 0x726   :  { %9277 = vrot.lane.b32.xlu0 %v9246_v35, %s11434_s4  ;;  %v8863_v44 = vpack.i.b16 %v8820_v29, %v8820_v29  ;;  %v8946_v6 = vshrl.u32 %v8820_v29, 16  ;;  %v9012_v11 = vrot.slane %v8820_v29, 6  ;;  %v9104_v46 = vor.u32 %v9103_v12, %v9099_v15 }
 0x727   :  { %v8750_v20 = vmax.f32 %v8704_v47, 0.0  ;;  %v9249_v1 = vsel %vm3975_vm10, %v9247_v58, %v9248_v31  ;;  %v9331_v25 = vrot.slane %v9099_v15, 1  ;;  %v11182_v10 = vpop.f32.mrf.mxu0  ;;  %v9332_v63 = vrot.slane %v9101_v13, 2 }
 0x728   :  { %v8868_v30 = vrot.slane %v8863_v44, %v18487_v38  ;;  %v8947_v45 = vpack.i.b16 %v8946_v6, %v8946_v6  ;;  %v9334_v26 = vshrl.u32 %v16779_v36, 16  ;;  %9409 = vrot.lane.b32.xlu1 %v9330_v8, %s11436_s10  ;;  %v9109_v22 = vsel %vm3794_vm0, %v9104_v46, %v9108_v9 }
 0x729   :  { %v8797_v33 = vcombine.low %v8749_v61, %v8750_v20  ;;  %v9337_v50 = vrot.slane %v9106_v41, 2  ;;  %v8647_v55 = vadd.f32 %v8646_v17, %v18485_v40  ;;  %v8649_v62 = vpop.f32.mrf.mxu0  ;;  %v9333_v28 = vor.u32 %v9332_v63, %v9331_v25 }
 0x72a   :  { %v16817_v0 = vrot.slane %v8947_v45, %v18488_v48  ;;  %v16820_v39 = vsel %vm18498_vm8, %v8868_v30, %v9012_v11  ;;  %9195 = vrot.lane.b32.xlu0 %v9109_v22, %s11435_s25  ;;  %v9336_v35 = vrot.slane %v9334_v26, 1  ;;  %v8650_v21 = vadd.f32 %v8649_v62, %v18486_v18  ;;  %vm18508_vm8 = vmmov %vm18506_vm7 }
 0x72b   :  { %v8705_v59 = vcombine.high %v8647_v55, %v8647_v55  ;;  %v8751_v54 = vmax.f32 %v8647_v55, 0.0  ;;  %v11183_v5 = vpop.f32.mrf.mxu0  ;;  %v9250_v34 = vrot.slane %v16820_v39, 1  ;;  %v9110_v43 = vshrl.u32 %v16820_v39, 16 }
 0x72c   :  { %v9338_v2 = vor.u32 %v9337_v50, %v9336_v35  ;;  %v9251_v19 = vrot.slane %v16817_v0, 1  ;;  %v9112_v37 = vshll.u32 %v16820_v39, 16  ;;  %9279 = vrot.lane.b32.xlu1 %v9249_v1, %s11434_s4  ;;  %v8706_v15 = vcombine.high %v8650_v21, %v8650_v21 }
 0x72d   :  { %v8752_v16 = vmax.f32 %v8705_v59, 0.0  ;;  %v8821_v52 = vpack.c.bf16 %v8751_v54, %v8797_v33  ;;  %v8753_v57 = vmax.f32 %v8650_v21, 0.0  ;;  %v9117_v53 = vshll.u32 %v16817_v0, 16 }
 0x72e   :  { %v9339_v13 = vsel %vm18499_vm9, %v9333_v28, %v9338_v2  ;;  %v9252_v41 = vsel %vm3975_vm10, %v9250_v34, %v9251_v19  ;;  %v9114_v49 = vrot.slane %v9112_v37, 1  ;;  %v8754_v31 = vmax.f32 %v8706_v15, 0.0  ;;  %vm18509_vm9 = vmmov %vm18506_vm7 }
 0x72f   :  { %9411 = vrot.lane.b32.xlu0 %v9339_v13, %s11436_s10  ;;  %v8870_v29 = vpack.i.b16 %v8821_v52, %v8821_v52  ;;  %v8953_v24 = vshrl.u32 %v8821_v52, 16  ;;  %v9013_v58 = vrot.slane %v8821_v52, 6  ;;  %v8798_v12 = vcombine.low %v8752_v16, %v8753_v57 }
 0x730   :  { %v9115_v9 = vor.u32 %v9114_v49, %v9110_v43  ;;  %v9119_v47 = vrot.slane %v9117_v53, 1  ;;  %v9340_v61 = vrot.slane %v9110_v43, 1  ;;  %v9341_v6 = vrot.slane %v9112_v37, 2 }
 0x731   :  { %v8875_v17 = vrot.slane %v8870_v29, %v18487_v38  ;;  %v8954_v44 = vpack.i.b16 %v8953_v24, %v8953_v24  ;;  %v9343_v11 = vshrl.u32 %v16817_v0, 16  ;;  %v8822_v8 = vpack.c.bf16 %v8754_v31, %v8798_v12 }
 0x732   :  { %v9120_v46 = vsel %vm3794_vm0, %v9115_v9, %v9119_v47  ;;  %v9346_v20 = vrot.slane %v9117_v53, 2  ;;  %v9342_v10 = vor.u32 %v9341_v6, %v9340_v61 }
 0x733   :  { %v16837_v1 = vrot.slane %v8954_v44, %v18488_v48  ;;  %v16840_v25 = vsel %vm18500_vm15, %v8875_v17, %v9013_v58  ;;  %9281 = vrot.lane.b32.xlu0 %v9252_v41, %s11434_s4  ;;  %9197 = vrot.lane.b32.xlu1 %v9120_v46, %s11435_s25  ;;  %v9345_v30 = vrot.slane %v9343_v11, 1  ;;  %v8877_v45 = vpack.i.b16 %v8822_v8, %v8822_v8  ;;  %vm18510_vm15 = vmmov %vm18501_vm3 }
 0x734   :  { %v8960_v63 = vshrl.u32 %v8822_v8, 16  ;;  %v9014_v26 = vrot.slane %v8822_v8, 6  ;;  %v9121_v22 = vshrl.u32 %v16840_v25, 16  ;;  %v9123_v50 = vshll.u32 %v16840_v25, 16 }
 0x735   :  { %v9347_v33 = vor.u32 %v9346_v20, %v9345_v30  ;;  %v9128_v55 = vshll.u32 %v16837_v1, 16  ;;  %v9253_v62 = vrot.slane %v16840_v25, 1  ;;  %v8882_v28 = vrot.slane %v8877_v45, %v18487_v38 }
 0x736   :  { %v8961_v35 = vpack.i.b16 %v8960_v63, %v8960_v63  ;;  %v9254_v59 = vrot.slane %v16837_v1, 1  ;;  %v9349_v54 = vrot.slane %v9121_v22, 1  ;;  %v9125_v5 = vrot.slane %v9123_v50, 1 }
 0x737   :  { %v9348_v21 = vsel %vm18501_vm3, %v9342_v10, %v9347_v33  ;;  %v9130_v34 = vrot.slane %v9128_v55, 1  ;;  %v9350_v2 = vrot.slane %v9123_v50, 2  ;;  %v16855_v43 = vsel %vm18502_vm13, %v8882_v28, %v9014_v26  ;;  %vm18511_vm13 = vmmov %vm18501_vm3 }
 0x738   :  { %v16852_v19 = vrot.slane %v8961_v35, %v18488_v48  ;;  %9413 = vrot.lane.b32.xlu1 %v9348_v21, %s11436_s10  ;;  %v9352_v37 = vshrl.u32 %v16837_v1, 16  ;;  %v9126_v16 = vor.u32 %v9125_v5, %v9121_v22  ;;  %v9355_v52 = vrot.slane %v9128_v55, 2 }
 0x739   :  { %v9132_v15 = vshrl.u32 %v16855_v43, 16  ;;  %v9255_v57 = vsel %vm3975_vm10, %v9253_v62, %v9254_v59  ;;  %v9134_v41 = vshll.u32 %v16855_v43, 16  ;;  %v9351_v29 = vor.u32 %v9350_v2, %v9349_v54 }
 0x73a   :  { %v9354_v13 = vrot.slane %v9352_v37, 1  ;;  %v9139_v49 = vshll.u32 %v16852_v19, 16  ;;  %v9131_v53 = vsel %vm3794_vm0, %v9126_v16, %v9130_v34  ;;  %v9361_v58 = vshrl.u32 %v16852_v19, 16 }
 0x73b   :  { %v9358_v24 = vrot.slane %v9132_v15, 1  ;;  %9199 = vrot.lane.b32.xlu0 %v9131_v53, %s11435_s25  ;;  %v9136_v12 = vrot.slane %v9134_v41, 1  ;;  %v9359_v47 = vrot.slane %v9134_v41, 2  ;;  %v9256_v11 = vrot.slane %v16855_v43, 1 }
 0x73c   :  { %9283 = vrot.lane.b32.xlu1 %v9255_v57, %s11434_s4  ;;  %v9356_v31 = vor.u32 %v9355_v52, %v9354_v13  ;;  %v9141_v9 = vrot.slane %v9139_v49, 1  ;;  %v9363_v61 = vrot.slane %v9361_v58, 1  ;;  %v9364_v17 = vrot.slane %v9139_v49, 2 }
 0x73d   :  { %v9137_v44 = vor.u32 %v9136_v12, %v9132_v15  ;;  %v9257_v8 = vrot.slane %v16852_v19, 1  ;;  %v9360_v20 = vor.u32 %v9359_v47, %v9358_v24 }
 0x73e   :  { %v9357_v6 = vsel %vm18503_vm14, %v9351_v29, %v9356_v31  ;;  %v9365_v10 = vor.u32 %v9364_v17, %v9363_v61 }
 0x73f   :  { %9415 = vrot.lane.b32.xlu0 %v9357_v6, %s11436_s10  ;;  %v9142_v46 = vsel %vm3794_vm0, %v9137_v44, %v9141_v9  ;;  %v9258_v30 = vsel %vm3975_vm10, %v9256_v11, %v9257_v8 }
 0x740   :  { %9201 = vrot.lane.b32.xlu1 %v9142_v46, %s11435_s25  ;;  %v9366_v45 = vsel %vm18504_vm11, %v9360_v20, %v9365_v10 }
 0x743   :  { %9285 = vrot.lane.b32.xlu0 %v9258_v30, %s11434_s4 }
 0x744   :  { %9417 = vrot.lane.b32.xlu1 %v9366_v45, %s11436_s10 }
 0x74e   :  { %v8654_v63 = vpop.f32.mrf.mxu0 }
 0x74f   :  { %v8655_v26 = vadd.f32 %v8654_v63, %v18484_v3 }
 0x750   :  { %v11186_v22 = vpop.f32.mrf.mxu0 }
 0x751   :  { %v8707_v33 = vcombine.high %v8655_v26, %v8655_v26  ;;  %v8755_v55 = vmax.f32 %v8655_v26, 0.0 }
 0x752   :  { %v8657_v50 = vpop.f32.mrf.mxu0 }
 0x753   :  { %v8756_v62 = vmax.f32 %v8707_v33, 0.0  ;;  %v8658_v28 = vadd.f32 %v8657_v50, %v18485_v40 }
 0x754   :  { %v11187_v35 = vpop.f32.mrf.mxu0 }
 0x755   :  { %v8799_v59 = vcombine.low %v8755_v55, %v8756_v62  ;;  %v8757_v54 = vmax.f32 %v8658_v28, 0.0  ;;  %v8708_v5 = vcombine.high %v8658_v28, %v8658_v28 }
 0x757   :  { %v8823_v21 = vpack.c.bf16 %v8757_v54, %v8799_v59  ;;  %v8758_v41 = vmax.f32 %v8708_v5, 0.0 }
 0x759   :  { %v8884_v34 = vpack.i.b16 %v8823_v21, %v8823_v21  ;;  %v8967_v2 = vshrl.u32 %v8823_v21, 16  ;;  %v8662_v37 = vpop.f32.mrf.mxu0  ;;  %v9015_v57 = vrot.slane %v8823_v21, 6 }
 0x75a   :  { %v8663_v16 = vadd.f32 %v8662_v37, %v18486_v18 }
 0x75b   :  { %v8889_v52 = vrot.slane %v8884_v34, %v18487_v38  ;;  %v8968_v15 = vpack.i.b16 %v8967_v2, %v8967_v2  ;;  %v11190_v13 = vpop.f32.mrf.mxu0 }
 0x75c   :  { %v8709_v49 = vcombine.high %v8663_v16, %v8663_v16  ;;  %v8759_v53 = vmax.f32 %v8663_v16, 0.0 }
 0x75d   :  { %v16882_v29 = vrot.slane %v8968_v15, %v18488_v48  ;;  %v16885_v24 = vsel %vm18505_vm12, %v8889_v52, %v9015_v57  ;;  %v8665_v58 = vpop.f32.mrf.mxu0 }
 0x75e   :  { %v8760_v31 = vmax.f32 %v8709_v49, 0.0  ;;  %v8800_v12 = vcombine.low %v8758_v41, %v8759_v53  ;;  %v8666_v9 = vadd.f32 %v8665_v58, %v18484_v3  ;;  %v9259_v47 = vrot.slane %v16885_v24, 1 }
 0x75f   :  { %v11191_v61 = vpop.f32.mrf.mxu0  ;;  %v9260_v17 = vrot.slane %v16882_v29, 1  ;;  %v9143_v44 = vshrl.u32 %v16885_v24, 16  ;;  %v9145_v6 = vshll.u32 %v16885_v24, 16  ;;  %v9150_v11 = vshll.u32 %v16882_v29, 16 }
 0x760   :  { %v8824_v8 = vpack.c.bf16 %v8760_v31, %v8800_v12  ;;  %v8710_v46 = vcombine.high %v8666_v9, %v8666_v9  ;;  %v8761_v20 = vmax.f32 %v8666_v9, 0.0  ;;  %v9370_v10 = vshrl.u32 %v16882_v29, 16 }
 0x761   :  { %v9261_v30 = vsel %vm3975_vm10, %v9259_v47, %v9260_v17  ;;  %v8670_v45 = vpop.f32.mrf.mxu0  ;;  %v9147_v3 = vrot.slane %v9145_v6, 1  ;;  %v9152_v63 = vrot.slane %v9150_v11, 1  ;;  %v9367_v26 = vrot.slane %v9143_v44, 1 }
 0x762   :  { %v8891_v22 = vpack.i.b16 %v8824_v8, %v8824_v8  ;;  %v8974_v33 = vshrl.u32 %v8824_v8, 16  ;;  %v9016_v50 = vrot.slane %v8824_v8, 6  ;;  %v8762_v55 = vmax.f32 %v8710_v46, 0.0  ;;  %9287 = vrot.lane.b32.xlu1 %v9261_v30, %s11434_s4 }
 0x763   :  { %v8671_v62 = vadd.f32 %v8670_v45, %v18485_v40  ;;  %v11194_v28 = vpop.f32.mrf.mxu0  ;;  %v9148_v35 = vor.u32 %v9147_v3, %v9143_v44  ;;  %v9368_v59 = vrot.slane %v9145_v6, 2  ;;  %v9372_v54 = vrot.slane %v9370_v10, 1 }
 0x764   :  { %v8896_v21 = vrot.slane %v8891_v22, %v18487_v38  ;;  %v8975_v5 = vpack.i.b16 %v8974_v33, %v8974_v33  ;;  %v8801_v34 = vcombine.low %v8761_v20, %v8762_v55  ;;  %v9373_v2 = vrot.slane %v9150_v11, 2 }
 0x765   :  { %v8711_v37 = vcombine.high %v8671_v62, %v8671_v62  ;;  %v8763_v16 = vmax.f32 %v8671_v62, 0.0  ;;  %v9153_v52 = vsel %vm3794_vm0, %v9148_v35, %v9152_v63  ;;  %v8673_v15 = vpop.f32.mrf.mxu0  ;;  %v9369_v57 = vor.u32 %v9368_v59, %v9367_v26 }
 0x766   :  { %v16900_v13 = vrot.slane %v8975_v5, %v18488_v48  ;;  %v16903_v40 = vsel %vm18506_vm7, %v8896_v21, %v9016_v50  ;;  %9203 = vrot.lane.b32.xlu0 %v9153_v52, %s11435_s25  ;;  %v8674_v41 = vadd.f32 %v8673_v15, %v18486_v18  ;;  %v9374_v49 = vor.u32 %v9373_v2, %v9372_v54 }
 0x767   :  { %v8764_v53 = vmax.f32 %v8711_v37, 0.0  ;;  %v8825_v58 = vpack.c.bf16 %v8763_v16, %v8801_v34  ;;  %v11195_v31 = vpop.f32.mrf.mxu0  ;;  %v9262_v12 = vrot.slane %v16903_v40, 1  ;;  %v9154_v9 = vshrl.u32 %v16903_v40, 16 }
 0x768   :  { %v8712_v47 = vcombine.high %v8674_v41, %v8674_v41  ;;  %v8765_v61 = vmax.f32 %v8674_v41, 0.0  ;;  %v9375_v17 = vsel %vm18507_vm6, %v9369_v57, %v9374_v49  ;;  %v9263_v44 = vrot.slane %v16900_v13, 1 }
 0x769   :  { %v8898_v6 = vpack.i.b16 %v8825_v58, %v8825_v58  ;;  %v8981_v11 = vshrl.u32 %v8825_v58, 16  ;;  %v9017_v8 = vrot.slane %v8825_v58, 6  ;;  %v9156_v46 = vshll.u32 %v16903_v40, 16 }
 0x76a   :  { %v8766_v18 = vmax.f32 %v8712_v47, 0.0  ;;  %v8802_v20 = vcombine.low %v8764_v53, %v8765_v61  ;;  %9419 = vrot.lane.b32.xlu0 %v9375_v17, %s11436_s10  ;;  %v9264_v10 = vsel %vm3975_vm10, %v9262_v12, %v9263_v44  ;;  %v9161_v30 = vshll.u32 %v16900_v13, 16 }
 0x76b   :  { %v8903_v45 = vrot.slane %v8898_v6, %v18487_v38  ;;  %v8982_v3 = vpack.i.b16 %v8981_v11, %v8981_v11  ;;  %v9158_v63 = vrot.slane %v9156_v46, 1  ;;  %v9376_v26 = vrot.slane %v9154_v9, 1 }
 0x76c   :  { %v8826_v22 = vpack.c.bf16 %v8766_v18, %v8802_v20  ;;  %v9163_v33 = vrot.slane %v9161_v30, 1  ;;  %v9377_v50 = vrot.slane %v9156_v46, 2  ;;  %v9379_v55 = vshrl.u32 %v16900_v13, 16 }
 0x76d   :  { %v16918_v62 = vrot.slane %v8982_v3, %v18488_v48  ;;  %v16921_v28 = vsel %vm18508_vm8, %v8903_v45, %v9017_v8  ;;  %v9159_v35 = vor.u32 %v9158_v63, %v9154_v9  ;;  %v9382_v59 = vrot.slane %v9161_v30, 2 }
 0x76e   :  { %v8905_v54 = vpack.i.b16 %v8826_v22, %v8826_v22  ;;  %v8988_v21 = vshrl.u32 %v8826_v22, 16  ;;  %v9018_v5 = vrot.slane %v8826_v22, 6  ;;  %9289 = vrot.lane.b32.xlu0 %v9264_v10, %s11434_s4  ;;  %v9378_v34 = vor.u32 %v9377_v50, %v9376_v26 }
 0x76f   :  { %v9164_v2 = vsel %vm3794_vm0, %v9159_v35, %v9163_v33  ;;  %v9381_v37 = vrot.slane %v9379_v55, 1  ;;  %v9165_v16 = vshrl.u32 %v16921_v28, 16  ;;  %v9167_v52 = vshll.u32 %v16921_v28, 16 }
 0x770   :  { %v8910_v15 = vrot.slane %v8905_v54, %v18487_v38  ;;  %v8989_v57 = vpack.i.b16 %v8988_v21, %v8988_v21  ;;  %9205 = vrot.lane.b32.xlu1 %v9164_v2, %s11435_s25  ;;  %v9172_v41 = vshll.u32 %v16918_v62, 16  ;;  %v9265_v49 = vrot.slane %v16921_v28, 1 }
 0x771   :  { %v9383_v53 = vor.u32 %v9382_v59, %v9381_v37  ;;  %v9169_v58 = vrot.slane %v9167_v52, 1  ;;  %v9266_v31 = vrot.slane %v16918_v62, 1  ;;  %v9385_v12 = vrot.slane %v9165_v16, 1 }
 0x772   :  { %v16933_v9 = vrot.slane %v8989_v57, %v18488_v48  ;;  %v16936_v47 = vsel %vm18509_vm9, %v8910_v15, %v9018_v5  ;;  %v9174_v61 = vrot.slane %v9172_v41, 1  ;;  %v9386_v38 = vrot.slane %v9167_v52, 2 }
 0x773   :  { %v9384_v17 = vsel %vm18510_vm15, %v9378_v34, %v9383_v53  ;;  %v9170_v44 = vor.u32 %v9169_v58, %v9165_v16  ;;  %v9388_v6 = vshrl.u32 %v16918_v62, 16  ;;  %v9391_v11 = vrot.slane %v9172_v41, 2  ;;  %v11383_v58 = vld [vmem:[%s17801_s5 + $0x128] sm:$0xff]  }
 0x774   :  { %9421 = vrot.lane.b32.xlu1 %v9384_v17, %s11436_s10  ;;  %v9176_v46 = vshrl.u32 %v16936_v47, 16  ;;  %v9178_v48 = vshll.u32 %v16936_v47, 16  ;;  %v9183_v18 = vshll.u32 %v16933_v9, 16  ;;  %v9267_v20 = vsel %vm3975_vm10, %v9265_v49, %v9266_v31  ;;  %v11384_v31 = vld [vmem:[%s17801_s5 + $0xd0] sm:$0xff]   ;;  %v11388_v17 = vld [vmem:[%s17801_s5 + $0xc0] sm:$0xff]  }
 0x775   :  { %v9175_v8 = vsel %vm3794_vm0, %v9170_v44, %v9174_v61  ;;  %v9387_v10 = vor.u32 %v9386_v38, %v9385_v12  ;;  %v9390_v30 = vrot.slane %v9388_v6, 1  ;;  %v9397_v33 = vshrl.u32 %v16933_v9, 16  ;;  %v11385_v12 = vld [vmem:[%s17801_s5 + $0x120] sm:$0xff]   ;;  %v11386_v61 = vld [vmem:[%s17801_s5 + $0xc8] sm:$0xff]   ;;  %v11387_v38 = vld [vmem:[%s17801_s5 + $0x118] sm:$0xff]  }
 0x776   :  { %9207 = vrot.lane.b32.xlu0 %v9175_v8, %s11435_s25  ;;  %v9180_v45 = vrot.slane %v9178_v48, 1  ;;  %v9185_v3 = vrot.slane %v9183_v18, 1  ;;  %v9394_v63 = vrot.slane %v9176_v46, 1  ;;  %v9395_v26 = vrot.slane %v9178_v48, 2  ;;  %v11389_v44 = vld [vmem:[%s17801_s5 + $0x110] sm:$0xff]   ;;  %v11391_v8 = vld [vmem:[%s17801_s5 + $0x108] sm:$0xff]  }
 0x777   :  { %v9392_v22 = vor.u32 %v9391_v11, %v9390_v30  ;;  %v9400_v50 = vrot.slane %v9183_v18, 2  ;;  %v9268_v59 = vrot.slane %v16936_v47, 1  ;;  %v9269_v54 = vrot.slane %v16933_v9, 1  ;;  %v11390_v11 = vld [vmem:[%s17801_s5 + $0xb8] sm:$0xff]  }
 0x778   :  { %9291 = vrot.lane.b32.xlu1 %v9267_v20, %s11434_s4  ;;  %v9181_v55 = vor.u32 %v9180_v45, %v9176_v46  ;;  %v9399_v21 = vrot.slane %v9397_v33, 1  ;;  %v9396_v34 = vor.u32 %v9395_v26, %v9394_v63  ;;  %v9272_v57 = vpop.permute.xlu1 %9271  ;;  %v9430_v46 = vrot.slane %v16738_v60, 2  ;;  %v11392_v20 = vld [vmem:[%s17801_s5 + $0xb0] sm:$0xff]   ;;  %v11395_v63 = vld [vmem:[%s17801_s5 + $0xf8] sm:$0xff]  }
 0x779   :  { %v9393_v35 = vsel %vm18501_vm3, %v9387_v10, %v9392_v22  ;;  %v9270_v16 = vsel %vm3975_vm10, %v9268_v59, %v9269_v54  ;;  %v9431_v48 = vrot.slane %v16735_v27, 2  ;;  %v11393_v10 = vld [vmem:[%s17801_s5 + $0x100] sm:$0xff]   ;;  %v9433_v22 = vrot.slane %v16751_v14, 2 }
 0x77a   :  { %9423 = vrot.lane.b32.xlu0 %v9393_v35, %s11436_s10  ;;  %v9186_v5 = vsel %vm3794_vm0, %v9181_v55, %v9185_v3  ;;  %v9401_v2 = vor.u32 %v9400_v50, %v9399_v21  ;;  %vm18512_vm0 = vcmask 785408   ;;  %v11394_v3 = vld [vmem:[%s17801_s5 + $0xa8] sm:$0xff]   ;;  %v9434_v33 = vrot.slane %v16748_v32, 2  ;;  %v11396_v55 = vld [vmem:[%s17801_s5 + $0xa0] sm:$0xff]   ;;  %v11397_v35 = vld [vmem:[%s17801_s5 + $0xf0] sm:$0xff]  }
 0x77b   :  { %v17036_v27 = vsel %vm4169_vm2, %v9430_v46, %v9431_v48  ;;  %vm18513_vm10 = vmmov %vm18512_vm0  ;;  %v9443_v46 = vrot.slane %v16817_v0, 2 }
 0x77c   :  { %9209 = vrot.lane.b32.xlu1 %v9186_v5, %s11435_s25  ;;  %v9402_v52 = vsel %vm18511_vm13, %v9396_v34, %v9401_v2  ;;  %v17069_v32 = vsel %vm4169_vm2, %v9433_v22, %v9434_v33  ;;  %v11398_v5 = vld [vmem:[%s17801_s5 + $0xe8] sm:$0xff]   ;;  %v11399_v34 = vld [vmem:[%s17801_s5 + $0x138] sm:$0xff]   ;;  %vm18514_vm14 = vmmov %vm18512_vm0  ;;  %v9448_v33 = vrot.slane %v16855_v43, 2 }
 0x77d   :  { %vm18515_vm11 = vmmov %vm18512_vm0 }
 0x77e   :  { %v9188_v37 = vpop.permute.xlu0 %9187  ;;  %9293 = vrot.lane.b32.xlu0 %v9270_v16, %s11434_s4  ;;  %v9437_v16 = vrot.slane %v16761_v4, 2  ;;  %vm18516_vm12 = vmmov %vm18512_vm0 }
 0x77f   :  { %v9464_v15 = vsel %vm4206_vm4, %v16717_v56, %v9188_v37  ;;  %v11382_v56 = vld [vmem:[%s17801_s5 + $0xd8] sm:$0xff]   ;;  %v9436_v37 = vrot.slane %v16764_v7, 2  ;;  %vm18517_vm7 = vmmov %vm18512_vm0 }
 0x780   :  { %9425 = vrot.lane.b32.xlu1 %v9402_v52, %s11436_s10  ;;  %v9488_v41 = vsel %vm3283_vm1, %v9464_v15, %v9272_v57  ;;  %v11400_v52 = vld [vmem:[%s17801_s5 + $0xe0] sm:$0xff]   ;;  %v11401_v15 = vld [vmem:[%s17801_s5 + $0x130] sm:$0xff]   ;;  %vm18518_vm6 = vmmov %vm18512_vm0 }
 0x781   :  { %v17101_v4 = vsel %vm4169_vm2, %v9436_v37, %v9437_v16  ;;  %vm18519_vm8 = vmmov %vm18512_vm0  ;;  %v9454_v16 = vrot.slane %v16903_v40, 2 }
 0x782   :  { %vm18520_vm9 = vmmov %vm18512_vm0 }
 0x783   :  { %vm18521_vm15 = vmmov %vm18512_vm0 }
 0x784   :  { %v9404_v49 = vpop.permute.xlu0 %9403  ;;  %vm18522_vm3 = vmmov %vm18512_vm0 }
 0x785   :  { %v16963_v53 = vsel %vm18512_vm0, %v9488_v41, %v9404_v49  ;;  %vm18523_vm13 = vmmov %vm18512_vm0 }
 0x786   :  { %9616 = vmatmul.mubr.bf16.vlgmr.msra.gmra.mxu1 %v16963_v53  ;;  %9777 = vmatmul.mubr.bf16.vlgmr.msra.gmra.mxu0 %v16963_v53 }
 0x787   :  { %10831 = vmatprep.mubr.msk.bf16.mxu1 %vm4206_vm4, %v16723_v51  ;;  %10847 = vmatprep.mubr.msk.bf16.mxu0 %vm4206_vm4, %v16723_v51 }
 0x788   :  { %9906 = vmatpush1.bf16.msra.mxu1 %v11382_v56  ;;  %10099 = vmatpush1.bf16.msra.mxu0 %v11383_v58  ;;  %v9190_v6 = vpop.permute.xlu1 %9189  ;;  %v9274_v18 = vpop.permute.xlu0 %9273 }
 0x789   :  { %9907 = vmatprep.subr.bf16.mxu1 %v18138_v23  ;;  %10100 = vmatprep.subr.bf16.mxu0 %v18138_v23  ;;  %v9466_v45 = vsel %vm4206_vm4, %v16738_v60, %v9190_v6 }
 0x78a   :  { %v9490_v60 = vsel %vm3283_vm1, %v9466_v45, %v9274_v18 }
 0x78c   :  { %9908 = vmatpush1.bf16.msra.mxu1 %v11384_v31  ;;  %10101 = vmatpush1.bf16.msra.mxu0 %v11385_v12  ;;  %v9439_v31 = vrot.slane %v16782_v42, 2  ;;  %v9440_v12 = vrot.slane %v16779_v36, 2 }
 0x78d   :  { %9909 = vmatprep.subr.bf16.mxu1 %v18138_v23  ;;  %10102 = vmatprep.subr.bf16.mxu0 %v18138_v23 }
 0x78e   :  { %9624 = vmatmul.mubr.bf16.gmra.mxu1 %v16963_v53  ;;  %9785 = vmatmul.mubr.bf16.gmra.mxu0 %v16963_v53  ;;  %v9406_v30 = vpop.permute.xlu1 %9405 }
 0x78f   :  { %10832 = vmatprep.mubr.msk.bf16.mxu1 %vm4206_vm4, %v16723_v51  ;;  %10848 = vmatprep.mubr.msk.bf16.mxu0 %vm4206_vm4, %v16723_v51  ;;  %v9192_v26 = vpop.permute.xlu0 %9191  ;;  %v17062_v59 = vsel %vm18513_vm10, %v9490_v60, %v9406_v30  ;;  %v9446_v30 = vrot.slane %v16837_v1, 2 }
 0x790   :  { %9910 = vmatpush1.bf16.msra.mxu1 %v11386_v61  ;;  %10103 = vmatpush1.bf16.msra.mxu0 %v11387_v38  ;;  %v9468_v54 = vsel %vm4206_vm4, %v16751_v14, %v9192_v26 }
 0x791   :  { %9911 = vmatprep.subr.bf16.mxu1 %v18138_v23  ;;  %10104 = vmatprep.subr.bf16.mxu0 %v18138_v23 }
 0x792   :  { %v9276_v50 = vpop.permute.xlu1 %9275 }
 0x793   :  { %v9492_v14 = vsel %vm3283_vm1, %v9468_v54, %v9276_v50  ;;  %v9449_v50 = vrot.slane %v16852_v19, 2 }
 0x794   :  { %9912 = vmatpush1.bf16.msra.mxu1 %v11388_v17  ;;  %10105 = vmatpush1.bf16.msra.mxu0 %v11389_v44  ;;  %v9408_v21 = vpop.permute.xlu0 %9407 }
 0x795   :  { %9913 = vmatprep.subr.bf16.mxu1 %v18138_v23  ;;  %10106 = vmatprep.subr.bf16.mxu0 %v18138_v23  ;;  %v17095_v57 = vsel %vm18514_vm14, %v9492_v14, %v9408_v21  ;;  %v9452_v14 = vrot.slane %v16882_v29, 2 }
 0x796   :  { %9632 = vmatmul.mubr.bf16.gmra.mxu1 %v16963_v53  ;;  %9793 = vmatmul.mubr.bf16.gmra.mxu0 %v16963_v53  ;;  %v9194_v2 = vpop.permute.xlu1 %9193 }
 0x797   :  { %10833 = vmatprep.mubr.msk.bf16.mxu1 %vm4206_vm4, %v16723_v51  ;;  %10849 = vmatprep.mubr.msk.bf16.mxu0 %vm4206_vm4, %v16723_v51  ;;  %v9470_v49 = vsel %vm4206_vm4, %v16764_v7, %v9194_v2  ;;  %v17118_v7 = vsel %vm4169_vm2, %v9439_v31, %v9440_v12  ;;  %v9457_v12 = vrot.slane %v16921_v28, 2 }
 0x798   :  { %9914 = vmatpush1.bf16.msra.mxu1 %v11390_v11  ;;  %10107 = vmatpush1.bf16.msra.mxu0 %v11391_v8  ;;  %v9278_v41 = vpop.permute.xlu0 %9277  ;;  %v9442_v8 = vrot.slane %v16820_v39, 2 }
 0x799   :  { %9915 = vmatprep.subr.bf16.mxu1 %v18138_v23  ;;  %10108 = vmatprep.subr.bf16.mxu0 %v18138_v23  ;;  %v9494_v58 = vsel %vm3283_vm1, %v9470_v49, %v9278_v41 }
 0x79a   :  { %v9410_v56 = vpop.permute.xlu1 %9409 }
 0x79b   :  { %v17113_v38 = vsel %vm18515_vm11, %v9494_v58, %v9410_v56 }
 0x79c   :  { %9916 = vmatpush1.bf16.msra.mxu1 %v11392_v20  ;;  %10109 = vmatpush1.bf16.msra.mxu0 %v11393_v10  ;;  %v9196_v61 = vpop.permute.xlu0 %9195  ;;  %v9445_v10 = vrot.slane %v16840_v25, 2 }
 0x79d   :  { %9917 = vmatprep.subr.bf16.mxu1 %v18138_v23  ;;  %10110 = vmatprep.subr.bf16.mxu0 %v18138_v23  ;;  %v9472_v44 = vsel %vm4206_vm4, %v16782_v42, %v9196_v61  ;;  %v17135_v42 = vsel %vm4169_vm2, %v9442_v8, %v9443_v46  ;;  %v9458_v61 = vrot.slane %v16918_v62, 2  ;;  %v9460_v8 = vrot.slane %v16936_v47, 2 }
 0x79e   :  { %9640 = vmatmul.mubr.bf16.gmra.mxu1 %v16963_v53  ;;  %9801 = vmatmul.mubr.bf16.gmra.mxu0 %v16963_v53  ;;  %v9280_v17 = vpop.permute.xlu1 %9279  ;;  %v17152_v26 = vsel %vm4169_vm2, %v9445_v10, %v9446_v30  ;;  %v9461_v46 = vrot.slane %v16933_v9, 2 }
 0x79f   :  { %10834 = vmatprep.mubr.msk.bf16.mxu1 %vm4206_vm4, %v17036_v27  ;;  %10850 = vmatprep.mubr.msk.bf16.mxu0 %vm4206_vm4, %v16723_v51  ;;  %v9496_v36 = vsel %vm3283_vm1, %v9472_v44, %v9280_v17 }
 0x7a0   :  { %9918 = vmatpush1.bf16.msra.mxu1 %v11394_v3  ;;  %10111 = vmatpush1.bf16.msra.mxu0 %v11395_v63 }
 0x7a1   :  { %9919 = vmatprep.subr.bf16.mxu1 %v18138_v23  ;;  %10112 = vmatprep.subr.bf16.mxu0 %v18138_v23  ;;  %v9412_v6 = vpop.permute.xlu0 %9411 }
 0x7a2   :  { %v17130_v48 = vsel %vm18516_vm12, %v9496_v36, %v9412_v6 }
 0x7a4   :  { %9920 = vmatpush1.bf16.msra.mxu1 %v11396_v55  ;;  %10113 = vmatpush1.bf16.msra.mxu0 %v11397_v35 }
 0x7a5   :  { %9933 = vmatprep.subr.bf16.mxu1 %v18138_v23  ;;  %10126 = vmatprep.subr.bf16.mxu0 %v18138_v23  ;;  %v9198_v11 = vpop.permute.xlu1 %9197  ;;  %v9282_v18 = vpop.permute.xlu0 %9281 }
 0x7a6   :  { %9648 = vmatmul.mubr.bf16.gmra.mxu1 %v17062_v59  ;;  %9809 = vmatmul.mubr.bf16.gmra.mxu0 %v16963_v53  ;;  %v9474_v0 = vsel %vm4206_vm4, %v16820_v39, %v9198_v11 }
 0x7a7   :  { %10835 = vmatprep.mubr.msk.bf16.mxu1 %vm4206_vm4, %v17069_v32  ;;  %10851 = vmatprep.mubr.msk.bf16.mxu0 %vm4206_vm4, %v17036_v27  ;;  %v9498_v3 = vsel %vm3283_vm1, %v9474_v0, %v9282_v18 }
 0x7a8   :  { %9934 = vmatpush2.bf16.msra.mxu1 %v11398_v5  ;;  %10127 = vmatpush2.bf16.msra.mxu0 %v11399_v34  ;;  %v9451_v34 = vrot.slane %v16885_v24, 2 }
 0x7a9   :  { %9935 = vmatprep.subr.bf16.mxu1 %v18138_v23  ;;  %10128 = vmatprep.subr.bf16.mxu0 %v18138_v23 }
 0x7aa   :  { %v9414_v20 = vpop.permute.xlu1 %9413 }
 0x7ab   :  { %v17147_v63 = vsel %vm18517_vm7, %v9498_v3, %v9414_v20 }
 0x7ac   :  { %9936 = vmatpush2.bf16.msra.mxu1 %v11400_v52  ;;  %10129 = vmatpush2.bf16.msra.mxu0 %v11401_v15  ;;  %v9455_v52 = vrot.slane %v16900_v13, 2 }
 0x7ad   :  { %10291 = vmatprep.subr.bf16.mxu1 %v18138_v23  ;;  %v9200_v45 = vpop.permute.xlu0 %9199 }
 0x7ae   :  { %9656 = vmatmul.mubr.bf16.gmra.mxu1 %v17095_v57  ;;  %9817 = vmatmul.mubr.bf16.gmra.mxu0 %v17062_v59  ;;  %v9284_v60 = vpop.permute.xlu1 %9283  ;;  %v9476_v39 = vsel %vm4206_vm4, %v16840_v25, %v9200_v45  ;;  %v17169_v25 = vsel %vm4169_vm2, %v9448_v33, %v9449_v50  ;;  %v11406_v33 = vld [vmem:[%s17801_s5 + $0x158] sm:$0xff]   ;;  %v11407_v50 = vld [vmem:[%s17801_s5 + $0x150] sm:$0xff]  }
 0x7af   :  { %10836 = vmatprep.mubr.msk.bf16.mxu1 %vm4206_vm4, %v17101_v4  ;;  %10852 = vmatprep.mubr.msk.bf16.mxu0 %vm4206_vm4, %v17069_v32  ;;  %v9500_v22 = vsel %vm3283_vm1, %v9476_v39, %v9284_v60  ;;  %v11403_v39 = vld [vmem:[%s17801_s5 + $0x170] sm:$0xff]  }
 0x7b1   :  { %v9416_v1 = vpop.permute.xlu0 %9415 }
 0x7b2   :  { %v9202_v55 = vpop.permute.xlu1 %9201  ;;  %v17164_v35 = vsel %vm18518_vm6, %v9500_v22, %v9416_v1  ;;  %v11404_v1 = vld [vmem:[%s17801_s5 + $0x168] sm:$0xff]   ;;  %v11405_v22 = vld [vmem:[%s17801_s5 + $0x160] sm:$0xff]  }
 0x7b3   :  { %v9478_v54 = vsel %vm4206_vm4, %v16855_v43, %v9202_v55  ;;  %v17186_v43 = vsel %vm4169_vm2, %v9451_v34, %v9452_v14  ;;  %v11408_v55 = vld [vmem:[%s17801_s5 + $0x148] sm:$0xff]  }
 0x7b5   :  { %v9286_v21 = vpop.permute.xlu0 %9285 }
 0x7b6   :  { %9664 = vmatmul.mubr.bf16.gmra.mxu1 %v17113_v38  ;;  %9825 = vmatmul.mubr.bf16.gmra.mxu0 %v17095_v57  ;;  %v9502_v19 = vsel %vm3283_vm1, %v9478_v54, %v9286_v21  ;;  %v9418_v5 = vpop.permute.xlu1 %9417  ;;  %v11409_v54 = vld [vmem:[%s17801_s5 + $0x140] sm:$0xff]   ;;  %v11410_v21 = vld [vmem:[%s17801_s5 + $0x188] sm:$0xff]  }
 0x7b7   :  { %10837 = vmatprep.mubr.msk.bf16.mxu1 %vm4206_vm4, %v17118_v7  ;;  %10853 = vmatprep.mubr.msk.bf16.mxu0 %vm4206_vm4, %v17101_v4  ;;  %v17181_v2 = vsel %vm18519_vm8, %v9502_v19, %v9418_v5  ;;  %v11411_v19 = vld [vmem:[%s17801_s5 + $0x180] sm:$0xff]  }
 0x7be   :  { %9672 = vmatmul.mubr.bf16.gmra.mxu1 %v17130_v48  ;;  %9833 = vmatmul.mubr.bf16.gmra.mxu0 %v17113_v38 }
 0x7bf   :  { %10838 = vmatprep.mubr.msk.bf16.mxu1 %vm4206_vm4, %v17135_v42  ;;  %10854 = vmatprep.mubr.msk.bf16.mxu0 %vm4206_vm4, %v17118_v7 }
 0x7c6   :  { %9680 = vmatmul.mubr.bf16.gmra.mxu1 %v17147_v63  ;;  %9841 = vmatmul.mubr.bf16.gmra.mxu0 %v17130_v48 }
 0x7c7   :  { %10839 = vmatprep.mubr.msk.bf16.mxu1 %vm4206_vm4, %v17152_v26  ;;  %10855 = vmatprep.mubr.msk.bf16.mxu0 %vm4206_vm4, %v17135_v42 }
 0x7ce   :  { %9688 = vmatmul.mubr.bf16.gmra.mxu1 %v17164_v35  ;;  %9849 = vmatmul.mubr.bf16.gmra.mxu0 %v17147_v63 }
 0x7cf   :  { %10840 = vmatprep.mubr.msk.bf16.mxu1 %vm4206_vm4, %v17169_v25  ;;  %10856 = vmatprep.mubr.msk.bf16.mxu0 %vm4206_vm4, %v17152_v26 }
 0x7d4   :  { %v9288_v15 = vpop.permute.xlu1 %9287 }
 0x7d6   :  { %9696 = vmatmul.mubr.bf16.gmra.mxu1 %v17181_v2  ;;  %9857 = vmatmul.mubr.bf16.gmra.mxu0 %v17164_v35 }
 0x7d7   :  { %10841 = vmatprep.mubr.msk.bf16.mxu1 %vm4206_vm4, %v17186_v43  ;;  %10857 = vmatprep.mubr.msk.bf16.mxu0 %vm4206_vm4, %v17169_v25 }
 0x7d8   :  { %v9204_v37 = vpop.permute.xlu0 %9203 }
 0x7d9   :  { %v9480_v29 = vsel %vm4206_vm4, %v16885_v24, %v9204_v37  ;;  %v17205_v24 = vsel %vm4169_vm2, %v9454_v16, %v9455_v52 }
 0x7da   :  { %v9504_v41 = vsel %vm3283_vm1, %v9480_v29, %v9288_v15 }
 0x7dc   :  { %v9420_v49 = vpop.permute.xlu0 %9419 }
 0x7dd   :  { %v17199_v56 = vsel %vm18520_vm9, %v9504_v41, %v9420_v49 }
 0x7de   :  { %9865 = vmatmul.mubr.bf16.gmra.mxu0 %v17181_v2  ;;  %9704 = vmatmul.mubr.bf16.gmra.mxu1 %v17199_v56 }
 0x7df   :  { %10858 = vmatprep.mubr.msk.bf16.mxu0 %vm4206_vm4, %v17186_v43  ;;  %10842 = vmatprep.mubr.msk.bf16.mxu1 %vm4206_vm4, %v17205_v24 }
 0x7e0   :  { %v9290_v31 = vpop.permute.xlu0 %9289 }
 0x7e2   :  { %v9206_v13 = vpop.permute.xlu1 %9205 }
 0x7e3   :  { %v9482_v58 = vsel %vm4206_vm4, %v16903_v40, %v9206_v13  ;;  %v17222_v40 = vsel %vm4169_vm2, %v9457_v12, %v9458_v61 }
 0x7e4   :  { %v9506_v17 = vsel %vm3283_vm1, %v9482_v58, %v9290_v31 }
 0x7e6   :  { %9873 = vmatmul.mubr.bf16.gmra.mxu0 %v17199_v56  ;;  %v9422_v44 = vpop.permute.xlu1 %9421 }
 0x7e7   :  { %10859 = vmatprep.mubr.msk.bf16.mxu0 %vm4206_vm4, %v17205_v24  ;;  %v17218_v36 = vsel %vm18521_vm15, %v9506_v17, %v9422_v44 }
 0x7e8   :  { %9712 = vmatmul.mubr.bf16.gmra.mxu1 %v17218_v36  ;;  %v9208_v6 = vpop.permute.xlu0 %9207 }
 0x7e9   :  { %v9484_v62 = vsel %vm4206_vm4, %v16921_v28, %v9208_v6  ;;  %10843 = vmatprep.mubr.msk.bf16.mxu1 %vm4206_vm4, %v17222_v40  ;;  %v17238_v28 = vsel %vm4169_vm2, %v9460_v8, %v9461_v46 }
 0x7ea   :  { %v9292_v11 = vpop.permute.xlu1 %9291 }
 0x7eb   :  { %v9508_v18 = vsel %vm3283_vm1, %v9484_v62, %v9292_v11 }
 0x7ec   :  { %v9424_v20 = vpop.permute.xlu0 %9423 }
 0x7ed   :  { %v17235_v10 = vsel %vm18522_vm3, %v9508_v18, %v9424_v20 }
 0x7ee   :  { %9881 = vmatmul.mubr.bf16.gmra.mxu0 %v17218_v36  ;;  %v9210_v0 = vpop.permute.xlu1 %9209 }
 0x7ef   :  { %10860 = vmatprep.mubr.msk.bf16.mxu0 %vm4206_vm4, %v17222_v40  ;;  %v9486_v9 = vsel %vm4206_vm4, %v16936_v47, %v9210_v0  ;;  %v11402_v47 = vld [vmem:[%s17801_s5 + $0x178] sm:$0xff]  }
 0x7f0   :  { %9720 = vmatmul.mubr.bf16.gmra.mxu1 %v17235_v10  ;;  %v9294_v30 = vpop.permute.xlu0 %9293 }
 0x7f1   :  { %10844 = vmatprep.mubr.msk.bf16.mxu1 %vm4206_vm4, %v17238_v28  ;;  %v9510_v45 = vsel %vm3283_vm1, %v9486_v9, %v9294_v30 }
 0x7f2   :  { %v9426_v3 = vpop.permute.xlu1 %9425 }
 0x7f3   :  { %v17250_v60 = vsel %vm18523_vm13, %v9510_v45, %v9426_v3 }
 0x7f6   :  { %9889 = vmatmul.mubr.bf16.gmra.mxu0 %v17235_v10 }
 0x7f7   :  { %10861 = vmatprep.mubr.msk.bf16.mxu0 %vm4206_vm4, %v17238_v28 }
 0x7f8   :  { %9728 = vmatmul.mubr.bf16.gmra.mxu1 %v17250_v60 }
 0x7f9   :  { %10845 = vmatprep.mubr.msk.bf16.mxu1 %vm4206_vm4, %v17238_v28 }
 0x7fe   :  { %9897 = vmatmul.mubr.bf16.gmra.mxu0 %v17250_v60 }
 0x7ff   :  { %10878 = vmatprep.mubr.msk.bf16.mxu0 %vm4206_vm4, %v16723_v51 }
 0x800   :  { %9736 = vmatmul.mubr.bf16.gmra.mxu1 %v17250_v60 }
 0x801   :  { %10862 = vmatprep.mubr.msk.bf16.mxu1 %vm4206_vm4, %v16723_v51 }
 0x806   :  { %10131 = vmatmul.mubr.bf16.vlgmr.msra.gmra.mxu0 %v16963_v53 }
 0x807   :  { %10879 = vmatprep.mubr.msk.bf16.mxu0 %vm4206_vm4, %v16723_v51 }
 0x808   :  { %9938 = vmatmul.mubr.bf16.vlgmr.msra.gmra.mxu1 %v16963_v53 }
 0x809   :  { %10292 = vmatpush1.bf16.msra.mxu1 %v11402_v47  ;;  %10863 = vmatprep.mubr.msk.bf16.mxu1 %vm4206_vm4, %v16723_v51 }
 0x80a   :  { %10293 = vmatprep.subr.bf16.mxu1 %v18138_v23 }
 0x80d   :  { %10294 = vmatpush1.bf16.msra.mxu1 %v11403_v39 }
 0x80e   :  { %10139 = vmatmul.mubr.bf16.gmra.mxu0 %v16963_v53  ;;  %10295 = vmatprep.subr.bf16.mxu1 %v18138_v23 }
 0x80f   :  { %10880 = vmatprep.mubr.msk.bf16.mxu0 %vm4206_vm4, %v17036_v27 }
 0x810   :  { %9946 = vmatmul.mubr.bf16.gmra.mxu1 %v16963_v53 }
 0x811   :  { %10864 = vmatprep.mubr.msk.bf16.mxu1 %vm4206_vm4, %v16723_v51  ;;  %10296 = vmatpush1.bf16.msra.mxu1 %v11404_v1 }
 0x812   :  { %10297 = vmatprep.subr.bf16.mxu1 %v18138_v23 }
 0x815   :  { %10298 = vmatpush1.bf16.msra.mxu1 %v11405_v22 }
 0x816   :  { %10147 = vmatmul.mubr.bf16.gmra.mxu0 %v17062_v59  ;;  %10299 = vmatprep.subr.bf16.mxu1 %v18138_v23 }
 0x817   :  { %10881 = vmatprep.mubr.msk.bf16.mxu0 %vm4206_vm4, %v17069_v32 }
 0x818   :  { %9954 = vmatmul.mubr.bf16.gmra.mxu1 %v16963_v53 }
 0x819   :  { %10865 = vmatprep.mubr.msk.bf16.mxu1 %vm4206_vm4, %v17036_v27  ;;  %10300 = vmatpush1.bf16.msra.mxu1 %v11406_v33 }
 0x81a   :  { %10301 = vmatprep.subr.bf16.mxu1 %v18138_v23 }
 0x81d   :  { %10302 = vmatpush1.bf16.msra.mxu1 %v11407_v50 }
 0x81e   :  { %10155 = vmatmul.mubr.bf16.gmra.mxu0 %v17095_v57  ;;  %10303 = vmatprep.subr.bf16.mxu1 %v18138_v23 }
 0x81f   :  { %10882 = vmatprep.mubr.msk.bf16.mxu0 %vm4206_vm4, %v17101_v4 }
 0x820   :  { %9962 = vmatmul.mubr.bf16.gmra.mxu1 %v17062_v59 }
 0x821   :  { %10866 = vmatprep.mubr.msk.bf16.mxu1 %vm4206_vm4, %v17069_v32  ;;  %10304 = vmatpush1.bf16.msra.mxu1 %v11408_v55 }
 0x822   :  { %10305 = vmatprep.subr.bf16.mxu1 %v18138_v23 }
 0x825   :  { %10306 = vmatpush1.bf16.msra.mxu1 %v11409_v54 }
 0x826   :  { %10163 = vmatmul.mubr.bf16.gmra.mxu0 %v17113_v38  ;;  %10319 = vmatprep.subr.bf16.mxu1 %v18138_v23 }
 0x827   :  { %10883 = vmatprep.mubr.msk.bf16.mxu0 %vm4206_vm4, %v17118_v7 }
 0x828   :  { %9970 = vmatmul.mubr.bf16.gmra.mxu1 %v17095_v57 }
 0x829   :  { %10867 = vmatprep.mubr.msk.bf16.mxu1 %vm4206_vm4, %v17101_v4  ;;  %10320 = vmatpush2.bf16.msra.mxu1 %v11410_v21 }
 0x82a   :  { %10321 = vmatprep.subr.bf16.mxu1 %v18138_v23 }
 0x82d   :  { %10322 = vmatpush2.bf16.msra.mxu1 %v11411_v19 }
 0x82e   :  { %10171 = vmatmul.mubr.bf16.gmra.mxu0 %v17130_v48 }
 0x82f   :  { %10884 = vmatprep.mubr.msk.bf16.mxu0 %vm4206_vm4, %v17135_v42 }
 0x830   :  { %9978 = vmatmul.mubr.bf16.gmra.mxu1 %v17113_v38 }
 0x831   :  { %10868 = vmatprep.mubr.msk.bf16.mxu1 %vm4206_vm4, %v17118_v7 }
 0x836   :  { %10179 = vmatmul.mubr.bf16.gmra.mxu0 %v17147_v63 }
 0x837   :  { %10885 = vmatprep.mubr.msk.bf16.mxu0 %vm4206_vm4, %v17152_v26 }
 0x838   :  { %9986 = vmatmul.mubr.bf16.gmra.mxu1 %v17130_v48 }
 0x839   :  { %10869 = vmatprep.mubr.msk.bf16.mxu1 %vm4206_vm4, %v17135_v42 }
 0x83e   :  { %10187 = vmatmul.mubr.bf16.gmra.mxu0 %v17164_v35 }
 0x83f   :  { %10886 = vmatprep.mubr.msk.bf16.mxu0 %vm4206_vm4, %v17169_v25 }
 0x840   :  { %9994 = vmatmul.mubr.bf16.gmra.mxu1 %v17147_v63 }
 0x841   :  { %10870 = vmatprep.mubr.msk.bf16.mxu1 %vm4206_vm4, %v17152_v26 }
 0x846   :  { %v9617_v23 = vpop.f32.mrf.mxu1  ;;  %v9778_v5 = vpop.f32.mrf.mxu0  ;;  %10195 = vmatmul.mubr.bf16.gmra.mxu0 %v17181_v2 }
 0x847   :  { %v17349_v34 = vadd.f32 %v9778_v5, %v9617_v23  ;;  %10887 = vmatprep.mubr.msk.bf16.mxu0 %vm4206_vm4, %v17186_v43 }
 0x848   :  { %v9619_v14 = vpop.f32.mrf.mxu1  ;;  %v9780_v37 = vpop.f32.mrf.mxu0  ;;  %10002 = vmatmul.mubr.bf16.gmra.mxu1 %v17164_v35 }
 0x849   :  { %10871 = vmatprep.mubr.msk.bf16.mxu1 %vm4206_vm4, %v17169_v25 }
 0x84a   :  { %v9620_v29 = vpop.f32.mrf.mxu1  ;;  %v9781_v16 = vpop.f32.mrf.mxu0 }
 0x84b   :  { %v17356_v52 = vadd.f32 %v9781_v16, %v9620_v29 }
 0x84c   :  { %v9622_v15 = vpop.f32.mrf.mxu1  ;;  %v9783_v41 = vpop.f32.mrf.mxu0 }
 0x84e   :  { %v9625_v49 = vpop.f32.mrf.mxu1  ;;  %v9786_v13 = vpop.f32.mrf.mxu0  ;;  %10203 = vmatmul.mubr.bf16.gmra.mxu0 %v17199_v56 }
 0x84f   :  { %v17359_v58 = vadd.f32 %v9786_v13, %v9625_v49  ;;  %10888 = vmatprep.mubr.msk.bf16.mxu0 %vm4206_vm4, %v17205_v24 }
 0x850   :  { %v9627_v31 = vpop.f32.mrf.mxu1  ;;  %v9788_v12 = vpop.f32.mrf.mxu0  ;;  %10010 = vmatmul.mubr.bf16.gmra.mxu1 %v17181_v2 }
 0x851   :  { %10872 = vmatprep.mubr.msk.bf16.mxu1 %vm4206_vm4, %v17186_v43 }
 0x852   :  { %v9628_v61 = vpop.f32.mrf.mxu1  ;;  %v9789_v17 = vpop.f32.mrf.mxu0 }
 0x853   :  { %v17366_v44 = vadd.f32 %v9789_v17, %v9628_v61 }
 0x854   :  { %v9630_v6 = vpop.f32.mrf.mxu1  ;;  %v9791_v62 = vpop.f32.mrf.mxu0 }
 0x856   :  { %v9633_v11 = vpop.f32.mrf.mxu1  ;;  %v9794_v8 = vpop.f32.mrf.mxu0  ;;  %10211 = vmatmul.mubr.bf16.gmra.mxu0 %v17218_v36 }
 0x857   :  { %v17369_v46 = vadd.f32 %v9794_v8, %v9633_v11  ;;  %10889 = vmatprep.mubr.msk.bf16.mxu0 %vm4206_vm4, %v17222_v40 }
 0x858   :  { %v9635_v18 = vpop.f32.mrf.mxu1  ;;  %v9796_v20 = vpop.f32.mrf.mxu0  ;;  %10018 = vmatmul.mubr.bf16.gmra.mxu1 %v17199_v56 }
 0x859   :  { %10873 = vmatprep.mubr.msk.bf16.mxu1 %vm4206_vm4, %v17205_v24 }
 0x85a   :  { %v9636_v0 = vpop.f32.mrf.mxu1  ;;  %v9797_v9 = vpop.f32.mrf.mxu0 }
 0x85b   :  { %v17376_v30 = vadd.f32 %v9797_v9, %v9636_v0 }
 0x85c   :  { %v9638_v45 = vpop.f32.mrf.mxu1  ;;  %v9799_v3 = vpop.f32.mrf.mxu0 }
 0x85e   :  { %v9641_v47 = vpop.f32.mrf.mxu1  ;;  %v9802_v39 = vpop.f32.mrf.mxu0  ;;  %10219 = vmatmul.mubr.bf16.gmra.mxu0 %v17235_v10 }
 0x85f   :  { %v17379_v1 = vadd.f32 %v9802_v39, %v9641_v47  ;;  %10890 = vmatprep.mubr.msk.bf16.mxu0 %vm4206_vm4, %v17238_v28 }
 0x860   :  { %v9643_v22 = vpop.f32.mrf.mxu1  ;;  %v9804_v33 = vpop.f32.mrf.mxu0  ;;  %10026 = vmatmul.mubr.bf16.gmra.mxu1 %v17218_v36 }
 0x861   :  { %10874 = vmatprep.mubr.msk.bf16.mxu1 %vm4206_vm4, %v17222_v40 }
 0x862   :  { %v9644_v50 = vpop.f32.mrf.mxu1  ;;  %v9805_v55 = vpop.f32.mrf.mxu0 }
 0x863   :  { %v17386_v54 = vadd.f32 %v9805_v55, %v9644_v50 }
 0x864   :  { %v9646_v21 = vpop.f32.mrf.mxu1  ;;  %v9807_v19 = vpop.f32.mrf.mxu0 }
 0x866   :  { %v9649_v23 = vpop.f32.mrf.mxu1  ;;  %v9810_v5 = vpop.f32.mrf.mxu0  ;;  %10227 = vmatmul.mubr.bf16.gmra.mxu0 %v17250_v60 }
 0x867   :  { %v17389_v14 = vadd.f32 %v9810_v5, %v9649_v23  ;;  %10891 = vmatprep.mubr.msk.bf16.mxu0 %vm4206_vm4, %v17238_v28 }
 0x868   :  { %v9651_v37 = vpop.f32.mrf.mxu1  ;;  %v9812_v29 = vpop.f32.mrf.mxu0  ;;  %10034 = vmatmul.mubr.bf16.gmra.mxu1 %v17235_v10 }
 0x869   :  { %10875 = vmatprep.mubr.msk.bf16.mxu1 %vm4206_vm4, %v17238_v28 }
 0x86a   :  { %v9652_v16 = vpop.f32.mrf.mxu1  ;;  %v9813_v15 = vpop.f32.mrf.mxu0 }
 0x86b   :  { %v17396_v41 = vadd.f32 %v9813_v15, %v9652_v16 }
 0x86c   :  { %v9654_v49 = vpop.f32.mrf.mxu1  ;;  %v9815_v13 = vpop.f32.mrf.mxu0 }
 0x86e   :  { %v9657_v31 = vpop.f32.mrf.mxu1  ;;  %v9818_v12 = vpop.f32.mrf.mxu0  ;;  %10235 = vmatmul.mubr.bf16.gmra.mxu0 %v17250_v60 }
 0x86f   :  { %v17399_v61 = vadd.f32 %v9818_v12, %v9657_v31  ;;  %10892 = vmatprep.mubr.msk.bf16.mxu0 %vm4206_vm4, %v17238_v28 }
 0x870   :  { %v9659_v17 = vpop.f32.mrf.mxu1  ;;  %v9820_v6 = vpop.f32.mrf.mxu0  ;;  %10042 = vmatmul.mubr.bf16.gmra.mxu1 %v17250_v60 }
 0x871   :  { %10876 = vmatprep.mubr.msk.bf16.mxu1 %vm4206_vm4, %v17238_v28 }
 0x872   :  { %v9660_v62 = vpop.f32.mrf.mxu1  ;;  %v9821_v11 = vpop.f32.mrf.mxu0 }
 0x873   :  { %v17406_v8 = vadd.f32 %v9821_v11, %v9660_v62 }
 0x874   :  { %v9662_v18 = vpop.f32.mrf.mxu1  ;;  %v9823_v20 = vpop.f32.mrf.mxu0 }
 0x876   :  { %v9665_v0 = vpop.f32.mrf.mxu1  ;;  %v9826_v9 = vpop.f32.mrf.mxu0  ;;  %10243 = vmatmul.mubr.bf16.gmra.mxu0 %v17250_v60 }
 0x877   :  { %v17409_v45 = vadd.f32 %v9826_v9, %v9665_v0  ;;  %10893 = vmatprep.mubr.msk.bf16.mxu0 %vm4206_vm4, %v17238_v28 }
 0x878   :  { %v9667_v3 = vpop.f32.mrf.mxu1  ;;  %v9828_v47 = vpop.f32.mrf.mxu0  ;;  %10050 = vmatmul.mubr.bf16.gmra.mxu1 %v17250_v60 }
 0x879   :  { %10877 = vmatprep.mubr.msk.bf16.mxu1 %vm4206_vm4, %v17238_v28 }
 0x87a   :  { %v9668_v39 = vpop.f32.mrf.mxu1  ;;  %v9829_v22 = vpop.f32.mrf.mxu0 }
 0x87b   :  { %v17416_v33 = vadd.f32 %v9829_v22, %v9668_v39 }
 0x87c   :  { %v9670_v50 = vpop.f32.mrf.mxu1  ;;  %v9831_v55 = vpop.f32.mrf.mxu0 }
 0x87e   :  { %v9673_v21 = vpop.f32.mrf.mxu1  ;;  %v9834_v19 = vpop.f32.mrf.mxu0  ;;  %10251 = vmatmul.mubr.bf16.gmra.mxu0 %v17250_v60 }
 0x87f   :  { %v17419_v23 = vadd.f32 %v9834_v19, %v9673_v21 }
 0x880   :  { %v9675_v5 = vpop.f32.mrf.mxu1  ;;  %v9836_v37 = vpop.f32.mrf.mxu0  ;;  %10058 = vmatmul.mubr.bf16.gmra.mxu1 %v17250_v60 }
 0x881   :  { %10894 = vmatprep.mubr.msk.bf16.mxu1 %vm4206_vm4, %v16723_v51 }
 0x882   :  { %v9676_v29 = vpop.f32.mrf.mxu1  ;;  %v9837_v16 = vpop.f32.mrf.mxu0 }
 0x883   :  { %v17424_v15 = vadd.f32 %v9837_v16, %v9676_v29 }
 0x884   :  { %v9678_v49 = vpop.f32.mrf.mxu1  ;;  %v9839_v13 = vpop.f32.mrf.mxu0 }
 0x886   :  { %v9681_v31 = vpop.f32.mrf.mxu1  ;;  %v9842_v12 = vpop.f32.mrf.mxu0 }
 0x887   :  { %v17426_v17 = vadd.f32 %v9842_v12, %v9681_v31 }
 0x888   :  { %v9683_v6 = vpop.f32.mrf.mxu1  ;;  %v9844_v62 = vpop.f32.mrf.mxu0  ;;  %10324 = vmatmul.mubr.bf16.vlgmr.msra.gmra.mxu1 %v16963_v53 }
 0x889   :  { %10895 = vmatprep.mubr.msk.bf16.mxu1 %vm4206_vm4, %v17036_v27 }
 0x88a   :  { %v9684_v11 = vpop.f32.mrf.mxu1  ;;  %v9845_v18 = vpop.f32.mrf.mxu0 }
 0x88b   :  { %v17431_v20 = vadd.f32 %v9845_v18, %v9684_v11 }
 0x88c   :  { %v9686_v51 = vpop.f32.mrf.mxu1  ;;  %v9847_v0 = vpop.f32.mrf.mxu0 }
 0x88e   :  { %v9689_v9 = vpop.f32.mrf.mxu1  ;;  %v9850_v3 = vpop.f32.mrf.mxu0 }
 0x88f   :  { %v17433_v47 = vadd.f32 %v9850_v3, %v9689_v9 }
 0x890   :  { %v9691_v39 = vpop.f32.mrf.mxu1  ;;  %v9852_v22 = vpop.f32.mrf.mxu0  ;;  %10332 = vmatmul.mubr.bf16.gmra.mxu1 %v17062_v59 }
 0x891   :  { %10896 = vmatprep.mubr.msk.bf16.mxu1 %vm4206_vm4, %v17069_v32 }
 0x892   :  { %v9692_v50 = vpop.f32.mrf.mxu1  ;;  %v9853_v55 = vpop.f32.mrf.mxu0 }
 0x893   :  { %v17438_v53 = vadd.f32 %v9853_v55, %v9692_v50 }
 0x894   :  { %v9694_v27 = vpop.f32.mrf.mxu1  ;;  %v9855_v21 = vpop.f32.mrf.mxu0 }
 0x896   :  { %v9697_v19 = vpop.f32.mrf.mxu1  ;;  %v9858_v5 = vpop.f32.mrf.mxu0 }
 0x897   :  { %v17440_v37 = vadd.f32 %v9858_v5, %v9697_v19 }
 0x898   :  { %v9699_v29 = vpop.f32.mrf.mxu1  ;;  %v9860_v16 = vpop.f32.mrf.mxu0  ;;  %10340 = vmatmul.mubr.bf16.gmra.mxu1 %v17095_v57 }
 0x899   :  { %10897 = vmatprep.mubr.msk.bf16.mxu1 %vm4206_vm4, %v17101_v4 }
 0x89a   :  { %v9700_v49 = vpop.f32.mrf.mxu1  ;;  %v9861_v13 = vpop.f32.mrf.mxu0 }
 0x89b   :  { %v17445_v59 = vadd.f32 %v9861_v13, %v9700_v49 }
 0x89c   :  { %v9702_v32 = vpop.f32.mrf.mxu1  ;;  %v9863_v31 = vpop.f32.mrf.mxu0 }
 0x89e   :  { %v9866_v12 = vpop.f32.mrf.mxu0  ;;  %v9705_v6 = vpop.f32.mrf.mxu1 }
 0x89f   :  { %v17447_v11 = vadd.f32 %v9866_v12, %v9705_v6 }
 0x8a0   :  { %v9868_v62 = vpop.f32.mrf.mxu0  ;;  %v9707_v18 = vpop.f32.mrf.mxu1  ;;  %10348 = vmatmul.mubr.bf16.gmra.mxu1 %v17113_v38 }
 0x8a1   :  { %10898 = vmatprep.mubr.msk.bf16.mxu1 %vm4206_vm4, %v17118_v7 }
 0x8a2   :  { %v9869_v51 = vpop.f32.mrf.mxu0  ;;  %v9708_v57 = vpop.f32.mrf.mxu1 }
 0x8a3   :  { %v17452_v9 = vadd.f32 %v9869_v51, %v9708_v57 }
 0x8a4   :  { %v9871_v0 = vpop.f32.mrf.mxu0  ;;  %v9710_v4 = vpop.f32.mrf.mxu1 }
 0x8a6   :  { %v9874_v3 = vpop.f32.mrf.mxu0 }
 0x8a8   :  { %v9876_v39 = vpop.f32.mrf.mxu0  ;;  %v9713_v22 = vpop.f32.mrf.mxu1  ;;  %10356 = vmatmul.mubr.bf16.gmra.mxu1 %v17130_v48 }
 0x8a9   :  { %v17455_v55 = vadd.f32 %v9874_v3, %v9713_v22  ;;  %10899 = vmatprep.mubr.msk.bf16.mxu1 %vm4206_vm4, %v17135_v42 }
 0x8aa   :  { %v9877_v50 = vpop.f32.mrf.mxu0  ;;  %v9715_v38 = vpop.f32.mrf.mxu1 }
 0x8ac   :  { %v9879_v27 = vpop.f32.mrf.mxu0  ;;  %v9716_v21 = vpop.f32.mrf.mxu1 }
 0x8ad   :  { %v17459_v19 = vadd.f32 %v9877_v50, %v9716_v21 }
 0x8ae   :  { %v9882_v7 = vpop.f32.mrf.mxu0  ;;  %v9718_v5 = vpop.f32.mrf.mxu1 }
 0x8b0   :  { %v9884_v29 = vpop.f32.mrf.mxu0  ;;  %v9721_v16 = vpop.f32.mrf.mxu1  ;;  %10364 = vmatmul.mubr.bf16.gmra.mxu1 %v17147_v63 }
 0x8b1   :  { %v17462_v13 = vadd.f32 %v9882_v7, %v9721_v16  ;;  %10900 = vmatprep.mubr.msk.bf16.mxu1 %vm4206_vm4, %v17152_v26 }
 0x8b2   :  { %v9885_v49 = vpop.f32.mrf.mxu0  ;;  %v9723_v48 = vpop.f32.mrf.mxu1 }
 0x8b4   :  { %v9887_v32 = vpop.f32.mrf.mxu0  ;;  %v9724_v42 = vpop.f32.mrf.mxu1 }
 0x8b5   :  { %v17466_v12 = vadd.f32 %v9885_v49, %v9724_v42 }
 0x8b6   :  { %v9890_v31 = vpop.f32.mrf.mxu0  ;;  %v9726_v6 = vpop.f32.mrf.mxu1 }
 0x8b8   :  { %v9892_v62 = vpop.f32.mrf.mxu0  ;;  %v9729_v18 = vpop.f32.mrf.mxu1  ;;  %10372 = vmatmul.mubr.bf16.gmra.mxu1 %v17164_v35 }
 0x8b9   :  { %v17469_v57 = vadd.f32 %v9890_v31, %v9729_v18  ;;  %10901 = vmatprep.mubr.msk.bf16.mxu1 %vm4206_vm4, %v17169_v25 }
 0x8ba   :  { %v9893_v51 = vpop.f32.mrf.mxu0  ;;  %v9731_v63 = vpop.f32.mrf.mxu1 }
 0x8bc   :  { %v9895_v0 = vpop.f32.mrf.mxu0  ;;  %v9732_v26 = vpop.f32.mrf.mxu1 }
 0x8bd   :  { %v17473_v3 = vadd.f32 %v9893_v51, %v9732_v26 }
 0x8be   :  { %v9898_v4 = vpop.f32.mrf.mxu0  ;;  %v9734_v39 = vpop.f32.mrf.mxu1 }
 0x8c0   :  { %v9900_v22 = vpop.f32.mrf.mxu0  ;;  %v9737_v50 = vpop.f32.mrf.mxu1  ;;  %10380 = vmatmul.mubr.bf16.gmra.mxu1 %v17181_v2 }
 0x8c1   :  { %v17476_v27 = vadd.f32 %v9898_v4, %v9737_v50  ;;  %10902 = vmatprep.mubr.msk.bf16.mxu1 %vm4206_vm4, %v17186_v43 }
 0x8c2   :  { %v9901_v38 = vpop.f32.mrf.mxu0  ;;  %v9739_v35 = vpop.f32.mrf.mxu1 }
 0x8c4   :  { %v9903_v21 = vpop.f32.mrf.mxu0  ;;  %v9740_v25 = vpop.f32.mrf.mxu1 }
 0x8c5   :  { %v17480_v5 = vadd.f32 %v9901_v38, %v9740_v25 }
 0x8c6   :  { %v10132_v7 = vpop.f32.mrf.mxu0  ;;  %v9742_v29 = vpop.f32.mrf.mxu1 }
 0x8c8   :  { %v10134_v16 = vpop.f32.mrf.mxu0  ;;  %v9939_v49 = vpop.f32.mrf.mxu1  ;;  %10388 = vmatmul.mubr.bf16.gmra.mxu1 %v17199_v56 }
 0x8c9   :  { %v10066_v2 = vadd.f32 %v9939_v49, %v17349_v34  ;;  %10903 = vmatprep.mubr.msk.bf16.mxu1 %vm4206_vm4, %v17205_v24 }
 0x8ca   :  { %v10135_v48 = vpop.f32.mrf.mxu0  ;;  %v9941_v32 = vpop.f32.mrf.mxu1 }
 0x8cb   :  { %v17486_v43 = vadd.f32 %v10132_v7, %v10066_v2 }
 0x8cc   :  { %v10137_v42 = vpop.f32.mrf.mxu0  ;;  %v9942_v31 = vpop.f32.mrf.mxu1 }
 0x8cd   :  { %v10067_v62 = vadd.f32 %v9942_v31, %v17356_v52 }
 0x8ce   :  { %v10140_v6 = vpop.f32.mrf.mxu0  ;;  %v9944_v18 = vpop.f32.mrf.mxu1 }
 0x8cf   :  { %v17489_v63 = vadd.f32 %v10135_v48, %v10067_v62 }
 0x8d0   :  { %v10142_v51 = vpop.f32.mrf.mxu0  ;;  %v9947_v0 = vpop.f32.mrf.mxu1  ;;  %10396 = vmatmul.mubr.bf16.gmra.mxu1 %v17218_v36 }
 0x8d1   :  { %v10068_v34 = vadd.f32 %v9947_v0, %v17359_v58  ;;  %10904 = vmatprep.mubr.msk.bf16.mxu1 %vm4206_vm4, %v17222_v40 }
 0x8d2   :  { %v10143_v56 = vpop.f32.mrf.mxu0  ;;  %v9949_v24 = vpop.f32.mrf.mxu1 }
 0x8d3   :  { %v17495_v4 = vadd.f32 %v10140_v6, %v10068_v34 }
 0x8d4   :  { %v10145_v26 = vpop.f32.mrf.mxu0  ;;  %v9950_v39 = vpop.f32.mrf.mxu1 }
 0x8d5   :  { %v10069_v52 = vadd.f32 %v9950_v39, %v17366_v44 }
 0x8d6   :  { %v10148_v22 = vpop.f32.mrf.mxu0  ;;  %v9952_v50 = vpop.f32.mrf.mxu1 }
 0x8d7   :  { %v17498_v35 = vadd.f32 %v10143_v56, %v10069_v52 }
 0x8d8   :  { %v10150_v38 = vpop.f32.mrf.mxu0  ;;  %v9955_v21 = vpop.f32.mrf.mxu1  ;;  %10404 = vmatmul.mubr.bf16.gmra.mxu1 %v17235_v10 }
 0x8d9   :  { %v10070_v58 = vadd.f32 %v9955_v21, %v17369_v46  ;;  %10905 = vmatprep.mubr.msk.bf16.mxu1 %vm4206_vm4, %v17238_v28 }
 0x8da   :  { %v10151_v36 = vpop.f32.mrf.mxu0  ;;  %v9957_v40 = vpop.f32.mrf.mxu1 }
 0x8db   :  { %v17504_v7 = vadd.f32 %v10148_v22, %v10070_v58 }
 0x8dc   :  { %v10153_v25 = vpop.f32.mrf.mxu0  ;;  %v9958_v29 = vpop.f32.mrf.mxu1 }
 0x8dd   :  { %v10071_v44 = vadd.f32 %v9958_v29, %v17376_v30 }
 0x8de   :  { %v10156_v16 = vpop.f32.mrf.mxu0  ;;  %v9960_v49 = vpop.f32.mrf.mxu1 }
 0x8df   :  { %v17507_v2 = vadd.f32 %v10151_v36, %v10071_v44 }
 0x8e0   :  { %v10158_v48 = vpop.f32.mrf.mxu0  ;;  %v9963_v32 = vpop.f32.mrf.mxu1  ;;  %10412 = vmatmul.mubr.bf16.gmra.mxu1 %v17250_v60 }
 0x8e1   :  { %v10072_v46 = vadd.f32 %v9963_v32, %v17379_v1  ;;  %10906 = vmatprep.mubr.msk.bf16.mxu1 %vm4206_vm4, %v17238_v28 }
 0x8e2   :  { %v10159_v10 = vpop.f32.mrf.mxu0  ;;  %v9965_v42 = vpop.f32.mrf.mxu1 }
 0x8e3   :  { %v17513_v6 = vadd.f32 %v10156_v16, %v10072_v46 }
 0x8e4   :  { %v10161_v31 = vpop.f32.mrf.mxu0  ;;  %v9966_v62 = vpop.f32.mrf.mxu1 }
 0x8e5   :  { %v10073_v30 = vadd.f32 %v9966_v62, %v17386_v54 }
 0x8e6   :  { %v10164_v18 = vpop.f32.mrf.mxu0  ;;  %v9968_v51 = vpop.f32.mrf.mxu1 }
 0x8e7   :  { %v17516_v56 = vadd.f32 %v10159_v10, %v10073_v30 }
 0x8e8   :  { %v10166_v0 = vpop.f32.mrf.mxu0  ;;  %v9971_v34 = vpop.f32.mrf.mxu1  ;;  %10420 = vmatmul.mubr.bf16.gmra.mxu1 %v17250_v60 }
 0x8e9   :  { %v10074_v1 = vadd.f32 %v9971_v34, %v17389_v14  ;;  %10907 = vmatprep.mubr.msk.bf16.mxu1 %vm4206_vm4, %v17238_v28 }
 0x8ea   :  { %v10167_v24 = vpop.f32.mrf.mxu0  ;;  %v9973_v26 = vpop.f32.mrf.mxu1 }
 0x8eb   :  { %v17522_v22 = vadd.f32 %v10164_v18, %v10074_v1 }
 0x8ec   :  { %v10169_v39 = vpop.f32.mrf.mxu0  ;;  %v9974_v52 = vpop.f32.mrf.mxu1 }
 0x8ed   :  { %v10075_v54 = vadd.f32 %v9974_v52, %v17396_v41 }
 0x8ee   :  { %v10172_v50 = vpop.f32.mrf.mxu0  ;;  %v9976_v38 = vpop.f32.mrf.mxu1 }
 0x8ef   :  { %v17525_v36 = vadd.f32 %v10167_v24, %v10075_v54 }
 0x8f0   :  { %v10174_v21 = vpop.f32.mrf.mxu0  ;;  %v9979_v58 = vpop.f32.mrf.mxu1  ;;  %10428 = vmatmul.mubr.bf16.gmra.mxu1 %v17250_v60 }
 0x8f1   :  { %v10076_v14 = vadd.f32 %v9979_v58, %v17399_v61  ;;  %10908 = vmatprep.mubr.msk.bf16.mxu1 %vm4206_vm4, %v17238_v28 }
 0x8f2   :  { %v10175_v40 = vpop.f32.mrf.mxu0  ;;  %v9981_v25 = vpop.f32.mrf.mxu1 }
 0x8f3   :  { %v17531_v16 = vadd.f32 %v10172_v50, %v10076_v14 }
 0x8f4   :  { %v10177_v29 = vpop.f32.mrf.mxu0  ;;  %v9982_v44 = vpop.f32.mrf.mxu1 }
 0x8f5   :  { %v10077_v41 = vadd.f32 %v9982_v44, %v17406_v8 }
 0x8f6   :  { %v10180_v49 = vpop.f32.mrf.mxu0  ;;  %v9984_v48 = vpop.f32.mrf.mxu1 }
 0x8f7   :  { %v17534_v10 = vadd.f32 %v10175_v40, %v10077_v41 }
 0x8f8   :  { %v10182_v32 = vpop.f32.mrf.mxu0  ;;  %v9987_v46 = vpop.f32.mrf.mxu1  ;;  %10436 = vmatmul.mubr.bf16.gmra.mxu1 %v17250_v60 }
 0x8f9   :  { %v10078_v61 = vadd.f32 %v9987_v46, %v17409_v45  ;;  %10909 = vmatprep.mubr.msk.bf16.mxu1 %vm4206_vm4, %v17238_v28 }
 0x8fa   :  { %v10183_v42 = vpop.f32.mrf.mxu0  ;;  %v9989_v31 = vpop.f32.mrf.mxu1 }
 0x8fb   :  { %v17540_v18 = vadd.f32 %v10180_v49, %v10078_v61 }
 0x8fc   :  { %v10185_v62 = vpop.f32.mrf.mxu0  ;;  %v9990_v30 = vpop.f32.mrf.mxu1 }
 0x8fd   :  { %v10079_v8 = vadd.f32 %v9990_v30, %v17416_v33 }
 0x8fe   :  { %v10188_v51 = vpop.f32.mrf.mxu0  ;;  %v9992_v0 = vpop.f32.mrf.mxu1 }
 0x8ff   :  { %v17543_v24 = vadd.f32 %v10183_v42, %v10079_v8 }
 0x900   :  { %v10190_v34 = vpop.f32.mrf.mxu0  ;;  %v9995_v1 = vpop.f32.mrf.mxu1  ;;  %10444 = vmatmul.mubr.bf16.gmra.mxu1 %v17250_v60 }
 0x901   :  { %v10080_v45 = vadd.f32 %v9995_v1, %v17419_v23 }
 0x902   :  { %v10191_v26 = vpop.f32.mrf.mxu0  ;;  %v9997_v39 = vpop.f32.mrf.mxu1 }
 0x903   :  { %v17547_v52 = vadd.f32 %v10188_v51, %v10080_v45 }
 0x904   :  { %v10193_v28 = vpop.f32.mrf.mxu0  ;;  %v9998_v50 = vpop.f32.mrf.mxu1 }
 0x905   :  { %v10081_v38 = vadd.f32 %v9998_v50, %v17424_v15 }
 0x906   :  { %v10196_v54 = vpop.f32.mrf.mxu0  ;;  %v10000_v21 = vpop.f32.mrf.mxu1 }
 0x907   :  { %v17550_v58 = vadd.f32 %v10191_v26, %v10081_v38 }
 0x908   :  { %v10198_v33 = vpop.f32.mrf.mxu0  ;;  %v10003_v40 = vpop.f32.mrf.mxu1 }
 0x909   :  { %v10082_v25 = vadd.f32 %v10003_v40, %v17426_v17 }
 0x90a   :  { %v10199_v14 = vpop.f32.mrf.mxu0  ;;  %v10005_v60 = vpop.f32.mrf.mxu1 }
 0x90b   :  { %v17553_v44 = vadd.f32 %v10196_v54, %v10082_v25 }
 0x90c   :  { %v10201_v29 = vpop.f32.mrf.mxu0  ;;  %v10006_v23 = vpop.f32.mrf.mxu1 }
 0x90d   :  { %v10083_v41 = vadd.f32 %v10006_v23, %v17431_v20 }
 0x90e   :  { %v10204_v49 = vpop.f32.mrf.mxu0  ;;  %v10008_v48 = vpop.f32.mrf.mxu1 }
 0x90f   :  { %v17556_v46 = vadd.f32 %v10199_v14, %v10083_v41 }
 0x910   :  { %v10206_v32 = vpop.f32.mrf.mxu0  ;;  %v10011_v15 = vpop.f32.mrf.mxu1 }
 0x911   :  { %v10084_v61 = vadd.f32 %v10011_v15, %v17433_v47 }
 0x912   :  { %v10207_v42 = vpop.f32.mrf.mxu0  ;;  %v10013_v31 = vpop.f32.mrf.mxu1 }
 0x913   :  { %v17559_v30 = vadd.f32 %v10204_v49, %v10084_v61 }
 0x914   :  { %v10209_v62 = vpop.f32.mrf.mxu0  ;;  %v10014_v17 = vpop.f32.mrf.mxu1 }
 0x915   :  { %v10085_v8 = vadd.f32 %v10014_v17, %v17438_v53 }
 0x916   :  { %v10212_v51 = vpop.f32.mrf.mxu0  ;;  %v10016_v0 = vpop.f32.mrf.mxu1 }
 0x917   :  { %v17562_v1 = vadd.f32 %v10207_v42, %v10085_v8 }
 0x918   :  { %v10214_v34 = vpop.f32.mrf.mxu0  ;;  %v10019_v20 = vpop.f32.mrf.mxu1 }
 0x919   :  { %v10086_v45 = vadd.f32 %v10019_v20, %v17440_v37 }
 0x91a   :  { %v10215_v26 = vpop.f32.mrf.mxu0  ;;  %v10021_v39 = vpop.f32.mrf.mxu1 }
 0x91b   :  { %v17565_v50 = vadd.f32 %v10212_v51, %v10086_v45 }
 0x91c   :  { %v10217_v28 = vpop.f32.mrf.mxu0  ;;  %v10022_v47 = vpop.f32.mrf.mxu1 }
 0x91d   :  { %v10087_v38 = vadd.f32 %v10022_v47, %v17445_v59 }
 0x91e   :  { %v10220_v54 = vpop.f32.mrf.mxu0  ;;  %v10024_v21 = vpop.f32.mrf.mxu1 }
 0x91f   :  { %v17568_v40 = vadd.f32 %v10215_v26, %v10087_v38 }
 0x920   :  { %v10222_v33 = vpop.f32.mrf.mxu0  ;;  %v10027_v53 = vpop.f32.mrf.mxu1 }
 0x921   :  { %v10088_v25 = vadd.f32 %v10027_v53, %v17447_v11 }
 0x922   :  { %v10223_v14 = vpop.f32.mrf.mxu0  ;;  %v10029_v60 = vpop.f32.mrf.mxu1 }
 0x923   :  { %v17571_v23 = vadd.f32 %v10220_v54, %v10088_v25 }
 0x924   :  { %v10225_v29 = vpop.f32.mrf.mxu0  ;;  %v10030_v37 = vpop.f32.mrf.mxu1 }
 0x925   :  { %v10089_v41 = vadd.f32 %v10030_v37, %v17452_v9 }
 0x926   :  { %v10228_v49 = vpop.f32.mrf.mxu0  ;;  %v10032_v48 = vpop.f32.mrf.mxu1 }
 0x927   :  { %v17574_v15 = vadd.f32 %v10223_v14, %v10089_v41 }
 0x928   :  { %v10230_v32 = vpop.f32.mrf.mxu0  ;;  %v10035_v59 = vpop.f32.mrf.mxu1 }
 0x929   :  { %v10090_v61 = vadd.f32 %v10035_v59, %v17455_v55 }
 0x92a   :  { %v10231_v42 = vpop.f32.mrf.mxu0  ;;  %v10037_v31 = vpop.f32.mrf.mxu1 }
 0x92b   :  { %v17577_v17 = vadd.f32 %v10228_v49, %v10090_v61 }
 0x92c   :  { %v10233_v62 = vpop.f32.mrf.mxu0  ;;  %v10038_v11 = vpop.f32.mrf.mxu1 }
 0x92d   :  { %v10091_v8 = vadd.f32 %v10038_v11, %v17459_v19 }
 0x92e   :  { %v10236_v51 = vpop.f32.mrf.mxu0  ;;  %v10040_v0 = vpop.f32.mrf.mxu1 }
 0x92f   :  { %v17580_v20 = vadd.f32 %v10231_v42, %v10091_v8 }
 0x930   :  { %v10238_v34 = vpop.f32.mrf.mxu0  ;;  %v10043_v9 = vpop.f32.mrf.mxu1 }
 0x931   :  { %v10092_v45 = vadd.f32 %v10043_v9, %v17462_v13 }
 0x932   :  { %v10239_v26 = vpop.f32.mrf.mxu0  ;;  %v10045_v39 = vpop.f32.mrf.mxu1 }
 0x933   :  { %v17583_v47 = vadd.f32 %v10236_v51, %v10092_v45 }
 0x934   :  { %v10241_v28 = vpop.f32.mrf.mxu0  ;;  %v10046_v55 = vpop.f32.mrf.mxu1 }
 0x935   :  { %v10093_v38 = vadd.f32 %v10046_v55, %v17466_v12 }
 0x936   :  { %v10244_v54 = vpop.f32.mrf.mxu0  ;;  %v10048_v21 = vpop.f32.mrf.mxu1 }
 0x937   :  { %v17586_v53 = vadd.f32 %v10239_v26, %v10093_v38  ;;  %v17604_v26 = vld [vmem:[%s17803_s6] ss:$0 sm:$0xff] }
 0x938   :  { %v10246_v33 = vpop.f32.mrf.mxu0  ;;  %v10051_v19 = vpop.f32.mrf.mxu1 }
 0x939   :  { %v10094_v25 = vadd.f32 %v10051_v19, %v17469_v57 }
 0x93a   :  { %v10247_v14 = vpop.f32.mrf.mxu0  ;;  %v10053_v60 = vpop.f32.mrf.mxu1 }
 0x93b   :  { %v17589_v37 = vadd.f32 %v10244_v54, %v10094_v25 }
 0x93c   :  { %v10249_v29 = vpop.f32.mrf.mxu0  ;;  %v10054_v13 = vpop.f32.mrf.mxu1 }
 0x93d   :  { %v10095_v41 = vadd.f32 %v10054_v13, %v17473_v3 }
 0x93e   :  { %v10252_v49 = vpop.f32.mrf.mxu0  ;;  %v10056_v48 = vpop.f32.mrf.mxu1 }
 0x93f   :  { %v17592_v59 = vadd.f32 %v10247_v14, %v10095_v41 }
 0x940   :  { %v10254_v32 = vpop.f32.mrf.mxu0  ;;  %v10059_v12 = vpop.f32.mrf.mxu1 }
 0x941   :  { %v10096_v61 = vadd.f32 %v10059_v12, %v17476_v27 }
 0x942   :  { %v10255_v42 = vpop.f32.mrf.mxu0  ;;  %v10061_v31 = vpop.f32.mrf.mxu1 }
 0x943   :  { %v17595_v11 = vadd.f32 %v10252_v49, %v10096_v61 }
 0x944   :  { %v10257_v62 = vpop.f32.mrf.mxu0  ;;  %v10062_v57 = vpop.f32.mrf.mxu1 }
 0x945   :  { %v10097_v51 = vadd.f32 %v10062_v57, %v17480_v5 }
 0x946   :  { %v10064_v8 = vpop.f32.mrf.mxu1 }
 0x947   :  { %v17598_v0 = vadd.f32 %v10255_v42, %v10097_v51 }
 0x948   :  { %v10325_v34 = vpop.f32.mrf.mxu1 }
 0x949   :  { %v10452_v3 = vadd.f32 %v10325_v34, %v17486_v43 }
 0x94a   :  { %v10327_v9 = vpop.f32.mrf.mxu1 }
 0x94b   :  { %v10484_v27 = vadd.f32 %v17604_v26, %v10452_v3 }
 0x94c   :  { %v10328_v45 = vpop.f32.mrf.mxu1 }
 0x94d   :  { %10910 = vst.msk [vmem:[%s17804_s7 + $0x100] sm:$0xff] %vm1438_vm5, %v10484_v27  ;;  %v10453_v5 = vadd.f32 %v10328_v45, %v17489_v63 }
 0x94e   :  { %v10330_v39 = vpop.f32.mrf.mxu1 }
 0x94f   :  { %v10485_v28 = vadd.f32 %v17604_v26, %v10453_v5 }
 0x950   :  { %v10333_v43 = vpop.f32.mrf.mxu1 }
 0x951   :  { %10911 = vst.msk [vmem:[%s17804_s7 + $0x108] sm:$0xff] %vm1438_vm5, %v10485_v28  ;;  %v10454_v55 = vadd.f32 %v10333_v43, %v17495_v4 }
 0x952   :  { %v10335_v54 = vpop.f32.mrf.mxu1 }
 0x953   :  { %v10486_v38 = vadd.f32 %v17604_v26, %v10454_v55 }
 0x954   :  { %v10336_v21 = vpop.f32.mrf.mxu1 }
 0x955   :  { %10912 = vst.msk [vmem:[%s17804_s7 + $0x110] sm:$0xff] %vm1438_vm5, %v10486_v38  ;;  %v10455_v63 = vadd.f32 %v10336_v21, %v17498_v35 }
 0x956   :  { %v10338_v33 = vpop.f32.mrf.mxu1 }
 0x957   :  { %v10487_v19 = vadd.f32 %v17604_v26, %v10455_v63 }
 0x958   :  { %v10341_v14 = vpop.f32.mrf.mxu1 }
 0x959   :  { %10913 = vst.msk [vmem:[%s17804_s7 + $0x118] sm:$0xff] %vm1438_vm5, %v10487_v19  ;;  %v10456_v4 = vadd.f32 %v10341_v14, %v17504_v7 }
 0x95a   :  { %v10343_v25 = vpop.f32.mrf.mxu1 }
 0x95b   :  { %v10488_v60 = vadd.f32 %v17604_v26, %v10456_v4 }
 0x95c   :  { %v10344_v29 = vpop.f32.mrf.mxu1 }
 0x95d   :  { %10914 = vst.msk [vmem:[%s17804_s7 + $0x120] sm:$0xff] %vm1438_vm5, %v10488_v60  ;;  %v10457_v35 = vadd.f32 %v10344_v29, %v17507_v2 }
 0x95e   :  { %v10346_v13 = vpop.f32.mrf.mxu1 }
 0x95f   :  { %v10489_v49 = vadd.f32 %v17604_v26, %v10457_v35 }
 0x960   :  { %v10349_v41 = vpop.f32.mrf.mxu1 }
 0x961   :  { %10915 = vst.msk [vmem:[%s17804_s7 + $0x128] sm:$0xff] %vm1438_vm5, %v10489_v49  ;;  %v10458_v7 = vadd.f32 %v10349_v41, %v17513_v6 }
 0x962   :  { %v10351_v48 = vpop.f32.mrf.mxu1 }
 0x963   :  { %v10490_v32 = vadd.f32 %v17604_v26, %v10458_v7 }
 0x964   :  { %v10352_v12 = vpop.f32.mrf.mxu1 }
 0x965   :  { %10916 = vst.msk [vmem:[%s17804_s7 + $0x130] sm:$0xff] %vm1438_vm5, %v10490_v32  ;;  %v10459_v2 = vadd.f32 %v10352_v12, %v17516_v56 }
 0x966   :  { %v10354_v42 = vpop.f32.mrf.mxu1 }
 0x967   :  { %v10491_v61 = vadd.f32 %v17604_v26, %v10459_v2 }
 0x968   :  { %v10357_v31 = vpop.f32.mrf.mxu1 }
 0x969   :  { %10917 = vst.msk [vmem:[%s17804_s7 + $0x138] sm:$0xff] %vm1438_vm5, %v10491_v61  ;;  %v10460_v6 = vadd.f32 %v10357_v31, %v17522_v22 }
 0x96a   :  { %v10359_v62 = vpop.f32.mrf.mxu1 }
 0x96b   :  { %v10492_v57 = vadd.f32 %v17604_v26, %v10460_v6 }
 0x96c   :  { %v10360_v51 = vpop.f32.mrf.mxu1 }
 0x96d   :  { %10918 = vst.msk [vmem:[%s17804_s7 + $0x140] sm:$0xff] %vm1438_vm5, %v10492_v57  ;;  %v10461_v56 = vadd.f32 %v10360_v51, %v17525_v36 }
 0x96e   :  { %v10362_v8 = vpop.f32.mrf.mxu1 }
 0x96f   :  { %v10493_v34 = vadd.f32 %v17604_v26, %v10461_v56 }
 0x970   :  { %v10365_v3 = vpop.f32.mrf.mxu1 }
 0x971   :  { %10919 = vst.msk [vmem:[%s17804_s7 + $0x148] sm:$0xff] %vm1438_vm5, %v10493_v34  ;;  %v10462_v22 = vadd.f32 %v10365_v3, %v17531_v16 }
 0x972   :  { %v10367_v9 = vpop.f32.mrf.mxu1 }
 0x973   :  { %v10494_v27 = vadd.f32 %v17604_v26, %v10462_v22 }
 0x974   :  { %v10368_v45 = vpop.f32.mrf.mxu1 }
 0x975   :  { %10920 = vst.msk [vmem:[%s17804_s7 + $0x150] sm:$0xff] %vm1438_vm5, %v10494_v27  ;;  %v10463_v36 = vadd.f32 %v10368_v45, %v17534_v10 }
 0x976   :  { %v10370_v5 = vpop.f32.mrf.mxu1 }
 0x977   :  { %v10495_v39 = vadd.f32 %v17604_v26, %v10463_v36 }
 0x978   :  { %v10373_v28 = vpop.f32.mrf.mxu1 }
 0x979   :  { %10921 = vst.msk [vmem:[%s17804_s7 + $0x158] sm:$0xff] %vm1438_vm5, %v10495_v39  ;;  %v10464_v16 = vadd.f32 %v10373_v28, %v17540_v18 }
 0x97a   :  { %v10375_v43 = vpop.f32.mrf.mxu1 }
 0x97b   :  { %v10496_v55 = vadd.f32 %v17604_v26, %v10464_v16 }
 0x97c   :  { %v10376_v54 = vpop.f32.mrf.mxu1 }
 0x97d   :  { %10922 = vst.msk [vmem:[%s17804_s7 + $0x160] sm:$0xff] %vm1438_vm5, %v10496_v55  ;;  %v10465_v10 = vadd.f32 %v10376_v54, %v17543_v24 }
 0x97e   :  { %v10378_v38 = vpop.f32.mrf.mxu1 }
 0x97f   :  { %v10497_v21 = vadd.f32 %v17604_v26, %v10465_v10 }
 0x980   :  { %v10381_v63 = vpop.f32.mrf.mxu1 }
 0x981   :  { %10923 = vst.msk [vmem:[%s17804_s7 + $0x168] sm:$0xff] %vm1438_vm5, %v10497_v21  ;;  %v10466_v18 = vadd.f32 %v10381_v63, %v17547_v52 }
 0x982   :  { %v10383_v33 = vpop.f32.mrf.mxu1 }
 0x983   :  { %v10498_v19 = vadd.f32 %v17604_v26, %v10466_v18 }
 0x984   :  { %v10384_v14 = vpop.f32.mrf.mxu1 }
 0x985   :  { %10924 = vst.msk [vmem:[%s17804_s7 + $0x170] sm:$0xff] %vm1438_vm5, %v10498_v19  ;;  %v10467_v24 = vadd.f32 %v10384_v14, %v17550_v58 }
 0x986   :  { %v10386_v4 = vpop.f32.mrf.mxu1 }
 0x987   :  { %v10499_v25 = vadd.f32 %v17604_v26, %v10467_v24 }
 0x988   :  { %v10389_v60 = vpop.f32.mrf.mxu1 }
 0x989   :  { %10925 = vst.msk [vmem:[%s17804_s7 + $0x178] sm:$0xff] %vm1438_vm5, %v10499_v25  ;;  %v10468_v52 = vadd.f32 %v10389_v60, %v17553_v44 }
 0x98a   :  { %v10391_v29 = vpop.f32.mrf.mxu1 }
 0x98b   :  { %v10500_v35 = vadd.f32 %v17604_v26, %v10468_v52 }
 0x98c   :  { %v10392_v13 = vpop.f32.mrf.mxu1 }
 0x98d   :  { %10926 = vst.msk [vmem:[%s17804_s7 + $0x180] sm:$0xff] %vm1438_vm5, %v10500_v35  ;;  %v10469_v58 = vadd.f32 %v10392_v13, %v17556_v46 }
 0x98e   :  { %v10394_v49 = vpop.f32.mrf.mxu1 }
 0x98f   :  { %v10501_v41 = vadd.f32 %v17604_v26, %v10469_v58 }
 0x990   :  { %v10397_v7 = vpop.f32.mrf.mxu1 }
 0x991   :  { %10927 = vst.msk [vmem:[%s17804_s7 + $0x188] sm:$0xff] %vm1438_vm5, %v10501_v41  ;;  %v10470_v44 = vadd.f32 %v10397_v7, %v17559_v30 }
 0x992   :  { %v10399_v48 = vpop.f32.mrf.mxu1 }
 0x993   :  { %v10502_v32 = vadd.f32 %v17604_v26, %v10470_v44 }
 0x994   :  { %v10400_v12 = vpop.f32.mrf.mxu1 }
 0x995   :  { %10928 = vst.msk [vmem:[%s17804_s7 + $0x190] sm:$0xff] %vm1438_vm5, %v10502_v32  ;;  %v10471_v46 = vadd.f32 %v10400_v12, %v17562_v1 }
 0x996   :  { %v10402_v2 = vpop.f32.mrf.mxu1 }
 0x997   :  { %v10503_v42 = vadd.f32 %v17604_v26, %v10471_v46 }
 0x998   :  { %v10405_v61 = vpop.f32.mrf.mxu1 }
 0x999   :  { %10929 = vst.msk [vmem:[%s17804_s7 + $0x198] sm:$0xff] %vm1438_vm5, %v10503_v42  ;;  %v10472_v30 = vadd.f32 %v10405_v61, %v17565_v50 }
 0x99a   :  { %v10407_v31 = vpop.f32.mrf.mxu1 }
 0x99b   :  { %v10504_v6 = vadd.f32 %v17604_v26, %v10472_v30 }
 0x99c   :  { %v10408_v62 = vpop.f32.mrf.mxu1 }
 0x99d   :  { %10930 = vst.msk [vmem:[%s17804_s7 + $0x1a0] sm:$0xff] %vm1438_vm5, %v10504_v6  ;;  %v10473_v1 = vadd.f32 %v10408_v62, %v17568_v40 }
 0x99e   :  { %v10410_v57 = vpop.f32.mrf.mxu1 }
 0x99f   :  { %v10505_v51 = vadd.f32 %v17604_v26, %v10473_v1 }
 0x9a0   :  { %v10413_v56 = vpop.f32.mrf.mxu1 }
 0x9a1   :  { %10931 = vst.msk [vmem:[%s17804_s7 + $0x1a8] sm:$0xff] %vm1438_vm5, %v10505_v51  ;;  %v10474_v50 = vadd.f32 %v10413_v56, %v17571_v23 }
 0x9a2   :  { %v10415_v8 = vpop.f32.mrf.mxu1 }
 0x9a3   :  { %v10506_v34 = vadd.f32 %v17604_v26, %v10474_v50 }
 0x9a4   :  { %v10416_v3 = vpop.f32.mrf.mxu1 }
 0x9a5   :  { %10932 = vst.msk [vmem:[%s17804_s7 + $0x1b0] sm:$0xff] %vm1438_vm5, %v10506_v34  ;;  %v10475_v40 = vadd.f32 %v10416_v3, %v17574_v15 }
 0x9a6   :  { %v10418_v22 = vpop.f32.mrf.mxu1 }
 0x9a7   :  { %v10507_v9 = vadd.f32 %v17604_v26, %v10475_v40 }
 0x9a8   :  { %v10421_v27 = vpop.f32.mrf.mxu1 }
 0x9a9   :  { %10933 = vst.msk [vmem:[%s17804_s7 + $0x1b8] sm:$0xff] %vm1438_vm5, %v10507_v9  ;;  %v10476_v23 = vadd.f32 %v10421_v27, %v17577_v17 }
 0x9aa   :  { %v10423_v45 = vpop.f32.mrf.mxu1 }
 0x9ab   :  { %v10508_v36 = vadd.f32 %v17604_v26, %v10476_v23 }
 0x9ac   :  { %v10424_v5 = vpop.f32.mrf.mxu1 }
 0x9ad   :  { %10934 = vst.msk [vmem:[%s17804_s7 + $0x1c0] sm:$0xff] %vm1438_vm5, %v10508_v36  ;;  %v10477_v15 = vadd.f32 %v10424_v5, %v17580_v20 }
 0x9ae   :  { %v10426_v39 = vpop.f32.mrf.mxu1 }
 0x9af   :  { %v10509_v28 = vadd.f32 %v17604_v26, %v10477_v15 }
 0x9b0   :  { %v10429_v16 = vpop.f32.mrf.mxu1 }
 0x9b1   :  { %10935 = vst.msk [vmem:[%s17804_s7 + $0x1c8] sm:$0xff] %vm1438_vm5, %v10509_v28  ;;  %v10478_v17 = vadd.f32 %v10429_v16, %v17583_v47 }
 0x9b2   :  { %v10431_v43 = vpop.f32.mrf.mxu1 }
 0x9b3   :  { %v10510_v55 = vadd.f32 %v17604_v26, %v10478_v17 }
 0x9b4   :  { %v10432_v54 = vpop.f32.mrf.mxu1 }
 0x9b5   :  { %10936 = vst.msk [vmem:[%s17804_s7 + $0x1d0] sm:$0xff] %vm1438_vm5, %v10510_v55  ;;  %v10479_v20 = vadd.f32 %v10432_v54, %v17586_v53 }
 0x9b6   :  { %v10434_v10 = vpop.f32.mrf.mxu1 }
 0x9b7   :  { %v10511_v38 = vadd.f32 %v17604_v26, %v10479_v20 }
 0x9b8   :  { %v10437_v21 = vpop.f32.mrf.mxu1 }
 0x9b9   :  { %10937 = vst.msk [vmem:[%s17804_s7 + $0x1d8] sm:$0xff] %vm1438_vm5, %v10511_v38  ;;  %v10480_v47 = vadd.f32 %v10437_v21, %v17589_v37 }
 0x9ba   :  { %v10439_v63 = vpop.f32.mrf.mxu1 }
 0x9bb   :  { %v10512_v18 = vadd.f32 %v17604_v26, %v10480_v47 }
 0x9bc   :  { %v10440_v33 = vpop.f32.mrf.mxu1 }
 0x9bd   :  { %10938 = vst.msk [vmem:[%s17804_s7 + $0x1e0] sm:$0xff] %vm1438_vm5, %v10512_v18  ;;  %v10481_v53 = vadd.f32 %v10440_v33, %v17592_v59 }
 0x9be   :  { %v10442_v19 = vpop.f32.mrf.mxu1 }
 0x9bf   :  { %v10513_v14 = vadd.f32 %v17604_v26, %v10481_v53 }
 0x9c0   :  { %v10445_v24 = vpop.f32.mrf.mxu1 }
 0x9c1   :  { %10939 = vst.msk [vmem:[%s17804_s7 + $0x1e8] sm:$0xff] %vm1438_vm5, %v10513_v14  ;;  %v10482_v37 = vadd.f32 %v10445_v24, %v17595_v11 }
 0x9c2   :  { %v10447_v4 = vpop.f32.mrf.mxu1 }
 0x9c3   :  { %v10514_v25 = vadd.f32 %v17604_v26, %v10482_v37 }
 0x9c4   :  { %v10448_v60 = vpop.f32.mrf.mxu1 }
 0x9c5   :  { %10940 = vst.msk [vmem:[%s17804_s7 + $0x1f0] sm:$0xff] %vm1438_vm5, %v10514_v25  ;;  %v10483_v59 = vadd.f32 %v10448_v60, %v17598_v0 }
 0x9c6   :  { %v10450_v52 = vpop.f32.mrf.mxu1 }
 0x9c7   :  { %v10515_v29 = vadd.f32 %v17604_v26, %v10483_v59 }
 0x9c9   :  { %10941 = vst.msk [vmem:[%s17804_s7 + $0x1f8] sm:$0xff] %vm1438_vm5, %v10515_v29 }

</bundles_post_ra>
